<compile_context>
chip_gen: v5e
topology: v5e:2x2
jax: 0.10.0
libtpu: 0.0.40
codegen_flags: <defaults>
</compile_context>

<pallas_src>
import functools

import jax
import jax.numpy as jnp
from jax.experimental import pallas as pl
from jax.experimental.pallas import tpu as pltpu


# ------------------------------- Pallas kernel -------------------------------

def _lstm_cell(gates, c_prev, H):
    """PyTorch LSTM cell update from pre-activation gates (i, f, g, o order)."""
    i = jax.nn.sigmoid(gates[:, 0 * H:1 * H])
    f = jax.nn.sigmoid(gates[:, 1 * H:2 * H])
    g = jnp.tanh(gates[:, 2 * H:3 * H])
    o = jax.nn.sigmoid(gates[:, 3 * H:4 * H])
    c_new = f * c_prev + i * g
    h_new = o * jnp.tanh(c_new)
    return h_new, c_new


def _forward_kernel(
        x_ref, f_ref,
        fc1_w_ref, fc1_b_ref, e_wih0_ref, e_b0_ref, e_whh0_ref,
        e_rest_w_ref, e_rest_b_ref,
        bridge_w_ref, bridge_b_ref,
        fc2_w_ref, fc2_b_ref, d_wih0_ref, d_b0_ref, d_whh0_ref,
        d_rest_w_ref, d_rest_b_ref,
        h_w1_ref, h_b1_ref, h_w2_ref, h_b2_ref,
        out_ref,
        y_scr,
        *, num_layers, eps_head):
    f32 = jnp.float32
    B, Te, _ = x_ref.shape
    _, Td, _ = f_ref.shape
    E = fc1_w_ref.shape[1]
    D = d_whh0_ref.shape[0]
    L = num_layers

    # ---- encoder pre-projection, hoisted over ALL timesteps -----------------
    # ReLU(x @ fc1_w + fc1_b)  (bn1 affine folded into e_wih0/e_b0)  @ W_ih0 + b0
    x2d = x_ref[...].reshape(B * Te, x_ref.shape[2])
    a1 = jnp.maximum(
        jnp.dot(x2d, fc1_w_ref[...], preferred_element_type=f32) + fc1_b_ref[...],
        0.0)
    gx_e = (jnp.dot(a1, e_wih0_ref[...], preferred_element_type=f32)
            + e_b0_ref[...]).reshape(B, Te, 4 * E)

    # ---- decoder pre-projection (independent of the encoder recurrence; the
    #      scheduler is free to overlap it with the serial loop below) --------
    f2d = f_ref[...].reshape(B * Td, f_ref.shape[2])
    a2 = jnp.maximum(
        jnp.dot(f2d, fc2_w_ref[...], preferred_element_type=f32) + fc2_b_ref[...],
        0.0)
    gx_d = (jnp.dot(a2, d_wih0_ref[...], preferred_element_type=f32)
            + d_b0_ref[...]).reshape(B, Td, 4 * D)

    # ---- encoder recurrence (fully unrolled; 3 matmuls per step) ------------
    e_whh0 = e_whh0_ref[...]
    e_rest_w = [e_rest_w_ref[l] for l in range(L - 1)]
    e_rest_b = [e_rest_b_ref[l] for l in range(L - 1)]
    h_e = [jnp.zeros((B, E), f32) for _ in range(L)]   # PyTorch default zero state
    c_e = [jnp.zeros((B, E), f32) for _ in range(L)]
    for t in range(Te):
        gates = gx_e[:, t, :] + jnp.dot(h_e[0], e_whh0, preferred_element_type=f32)
        h_e[0], c_e[0] = _lstm_cell(gates, c_e[0], E)
        layer_in = h_e[0]
        for l in range(1, L):                           # inter-layer dropout = identity
            cat = jnp.concatenate([layer_in, h_e[l]], axis=-1)       # (B, 2E)
            gates = (jnp.dot(cat, e_rest_w[l - 1], preferred_element_type=f32)
                     + e_rest_b[l - 1])
            h_e[l], c_e[l] = _lstm_cell(gates, c_e[l], E)
            layer_in = h_e[l]

    # ---- hidden/cell bridges: ONE stacked matmul -----------------------------
    # [h_0..h_{L-1}; c_0..c_{L-1}] (2LB, E) @ [hb_w | cb_w] (E, 2D) + [hb_b | cb_b]
    hc = jnp.concatenate(h_e + c_e, axis=0)                           # (2LB, E)
    bridged = (jnp.dot(hc, bridge_w_ref[...], preferred_element_type=f32)
               + bridge_b_ref[...])                                   # (2LB, 2D)
    h_d = [bridged[l * B:(l + 1) * B, 0:D] for l in range(L)]
    c_d = [bridged[(L + l) * B:(L + l + 1) * B, D:2 * D] for l in range(L)]

    # ---- decoder recurrence ---------------------------------------------------
    d_whh0 = d_whh0_ref[...]
    d_rest_w = [d_rest_w_ref[l] for l in range(L - 1)]
    d_rest_b = [d_rest_b_ref[l] for l in range(L - 1)]
    for t in range(Td):
        gates = gx_d[:, t, :] + jnp.dot(h_d[0], d_whh0, preferred_element_type=f32)
        h_d[0], c_d[0] = _lstm_cell(gates, c_d[0], D)
        layer_in = h_d[0]
        for l in range(1, L):
            cat = jnp.concatenate([layer_in, h_d[l]], axis=-1)       # (B, 2D)
            gates = (jnp.dot(cat, d_rest_w[l - 1], preferred_element_type=f32)
                     + d_rest_b[l - 1])
            h_d[l], c_d[l] = _lstm_cell(gates, c_d[l], D)
            layer_in = h_d[l]
        # top-layer output, stored batch-major so the head/output need no transpose
        y_scr[:, t:t + 1, :] = layer_in.reshape(B, 1, D)

    # ---- CMAL head (bn3 folded into w1/b1), one matmul pair over all rows -----
    z = y_scr[...].reshape(B * Td, D)
    hdn = jnp.maximum(
        jnp.dot(z, h_w1_ref[...], preferred_element_type=f32) + h_b1_ref[...], 0.0)
    o = jnp.dot(hdn, h_w2_ref[...], preferred_element_type=f32) + h_b2_ref[...]
    C = o.shape[1] // 4
    m = o[:, 0 * C:1 * C]
    b_ = o[:, 1 * C:2 * C]
    tt = o[:, 2 * C:3 * C]
    p = o[:, 3 * C:4 * C]
    # Softplus(beta=2) + eps, numerically stable: max(x,0) + 0.5*log(1+exp(-|2x|))
    b_ = (jnp.maximum(b_, 0.0)
          + 0.5 * jnp.log(1.0 + jnp.exp(-jnp.abs(2.0 * b_)))) + eps_head
    tt = (1.0 - eps_head) * jax.nn.sigmoid(tt) + eps_head
    pm = jnp.max(p, axis=-1, keepdims=True)
    pe = jnp.exp(p - pm)
    p = (1.0 - eps_head) * (pe / jnp.sum(pe, axis=-1, keepdims=True)) + eps_head

    out = jnp.concatenate([m, b_, tt, p], axis=-1)                    # (B*Td, 4C)
    out_ref[...] = out.reshape(B, Td, 4 * C).astype(out_ref.dtype)


# -------------------------------- parameters ---------------------------------

def init_params(key, P, FP, E, D, L, components):
    keys = iter(jax.random.split(key, 128))

    def nrm(shape, scale=0.1):
        return scale * jax.random.normal(next(keys), shape, dtype=jnp.float32)

    params = {}
    params["fc1_w"], params["fc1_b"] = nrm((P, E)), nrm((E,))

    params["bn1_gamma"] = 1.0 + nrm((E,), 0.05)
    params["bn1_beta"] = nrm((E,), 0.05)
    params["bn1_mean"] = nrm((E,), 0.05)
    params["bn1_var"] = 1.0 + jnp.abs(nrm((E,), 0.05))

    # (w_ih, w_hh, bias) per layer; bias = b_ih + b_hh (PyTorch gate order i,f,g,o)
    params["enc"] = [(nrm((E, 4 * E)), nrm((E, 4 * E)), nrm((4 * E,)))
                     for _ in range(L)]

    params["hb_w"], params["hb_b"] = nrm((E, D)), nrm((D,))
    params["cb_w"], params["cb_b"] = nrm((E, D)), nrm((D,))

    params["fc2_w"], params["fc2_b"] = nrm((FP, E)), nrm((E,))

    params["dec"] = [(nrm((E if l == 0 else D, 4 * D)), nrm((D, 4 * D)), nrm((4 * D,)))
                     for l in range(L)]

    params["bn3_gamma"] = 1.0 + nrm((D,), 0.05)
    params["bn3_beta"] = nrm((D,), 0.05)
    params["bn3_mean"] = nrm((D,), 0.05)
    params["bn3_var"] = 1.0 + jnp.abs(nrm((D,), 0.05))

    params["head_w1"], params["head_b1"] = nrm((D, 2 * D)), nrm((2 * D,))
    params["head_w2"], params["head_b2"] = nrm((2 * D, 4 * components)), nrm((4 * components,))
    return params


def pack_params(params, eps_bn=1e-5):
    """One-time weight folding/packing (call once, outside jit).

    - folds the inference bn1 affine into the encoder layer-0 input projection
    - folds the inference bn3 affine into the CMAL head's first Linear
    - stacks layers 1..L-1 as [W_ih; W_hh] (L-1, 2H, 4H) + (L-1, 1, 4H) biases
    - concatenates the hidden/cell bridge weights into (E, 2D) / (1, 2D)
    """
    p = {}
    # encoder pre-projection (bn1 folded)
    scale1 = params["bn1_gamma"] * jax.lax.rsqrt(params["bn1_var"] + eps_bn)
    shift1 = params["bn1_beta"] - params["bn1_mean"] * scale1
    wih0_e, whh0_e, b0_e = params["enc"][0]
    p["fc1_w"] = params["fc1_w"]
    p["fc1_b"] = params["fc1_b"].reshape(1, -1)
    p["e_wih0"] = scale1[:, None] * wih0_e
    p["e_b0"] = (b0_e + shift1 @ wih0_e).reshape(1, -1)
    p["e_whh0"] = whh0_e
    p["e_rest_w"] = jnp.stack(
        [jnp.concatenate([w_ih, w_hh], axis=0) for (w_ih, w_hh, _) in params["enc"][1:]])
    p["e_rest_b"] = jnp.stack([b.reshape(1, -1) for (_, _, b) in params["enc"][1:]])

    # bridges, concatenated along the output dim
    p["bridge_w"] = jnp.concatenate([params["hb_w"], params["cb_w"]], axis=1)
    p["bridge_b"] = jnp.concatenate([params["hb_b"], params["cb_b"]]).reshape(1, -1)

    # decoder
    wih0_d, whh0_d, b0_d = params["dec"][0]
    p["fc2_w"] = params["fc2_w"]
    p["fc2_b"] = params["fc2_b"].reshape(1, -1)
    p["d_wih0"] = wih0_d
    p["d_b0"] = b0_d.reshape(1, -1)
    p["d_whh0"] = whh0_d
    p["d_rest_w"] = jnp.stack(
        [jnp.concatenate([w_ih, w_hh], axis=0) for (w_ih, w_hh, _) in params["dec"][1:]])
    p["d_rest_b"] = jnp.stack([b.reshape(1, -1) for (_, _, b) in params["dec"][1:]])

    # head (bn3 folded)
    scale3 = params["bn3_gamma"] * jax.lax.rsqrt(params["bn3_var"] + eps_bn)
    shift3 = params["bn3_beta"] - params["bn3_mean"] * scale3
    p["h_w1"] = scale3[:, None] * params["head_w1"]
    p["h_b1"] = (params["head_b1"] + shift3 @ params["head_w1"]).reshape(1, -1)
    p["h_w2"] = params["head_w2"]
    p["h_b2"] = params["head_b2"].reshape(1, -1)
    return p


# --------------------------------- forward -----------------------------------

def stacked_lstm_forward(packed, x, t, f, *, eps_head=1e-5):
    """Whole forward = ONE pallas_call.  Returns (m, b, t, p) each (B, T_dec, C)."""
    del t  # addEncodings=False (module default) -> positional encodings skipped
    B, _, _ = x.shape
    _, Td, _ = f.shape
    L = packed["e_rest_w"].shape[0] + 1
    D = packed["d_whh0"].shape[0]
    C4 = packed["h_w2"].shape[1]
    C = C4 // 4

    out = pl.pallas_call(
        functools.partial(_forward_kernel, num_layers=L, eps_head=eps_head),
        out_shape=jax.ShapeDtypeStruct((B, Td, C4), jnp.float32),
        scratch_shapes=[pltpu.VMEM((B, Td, D), jnp.float32)],
    )(x, f,
      packed["fc1_w"], packed["fc1_b"], packed["e_wih0"], packed["e_b0"],
      packed["e_whh0"], packed["e_rest_w"], packed["e_rest_b"],
      packed["bridge_w"], packed["bridge_b"],
      packed["fc2_w"], packed["fc2_b"], packed["d_wih0"], packed["d_b0"],
      packed["d_whh0"], packed["d_rest_w"], packed["d_rest_b"],
      packed["h_w1"], packed["h_b1"], packed["h_w2"], packed["h_b2"])

    m = out[..., 0 * C:1 * C]
    b_ = out[..., 1 * C:2 * C]
    tt = out[..., 2 * C:3 * C]
    p = out[..., 3 * C:4 * C]
    return m, b_, tt, p


# ----------------------------------- main -------------------------------------

if __name__ == "__main__":
    B, T_hist, timesteps = 2, 12, 8
    P, FP, E, D, L, components = 6, 4, 32, 32, 3, 1

    key = jax.random.PRNGKey(0)
    kx, kf, kp = jax.random.split(key, 3)
    x = jax.random.normal(kx, (B, T_hist, P), dtype=jnp.float32)
    t = jnp.arange(B * (T_hist + timesteps), dtype=jnp.int32).reshape(
        B, T_hist + timesteps)
    f = jax.random.normal(kf, (B, timesteps, FP), dtype=jnp.float32)

    params = init_params(kp, P, FP, E, D, L, components)
    packed = pack_params(params)   # one-time folding/packing, outside jit

    fwd = jax.jit(stacked_lstm_forward)
    m, b_, tt, p = fwd(packed, x, t, f)
    jax.block_until_ready((m, b_, tt, p))

    assert m.shape == (B, timesteps, components)
    assert b_.shape == (B, timesteps, components)
    assert tt.shape == (B, timesteps, components)
    assert p.shape == (B, timesteps, components)
    assert bool(jnp.all(jnp.isfinite(m))) and bool(jnp.all(jnp.isfinite(b_)))
    assert bool(jnp.all(b_ > 0.0)) and bool(jnp.all((tt > 0.0) & (tt < 1.0)))
    assert bool(jnp.all(jnp.isfinite(p)))
    print("KERNEL_OK")
</pallas_src>

<mosaic_0001>
module attributes {stable_mosaic.version = 11 : i64} {
  func.func @_forward_kernel(%arg0: memref<2x12x6xf32, #tpu.memory_space<vmem>>, %arg1: memref<2x8x4xf32, #tpu.memory_space<vmem>>, %arg2: memref<6x32xf32, #tpu.memory_space<vmem>>, %arg3: memref<1x32xf32, #tpu.memory_space<vmem>>, %arg4: memref<32x128xf32, #tpu.memory_space<vmem>>, %arg5: memref<1x128xf32, #tpu.memory_space<vmem>>, %arg6: memref<32x128xf32, #tpu.memory_space<vmem>>, %arg7: memref<2x64x128xf32, #tpu.memory_space<vmem>>, %arg8: memref<2x1x128xf32, #tpu.memory_space<vmem>>, %arg9: memref<32x64xf32, #tpu.memory_space<vmem>>, %arg10: memref<1x64xf32, #tpu.memory_space<vmem>>, %arg11: memref<4x32xf32, #tpu.memory_space<vmem>>, %arg12: memref<1x32xf32, #tpu.memory_space<vmem>>, %arg13: memref<32x128xf32, #tpu.memory_space<vmem>>, %arg14: memref<1x128xf32, #tpu.memory_space<vmem>>, %arg15: memref<32x128xf32, #tpu.memory_space<vmem>>, %arg16: memref<2x64x128xf32, #tpu.memory_space<vmem>>, %arg17: memref<2x1x128xf32, #tpu.memory_space<vmem>>, %arg18: memref<32x64xf32, #tpu.memory_space<vmem>>, %arg19: memref<1x64xf32, #tpu.memory_space<vmem>>, %arg20: memref<64x4xf32, #tpu.memory_space<vmem>>, %arg21: memref<1x4xf32, #tpu.memory_space<vmem>>, %arg22: memref<2x8x4xf32, #tpu.memory_space<vmem>>, %arg23: memref<2x8x32xf32, #tpu.memory_space<vmem>>) attributes {dimension_semantics = [], scalar_prefetch = 0 : i64, scratch_operands = 1 : i64, tpu.core_type = #tpu.core_type<tc>} {
    %c0 = arith.constant 0 : index
    %c0_0 = arith.constant 0 : index
    %c0_1 = arith.constant 0 : index
    %0 = vector.load %arg0[%c0, %c0_0, %c0_1] : memref<2x12x6xf32, #tpu.memory_space<vmem>>, vector<2x12x6xf32>
    %1 = vector.shape_cast %0 : vector<2x12x6xf32> to vector<24x6xf32>
    %c0_2 = arith.constant 0 : index
    %c0_3 = arith.constant 0 : index
    %2 = vector.load %arg2[%c0_2, %c0_3] : memref<6x32xf32, #tpu.memory_space<vmem>>, vector<6x32xf32>
    %cst = arith.constant dense<0.000000e+00> : vector<24x32xf32>
    %3 = tpu.matmul %1, %2, %cst {dimension_numbers = #tpu.dot_dimension_numbers<[1], [0], [0], [1], [0, 0, 1, 1], [], []>} : vector<24x6xf32>, vector<6x32xf32>, vector<24x32xf32> -> vector<24x32xf32>
    %c0_4 = arith.constant 0 : index
    %c0_5 = arith.constant 0 : index
    %4 = vector.load %arg3[%c0_4, %c0_5] : memref<1x32xf32, #tpu.memory_space<vmem>>, vector<1x32xf32>
    %5 = vector.broadcast %4 : vector<1x32xf32> to vector<24x32xf32>
    %6 = arith.addf %3, %5 : vector<24x32xf32>
    %cst_6 = arith.constant 0.000000e+00 : f32
    %7 = vector.broadcast %cst_6 : f32 to vector<24x32xf32>
    %8 = arith.maximumf %6, %7 : vector<24x32xf32>
    %c0_7 = arith.constant 0 : index
    %c0_8 = arith.constant 0 : index
    %9 = vector.load %arg4[%c0_7, %c0_8] : memref<32x128xf32, #tpu.memory_space<vmem>>, vector<32x128xf32>
    %cst_9 = arith.constant dense<0.000000e+00> : vector<24x128xf32>
    %10 = tpu.matmul %8, %9, %cst_9 {dimension_numbers = #tpu.dot_dimension_numbers<[1], [0], [0], [1], [0, 0, 1, 1], [], []>} : vector<24x32xf32>, vector<32x128xf32>, vector<24x128xf32> -> vector<24x128xf32>
    %c0_10 = arith.constant 0 : index
    %c0_11 = arith.constant 0 : index
    %11 = vector.load %arg5[%c0_10, %c0_11] : memref<1x128xf32, #tpu.memory_space<vmem>>, vector<1x128xf32>
    %12 = vector.broadcast %11 : vector<1x128xf32> to vector<24x128xf32>
    %13 = arith.addf %10, %12 : vector<24x128xf32>
    %14 = vector.shape_cast %13 : vector<24x128xf32> to vector<2x12x128xf32>
    %c0_12 = arith.constant 0 : index
    %c0_13 = arith.constant 0 : index
    %c0_14 = arith.constant 0 : index
    %15 = vector.load %arg1[%c0_12, %c0_13, %c0_14] : memref<2x8x4xf32, #tpu.memory_space<vmem>>, vector<2x8x4xf32>
    %16 = vector.shape_cast %15 : vector<2x8x4xf32> to vector<16x4xf32>
    %c0_15 = arith.constant 0 : index
    %c0_16 = arith.constant 0 : index
    %17 = vector.load %arg11[%c0_15, %c0_16] : memref<4x32xf32, #tpu.memory_space<vmem>>, vector<4x32xf32>
    %cst_17 = arith.constant dense<0.000000e+00> : vector<16x32xf32>
    %18 = tpu.matmul %16, %17, %cst_17 {dimension_numbers = #tpu.dot_dimension_numbers<[1], [0], [0], [1], [0, 0, 1, 1], [], []>} : vector<16x4xf32>, vector<4x32xf32>, vector<16x32xf32> -> vector<16x32xf32>
    %c0_18 = arith.constant 0 : index
    %c0_19 = arith.constant 0 : index
    %19 = vector.load %arg12[%c0_18, %c0_19] : memref<1x32xf32, #tpu.memory_space<vmem>>, vector<1x32xf32>
    %20 = vector.broadcast %19 : vector<1x32xf32> to vector<16x32xf32>
    %21 = arith.addf %18, %20 : vector<16x32xf32>
    %cst_20 = arith.constant 0.000000e+00 : f32
    %22 = vector.broadcast %cst_20 : f32 to vector<16x32xf32>
    %23 = arith.maximumf %21, %22 : vector<16x32xf32>
    %c0_21 = arith.constant 0 : index
    %c0_22 = arith.constant 0 : index
    %24 = vector.load %arg13[%c0_21, %c0_22] : memref<32x128xf32, #tpu.memory_space<vmem>>, vector<32x128xf32>
    %cst_23 = arith.constant dense<0.000000e+00> : vector<16x128xf32>
    %25 = tpu.matmul %23, %24, %cst_23 {dimension_numbers = #tpu.dot_dimension_numbers<[1], [0], [0], [1], [0, 0, 1, 1], [], []>} : vector<16x32xf32>, vector<32x128xf32>, vector<16x128xf32> -> vector<16x128xf32>
    %c0_24 = arith.constant 0 : index
    %c0_25 = arith.constant 0 : index
    %26 = vector.load %arg14[%c0_24, %c0_25] : memref<1x128xf32, #tpu.memory_space<vmem>>, vector<1x128xf32>
    %27 = vector.broadcast %26 : vector<1x128xf32> to vector<16x128xf32>
    %28 = arith.addf %25, %27 : vector<16x128xf32>
    %29 = vector.shape_cast %28 : vector<16x128xf32> to vector<2x8x128xf32>
    %c0_26 = arith.constant 0 : index
    %c0_27 = arith.constant 0 : index
    %30 = vector.load %arg6[%c0_26, %c0_27] : memref<32x128xf32, #tpu.memory_space<vmem>>, vector<32x128xf32>
    %c0_28 = arith.constant 0 : index
    %c0_29 = arith.constant 0 : index
    %c0_30 = arith.constant 0 : index
    %31 = vector.load %arg7[%c0_28, %c0_29, %c0_30] : memref<2x64x128xf32, #tpu.memory_space<vmem>>, vector<1x64x128xf32>
    %32 = vector.shape_cast %31 : vector<1x64x128xf32> to vector<64x128xf32>
    %c1 = arith.constant 1 : index
    %c0_31 = arith.constant 0 : index
    %c0_32 = arith.constant 0 : index
    %33 = vector.load %arg7[%c1, %c0_31, %c0_32] : memref<2x64x128xf32, #tpu.memory_space<vmem>>, vector<1x64x128xf32>
    %34 = vector.shape_cast %33 : vector<1x64x128xf32> to vector<64x128xf32>
    %c0_33 = arith.constant 0 : index
    %c0_34 = arith.constant 0 : index
    %c0_35 = arith.constant 0 : index
    %35 = vector.load %arg8[%c0_33, %c0_34, %c0_35] : memref<2x1x128xf32, #tpu.memory_space<vmem>>, vector<1x1x128xf32>
    %36 = vector.shape_cast %35 : vector<1x1x128xf32> to vector<1x128xf32>
    %c1_36 = arith.constant 1 : index
    %c0_37 = arith.constant 0 : index
    %c0_38 = arith.constant 0 : index
    %37 = vector.load %arg8[%c1_36, %c0_37, %c0_38] : memref<2x1x128xf32, #tpu.memory_space<vmem>>, vector<1x1x128xf32>
    %38 = vector.shape_cast %37 : vector<1x1x128xf32> to vector<1x128xf32>
    %cst_39 = arith.constant 0.000000e+00 : f32
    %39 = vector.broadcast %cst_39 : f32 to vector<2x32xf32>
    %cst_40 = arith.constant 0.000000e+00 : f32
    %40 = vector.broadcast %cst_40 : f32 to vector<2x32xf32>
    %cst_41 = arith.constant 0.000000e+00 : f32
    %41 = vector.broadcast %cst_41 : f32 to vector<2x32xf32>
    %cst_42 = arith.constant 0.000000e+00 : f32
    %42 = vector.broadcast %cst_42 : f32 to vector<2x32xf32>
    %cst_43 = arith.constant 0.000000e+00 : f32
    %43 = vector.broadcast %cst_43 : f32 to vector<2x32xf32>
    %cst_44 = arith.constant 0.000000e+00 : f32
    %44 = vector.broadcast %cst_44 : f32 to vector<2x32xf32>
    %45 = vector.extract_strided_slice %14 {offsets = [0, 0, 0], sizes = [2, 1, 128], strides = [1, 1, 1]} : vector<2x12x128xf32> to vector<2x1x128xf32>
    %46 = vector.shape_cast %45 : vector<2x1x128xf32> to vector<2x128xf32>
    %cst_45 = arith.constant dense<0.000000e+00> : vector<2x128xf32>
    %47 = tpu.matmul %39, %30, %cst_45 {dimension_numbers = #tpu.dot_dimension_numbers<[1], [0], [0], [1], [0, 0, 1, 1], [], []>} : vector<2x32xf32>, vector<32x128xf32>, vector<2x128xf32> -> vector<2x128xf32>
    %48 = arith.addf %46, %47 : vector<2x128xf32>
    %49 = vector.extract_strided_slice %48 {offsets = [0, 0], sizes = [2, 32], strides = [1, 1]} : vector<2x128xf32> to vector<2x32xf32>
    %50 = arith.negf %49 : vector<2x32xf32>
    %51 = math.exp %50 : vector<2x32xf32>
    %cst_46 = arith.constant 1.000000e+00 : f32
    %52 = vector.broadcast %cst_46 : f32 to vector<2x32xf32>
    %53 = arith.addf %52, %51 : vector<2x32xf32>
    %54 = arith.divf %52, %53 : vector<2x32xf32>
    %55 = vector.extract_strided_slice %48 {offsets = [0, 32], sizes = [2, 32], strides = [1, 1]} : vector<2x128xf32> to vector<2x32xf32>
    %56 = arith.negf %55 : vector<2x32xf32>
    %57 = math.exp %56 : vector<2x32xf32>
    %cst_47 = arith.constant 1.000000e+00 : f32
    %58 = vector.broadcast %cst_47 : f32 to vector<2x32xf32>
    %59 = arith.addf %58, %57 : vector<2x32xf32>
    %60 = arith.divf %58, %59 : vector<2x32xf32>
    %61 = vector.extract_strided_slice %48 {offsets = [0, 64], sizes = [2, 32], strides = [1, 1]} : vector<2x128xf32> to vector<2x32xf32>
    %62 = math.tanh %61 : vector<2x32xf32>
    %63 = vector.extract_strided_slice %48 {offsets = [0, 96], sizes = [2, 32], strides = [1, 1]} : vector<2x128xf32> to vector<2x32xf32>
    %64 = arith.negf %63 : vector<2x32xf32>
    %65 = math.exp %64 : vector<2x32xf32>
    %cst_48 = arith.constant 1.000000e+00 : f32
    %66 = vector.broadcast %cst_48 : f32 to vector<2x32xf32>
    %67 = arith.addf %66, %65 : vector<2x32xf32>
    %68 = arith.divf %66, %67 : vector<2x32xf32>
    %69 = arith.mulf %60, %42 : vector<2x32xf32>
    %70 = arith.mulf %54, %62 : vector<2x32xf32>
    %71 = arith.addf %69, %70 : vector<2x32xf32>
    %72 = math.tanh %71 : vector<2x32xf32>
    %73 = arith.mulf %68, %72 : vector<2x32xf32>
    %74 = tpu.concatenate %73, %40 in 1 : vector<2x32xf32>, vector<2x32xf32> -> vector<2x64xf32>
    %cst_49 = arith.constant dense<0.000000e+00> : vector<2x128xf32>
    %75 = tpu.matmul %74, %32, %cst_49 {dimension_numbers = #tpu.dot_dimension_numbers<[1], [0], [0], [1], [0, 0, 1, 1], [], []>} : vector<2x64xf32>, vector<64x128xf32>, vector<2x128xf32> -> vector<2x128xf32>
    %76 = vector.broadcast %36 : vector<1x128xf32> to vector<2x128xf32>
    %77 = arith.addf %75, %76 : vector<2x128xf32>
    %78 = vector.extract_strided_slice %77 {offsets = [0, 0], sizes = [2, 32], strides = [1, 1]} : vector<2x128xf32> to vector<2x32xf32>
    %79 = arith.negf %78 : vector<2x32xf32>
    %80 = math.exp %79 : vector<2x32xf32>
    %cst_50 = arith.constant 1.000000e+00 : f32
    %81 = vector.broadcast %cst_50 : f32 to vector<2x32xf32>
    %82 = arith.addf %81, %80 : vector<2x32xf32>
    %83 = arith.divf %81, %82 : vector<2x32xf32>
    %84 = vector.extract_strided_slice %77 {offsets = [0, 32], sizes = [2, 32], strides = [1, 1]} : vector<2x128xf32> to vector<2x32xf32>
    %85 = arith.negf %84 : vector<2x32xf32>
    %86 = math.exp %85 : vector<2x32xf32>
    %cst_51 = arith.constant 1.000000e+00 : f32
    %87 = vector.broadcast %cst_51 : f32 to vector<2x32xf32>
    %88 = arith.addf %87, %86 : vector<2x32xf32>
    %89 = arith.divf %87, %88 : vector<2x32xf32>
    %90 = vector.extract_strided_slice %77 {offsets = [0, 64], sizes = [2, 32], strides = [1, 1]} : vector<2x128xf32> to vector<2x32xf32>
    %91 = math.tanh %90 : vector<2x32xf32>
    %92 = vector.extract_strided_slice %77 {offsets = [0, 96], sizes = [2, 32], strides = [1, 1]} : vector<2x128xf32> to vector<2x32xf32>
    %93 = arith.negf %92 : vector<2x32xf32>
    %94 = math.exp %93 : vector<2x32xf32>
    %cst_52 = arith.constant 1.000000e+00 : f32
    %95 = vector.broadcast %cst_52 : f32 to vector<2x32xf32>
    %96 = arith.addf %95, %94 : vector<2x32xf32>
    %97 = arith.divf %95, %96 : vector<2x32xf32>
    %98 = arith.mulf %89, %43 : vector<2x32xf32>
    %99 = arith.mulf %83, %91 : vector<2x32xf32>
    %100 = arith.addf %98, %99 : vector<2x32xf32>
    %101 = math.tanh %100 : vector<2x32xf32>
    %102 = arith.mulf %97, %101 : vector<2x32xf32>
    %103 = tpu.concatenate %102, %41 in 1 : vector<2x32xf32>, vector<2x32xf32> -> vector<2x64xf32>
    %cst_53 = arith.constant dense<0.000000e+00> : vector<2x128xf32>
    %104 = tpu.matmul %103, %34, %cst_53 {dimension_numbers = #tpu.dot_dimension_numbers<[1], [0], [0], [1], [0, 0, 1, 1], [], []>} : vector<2x64xf32>, vector<64x128xf32>, vector<2x128xf32> -> vector<2x128xf32>
    %105 = vector.broadcast %38 : vector<1x128xf32> to vector<2x128xf32>
    %106 = arith.addf %104, %105 : vector<2x128xf32>
    %107 = vector.extract_strided_slice %106 {offsets = [0, 0], sizes = [2, 32], strides = [1, 1]} : vector<2x128xf32> to vector<2x32xf32>
    %108 = arith.negf %107 : vector<2x32xf32>
    %109 = math.exp %108 : vector<2x32xf32>
    %cst_54 = arith.constant 1.000000e+00 : f32
    %110 = vector.broadcast %cst_54 : f32 to vector<2x32xf32>
    %111 = arith.addf %110, %109 : vector<2x32xf32>
    %112 = arith.divf %110, %111 : vector<2x32xf32>
    %113 = vector.extract_strided_slice %106 {offsets = [0, 32], sizes = [2, 32], strides = [1, 1]} : vector<2x128xf32> to vector<2x32xf32>
    %114 = arith.negf %113 : vector<2x32xf32>
    %115 = math.exp %114 : vector<2x32xf32>
    %cst_55 = arith.constant 1.000000e+00 : f32
    %116 = vector.broadcast %cst_55 : f32 to vector<2x32xf32>
    %117 = arith.addf %116, %115 : vector<2x32xf32>
    %118 = arith.divf %116, %117 : vector<2x32xf32>
    %119 = vector.extract_strided_slice %106 {offsets = [0, 64], sizes = [2, 32], strides = [1, 1]} : vector<2x128xf32> to vector<2x32xf32>
    %120 = math.tanh %119 : vector<2x32xf32>
    %121 = vector.extract_strided_slice %106 {offsets = [0, 96], sizes = [2, 32], strides = [1, 1]} : vector<2x128xf32> to vector<2x32xf32>
    %122 = arith.negf %121 : vector<2x32xf32>
    %123 = math.exp %122 : vector<2x32xf32>
    %cst_56 = arith.constant 1.000000e+00 : f32
    %124 = vector.broadcast %cst_56 : f32 to vector<2x32xf32>
    %125 = arith.addf %124, %123 : vector<2x32xf32>
    %126 = arith.divf %124, %125 : vector<2x32xf32>
    %127 = arith.mulf %118, %44 : vector<2x32xf32>
    %128 = arith.mulf %112, %120 : vector<2x32xf32>
    %129 = arith.addf %127, %128 : vector<2x32xf32>
    %130 = math.tanh %129 : vector<2x32xf32>
    %131 = arith.mulf %126, %130 : vector<2x32xf32>
    %132 = vector.extract_strided_slice %14 {offsets = [0, 1, 0], sizes = [2, 1, 128], strides = [1, 1, 1]} : vector<2x12x128xf32> to vector<2x1x128xf32>
    %133 = vector.shape_cast %132 : vector<2x1x128xf32> to vector<2x128xf32>
    %cst_57 = arith.constant dense<0.000000e+00> : vector<2x128xf32>
    %134 = tpu.matmul %73, %30, %cst_57 {dimension_numbers = #tpu.dot_dimension_numbers<[1], [0], [0], [1], [0, 0, 1, 1], [], []>} : vector<2x32xf32>, vector<32x128xf32>, vector<2x128xf32> -> vector<2x128xf32>
    %135 = arith.addf %133, %134 : vector<2x128xf32>
    %136 = vector.extract_strided_slice %135 {offsets = [0, 0], sizes = [2, 32], strides = [1, 1]} : vector<2x128xf32> to vector<2x32xf32>
    %137 = arith.negf %136 : vector<2x32xf32>
    %138 = math.exp %137 : vector<2x32xf32>
    %cst_58 = arith.constant 1.000000e+00 : f32
    %139 = vector.broadcast %cst_58 : f32 to vector<2x32xf32>
    %140 = arith.addf %139, %138 : vector<2x32xf32>
    %141 = arith.divf %139, %140 : vector<2x32xf32>
    %142 = vector.extract_strided_slice %135 {offsets = [0, 32], sizes = [2, 32], strides = [1, 1]} : vector<2x128xf32> to vector<2x32xf32>
    %143 = arith.negf %142 : vector<2x32xf32>
    %144 = math.exp %143 : vector<2x32xf32>
    %cst_59 = arith.constant 1.000000e+00 : f32
    %145 = vector.broadcast %cst_59 : f32 to vector<2x32xf32>
    %146 = arith.addf %145, %144 : vector<2x32xf32>
    %147 = arith.divf %145, %146 : vector<2x32xf32>
    %148 = vector.extract_strided_slice %135 {offsets = [0, 64], sizes = [2, 32], strides = [1, 1]} : vector<2x128xf32> to vector<2x32xf32>
    %149 = math.tanh %148 : vector<2x32xf32>
    %150 = vector.extract_strided_slice %135 {offsets = [0, 96], sizes = [2, 32], strides = [1, 1]} : vector<2x128xf32> to vector<2x32xf32>
    %151 = arith.negf %150 : vector<2x32xf32>
    %152 = math.exp %151 : vector<2x32xf32>
    %cst_60 = arith.constant 1.000000e+00 : f32
    %153 = vector.broadcast %cst_60 : f32 to vector<2x32xf32>
    %154 = arith.addf %153, %152 : vector<2x32xf32>
    %155 = arith.divf %153, %154 : vector<2x32xf32>
    %156 = arith.mulf %147, %71 : vector<2x32xf32>
    %157 = arith.mulf %141, %149 : vector<2x32xf32>
    %158 = arith.addf %156, %157 : vector<2x32xf32>
    %159 = math.tanh %158 : vector<2x32xf32>
    %160 = arith.mulf %155, %159 : vector<2x32xf32>
    %161 = tpu.concatenate %160, %102 in 1 : vector<2x32xf32>, vector<2x32xf32> -> vector<2x64xf32>
    %cst_61 = arith.constant dense<0.000000e+00> : vector<2x128xf32>
    %162 = tpu.matmul %161, %32, %cst_61 {dimension_numbers = #tpu.dot_dimension_numbers<[1], [0], [0], [1], [0, 0, 1, 1], [], []>} : vector<2x64xf32>, vector<64x128xf32>, vector<2x128xf32> -> vector<2x128xf32>
    %163 = vector.broadcast %36 : vector<1x128xf32> to vector<2x128xf32>
    %164 = arith.addf %162, %163 : vector<2x128xf32>
    %165 = vector.extract_strided_slice %164 {offsets = [0, 0], sizes = [2, 32], strides = [1, 1]} : vector<2x128xf32> to vector<2x32xf32>
    %166 = arith.negf %165 : vector<2x32xf32>
    %167 = math.exp %166 : vector<2x32xf32>
    %cst_62 = arith.constant 1.000000e+00 : f32
    %168 = vector.broadcast %cst_62 : f32 to vector<2x32xf32>
    %169 = arith.addf %168, %167 : vector<2x32xf32>
    %170 = arith.divf %168, %169 : vector<2x32xf32>
    %171 = vector.extract_strided_slice %164 {offsets = [0, 32], sizes = [2, 32], strides = [1, 1]} : vector<2x128xf32> to vector<2x32xf32>
    %172 = arith.negf %171 : vector<2x32xf32>
    %173 = math.exp %172 : vector<2x32xf32>
    %cst_63 = arith.constant 1.000000e+00 : f32
    %174 = vector.broadcast %cst_63 : f32 to vector<2x32xf32>
    %175 = arith.addf %174, %173 : vector<2x32xf32>
    %176 = arith.divf %174, %175 : vector<2x32xf32>
    %177 = vector.extract_strided_slice %164 {offsets = [0, 64], sizes = [2, 32], strides = [1, 1]} : vector<2x128xf32> to vector<2x32xf32>
    %178 = math.tanh %177 : vector<2x32xf32>
    %179 = vector.extract_strided_slice %164 {offsets = [0, 96], sizes = [2, 32], strides = [1, 1]} : vector<2x128xf32> to vector<2x32xf32>
    %180 = arith.negf %179 : vector<2x32xf32>
    %181 = math.exp %180 : vector<2x32xf32>
    %cst_64 = arith.constant 1.000000e+00 : f32
    %182 = vector.broadcast %cst_64 : f32 to vector<2x32xf32>
    %183 = arith.addf %182, %181 : vector<2x32xf32>
    %184 = arith.divf %182, %183 : vector<2x32xf32>
    %185 = arith.mulf %176, %100 : vector<2x32xf32>
    %186 = arith.mulf %170, %178 : vector<2x32xf32>
    %187 = arith.addf %185, %186 : vector<2x32xf32>
    %188 = math.tanh %187 : vector<2x32xf32>
    %189 = arith.mulf %184, %188 : vector<2x32xf32>
    %190 = tpu.concatenate %189, %131 in 1 : vector<2x32xf32>, vector<2x32xf32> -> vector<2x64xf32>
    %cst_65 = arith.constant dense<0.000000e+00> : vector<2x128xf32>
    %191 = tpu.matmul %190, %34, %cst_65 {dimension_numbers = #tpu.dot_dimension_numbers<[1], [0], [0], [1], [0, 0, 1, 1], [], []>} : vector<2x64xf32>, vector<64x128xf32>, vector<2x128xf32> -> vector<2x128xf32>
    %192 = vector.broadcast %38 : vector<1x128xf32> to vector<2x128xf32>
    %193 = arith.addf %191, %192 : vector<2x128xf32>
    %194 = vector.extract_strided_slice %193 {offsets = [0, 0], sizes = [2, 32], strides = [1, 1]} : vector<2x128xf32> to vector<2x32xf32>
    %195 = arith.negf %194 : vector<2x32xf32>
    %196 = math.exp %195 : vector<2x32xf32>
    %cst_66 = arith.constant 1.000000e+00 : f32
    %197 = vector.broadcast %cst_66 : f32 to vector<2x32xf32>
    %198 = arith.addf %197, %196 : vector<2x32xf32>
    %199 = arith.divf %197, %198 : vector<2x32xf32>
    %200 = vector.extract_strided_slice %193 {offsets = [0, 32], sizes = [2, 32], strides = [1, 1]} : vector<2x128xf32> to vector<2x32xf32>
    %201 = arith.negf %200 : vector<2x32xf32>
    %202 = math.exp %201 : vector<2x32xf32>
    %cst_67 = arith.constant 1.000000e+00 : f32
    %203 = vector.broadcast %cst_67 : f32 to vector<2x32xf32>
    %204 = arith.addf %203, %202 : vector<2x32xf32>
    %205 = arith.divf %203, %204 : vector<2x32xf32>
    %206 = vector.extract_strided_slice %193 {offsets = [0, 64], sizes = [2, 32], strides = [1, 1]} : vector<2x128xf32> to vector<2x32xf32>
    %207 = math.tanh %206 : vector<2x32xf32>
    %208 = vector.extract_strided_slice %193 {offsets = [0, 96], sizes = [2, 32], strides = [1, 1]} : vector<2x128xf32> to vector<2x32xf32>
    %209 = arith.negf %208 : vector<2x32xf32>
    %210 = math.exp %209 : vector<2x32xf32>
    %cst_68 = arith.constant 1.000000e+00 : f32
    %211 = vector.broadcast %cst_68 : f32 to vector<2x32xf32>
    %212 = arith.addf %211, %210 : vector<2x32xf32>
    %213 = arith.divf %211, %212 : vector<2x32xf32>
    %214 = arith.mulf %205, %129 : vector<2x32xf32>
    %215 = arith.mulf %199, %207 : vector<2x32xf32>
    %216 = arith.addf %214, %215 : vector<2x32xf32>
    %217 = math.tanh %216 : vector<2x32xf32>
    %218 = arith.mulf %213, %217 : vector<2x32xf32>
    %219 = vector.extract_strided_slice %14 {offsets = [0, 2, 0], sizes = [2, 1, 128], strides = [1, 1, 1]} : vector<2x12x128xf32> to vector<2x1x128xf32>
    %220 = vector.shape_cast %219 : vector<2x1x128xf32> to vector<2x128xf32>
    %cst_69 = arith.constant dense<0.000000e+00> : vector<2x128xf32>
    %221 = tpu.matmul %160, %30, %cst_69 {dimension_numbers = #tpu.dot_dimension_numbers<[1], [0], [0], [1], [0, 0, 1, 1], [], []>} : vector<2x32xf32>, vector<32x128xf32>, vector<2x128xf32> -> vector<2x128xf32>
    %222 = arith.addf %220, %221 : vector<2x128xf32>
    %223 = vector.extract_strided_slice %222 {offsets = [0, 0], sizes = [2, 32], strides = [1, 1]} : vector<2x128xf32> to vector<2x32xf32>
    %224 = arith.negf %223 : vector<2x32xf32>
    %225 = math.exp %224 : vector<2x32xf32>
    %cst_70 = arith.constant 1.000000e+00 : f32
    %226 = vector.broadcast %cst_70 : f32 to vector<2x32xf32>
    %227 = arith.addf %226, %225 : vector<2x32xf32>
    %228 = arith.divf %226, %227 : vector<2x32xf32>
    %229 = vector.extract_strided_slice %222 {offsets = [0, 32], sizes = [2, 32], strides = [1, 1]} : vector<2x128xf32> to vector<2x32xf32>
    %230 = arith.negf %229 : vector<2x32xf32>
    %231 = math.exp %230 : vector<2x32xf32>
    %cst_71 = arith.constant 1.000000e+00 : f32
    %232 = vector.broadcast %cst_71 : f32 to vector<2x32xf32>
    %233 = arith.addf %232, %231 : vector<2x32xf32>
    %234 = arith.divf %232, %233 : vector<2x32xf32>
    %235 = vector.extract_strided_slice %222 {offsets = [0, 64], sizes = [2, 32], strides = [1, 1]} : vector<2x128xf32> to vector<2x32xf32>
    %236 = math.tanh %235 : vector<2x32xf32>
    %237 = vector.extract_strided_slice %222 {offsets = [0, 96], sizes = [2, 32], strides = [1, 1]} : vector<2x128xf32> to vector<2x32xf32>
    %238 = arith.negf %237 : vector<2x32xf32>
    %239 = math.exp %238 : vector<2x32xf32>
    %cst_72 = arith.constant 1.000000e+00 : f32
    %240 = vector.broadcast %cst_72 : f32 to vector<2x32xf32>
    %241 = arith.addf %240, %239 : vector<2x32xf32>
    %242 = arith.divf %240, %241 : vector<2x32xf32>
    %243 = arith.mulf %234, %158 : vector<2x32xf32>
    %244 = arith.mulf %228, %236 : vector<2x32xf32>
    %245 = arith.addf %243, %244 : vector<2x32xf32>
    %246 = math.tanh %245 : vector<2x32xf32>
    %247 = arith.mulf %242, %246 : vector<2x32xf32>
    %248 = tpu.concatenate %247, %189 in 1 : vector<2x32xf32>, vector<2x32xf32> -> vector<2x64xf32>
    %cst_73 = arith.constant dense<0.000000e+00> : vector<2x128xf32>
    %249 = tpu.matmul %248, %32, %cst_73 {dimension_numbers = #tpu.dot_dimension_numbers<[1], [0], [0], [1], [0, 0, 1, 1], [], []>} : vector<2x64xf32>, vector<64x128xf32>, vector<2x128xf32> -> vector<2x128xf32>
    %250 = vector.broadcast %36 : vector<1x128xf32> to vector<2x128xf32>
    %251 = arith.addf %249, %250 : vector<2x128xf32>
    %252 = vector.extract_strided_slice %251 {offsets = [0, 0], sizes = [2, 32], strides = [1, 1]} : vector<2x128xf32> to vector<2x32xf32>
    %253 = arith.negf %252 : vector<2x32xf32>
    %254 = math.exp %253 : vector<2x32xf32>
    %cst_74 = arith.constant 1.000000e+00 : f32
    %255 = vector.broadcast %cst_74 : f32 to vector<2x32xf32>
    %256 = arith.addf %255, %254 : vector<2x32xf32>
    %257 = arith.divf %255, %256 : vector<2x32xf32>
    %258 = vector.extract_strided_slice %251 {offsets = [0, 32], sizes = [2, 32], strides = [1, 1]} : vector<2x128xf32> to vector<2x32xf32>
    %259 = arith.negf %258 : vector<2x32xf32>
    %260 = math.exp %259 : vector<2x32xf32>
    %cst_75 = arith.constant 1.000000e+00 : f32
    %261 = vector.broadcast %cst_75 : f32 to vector<2x32xf32>
    %262 = arith.addf %261, %260 : vector<2x32xf32>
    %263 = arith.divf %261, %262 : vector<2x32xf32>
    %264 = vector.extract_strided_slice %251 {offsets = [0, 64], sizes = [2, 32], strides = [1, 1]} : vector<2x128xf32> to vector<2x32xf32>
    %265 = math.tanh %264 : vector<2x32xf32>
    %266 = vector.extract_strided_slice %251 {offsets = [0, 96], sizes = [2, 32], strides = [1, 1]} : vector<2x128xf32> to vector<2x32xf32>
    %267 = arith.negf %266 : vector<2x32xf32>
    %268 = math.exp %267 : vector<2x32xf32>
    %cst_76 = arith.constant 1.000000e+00 : f32
    %269 = vector.broadcast %cst_76 : f32 to vector<2x32xf32>
    %270 = arith.addf %269, %268 : vector<2x32xf32>
    %271 = arith.divf %269, %270 : vector<2x32xf32>
    %272 = arith.mulf %263, %187 : vector<2x32xf32>
    %273 = arith.mulf %257, %265 : vector<2x32xf32>
    %274 = arith.addf %272, %273 : vector<2x32xf32>
    %275 = math.tanh %274 : vector<2x32xf32>
    %276 = arith.mulf %271, %275 : vector<2x32xf32>
    %277 = tpu.concatenate %276, %218 in 1 : vector<2x32xf32>, vector<2x32xf32> -> vector<2x64xf32>
    %cst_77 = arith.constant dense<0.000000e+00> : vector<2x128xf32>
    %278 = tpu.matmul %277, %34, %cst_77 {dimension_numbers = #tpu.dot_dimension_numbers<[1], [0], [0], [1], [0, 0, 1, 1], [], []>} : vector<2x64xf32>, vector<64x128xf32>, vector<2x128xf32> -> vector<2x128xf32>
    %279 = vector.broadcast %38 : vector<1x128xf32> to vector<2x128xf32>
    %280 = arith.addf %278, %279 : vector<2x128xf32>
    %281 = vector.extract_strided_slice %280 {offsets = [0, 0], sizes = [2, 32], strides = [1, 1]} : vector<2x128xf32> to vector<2x32xf32>
    %282 = arith.negf %281 : vector<2x32xf32>
    %283 = math.exp %282 : vector<2x32xf32>
    %cst_78 = arith.constant 1.000000e+00 : f32
    %284 = vector.broadcast %cst_78 : f32 to vector<2x32xf32>
    %285 = arith.addf %284, %283 : vector<2x32xf32>
    %286 = arith.divf %284, %285 : vector<2x32xf32>
    %287 = vector.extract_strided_slice %280 {offsets = [0, 32], sizes = [2, 32], strides = [1, 1]} : vector<2x128xf32> to vector<2x32xf32>
    %288 = arith.negf %287 : vector<2x32xf32>
    %289 = math.exp %288 : vector<2x32xf32>
    %cst_79 = arith.constant 1.000000e+00 : f32
    %290 = vector.broadcast %cst_79 : f32 to vector<2x32xf32>
    %291 = arith.addf %290, %289 : vector<2x32xf32>
    %292 = arith.divf %290, %291 : vector<2x32xf32>
    %293 = vector.extract_strided_slice %280 {offsets = [0, 64], sizes = [2, 32], strides = [1, 1]} : vector<2x128xf32> to vector<2x32xf32>
    %294 = math.tanh %293 : vector<2x32xf32>
    %295 = vector.extract_strided_slice %280 {offsets = [0, 96], sizes = [2, 32], strides = [1, 1]} : vector<2x128xf32> to vector<2x32xf32>
    %296 = arith.negf %295 : vector<2x32xf32>
    %297 = math.exp %296 : vector<2x32xf32>
    %cst_80 = arith.constant 1.000000e+00 : f32
    %298 = vector.broadcast %cst_80 : f32 to vector<2x32xf32>
    %299 = arith.addf %298, %297 : vector<2x32xf32>
    %300 = arith.divf %298, %299 : vector<2x32xf32>
    %301 = arith.mulf %292, %216 : vector<2x32xf32>
    %302 = arith.mulf %286, %294 : vector<2x32xf32>
    %303 = arith.addf %301, %302 : vector<2x32xf32>
    %304 = math.tanh %303 : vector<2x32xf32>
    %305 = arith.mulf %300, %304 : vector<2x32xf32>
    %306 = vector.extract_strided_slice %14 {offsets = [0, 3, 0], sizes = [2, 1, 128], strides = [1, 1, 1]} : vector<2x12x128xf32> to vector<2x1x128xf32>
    %307 = vector.shape_cast %306 : vector<2x1x128xf32> to vector<2x128xf32>
    %cst_81 = arith.constant dense<0.000000e+00> : vector<2x128xf32>
    %308 = tpu.matmul %247, %30, %cst_81 {dimension_numbers = #tpu.dot_dimension_numbers<[1], [0], [0], [1], [0, 0, 1, 1], [], []>} : vector<2x32xf32>, vector<32x128xf32>, vector<2x128xf32> -> vector<2x128xf32>
    %309 = arith.addf %307, %308 : vector<2x128xf32>
    %310 = vector.extract_strided_slice %309 {offsets = [0, 0], sizes = [2, 32], strides = [1, 1]} : vector<2x128xf32> to vector<2x32xf32>
    %311 = arith.negf %310 : vector<2x32xf32>
    %312 = math.exp %311 : vector<2x32xf32>
    %cst_82 = arith.constant 1.000000e+00 : f32
    %313 = vector.broadcast %cst_82 : f32 to vector<2x32xf32>
    %314 = arith.addf %313, %312 : vector<2x32xf32>
    %315 = arith.divf %313, %314 : vector<2x32xf32>
    %316 = vector.extract_strided_slice %309 {offsets = [0, 32], sizes = [2, 32], strides = [1, 1]} : vector<2x128xf32> to vector<2x32xf32>
    %317 = arith.negf %316 : vector<2x32xf32>
    %318 = math.exp %317 : vector<2x32xf32>
    %cst_83 = arith.constant 1.000000e+00 : f32
    %319 = vector.broadcast %cst_83 : f32 to vector<2x32xf32>
    %320 = arith.addf %319, %318 : vector<2x32xf32>
    %321 = arith.divf %319, %320 : vector<2x32xf32>
    %322 = vector.extract_strided_slice %309 {offsets = [0, 64], sizes = [2, 32], strides = [1, 1]} : vector<2x128xf32> to vector<2x32xf32>
    %323 = math.tanh %322 : vector<2x32xf32>
    %324 = vector.extract_strided_slice %309 {offsets = [0, 96], sizes = [2, 32], strides = [1, 1]} : vector<2x128xf32> to vector<2x32xf32>
    %325 = arith.negf %324 : vector<2x32xf32>
    %326 = math.exp %325 : vector<2x32xf32>
    %cst_84 = arith.constant 1.000000e+00 : f32
    %327 = vector.broadcast %cst_84 : f32 to vector<2x32xf32>
    %328 = arith.addf %327, %326 : vector<2x32xf32>
    %329 = arith.divf %327, %328 : vector<2x32xf32>
    %330 = arith.mulf %321, %245 : vector<2x32xf32>
    %331 = arith.mulf %315, %323 : vector<2x32xf32>
    %332 = arith.addf %330, %331 : vector<2x32xf32>
    %333 = math.tanh %332 : vector<2x32xf32>
    %334 = arith.mulf %329, %333 : vector<2x32xf32>
    %335 = tpu.concatenate %334, %276 in 1 : vector<2x32xf32>, vector<2x32xf32> -> vector<2x64xf32>
    %cst_85 = arith.constant dense<0.000000e+00> : vector<2x128xf32>
    %336 = tpu.matmul %335, %32, %cst_85 {dimension_numbers = #tpu.dot_dimension_numbers<[1], [0], [0], [1], [0, 0, 1, 1], [], []>} : vector<2x64xf32>, vector<64x128xf32>, vector<2x128xf32> -> vector<2x128xf32>
    %337 = vector.broadcast %36 : vector<1x128xf32> to vector<2x128xf32>
    %338 = arith.addf %336, %337 : vector<2x128xf32>
    %339 = vector.extract_strided_slice %338 {offsets = [0, 0], sizes = [2, 32], strides = [1, 1]} : vector<2x128xf32> to vector<2x32xf32>
    %340 = arith.negf %339 : vector<2x32xf32>
    %341 = math.exp %340 : vector<2x32xf32>
    %cst_86 = arith.constant 1.000000e+00 : f32
    %342 = vector.broadcast %cst_86 : f32 to vector<2x32xf32>
    %343 = arith.addf %342, %341 : vector<2x32xf32>
    %344 = arith.divf %342, %343 : vector<2x32xf32>
    %345 = vector.extract_strided_slice %338 {offsets = [0, 32], sizes = [2, 32], strides = [1, 1]} : vector<2x128xf32> to vector<2x32xf32>
    %346 = arith.negf %345 : vector<2x32xf32>
    %347 = math.exp %346 : vector<2x32xf32>
    %cst_87 = arith.constant 1.000000e+00 : f32
    %348 = vector.broadcast %cst_87 : f32 to vector<2x32xf32>
    %349 = arith.addf %348, %347 : vector<2x32xf32>
    %350 = arith.divf %348, %349 : vector<2x32xf32>
    %351 = vector.extract_strided_slice %338 {offsets = [0, 64], sizes = [2, 32], strides = [1, 1]} : vector<2x128xf32> to vector<2x32xf32>
    %352 = math.tanh %351 : vector<2x32xf32>
    %353 = vector.extract_strided_slice %338 {offsets = [0, 96], sizes = [2, 32], strides = [1, 1]} : vector<2x128xf32> to vector<2x32xf32>
    %354 = arith.negf %353 : vector<2x32xf32>
    %355 = math.exp %354 : vector<2x32xf32>
    %cst_88 = arith.constant 1.000000e+00 : f32
    %356 = vector.broadcast %cst_88 : f32 to vector<2x32xf32>
    %357 = arith.addf %356, %355 : vector<2x32xf32>
    %358 = arith.divf %356, %357 : vector<2x32xf32>
    %359 = arith.mulf %350, %274 : vector<2x32xf32>
    %360 = arith.mulf %344, %352 : vector<2x32xf32>
    %361 = arith.addf %359, %360 : vector<2x32xf32>
    %362 = math.tanh %361 : vector<2x32xf32>
    %363 = arith.mulf %358, %362 : vector<2x32xf32>
    %364 = tpu.concatenate %363, %305 in 1 : vector<2x32xf32>, vector<2x32xf32> -> vector<2x64xf32>
    %cst_89 = arith.constant dense<0.000000e+00> : vector<2x128xf32>
    %365 = tpu.matmul %364, %34, %cst_89 {dimension_numbers = #tpu.dot_dimension_numbers<[1], [0], [0], [1], [0, 0, 1, 1], [], []>} : vector<2x64xf32>, vector<64x128xf32>, vector<2x128xf32> -> vector<2x128xf32>
    %366 = vector.broadcast %38 : vector<1x128xf32> to vector<2x128xf32>
    %367 = arith.addf %365, %366 : vector<2x128xf32>
    %368 = vector.extract_strided_slice %367 {offsets = [0, 0], sizes = [2, 32], strides = [1, 1]} : vector<2x128xf32> to vector<2x32xf32>
    %369 = arith.negf %368 : vector<2x32xf32>
    %370 = math.exp %369 : vector<2x32xf32>
    %cst_90 = arith.constant 1.000000e+00 : f32
    %371 = vector.broadcast %cst_90 : f32 to vector<2x32xf32>
    %372 = arith.addf %371, %370 : vector<2x32xf32>
    %373 = arith.divf %371, %372 : vector<2x32xf32>
    %374 = vector.extract_strided_slice %367 {offsets = [0, 32], sizes = [2, 32], strides = [1, 1]} : vector<2x128xf32> to vector<2x32xf32>
    %375 = arith.negf %374 : vector<2x32xf32>
    %376 = math.exp %375 : vector<2x32xf32>
    %cst_91 = arith.constant 1.000000e+00 : f32
    %377 = vector.broadcast %cst_91 : f32 to vector<2x32xf32>
    %378 = arith.addf %377, %376 : vector<2x32xf32>
    %379 = arith.divf %377, %378 : vector<2x32xf32>
    %380 = vector.extract_strided_slice %367 {offsets = [0, 64], sizes = [2, 32], strides = [1, 1]} : vector<2x128xf32> to vector<2x32xf32>
    %381 = math.tanh %380 : vector<2x32xf32>
    %382 = vector.extract_strided_slice %367 {offsets = [0, 96], sizes = [2, 32], strides = [1, 1]} : vector<2x128xf32> to vector<2x32xf32>
    %383 = arith.negf %382 : vector<2x32xf32>
    %384 = math.exp %383 : vector<2x32xf32>
    %cst_92 = arith.constant 1.000000e+00 : f32
    %385 = vector.broadcast %cst_92 : f32 to vector<2x32xf32>
    %386 = arith.addf %385, %384 : vector<2x32xf32>
    %387 = arith.divf %385, %386 : vector<2x32xf32>
    %388 = arith.mulf %379, %303 : vector<2x32xf32>
    %389 = arith.mulf %373, %381 : vector<2x32xf32>
    %390 = arith.addf %388, %389 : vector<2x32xf32>
    %391 = math.tanh %390 : vector<2x32xf32>
    %392 = arith.mulf %387, %391 : vector<2x32xf32>
    %393 = vector.extract_strided_slice %14 {offsets = [0, 4, 0], sizes = [2, 1, 128], strides = [1, 1, 1]} : vector<2x12x128xf32> to vector<2x1x128xf32>
    %394 = vector.shape_cast %393 : vector<2x1x128xf32> to vector<2x128xf32>
    %cst_93 = arith.constant dense<0.000000e+00> : vector<2x128xf32>
    %395 = tpu.matmul %334, %30, %cst_93 {dimension_numbers = #tpu.dot_dimension_numbers<[1], [0], [0], [1], [0, 0, 1, 1], [], []>} : vector<2x32xf32>, vector<32x128xf32>, vector<2x128xf32> -> vector<2x128xf32>
    %396 = arith.addf %394, %395 : vector<2x128xf32>
    %397 = vector.extract_strided_slice %396 {offsets = [0, 0], sizes = [2, 32], strides = [1, 1]} : vector<2x128xf32> to vector<2x32xf32>
    %398 = arith.negf %397 : vector<2x32xf32>
    %399 = math.exp %398 : vector<2x32xf32>
    %cst_94 = arith.constant 1.000000e+00 : f32
    %400 = vector.broadcast %cst_94 : f32 to vector<2x32xf32>
    %401 = arith.addf %400, %399 : vector<2x32xf32>
    %402 = arith.divf %400, %401 : vector<2x32xf32>
    %403 = vector.extract_strided_slice %396 {offsets = [0, 32], sizes = [2, 32], strides = [1, 1]} : vector<2x128xf32> to vector<2x32xf32>
    %404 = arith.negf %403 : vector<2x32xf32>
    %405 = math.exp %404 : vector<2x32xf32>
    %cst_95 = arith.constant 1.000000e+00 : f32
    %406 = vector.broadcast %cst_95 : f32 to vector<2x32xf32>
    %407 = arith.addf %406, %405 : vector<2x32xf32>
    %408 = arith.divf %406, %407 : vector<2x32xf32>
    %409 = vector.extract_strided_slice %396 {offsets = [0, 64], sizes = [2, 32], strides = [1, 1]} : vector<2x128xf32> to vector<2x32xf32>
    %410 = math.tanh %409 : vector<2x32xf32>
    %411 = vector.extract_strided_slice %396 {offsets = [0, 96], sizes = [2, 32], strides = [1, 1]} : vector<2x128xf32> to vector<2x32xf32>
    %412 = arith.negf %411 : vector<2x32xf32>
    %413 = math.exp %412 : vector<2x32xf32>
    %cst_96 = arith.constant 1.000000e+00 : f32
    %414 = vector.broadcast %cst_96 : f32 to vector<2x32xf32>
    %415 = arith.addf %414, %413 : vector<2x32xf32>
    %416 = arith.divf %414, %415 : vector<2x32xf32>
    %417 = arith.mulf %408, %332 : vector<2x32xf32>
    %418 = arith.mulf %402, %410 : vector<2x32xf32>
    %419 = arith.addf %417, %418 : vector<2x32xf32>
    %420 = math.tanh %419 : vector<2x32xf32>
    %421 = arith.mulf %416, %420 : vector<2x32xf32>
    %422 = tpu.concatenate %421, %363 in 1 : vector<2x32xf32>, vector<2x32xf32> -> vector<2x64xf32>
    %cst_97 = arith.constant dense<0.000000e+00> : vector<2x128xf32>
    %423 = tpu.matmul %422, %32, %cst_97 {dimension_numbers = #tpu.dot_dimension_numbers<[1], [0], [0], [1], [0, 0, 1, 1], [], []>} : vector<2x64xf32>, vector<64x128xf32>, vector<2x128xf32> -> vector<2x128xf32>
    %424 = vector.broadcast %36 : vector<1x128xf32> to vector<2x128xf32>
    %425 = arith.addf %423, %424 : vector<2x128xf32>
    %426 = vector.extract_strided_slice %425 {offsets = [0, 0], sizes = [2, 32], strides = [1, 1]} : vector<2x128xf32> to vector<2x32xf32>
    %427 = arith.negf %426 : vector<2x32xf32>
    %428 = math.exp %427 : vector<2x32xf32>
    %cst_98 = arith.constant 1.000000e+00 : f32
    %429 = vector.broadcast %cst_98 : f32 to vector<2x32xf32>
    %430 = arith.addf %429, %428 : vector<2x32xf32>
    %431 = arith.divf %429, %430 : vector<2x32xf32>
    %432 = vector.extract_strided_slice %425 {offsets = [0, 32], sizes = [2, 32], strides = [1, 1]} : vector<2x128xf32> to vector<2x32xf32>
    %433 = arith.negf %432 : vector<2x32xf32>
    %434 = math.exp %433 : vector<2x32xf32>
    %cst_99 = arith.constant 1.000000e+00 : f32
    %435 = vector.broadcast %cst_99 : f32 to vector<2x32xf32>
    %436 = arith.addf %435, %434 : vector<2x32xf32>
    %437 = arith.divf %435, %436 : vector<2x32xf32>
    %438 = vector.extract_strided_slice %425 {offsets = [0, 64], sizes = [2, 32], strides = [1, 1]} : vector<2x128xf32> to vector<2x32xf32>
    %439 = math.tanh %438 : vector<2x32xf32>
    %440 = vector.extract_strided_slice %425 {offsets = [0, 96], sizes = [2, 32], strides = [1, 1]} : vector<2x128xf32> to vector<2x32xf32>
    %441 = arith.negf %440 : vector<2x32xf32>
    %442 = math.exp %441 : vector<2x32xf32>
    %cst_100 = arith.constant 1.000000e+00 : f32
    %443 = vector.broadcast %cst_100 : f32 to vector<2x32xf32>
    %444 = arith.addf %443, %442 : vector<2x32xf32>
    %445 = arith.divf %443, %444 : vector<2x32xf32>
    %446 = arith.mulf %437, %361 : vector<2x32xf32>
    %447 = arith.mulf %431, %439 : vector<2x32xf32>
    %448 = arith.addf %446, %447 : vector<2x32xf32>
    %449 = math.tanh %448 : vector<2x32xf32>
    %450 = arith.mulf %445, %449 : vector<2x32xf32>
    %451 = tpu.concatenate %450, %392 in 1 : vector<2x32xf32>, vector<2x32xf32> -> vector<2x64xf32>
    %cst_101 = arith.constant dense<0.000000e+00> : vector<2x128xf32>
    %452 = tpu.matmul %451, %34, %cst_101 {dimension_numbers = #tpu.dot_dimension_numbers<[1], [0], [0], [1], [0, 0, 1, 1], [], []>} : vector<2x64xf32>, vector<64x128xf32>, vector<2x128xf32> -> vector<2x128xf32>
    %453 = vector.broadcast %38 : vector<1x128xf32> to vector<2x128xf32>
    %454 = arith.addf %452, %453 : vector<2x128xf32>
    %455 = vector.extract_strided_slice %454 {offsets = [0, 0], sizes = [2, 32], strides = [1, 1]} : vector<2x128xf32> to vector<2x32xf32>
    %456 = arith.negf %455 : vector<2x32xf32>
    %457 = math.exp %456 : vector<2x32xf32>
    %cst_102 = arith.constant 1.000000e+00 : f32
    %458 = vector.broadcast %cst_102 : f32 to vector<2x32xf32>
    %459 = arith.addf %458, %457 : vector<2x32xf32>
    %460 = arith.divf %458, %459 : vector<2x32xf32>
    %461 = vector.extract_strided_slice %454 {offsets = [0, 32], sizes = [2, 32], strides = [1, 1]} : vector<2x128xf32> to vector<2x32xf32>
    %462 = arith.negf %461 : vector<2x32xf32>
    %463 = math.exp %462 : vector<2x32xf32>
    %cst_103 = arith.constant 1.000000e+00 : f32
    %464 = vector.broadcast %cst_103 : f32 to vector<2x32xf32>
    %465 = arith.addf %464, %463 : vector<2x32xf32>
    %466 = arith.divf %464, %465 : vector<2x32xf32>
    %467 = vector.extract_strided_slice %454 {offsets = [0, 64], sizes = [2, 32], strides = [1, 1]} : vector<2x128xf32> to vector<2x32xf32>
    %468 = math.tanh %467 : vector<2x32xf32>
    %469 = vector.extract_strided_slice %454 {offsets = [0, 96], sizes = [2, 32], strides = [1, 1]} : vector<2x128xf32> to vector<2x32xf32>
    %470 = arith.negf %469 : vector<2x32xf32>
    %471 = math.exp %470 : vector<2x32xf32>
    %cst_104 = arith.constant 1.000000e+00 : f32
    %472 = vector.broadcast %cst_104 : f32 to vector<2x32xf32>
    %473 = arith.addf %472, %471 : vector<2x32xf32>
    %474 = arith.divf %472, %473 : vector<2x32xf32>
    %475 = arith.mulf %466, %390 : vector<2x32xf32>
    %476 = arith.mulf %460, %468 : vector<2x32xf32>
    %477 = arith.addf %475, %476 : vector<2x32xf32>
    %478 = math.tanh %477 : vector<2x32xf32>
    %479 = arith.mulf %474, %478 : vector<2x32xf32>
    %480 = vector.extract_strided_slice %14 {offsets = [0, 5, 0], sizes = [2, 1, 128], strides = [1, 1, 1]} : vector<2x12x128xf32> to vector<2x1x128xf32>
    %481 = vector.shape_cast %480 : vector<2x1x128xf32> to vector<2x128xf32>
    %cst_105 = arith.constant dense<0.000000e+00> : vector<2x128xf32>
    %482 = tpu.matmul %421, %30, %cst_105 {dimension_numbers = #tpu.dot_dimension_numbers<[1], [0], [0], [1], [0, 0, 1, 1], [], []>} : vector<2x32xf32>, vector<32x128xf32>, vector<2x128xf32> -> vector<2x128xf32>
    %483 = arith.addf %481, %482 : vector<2x128xf32>
    %484 = vector.extract_strided_slice %483 {offsets = [0, 0], sizes = [2, 32], strides = [1, 1]} : vector<2x128xf32> to vector<2x32xf32>
    %485 = arith.negf %484 : vector<2x32xf32>
    %486 = math.exp %485 : vector<2x32xf32>
    %cst_106 = arith.constant 1.000000e+00 : f32
    %487 = vector.broadcast %cst_106 : f32 to vector<2x32xf32>
    %488 = arith.addf %487, %486 : vector<2x32xf32>
    %489 = arith.divf %487, %488 : vector<2x32xf32>
    %490 = vector.extract_strided_slice %483 {offsets = [0, 32], sizes = [2, 32], strides = [1, 1]} : vector<2x128xf32> to vector<2x32xf32>
    %491 = arith.negf %490 : vector<2x32xf32>
    %492 = math.exp %491 : vector<2x32xf32>
    %cst_107 = arith.constant 1.000000e+00 : f32
    %493 = vector.broadcast %cst_107 : f32 to vector<2x32xf32>
    %494 = arith.addf %493, %492 : vector<2x32xf32>
    %495 = arith.divf %493, %494 : vector<2x32xf32>
    %496 = vector.extract_strided_slice %483 {offsets = [0, 64], sizes = [2, 32], strides = [1, 1]} : vector<2x128xf32> to vector<2x32xf32>
    %497 = math.tanh %496 : vector<2x32xf32>
    %498 = vector.extract_strided_slice %483 {offsets = [0, 96], sizes = [2, 32], strides = [1, 1]} : vector<2x128xf32> to vector<2x32xf32>
    %499 = arith.negf %498 : vector<2x32xf32>
    %500 = math.exp %499 : vector<2x32xf32>
    %cst_108 = arith.constant 1.000000e+00 : f32
    %501 = vector.broadcast %cst_108 : f32 to vector<2x32xf32>
    %502 = arith.addf %501, %500 : vector<2x32xf32>
    %503 = arith.divf %501, %502 : vector<2x32xf32>
    %504 = arith.mulf %495, %419 : vector<2x32xf32>
    %505 = arith.mulf %489, %497 : vector<2x32xf32>
    %506 = arith.addf %504, %505 : vector<2x32xf32>
    %507 = math.tanh %506 : vector<2x32xf32>
    %508 = arith.mulf %503, %507 : vector<2x32xf32>
    %509 = tpu.concatenate %508, %450 in 1 : vector<2x32xf32>, vector<2x32xf32> -> vector<2x64xf32>
    %cst_109 = arith.constant dense<0.000000e+00> : vector<2x128xf32>
    %510 = tpu.matmul %509, %32, %cst_109 {dimension_numbers = #tpu.dot_dimension_numbers<[1], [0], [0], [1], [0, 0, 1, 1], [], []>} : vector<2x64xf32>, vector<64x128xf32>, vector<2x128xf32> -> vector<2x128xf32>
    %511 = vector.broadcast %36 : vector<1x128xf32> to vector<2x128xf32>
    %512 = arith.addf %510, %511 : vector<2x128xf32>
    %513 = vector.extract_strided_slice %512 {offsets = [0, 0], sizes = [2, 32], strides = [1, 1]} : vector<2x128xf32> to vector<2x32xf32>
    %514 = arith.negf %513 : vector<2x32xf32>
    %515 = math.exp %514 : vector<2x32xf32>
    %cst_110 = arith.constant 1.000000e+00 : f32
    %516 = vector.broadcast %cst_110 : f32 to vector<2x32xf32>
    %517 = arith.addf %516, %515 : vector<2x32xf32>
    %518 = arith.divf %516, %517 : vector<2x32xf32>
    %519 = vector.extract_strided_slice %512 {offsets = [0, 32], sizes = [2, 32], strides = [1, 1]} : vector<2x128xf32> to vector<2x32xf32>
    %520 = arith.negf %519 : vector<2x32xf32>
    %521 = math.exp %520 : vector<2x32xf32>
    %cst_111 = arith.constant 1.000000e+00 : f32
    %522 = vector.broadcast %cst_111 : f32 to vector<2x32xf32>
    %523 = arith.addf %522, %521 : vector<2x32xf32>
    %524 = arith.divf %522, %523 : vector<2x32xf32>
    %525 = vector.extract_strided_slice %512 {offsets = [0, 64], sizes = [2, 32], strides = [1, 1]} : vector<2x128xf32> to vector<2x32xf32>
    %526 = math.tanh %525 : vector<2x32xf32>
    %527 = vector.extract_strided_slice %512 {offsets = [0, 96], sizes = [2, 32], strides = [1, 1]} : vector<2x128xf32> to vector<2x32xf32>
    %528 = arith.negf %527 : vector<2x32xf32>
    %529 = math.exp %528 : vector<2x32xf32>
    %cst_112 = arith.constant 1.000000e+00 : f32
    %530 = vector.broadcast %cst_112 : f32 to vector<2x32xf32>
    %531 = arith.addf %530, %529 : vector<2x32xf32>
    %532 = arith.divf %530, %531 : vector<2x32xf32>
    %533 = arith.mulf %524, %448 : vector<2x32xf32>
    %534 = arith.mulf %518, %526 : vector<2x32xf32>
    %535 = arith.addf %533, %534 : vector<2x32xf32>
    %536 = math.tanh %535 : vector<2x32xf32>
    %537 = arith.mulf %532, %536 : vector<2x32xf32>
    %538 = tpu.concatenate %537, %479 in 1 : vector<2x32xf32>, vector<2x32xf32> -> vector<2x64xf32>
    %cst_113 = arith.constant dense<0.000000e+00> : vector<2x128xf32>
    %539 = tpu.matmul %538, %34, %cst_113 {dimension_numbers = #tpu.dot_dimension_numbers<[1], [0], [0], [1], [0, 0, 1, 1], [], []>} : vector<2x64xf32>, vector<64x128xf32>, vector<2x128xf32> -> vector<2x128xf32>
    %540 = vector.broadcast %38 : vector<1x128xf32> to vector<2x128xf32>
    %541 = arith.addf %539, %540 : vector<2x128xf32>
    %542 = vector.extract_strided_slice %541 {offsets = [0, 0], sizes = [2, 32], strides = [1, 1]} : vector<2x128xf32> to vector<2x32xf32>
    %543 = arith.negf %542 : vector<2x32xf32>
    %544 = math.exp %543 : vector<2x32xf32>
    %cst_114 = arith.constant 1.000000e+00 : f32
    %545 = vector.broadcast %cst_114 : f32 to vector<2x32xf32>
    %546 = arith.addf %545, %544 : vector<2x32xf32>
    %547 = arith.divf %545, %546 : vector<2x32xf32>
    %548 = vector.extract_strided_slice %541 {offsets = [0, 32], sizes = [2, 32], strides = [1, 1]} : vector<2x128xf32> to vector<2x32xf32>
    %549 = arith.negf %548 : vector<2x32xf32>
    %550 = math.exp %549 : vector<2x32xf32>
    %cst_115 = arith.constant 1.000000e+00 : f32
    %551 = vector.broadcast %cst_115 : f32 to vector<2x32xf32>
    %552 = arith.addf %551, %550 : vector<2x32xf32>
    %553 = arith.divf %551, %552 : vector<2x32xf32>
    %554 = vector.extract_strided_slice %541 {offsets = [0, 64], sizes = [2, 32], strides = [1, 1]} : vector<2x128xf32> to vector<2x32xf32>
    %555 = math.tanh %554 : vector<2x32xf32>
    %556 = vector.extract_strided_slice %541 {offsets = [0, 96], sizes = [2, 32], strides = [1, 1]} : vector<2x128xf32> to vector<2x32xf32>
    %557 = arith.negf %556 : vector<2x32xf32>
    %558 = math.exp %557 : vector<2x32xf32>
    %cst_116 = arith.constant 1.000000e+00 : f32
    %559 = vector.broadcast %cst_116 : f32 to vector<2x32xf32>
    %560 = arith.addf %559, %558 : vector<2x32xf32>
    %561 = arith.divf %559, %560 : vector<2x32xf32>
    %562 = arith.mulf %553, %477 : vector<2x32xf32>
    %563 = arith.mulf %547, %555 : vector<2x32xf32>
    %564 = arith.addf %562, %563 : vector<2x32xf32>
    %565 = math.tanh %564 : vector<2x32xf32>
    %566 = arith.mulf %561, %565 : vector<2x32xf32>
    %567 = vector.extract_strided_slice %14 {offsets = [0, 6, 0], sizes = [2, 1, 128], strides = [1, 1, 1]} : vector<2x12x128xf32> to vector<2x1x128xf32>
    %568 = vector.shape_cast %567 : vector<2x1x128xf32> to vector<2x128xf32>
    %cst_117 = arith.constant dense<0.000000e+00> : vector<2x128xf32>
    %569 = tpu.matmul %508, %30, %cst_117 {dimension_numbers = #tpu.dot_dimension_numbers<[1], [0], [0], [1], [0, 0, 1, 1], [], []>} : vector<2x32xf32>, vector<32x128xf32>, vector<2x128xf32> -> vector<2x128xf32>
    %570 = arith.addf %568, %569 : vector<2x128xf32>
    %571 = vector.extract_strided_slice %570 {offsets = [0, 0], sizes = [2, 32], strides = [1, 1]} : vector<2x128xf32> to vector<2x32xf32>
    %572 = arith.negf %571 : vector<2x32xf32>
    %573 = math.exp %572 : vector<2x32xf32>
    %cst_118 = arith.constant 1.000000e+00 : f32
    %574 = vector.broadcast %cst_118 : f32 to vector<2x32xf32>
    %575 = arith.addf %574, %573 : vector<2x32xf32>
    %576 = arith.divf %574, %575 : vector<2x32xf32>
    %577 = vector.extract_strided_slice %570 {offsets = [0, 32], sizes = [2, 32], strides = [1, 1]} : vector<2x128xf32> to vector<2x32xf32>
    %578 = arith.negf %577 : vector<2x32xf32>
    %579 = math.exp %578 : vector<2x32xf32>
    %cst_119 = arith.constant 1.000000e+00 : f32
    %580 = vector.broadcast %cst_119 : f32 to vector<2x32xf32>
    %581 = arith.addf %580, %579 : vector<2x32xf32>
    %582 = arith.divf %580, %581 : vector<2x32xf32>
    %583 = vector.extract_strided_slice %570 {offsets = [0, 64], sizes = [2, 32], strides = [1, 1]} : vector<2x128xf32> to vector<2x32xf32>
    %584 = math.tanh %583 : vector<2x32xf32>
    %585 = vector.extract_strided_slice %570 {offsets = [0, 96], sizes = [2, 32], strides = [1, 1]} : vector<2x128xf32> to vector<2x32xf32>
    %586 = arith.negf %585 : vector<2x32xf32>
    %587 = math.exp %586 : vector<2x32xf32>
    %cst_120 = arith.constant 1.000000e+00 : f32
    %588 = vector.broadcast %cst_120 : f32 to vector<2x32xf32>
    %589 = arith.addf %588, %587 : vector<2x32xf32>
    %590 = arith.divf %588, %589 : vector<2x32xf32>
    %591 = arith.mulf %582, %506 : vector<2x32xf32>
    %592 = arith.mulf %576, %584 : vector<2x32xf32>
    %593 = arith.addf %591, %592 : vector<2x32xf32>
    %594 = math.tanh %593 : vector<2x32xf32>
    %595 = arith.mulf %590, %594 : vector<2x32xf32>
    %596 = tpu.concatenate %595, %537 in 1 : vector<2x32xf32>, vector<2x32xf32> -> vector<2x64xf32>
    %cst_121 = arith.constant dense<0.000000e+00> : vector<2x128xf32>
    %597 = tpu.matmul %596, %32, %cst_121 {dimension_numbers = #tpu.dot_dimension_numbers<[1], [0], [0], [1], [0, 0, 1, 1], [], []>} : vector<2x64xf32>, vector<64x128xf32>, vector<2x128xf32> -> vector<2x128xf32>
    %598 = vector.broadcast %36 : vector<1x128xf32> to vector<2x128xf32>
    %599 = arith.addf %597, %598 : vector<2x128xf32>
    %600 = vector.extract_strided_slice %599 {offsets = [0, 0], sizes = [2, 32], strides = [1, 1]} : vector<2x128xf32> to vector<2x32xf32>
    %601 = arith.negf %600 : vector<2x32xf32>
    %602 = math.exp %601 : vector<2x32xf32>
    %cst_122 = arith.constant 1.000000e+00 : f32
    %603 = vector.broadcast %cst_122 : f32 to vector<2x32xf32>
    %604 = arith.addf %603, %602 : vector<2x32xf32>
    %605 = arith.divf %603, %604 : vector<2x32xf32>
    %606 = vector.extract_strided_slice %599 {offsets = [0, 32], sizes = [2, 32], strides = [1, 1]} : vector<2x128xf32> to vector<2x32xf32>
    %607 = arith.negf %606 : vector<2x32xf32>
    %608 = math.exp %607 : vector<2x32xf32>
    %cst_123 = arith.constant 1.000000e+00 : f32
    %609 = vector.broadcast %cst_123 : f32 to vector<2x32xf32>
    %610 = arith.addf %609, %608 : vector<2x32xf32>
    %611 = arith.divf %609, %610 : vector<2x32xf32>
    %612 = vector.extract_strided_slice %599 {offsets = [0, 64], sizes = [2, 32], strides = [1, 1]} : vector<2x128xf32> to vector<2x32xf32>
    %613 = math.tanh %612 : vector<2x32xf32>
    %614 = vector.extract_strided_slice %599 {offsets = [0, 96], sizes = [2, 32], strides = [1, 1]} : vector<2x128xf32> to vector<2x32xf32>
    %615 = arith.negf %614 : vector<2x32xf32>
    %616 = math.exp %615 : vector<2x32xf32>
    %cst_124 = arith.constant 1.000000e+00 : f32
    %617 = vector.broadcast %cst_124 : f32 to vector<2x32xf32>
    %618 = arith.addf %617, %616 : vector<2x32xf32>
    %619 = arith.divf %617, %618 : vector<2x32xf32>
    %620 = arith.mulf %611, %535 : vector<2x32xf32>
    %621 = arith.mulf %605, %613 : vector<2x32xf32>
    %622 = arith.addf %620, %621 : vector<2x32xf32>
    %623 = math.tanh %622 : vector<2x32xf32>
    %624 = arith.mulf %619, %623 : vector<2x32xf32>
    %625 = tpu.concatenate %624, %566 in 1 : vector<2x32xf32>, vector<2x32xf32> -> vector<2x64xf32>
    %cst_125 = arith.constant dense<0.000000e+00> : vector<2x128xf32>
    %626 = tpu.matmul %625, %34, %cst_125 {dimension_numbers = #tpu.dot_dimension_numbers<[1], [0], [0], [1], [0, 0, 1, 1], [], []>} : vector<2x64xf32>, vector<64x128xf32>, vector<2x128xf32> -> vector<2x128xf32>
    %627 = vector.broadcast %38 : vector<1x128xf32> to vector<2x128xf32>
    %628 = arith.addf %626, %627 : vector<2x128xf32>
    %629 = vector.extract_strided_slice %628 {offsets = [0, 0], sizes = [2, 32], strides = [1, 1]} : vector<2x128xf32> to vector<2x32xf32>
    %630 = arith.negf %629 : vector<2x32xf32>
    %631 = math.exp %630 : vector<2x32xf32>
    %cst_126 = arith.constant 1.000000e+00 : f32
    %632 = vector.broadcast %cst_126 : f32 to vector<2x32xf32>
    %633 = arith.addf %632, %631 : vector<2x32xf32>
    %634 = arith.divf %632, %633 : vector<2x32xf32>
    %635 = vector.extract_strided_slice %628 {offsets = [0, 32], sizes = [2, 32], strides = [1, 1]} : vector<2x128xf32> to vector<2x32xf32>
    %636 = arith.negf %635 : vector<2x32xf32>
    %637 = math.exp %636 : vector<2x32xf32>
    %cst_127 = arith.constant 1.000000e+00 : f32
    %638 = vector.broadcast %cst_127 : f32 to vector<2x32xf32>
    %639 = arith.addf %638, %637 : vector<2x32xf32>
    %640 = arith.divf %638, %639 : vector<2x32xf32>
    %641 = vector.extract_strided_slice %628 {offsets = [0, 64], sizes = [2, 32], strides = [1, 1]} : vector<2x128xf32> to vector<2x32xf32>
    %642 = math.tanh %641 : vector<2x32xf32>
    %643 = vector.extract_strided_slice %628 {offsets = [0, 96], sizes = [2, 32], strides = [1, 1]} : vector<2x128xf32> to vector<2x32xf32>
    %644 = arith.negf %643 : vector<2x32xf32>
    %645 = math.exp %644 : vector<2x32xf32>
    %cst_128 = arith.constant 1.000000e+00 : f32
    %646 = vector.broadcast %cst_128 : f32 to vector<2x32xf32>
    %647 = arith.addf %646, %645 : vector<2x32xf32>
    %648 = arith.divf %646, %647 : vector<2x32xf32>
    %649 = arith.mulf %640, %564 : vector<2x32xf32>
    %650 = arith.mulf %634, %642 : vector<2x32xf32>
    %651 = arith.addf %649, %650 : vector<2x32xf32>
    %652 = math.tanh %651 : vector<2x32xf32>
    %653 = arith.mulf %648, %652 : vector<2x32xf32>
    %654 = vector.extract_strided_slice %14 {offsets = [0, 7, 0], sizes = [2, 1, 128], strides = [1, 1, 1]} : vector<2x12x128xf32> to vector<2x1x128xf32>
    %655 = vector.shape_cast %654 : vector<2x1x128xf32> to vector<2x128xf32>
    %cst_129 = arith.constant dense<0.000000e+00> : vector<2x128xf32>
    %656 = tpu.matmul %595, %30, %cst_129 {dimension_numbers = #tpu.dot_dimension_numbers<[1], [0], [0], [1], [0, 0, 1, 1], [], []>} : vector<2x32xf32>, vector<32x128xf32>, vector<2x128xf32> -> vector<2x128xf32>
    %657 = arith.addf %655, %656 : vector<2x128xf32>
    %658 = vector.extract_strided_slice %657 {offsets = [0, 0], sizes = [2, 32], strides = [1, 1]} : vector<2x128xf32> to vector<2x32xf32>
    %659 = arith.negf %658 : vector<2x32xf32>
    %660 = math.exp %659 : vector<2x32xf32>
    %cst_130 = arith.constant 1.000000e+00 : f32
    %661 = vector.broadcast %cst_130 : f32 to vector<2x32xf32>
    %662 = arith.addf %661, %660 : vector<2x32xf32>
    %663 = arith.divf %661, %662 : vector<2x32xf32>
    %664 = vector.extract_strided_slice %657 {offsets = [0, 32], sizes = [2, 32], strides = [1, 1]} : vector<2x128xf32> to vector<2x32xf32>
    %665 = arith.negf %664 : vector<2x32xf32>
    %666 = math.exp %665 : vector<2x32xf32>
    %cst_131 = arith.constant 1.000000e+00 : f32
    %667 = vector.broadcast %cst_131 : f32 to vector<2x32xf32>
    %668 = arith.addf %667, %666 : vector<2x32xf32>
    %669 = arith.divf %667, %668 : vector<2x32xf32>
    %670 = vector.extract_strided_slice %657 {offsets = [0, 64], sizes = [2, 32], strides = [1, 1]} : vector<2x128xf32> to vector<2x32xf32>
    %671 = math.tanh %670 : vector<2x32xf32>
    %672 = vector.extract_strided_slice %657 {offsets = [0, 96], sizes = [2, 32], strides = [1, 1]} : vector<2x128xf32> to vector<2x32xf32>
    %673 = arith.negf %672 : vector<2x32xf32>
    %674 = math.exp %673 : vector<2x32xf32>
    %cst_132 = arith.constant 1.000000e+00 : f32
    %675 = vector.broadcast %cst_132 : f32 to vector<2x32xf32>
    %676 = arith.addf %675, %674 : vector<2x32xf32>
    %677 = arith.divf %675, %676 : vector<2x32xf32>
    %678 = arith.mulf %669, %593 : vector<2x32xf32>
    %679 = arith.mulf %663, %671 : vector<2x32xf32>
    %680 = arith.addf %678, %679 : vector<2x32xf32>
    %681 = math.tanh %680 : vector<2x32xf32>
    %682 = arith.mulf %677, %681 : vector<2x32xf32>
    %683 = tpu.concatenate %682, %624 in 1 : vector<2x32xf32>, vector<2x32xf32> -> vector<2x64xf32>
    %cst_133 = arith.constant dense<0.000000e+00> : vector<2x128xf32>
    %684 = tpu.matmul %683, %32, %cst_133 {dimension_numbers = #tpu.dot_dimension_numbers<[1], [0], [0], [1], [0, 0, 1, 1], [], []>} : vector<2x64xf32>, vector<64x128xf32>, vector<2x128xf32> -> vector<2x128xf32>
    %685 = vector.broadcast %36 : vector<1x128xf32> to vector<2x128xf32>
    %686 = arith.addf %684, %685 : vector<2x128xf32>
    %687 = vector.extract_strided_slice %686 {offsets = [0, 0], sizes = [2, 32], strides = [1, 1]} : vector<2x128xf32> to vector<2x32xf32>
    %688 = arith.negf %687 : vector<2x32xf32>
    %689 = math.exp %688 : vector<2x32xf32>
    %cst_134 = arith.constant 1.000000e+00 : f32
    %690 = vector.broadcast %cst_134 : f32 to vector<2x32xf32>
    %691 = arith.addf %690, %689 : vector<2x32xf32>
    %692 = arith.divf %690, %691 : vector<2x32xf32>
    %693 = vector.extract_strided_slice %686 {offsets = [0, 32], sizes = [2, 32], strides = [1, 1]} : vector<2x128xf32> to vector<2x32xf32>
    %694 = arith.negf %693 : vector<2x32xf32>
    %695 = math.exp %694 : vector<2x32xf32>
    %cst_135 = arith.constant 1.000000e+00 : f32
    %696 = vector.broadcast %cst_135 : f32 to vector<2x32xf32>
    %697 = arith.addf %696, %695 : vector<2x32xf32>
    %698 = arith.divf %696, %697 : vector<2x32xf32>
    %699 = vector.extract_strided_slice %686 {offsets = [0, 64], sizes = [2, 32], strides = [1, 1]} : vector<2x128xf32> to vector<2x32xf32>
    %700 = math.tanh %699 : vector<2x32xf32>
    %701 = vector.extract_strided_slice %686 {offsets = [0, 96], sizes = [2, 32], strides = [1, 1]} : vector<2x128xf32> to vector<2x32xf32>
    %702 = arith.negf %701 : vector<2x32xf32>
    %703 = math.exp %702 : vector<2x32xf32>
    %cst_136 = arith.constant 1.000000e+00 : f32
    %704 = vector.broadcast %cst_136 : f32 to vector<2x32xf32>
    %705 = arith.addf %704, %703 : vector<2x32xf32>
    %706 = arith.divf %704, %705 : vector<2x32xf32>
    %707 = arith.mulf %698, %622 : vector<2x32xf32>
    %708 = arith.mulf %692, %700 : vector<2x32xf32>
    %709 = arith.addf %707, %708 : vector<2x32xf32>
    %710 = math.tanh %709 : vector<2x32xf32>
    %711 = arith.mulf %706, %710 : vector<2x32xf32>
    %712 = tpu.concatenate %711, %653 in 1 : vector<2x32xf32>, vector<2x32xf32> -> vector<2x64xf32>
    %cst_137 = arith.constant dense<0.000000e+00> : vector<2x128xf32>
    %713 = tpu.matmul %712, %34, %cst_137 {dimension_numbers = #tpu.dot_dimension_numbers<[1], [0], [0], [1], [0, 0, 1, 1], [], []>} : vector<2x64xf32>, vector<64x128xf32>, vector<2x128xf32> -> vector<2x128xf32>
    %714 = vector.broadcast %38 : vector<1x128xf32> to vector<2x128xf32>
    %715 = arith.addf %713, %714 : vector<2x128xf32>
    %716 = vector.extract_strided_slice %715 {offsets = [0, 0], sizes = [2, 32], strides = [1, 1]} : vector<2x128xf32> to vector<2x32xf32>
    %717 = arith.negf %716 : vector<2x32xf32>
    %718 = math.exp %717 : vector<2x32xf32>
    %cst_138 = arith.constant 1.000000e+00 : f32
    %719 = vector.broadcast %cst_138 : f32 to vector<2x32xf32>
    %720 = arith.addf %719, %718 : vector<2x32xf32>
    %721 = arith.divf %719, %720 : vector<2x32xf32>
    %722 = vector.extract_strided_slice %715 {offsets = [0, 32], sizes = [2, 32], strides = [1, 1]} : vector<2x128xf32> to vector<2x32xf32>
    %723 = arith.negf %722 : vector<2x32xf32>
    %724 = math.exp %723 : vector<2x32xf32>
    %cst_139 = arith.constant 1.000000e+00 : f32
    %725 = vector.broadcast %cst_139 : f32 to vector<2x32xf32>
    %726 = arith.addf %725, %724 : vector<2x32xf32>
    %727 = arith.divf %725, %726 : vector<2x32xf32>
    %728 = vector.extract_strided_slice %715 {offsets = [0, 64], sizes = [2, 32], strides = [1, 1]} : vector<2x128xf32> to vector<2x32xf32>
    %729 = math.tanh %728 : vector<2x32xf32>
    %730 = vector.extract_strided_slice %715 {offsets = [0, 96], sizes = [2, 32], strides = [1, 1]} : vector<2x128xf32> to vector<2x32xf32>
    %731 = arith.negf %730 : vector<2x32xf32>
    %732 = math.exp %731 : vector<2x32xf32>
    %cst_140 = arith.constant 1.000000e+00 : f32
    %733 = vector.broadcast %cst_140 : f32 to vector<2x32xf32>
    %734 = arith.addf %733, %732 : vector<2x32xf32>
    %735 = arith.divf %733, %734 : vector<2x32xf32>
    %736 = arith.mulf %727, %651 : vector<2x32xf32>
    %737 = arith.mulf %721, %729 : vector<2x32xf32>
    %738 = arith.addf %736, %737 : vector<2x32xf32>
    %739 = math.tanh %738 : vector<2x32xf32>
    %740 = arith.mulf %735, %739 : vector<2x32xf32>
    %741 = vector.extract_strided_slice %14 {offsets = [0, 8, 0], sizes = [2, 1, 128], strides = [1, 1, 1]} : vector<2x12x128xf32> to vector<2x1x128xf32>
    %742 = vector.shape_cast %741 : vector<2x1x128xf32> to vector<2x128xf32>
    %cst_141 = arith.constant dense<0.000000e+00> : vector<2x128xf32>
    %743 = tpu.matmul %682, %30, %cst_141 {dimension_numbers = #tpu.dot_dimension_numbers<[1], [0], [0], [1], [0, 0, 1, 1], [], []>} : vector<2x32xf32>, vector<32x128xf32>, vector<2x128xf32> -> vector<2x128xf32>
    %744 = arith.addf %742, %743 : vector<2x128xf32>
    %745 = vector.extract_strided_slice %744 {offsets = [0, 0], sizes = [2, 32], strides = [1, 1]} : vector<2x128xf32> to vector<2x32xf32>
    %746 = arith.negf %745 : vector<2x32xf32>
    %747 = math.exp %746 : vector<2x32xf32>
    %cst_142 = arith.constant 1.000000e+00 : f32
    %748 = vector.broadcast %cst_142 : f32 to vector<2x32xf32>
    %749 = arith.addf %748, %747 : vector<2x32xf32>
    %750 = arith.divf %748, %749 : vector<2x32xf32>
    %751 = vector.extract_strided_slice %744 {offsets = [0, 32], sizes = [2, 32], strides = [1, 1]} : vector<2x128xf32> to vector<2x32xf32>
    %752 = arith.negf %751 : vector<2x32xf32>
    %753 = math.exp %752 : vector<2x32xf32>
    %cst_143 = arith.constant 1.000000e+00 : f32
    %754 = vector.broadcast %cst_143 : f32 to vector<2x32xf32>
    %755 = arith.addf %754, %753 : vector<2x32xf32>
    %756 = arith.divf %754, %755 : vector<2x32xf32>
    %757 = vector.extract_strided_slice %744 {offsets = [0, 64], sizes = [2, 32], strides = [1, 1]} : vector<2x128xf32> to vector<2x32xf32>
    %758 = math.tanh %757 : vector<2x32xf32>
    %759 = vector.extract_strided_slice %744 {offsets = [0, 96], sizes = [2, 32], strides = [1, 1]} : vector<2x128xf32> to vector<2x32xf32>
    %760 = arith.negf %759 : vector<2x32xf32>
    %761 = math.exp %760 : vector<2x32xf32>
    %cst_144 = arith.constant 1.000000e+00 : f32
    %762 = vector.broadcast %cst_144 : f32 to vector<2x32xf32>
    %763 = arith.addf %762, %761 : vector<2x32xf32>
    %764 = arith.divf %762, %763 : vector<2x32xf32>
    %765 = arith.mulf %756, %680 : vector<2x32xf32>
    %766 = arith.mulf %750, %758 : vector<2x32xf32>
    %767 = arith.addf %765, %766 : vector<2x32xf32>
    %768 = math.tanh %767 : vector<2x32xf32>
    %769 = arith.mulf %764, %768 : vector<2x32xf32>
    %770 = tpu.concatenate %769, %711 in 1 : vector<2x32xf32>, vector<2x32xf32> -> vector<2x64xf32>
    %cst_145 = arith.constant dense<0.000000e+00> : vector<2x128xf32>
    %771 = tpu.matmul %770, %32, %cst_145 {dimension_numbers = #tpu.dot_dimension_numbers<[1], [0], [0], [1], [0, 0, 1, 1], [], []>} : vector<2x64xf32>, vector<64x128xf32>, vector<2x128xf32> -> vector<2x128xf32>
    %772 = vector.broadcast %36 : vector<1x128xf32> to vector<2x128xf32>
    %773 = arith.addf %771, %772 : vector<2x128xf32>
    %774 = vector.extract_strided_slice %773 {offsets = [0, 0], sizes = [2, 32], strides = [1, 1]} : vector<2x128xf32> to vector<2x32xf32>
    %775 = arith.negf %774 : vector<2x32xf32>
    %776 = math.exp %775 : vector<2x32xf32>
    %cst_146 = arith.constant 1.000000e+00 : f32
    %777 = vector.broadcast %cst_146 : f32 to vector<2x32xf32>
    %778 = arith.addf %777, %776 : vector<2x32xf32>
    %779 = arith.divf %777, %778 : vector<2x32xf32>
    %780 = vector.extract_strided_slice %773 {offsets = [0, 32], sizes = [2, 32], strides = [1, 1]} : vector<2x128xf32> to vector<2x32xf32>
    %781 = arith.negf %780 : vector<2x32xf32>
    %782 = math.exp %781 : vector<2x32xf32>
    %cst_147 = arith.constant 1.000000e+00 : f32
    %783 = vector.broadcast %cst_147 : f32 to vector<2x32xf32>
    %784 = arith.addf %783, %782 : vector<2x32xf32>
    %785 = arith.divf %783, %784 : vector<2x32xf32>
    %786 = vector.extract_strided_slice %773 {offsets = [0, 64], sizes = [2, 32], strides = [1, 1]} : vector<2x128xf32> to vector<2x32xf32>
    %787 = math.tanh %786 : vector<2x32xf32>
    %788 = vector.extract_strided_slice %773 {offsets = [0, 96], sizes = [2, 32], strides = [1, 1]} : vector<2x128xf32> to vector<2x32xf32>
    %789 = arith.negf %788 : vector<2x32xf32>
    %790 = math.exp %789 : vector<2x32xf32>
    %cst_148 = arith.constant 1.000000e+00 : f32
    %791 = vector.broadcast %cst_148 : f32 to vector<2x32xf32>
    %792 = arith.addf %791, %790 : vector<2x32xf32>
    %793 = arith.divf %791, %792 : vector<2x32xf32>
    %794 = arith.mulf %785, %709 : vector<2x32xf32>
    %795 = arith.mulf %779, %787 : vector<2x32xf32>
    %796 = arith.addf %794, %795 : vector<2x32xf32>
    %797 = math.tanh %796 : vector<2x32xf32>
    %798 = arith.mulf %793, %797 : vector<2x32xf32>
    %799 = tpu.concatenate %798, %740 in 1 : vector<2x32xf32>, vector<2x32xf32> -> vector<2x64xf32>
    %cst_149 = arith.constant dense<0.000000e+00> : vector<2x128xf32>
    %800 = tpu.matmul %799, %34, %cst_149 {dimension_numbers = #tpu.dot_dimension_numbers<[1], [0], [0], [1], [0, 0, 1, 1], [], []>} : vector<2x64xf32>, vector<64x128xf32>, vector<2x128xf32> -> vector<2x128xf32>
    %801 = vector.broadcast %38 : vector<1x128xf32> to vector<2x128xf32>
    %802 = arith.addf %800, %801 : vector<2x128xf32>
    %803 = vector.extract_strided_slice %802 {offsets = [0, 0], sizes = [2, 32], strides = [1, 1]} : vector<2x128xf32> to vector<2x32xf32>
    %804 = arith.negf %803 : vector<2x32xf32>
    %805 = math.exp %804 : vector<2x32xf32>
    %cst_150 = arith.constant 1.000000e+00 : f32
    %806 = vector.broadcast %cst_150 : f32 to vector<2x32xf32>
    %807 = arith.addf %806, %805 : vector<2x32xf32>
    %808 = arith.divf %806, %807 : vector<2x32xf32>
    %809 = vector.extract_strided_slice %802 {offsets = [0, 32], sizes = [2, 32], strides = [1, 1]} : vector<2x128xf32> to vector<2x32xf32>
    %810 = arith.negf %809 : vector<2x32xf32>
    %811 = math.exp %810 : vector<2x32xf32>
    %cst_151 = arith.constant 1.000000e+00 : f32
    %812 = vector.broadcast %cst_151 : f32 to vector<2x32xf32>
    %813 = arith.addf %812, %811 : vector<2x32xf32>
    %814 = arith.divf %812, %813 : vector<2x32xf32>
    %815 = vector.extract_strided_slice %802 {offsets = [0, 64], sizes = [2, 32], strides = [1, 1]} : vector<2x128xf32> to vector<2x32xf32>
    %816 = math.tanh %815 : vector<2x32xf32>
    %817 = vector.extract_strided_slice %802 {offsets = [0, 96], sizes = [2, 32], strides = [1, 1]} : vector<2x128xf32> to vector<2x32xf32>
    %818 = arith.negf %817 : vector<2x32xf32>
    %819 = math.exp %818 : vector<2x32xf32>
    %cst_152 = arith.constant 1.000000e+00 : f32
    %820 = vector.broadcast %cst_152 : f32 to vector<2x32xf32>
    %821 = arith.addf %820, %819 : vector<2x32xf32>
    %822 = arith.divf %820, %821 : vector<2x32xf32>
    %823 = arith.mulf %814, %738 : vector<2x32xf32>
    %824 = arith.mulf %808, %816 : vector<2x32xf32>
    %825 = arith.addf %823, %824 : vector<2x32xf32>
    %826 = math.tanh %825 : vector<2x32xf32>
    %827 = arith.mulf %822, %826 : vector<2x32xf32>
    %828 = vector.extract_strided_slice %14 {offsets = [0, 9, 0], sizes = [2, 1, 128], strides = [1, 1, 1]} : vector<2x12x128xf32> to vector<2x1x128xf32>
    %829 = vector.shape_cast %828 : vector<2x1x128xf32> to vector<2x128xf32>
    %cst_153 = arith.constant dense<0.000000e+00> : vector<2x128xf32>
    %830 = tpu.matmul %769, %30, %cst_153 {dimension_numbers = #tpu.dot_dimension_numbers<[1], [0], [0], [1], [0, 0, 1, 1], [], []>} : vector<2x32xf32>, vector<32x128xf32>, vector<2x128xf32> -> vector<2x128xf32>
    %831 = arith.addf %829, %830 : vector<2x128xf32>
    %832 = vector.extract_strided_slice %831 {offsets = [0, 0], sizes = [2, 32], strides = [1, 1]} : vector<2x128xf32> to vector<2x32xf32>
    %833 = arith.negf %832 : vector<2x32xf32>
    %834 = math.exp %833 : vector<2x32xf32>
    %cst_154 = arith.constant 1.000000e+00 : f32
    %835 = vector.broadcast %cst_154 : f32 to vector<2x32xf32>
    %836 = arith.addf %835, %834 : vector<2x32xf32>
    %837 = arith.divf %835, %836 : vector<2x32xf32>
    %838 = vector.extract_strided_slice %831 {offsets = [0, 32], sizes = [2, 32], strides = [1, 1]} : vector<2x128xf32> to vector<2x32xf32>
    %839 = arith.negf %838 : vector<2x32xf32>
    %840 = math.exp %839 : vector<2x32xf32>
    %cst_155 = arith.constant 1.000000e+00 : f32
    %841 = vector.broadcast %cst_155 : f32 to vector<2x32xf32>
    %842 = arith.addf %841, %840 : vector<2x32xf32>
    %843 = arith.divf %841, %842 : vector<2x32xf32>
    %844 = vector.extract_strided_slice %831 {offsets = [0, 64], sizes = [2, 32], strides = [1, 1]} : vector<2x128xf32> to vector<2x32xf32>
    %845 = math.tanh %844 : vector<2x32xf32>
    %846 = vector.extract_strided_slice %831 {offsets = [0, 96], sizes = [2, 32], strides = [1, 1]} : vector<2x128xf32> to vector<2x32xf32>
    %847 = arith.negf %846 : vector<2x32xf32>
    %848 = math.exp %847 : vector<2x32xf32>
    %cst_156 = arith.constant 1.000000e+00 : f32
    %849 = vector.broadcast %cst_156 : f32 to vector<2x32xf32>
    %850 = arith.addf %849, %848 : vector<2x32xf32>
    %851 = arith.divf %849, %850 : vector<2x32xf32>
    %852 = arith.mulf %843, %767 : vector<2x32xf32>
    %853 = arith.mulf %837, %845 : vector<2x32xf32>
    %854 = arith.addf %852, %853 : vector<2x32xf32>
    %855 = math.tanh %854 : vector<2x32xf32>
    %856 = arith.mulf %851, %855 : vector<2x32xf32>
    %857 = tpu.concatenate %856, %798 in 1 : vector<2x32xf32>, vector<2x32xf32> -> vector<2x64xf32>
    %cst_157 = arith.constant dense<0.000000e+00> : vector<2x128xf32>
    %858 = tpu.matmul %857, %32, %cst_157 {dimension_numbers = #tpu.dot_dimension_numbers<[1], [0], [0], [1], [0, 0, 1, 1], [], []>} : vector<2x64xf32>, vector<64x128xf32>, vector<2x128xf32> -> vector<2x128xf32>
    %859 = vector.broadcast %36 : vector<1x128xf32> to vector<2x128xf32>
    %860 = arith.addf %858, %859 : vector<2x128xf32>
    %861 = vector.extract_strided_slice %860 {offsets = [0, 0], sizes = [2, 32], strides = [1, 1]} : vector<2x128xf32> to vector<2x32xf32>
    %862 = arith.negf %861 : vector<2x32xf32>
    %863 = math.exp %862 : vector<2x32xf32>
    %cst_158 = arith.constant 1.000000e+00 : f32
    %864 = vector.broadcast %cst_158 : f32 to vector<2x32xf32>
    %865 = arith.addf %864, %863 : vector<2x32xf32>
    %866 = arith.divf %864, %865 : vector<2x32xf32>
    %867 = vector.extract_strided_slice %860 {offsets = [0, 32], sizes = [2, 32], strides = [1, 1]} : vector<2x128xf32> to vector<2x32xf32>
    %868 = arith.negf %867 : vector<2x32xf32>
    %869 = math.exp %868 : vector<2x32xf32>
    %cst_159 = arith.constant 1.000000e+00 : f32
    %870 = vector.broadcast %cst_159 : f32 to vector<2x32xf32>
    %871 = arith.addf %870, %869 : vector<2x32xf32>
    %872 = arith.divf %870, %871 : vector<2x32xf32>
    %873 = vector.extract_strided_slice %860 {offsets = [0, 64], sizes = [2, 32], strides = [1, 1]} : vector<2x128xf32> to vector<2x32xf32>
    %874 = math.tanh %873 : vector<2x32xf32>
    %875 = vector.extract_strided_slice %860 {offsets = [0, 96], sizes = [2, 32], strides = [1, 1]} : vector<2x128xf32> to vector<2x32xf32>
    %876 = arith.negf %875 : vector<2x32xf32>
    %877 = math.exp %876 : vector<2x32xf32>
    %cst_160 = arith.constant 1.000000e+00 : f32
    %878 = vector.broadcast %cst_160 : f32 to vector<2x32xf32>
    %879 = arith.addf %878, %877 : vector<2x32xf32>
    %880 = arith.divf %878, %879 : vector<2x32xf32>
    %881 = arith.mulf %872, %796 : vector<2x32xf32>
    %882 = arith.mulf %866, %874 : vector<2x32xf32>
    %883 = arith.addf %881, %882 : vector<2x32xf32>
    %884 = math.tanh %883 : vector<2x32xf32>
    %885 = arith.mulf %880, %884 : vector<2x32xf32>
    %886 = tpu.concatenate %885, %827 in 1 : vector<2x32xf32>, vector<2x32xf32> -> vector<2x64xf32>
    %cst_161 = arith.constant dense<0.000000e+00> : vector<2x128xf32>
    %887 = tpu.matmul %886, %34, %cst_161 {dimension_numbers = #tpu.dot_dimension_numbers<[1], [0], [0], [1], [0, 0, 1, 1], [], []>} : vector<2x64xf32>, vector<64x128xf32>, vector<2x128xf32> -> vector<2x128xf32>
    %888 = vector.broadcast %38 : vector<1x128xf32> to vector<2x128xf32>
    %889 = arith.addf %887, %888 : vector<2x128xf32>
    %890 = vector.extract_strided_slice %889 {offsets = [0, 0], sizes = [2, 32], strides = [1, 1]} : vector<2x128xf32> to vector<2x32xf32>
    %891 = arith.negf %890 : vector<2x32xf32>
    %892 = math.exp %891 : vector<2x32xf32>
    %cst_162 = arith.constant 1.000000e+00 : f32
    %893 = vector.broadcast %cst_162 : f32 to vector<2x32xf32>
    %894 = arith.addf %893, %892 : vector<2x32xf32>
    %895 = arith.divf %893, %894 : vector<2x32xf32>
    %896 = vector.extract_strided_slice %889 {offsets = [0, 32], sizes = [2, 32], strides = [1, 1]} : vector<2x128xf32> to vector<2x32xf32>
    %897 = arith.negf %896 : vector<2x32xf32>
    %898 = math.exp %897 : vector<2x32xf32>
    %cst_163 = arith.constant 1.000000e+00 : f32
    %899 = vector.broadcast %cst_163 : f32 to vector<2x32xf32>
    %900 = arith.addf %899, %898 : vector<2x32xf32>
    %901 = arith.divf %899, %900 : vector<2x32xf32>
    %902 = vector.extract_strided_slice %889 {offsets = [0, 64], sizes = [2, 32], strides = [1, 1]} : vector<2x128xf32> to vector<2x32xf32>
    %903 = math.tanh %902 : vector<2x32xf32>
    %904 = vector.extract_strided_slice %889 {offsets = [0, 96], sizes = [2, 32], strides = [1, 1]} : vector<2x128xf32> to vector<2x32xf32>
    %905 = arith.negf %904 : vector<2x32xf32>
    %906 = math.exp %905 : vector<2x32xf32>
    %cst_164 = arith.constant 1.000000e+00 : f32
    %907 = vector.broadcast %cst_164 : f32 to vector<2x32xf32>
    %908 = arith.addf %907, %906 : vector<2x32xf32>
    %909 = arith.divf %907, %908 : vector<2x32xf32>
    %910 = arith.mulf %901, %825 : vector<2x32xf32>
    %911 = arith.mulf %895, %903 : vector<2x32xf32>
    %912 = arith.addf %910, %911 : vector<2x32xf32>
    %913 = math.tanh %912 : vector<2x32xf32>
    %914 = arith.mulf %909, %913 : vector<2x32xf32>
    %915 = vector.extract_strided_slice %14 {offsets = [0, 10, 0], sizes = [2, 1, 128], strides = [1, 1, 1]} : vector<2x12x128xf32> to vector<2x1x128xf32>
    %916 = vector.shape_cast %915 : vector<2x1x128xf32> to vector<2x128xf32>
    %cst_165 = arith.constant dense<0.000000e+00> : vector<2x128xf32>
    %917 = tpu.matmul %856, %30, %cst_165 {dimension_numbers = #tpu.dot_dimension_numbers<[1], [0], [0], [1], [0, 0, 1, 1], [], []>} : vector<2x32xf32>, vector<32x128xf32>, vector<2x128xf32> -> vector<2x128xf32>
    %918 = arith.addf %916, %917 : vector<2x128xf32>
    %919 = vector.extract_strided_slice %918 {offsets = [0, 0], sizes = [2, 32], strides = [1, 1]} : vector<2x128xf32> to vector<2x32xf32>
    %920 = arith.negf %919 : vector<2x32xf32>
    %921 = math.exp %920 : vector<2x32xf32>
    %cst_166 = arith.constant 1.000000e+00 : f32
    %922 = vector.broadcast %cst_166 : f32 to vector<2x32xf32>
    %923 = arith.addf %922, %921 : vector<2x32xf32>
    %924 = arith.divf %922, %923 : vector<2x32xf32>
    %925 = vector.extract_strided_slice %918 {offsets = [0, 32], sizes = [2, 32], strides = [1, 1]} : vector<2x128xf32> to vector<2x32xf32>
    %926 = arith.negf %925 : vector<2x32xf32>
    %927 = math.exp %926 : vector<2x32xf32>
    %cst_167 = arith.constant 1.000000e+00 : f32
    %928 = vector.broadcast %cst_167 : f32 to vector<2x32xf32>
    %929 = arith.addf %928, %927 : vector<2x32xf32>
    %930 = arith.divf %928, %929 : vector<2x32xf32>
    %931 = vector.extract_strided_slice %918 {offsets = [0, 64], sizes = [2, 32], strides = [1, 1]} : vector<2x128xf32> to vector<2x32xf32>
    %932 = math.tanh %931 : vector<2x32xf32>
    %933 = vector.extract_strided_slice %918 {offsets = [0, 96], sizes = [2, 32], strides = [1, 1]} : vector<2x128xf32> to vector<2x32xf32>
    %934 = arith.negf %933 : vector<2x32xf32>
    %935 = math.exp %934 : vector<2x32xf32>
    %cst_168 = arith.constant 1.000000e+00 : f32
    %936 = vector.broadcast %cst_168 : f32 to vector<2x32xf32>
    %937 = arith.addf %936, %935 : vector<2x32xf32>
    %938 = arith.divf %936, %937 : vector<2x32xf32>
    %939 = arith.mulf %930, %854 : vector<2x32xf32>
    %940 = arith.mulf %924, %932 : vector<2x32xf32>
    %941 = arith.addf %939, %940 : vector<2x32xf32>
    %942 = math.tanh %941 : vector<2x32xf32>
    %943 = arith.mulf %938, %942 : vector<2x32xf32>
    %944 = tpu.concatenate %943, %885 in 1 : vector<2x32xf32>, vector<2x32xf32> -> vector<2x64xf32>
    %cst_169 = arith.constant dense<0.000000e+00> : vector<2x128xf32>
    %945 = tpu.matmul %944, %32, %cst_169 {dimension_numbers = #tpu.dot_dimension_numbers<[1], [0], [0], [1], [0, 0, 1, 1], [], []>} : vector<2x64xf32>, vector<64x128xf32>, vector<2x128xf32> -> vector<2x128xf32>
    %946 = vector.broadcast %36 : vector<1x128xf32> to vector<2x128xf32>
    %947 = arith.addf %945, %946 : vector<2x128xf32>
    %948 = vector.extract_strided_slice %947 {offsets = [0, 0], sizes = [2, 32], strides = [1, 1]} : vector<2x128xf32> to vector<2x32xf32>
    %949 = arith.negf %948 : vector<2x32xf32>
    %950 = math.exp %949 : vector<2x32xf32>
    %cst_170 = arith.constant 1.000000e+00 : f32
    %951 = vector.broadcast %cst_170 : f32 to vector<2x32xf32>
    %952 = arith.addf %951, %950 : vector<2x32xf32>
    %953 = arith.divf %951, %952 : vector<2x32xf32>
    %954 = vector.extract_strided_slice %947 {offsets = [0, 32], sizes = [2, 32], strides = [1, 1]} : vector<2x128xf32> to vector<2x32xf32>
    %955 = arith.negf %954 : vector<2x32xf32>
    %956 = math.exp %955 : vector<2x32xf32>
    %cst_171 = arith.constant 1.000000e+00 : f32
    %957 = vector.broadcast %cst_171 : f32 to vector<2x32xf32>
    %958 = arith.addf %957, %956 : vector<2x32xf32>
    %959 = arith.divf %957, %958 : vector<2x32xf32>
    %960 = vector.extract_strided_slice %947 {offsets = [0, 64], sizes = [2, 32], strides = [1, 1]} : vector<2x128xf32> to vector<2x32xf32>
    %961 = math.tanh %960 : vector<2x32xf32>
    %962 = vector.extract_strided_slice %947 {offsets = [0, 96], sizes = [2, 32], strides = [1, 1]} : vector<2x128xf32> to vector<2x32xf32>
    %963 = arith.negf %962 : vector<2x32xf32>
    %964 = math.exp %963 : vector<2x32xf32>
    %cst_172 = arith.constant 1.000000e+00 : f32
    %965 = vector.broadcast %cst_172 : f32 to vector<2x32xf32>
    %966 = arith.addf %965, %964 : vector<2x32xf32>
    %967 = arith.divf %965, %966 : vector<2x32xf32>
    %968 = arith.mulf %959, %883 : vector<2x32xf32>
    %969 = arith.mulf %953, %961 : vector<2x32xf32>
    %970 = arith.addf %968, %969 : vector<2x32xf32>
    %971 = math.tanh %970 : vector<2x32xf32>
    %972 = arith.mulf %967, %971 : vector<2x32xf32>
    %973 = tpu.concatenate %972, %914 in 1 : vector<2x32xf32>, vector<2x32xf32> -> vector<2x64xf32>
    %cst_173 = arith.constant dense<0.000000e+00> : vector<2x128xf32>
    %974 = tpu.matmul %973, %34, %cst_173 {dimension_numbers = #tpu.dot_dimension_numbers<[1], [0], [0], [1], [0, 0, 1, 1], [], []>} : vector<2x64xf32>, vector<64x128xf32>, vector<2x128xf32> -> vector<2x128xf32>
    %975 = vector.broadcast %38 : vector<1x128xf32> to vector<2x128xf32>
    %976 = arith.addf %974, %975 : vector<2x128xf32>
    %977 = vector.extract_strided_slice %976 {offsets = [0, 0], sizes = [2, 32], strides = [1, 1]} : vector<2x128xf32> to vector<2x32xf32>
    %978 = arith.negf %977 : vector<2x32xf32>
    %979 = math.exp %978 : vector<2x32xf32>
    %cst_174 = arith.constant 1.000000e+00 : f32
    %980 = vector.broadcast %cst_174 : f32 to vector<2x32xf32>
    %981 = arith.addf %980, %979 : vector<2x32xf32>
    %982 = arith.divf %980, %981 : vector<2x32xf32>
    %983 = vector.extract_strided_slice %976 {offsets = [0, 32], sizes = [2, 32], strides = [1, 1]} : vector<2x128xf32> to vector<2x32xf32>
    %984 = arith.negf %983 : vector<2x32xf32>
    %985 = math.exp %984 : vector<2x32xf32>
    %cst_175 = arith.constant 1.000000e+00 : f32
    %986 = vector.broadcast %cst_175 : f32 to vector<2x32xf32>
    %987 = arith.addf %986, %985 : vector<2x32xf32>
    %988 = arith.divf %986, %987 : vector<2x32xf32>
    %989 = vector.extract_strided_slice %976 {offsets = [0, 64], sizes = [2, 32], strides = [1, 1]} : vector<2x128xf32> to vector<2x32xf32>
    %990 = math.tanh %989 : vector<2x32xf32>
    %991 = vector.extract_strided_slice %976 {offsets = [0, 96], sizes = [2, 32], strides = [1, 1]} : vector<2x128xf32> to vector<2x32xf32>
    %992 = arith.negf %991 : vector<2x32xf32>
    %993 = math.exp %992 : vector<2x32xf32>
    %cst_176 = arith.constant 1.000000e+00 : f32
    %994 = vector.broadcast %cst_176 : f32 to vector<2x32xf32>
    %995 = arith.addf %994, %993 : vector<2x32xf32>
    %996 = arith.divf %994, %995 : vector<2x32xf32>
    %997 = arith.mulf %988, %912 : vector<2x32xf32>
    %998 = arith.mulf %982, %990 : vector<2x32xf32>
    %999 = arith.addf %997, %998 : vector<2x32xf32>
    %1000 = math.tanh %999 : vector<2x32xf32>
    %1001 = arith.mulf %996, %1000 : vector<2x32xf32>
    %1002 = vector.extract_strided_slice %14 {offsets = [0, 11, 0], sizes = [2, 1, 128], strides = [1, 1, 1]} : vector<2x12x128xf32> to vector<2x1x128xf32>
    %1003 = vector.shape_cast %1002 : vector<2x1x128xf32> to vector<2x128xf32>
    %cst_177 = arith.constant dense<0.000000e+00> : vector<2x128xf32>
    %1004 = tpu.matmul %943, %30, %cst_177 {dimension_numbers = #tpu.dot_dimension_numbers<[1], [0], [0], [1], [0, 0, 1, 1], [], []>} : vector<2x32xf32>, vector<32x128xf32>, vector<2x128xf32> -> vector<2x128xf32>
    %1005 = arith.addf %1003, %1004 : vector<2x128xf32>
    %1006 = vector.extract_strided_slice %1005 {offsets = [0, 0], sizes = [2, 32], strides = [1, 1]} : vector<2x128xf32> to vector<2x32xf32>
    %1007 = arith.negf %1006 : vector<2x32xf32>
    %1008 = math.exp %1007 : vector<2x32xf32>
    %cst_178 = arith.constant 1.000000e+00 : f32
    %1009 = vector.broadcast %cst_178 : f32 to vector<2x32xf32>
    %1010 = arith.addf %1009, %1008 : vector<2x32xf32>
    %1011 = arith.divf %1009, %1010 : vector<2x32xf32>
    %1012 = vector.extract_strided_slice %1005 {offsets = [0, 32], sizes = [2, 32], strides = [1, 1]} : vector<2x128xf32> to vector<2x32xf32>
    %1013 = arith.negf %1012 : vector<2x32xf32>
    %1014 = math.exp %1013 : vector<2x32xf32>
    %cst_179 = arith.constant 1.000000e+00 : f32
    %1015 = vector.broadcast %cst_179 : f32 to vector<2x32xf32>
    %1016 = arith.addf %1015, %1014 : vector<2x32xf32>
    %1017 = arith.divf %1015, %1016 : vector<2x32xf32>
    %1018 = vector.extract_strided_slice %1005 {offsets = [0, 64], sizes = [2, 32], strides = [1, 1]} : vector<2x128xf32> to vector<2x32xf32>
    %1019 = math.tanh %1018 : vector<2x32xf32>
    %1020 = vector.extract_strided_slice %1005 {offsets = [0, 96], sizes = [2, 32], strides = [1, 1]} : vector<2x128xf32> to vector<2x32xf32>
    %1021 = arith.negf %1020 : vector<2x32xf32>
    %1022 = math.exp %1021 : vector<2x32xf32>
    %cst_180 = arith.constant 1.000000e+00 : f32
    %1023 = vector.broadcast %cst_180 : f32 to vector<2x32xf32>
    %1024 = arith.addf %1023, %1022 : vector<2x32xf32>
    %1025 = arith.divf %1023, %1024 : vector<2x32xf32>
    %1026 = arith.mulf %1017, %941 : vector<2x32xf32>
    %1027 = arith.mulf %1011, %1019 : vector<2x32xf32>
    %1028 = arith.addf %1026, %1027 : vector<2x32xf32>
    %1029 = math.tanh %1028 : vector<2x32xf32>
    %1030 = arith.mulf %1025, %1029 : vector<2x32xf32>
    %1031 = tpu.concatenate %1030, %972 in 1 : vector<2x32xf32>, vector<2x32xf32> -> vector<2x64xf32>
    %cst_181 = arith.constant dense<0.000000e+00> : vector<2x128xf32>
    %1032 = tpu.matmul %1031, %32, %cst_181 {dimension_numbers = #tpu.dot_dimension_numbers<[1], [0], [0], [1], [0, 0, 1, 1], [], []>} : vector<2x64xf32>, vector<64x128xf32>, vector<2x128xf32> -> vector<2x128xf32>
    %1033 = vector.broadcast %36 : vector<1x128xf32> to vector<2x128xf32>
    %1034 = arith.addf %1032, %1033 : vector<2x128xf32>
    %1035 = vector.extract_strided_slice %1034 {offsets = [0, 0], sizes = [2, 32], strides = [1, 1]} : vector<2x128xf32> to vector<2x32xf32>
    %1036 = arith.negf %1035 : vector<2x32xf32>
    %1037 = math.exp %1036 : vector<2x32xf32>
    %cst_182 = arith.constant 1.000000e+00 : f32
    %1038 = vector.broadcast %cst_182 : f32 to vector<2x32xf32>
    %1039 = arith.addf %1038, %1037 : vector<2x32xf32>
    %1040 = arith.divf %1038, %1039 : vector<2x32xf32>
    %1041 = vector.extract_strided_slice %1034 {offsets = [0, 32], sizes = [2, 32], strides = [1, 1]} : vector<2x128xf32> to vector<2x32xf32>
    %1042 = arith.negf %1041 : vector<2x32xf32>
    %1043 = math.exp %1042 : vector<2x32xf32>
    %cst_183 = arith.constant 1.000000e+00 : f32
    %1044 = vector.broadcast %cst_183 : f32 to vector<2x32xf32>
    %1045 = arith.addf %1044, %1043 : vector<2x32xf32>
    %1046 = arith.divf %1044, %1045 : vector<2x32xf32>
    %1047 = vector.extract_strided_slice %1034 {offsets = [0, 64], sizes = [2, 32], strides = [1, 1]} : vector<2x128xf32> to vector<2x32xf32>
    %1048 = math.tanh %1047 : vector<2x32xf32>
    %1049 = vector.extract_strided_slice %1034 {offsets = [0, 96], sizes = [2, 32], strides = [1, 1]} : vector<2x128xf32> to vector<2x32xf32>
    %1050 = arith.negf %1049 : vector<2x32xf32>
    %1051 = math.exp %1050 : vector<2x32xf32>
    %cst_184 = arith.constant 1.000000e+00 : f32
    %1052 = vector.broadcast %cst_184 : f32 to vector<2x32xf32>
    %1053 = arith.addf %1052, %1051 : vector<2x32xf32>
    %1054 = arith.divf %1052, %1053 : vector<2x32xf32>
    %1055 = arith.mulf %1046, %970 : vector<2x32xf32>
    %1056 = arith.mulf %1040, %1048 : vector<2x32xf32>
    %1057 = arith.addf %1055, %1056 : vector<2x32xf32>
    %1058 = math.tanh %1057 : vector<2x32xf32>
    %1059 = arith.mulf %1054, %1058 : vector<2x32xf32>
    %1060 = tpu.concatenate %1059, %1001 in 1 : vector<2x32xf32>, vector<2x32xf32> -> vector<2x64xf32>
    %cst_185 = arith.constant dense<0.000000e+00> : vector<2x128xf32>
    %1061 = tpu.matmul %1060, %34, %cst_185 {dimension_numbers = #tpu.dot_dimension_numbers<[1], [0], [0], [1], [0, 0, 1, 1], [], []>} : vector<2x64xf32>, vector<64x128xf32>, vector<2x128xf32> -> vector<2x128xf32>
    %1062 = vector.broadcast %38 : vector<1x128xf32> to vector<2x128xf32>
    %1063 = arith.addf %1061, %1062 : vector<2x128xf32>
    %1064 = vector.extract_strided_slice %1063 {offsets = [0, 0], sizes = [2, 32], strides = [1, 1]} : vector<2x128xf32> to vector<2x32xf32>
    %1065 = arith.negf %1064 : vector<2x32xf32>
    %1066 = math.exp %1065 : vector<2x32xf32>
    %cst_186 = arith.constant 1.000000e+00 : f32
    %1067 = vector.broadcast %cst_186 : f32 to vector<2x32xf32>
    %1068 = arith.addf %1067, %1066 : vector<2x32xf32>
    %1069 = arith.divf %1067, %1068 : vector<2x32xf32>
    %1070 = vector.extract_strided_slice %1063 {offsets = [0, 32], sizes = [2, 32], strides = [1, 1]} : vector<2x128xf32> to vector<2x32xf32>
    %1071 = arith.negf %1070 : vector<2x32xf32>
    %1072 = math.exp %1071 : vector<2x32xf32>
    %cst_187 = arith.constant 1.000000e+00 : f32
    %1073 = vector.broadcast %cst_187 : f32 to vector<2x32xf32>
    %1074 = arith.addf %1073, %1072 : vector<2x32xf32>
    %1075 = arith.divf %1073, %1074 : vector<2x32xf32>
    %1076 = vector.extract_strided_slice %1063 {offsets = [0, 64], sizes = [2, 32], strides = [1, 1]} : vector<2x128xf32> to vector<2x32xf32>
    %1077 = math.tanh %1076 : vector<2x32xf32>
    %1078 = vector.extract_strided_slice %1063 {offsets = [0, 96], sizes = [2, 32], strides = [1, 1]} : vector<2x128xf32> to vector<2x32xf32>
    %1079 = arith.negf %1078 : vector<2x32xf32>
    %1080 = math.exp %1079 : vector<2x32xf32>
    %cst_188 = arith.constant 1.000000e+00 : f32
    %1081 = vector.broadcast %cst_188 : f32 to vector<2x32xf32>
    %1082 = arith.addf %1081, %1080 : vector<2x32xf32>
    %1083 = arith.divf %1081, %1082 : vector<2x32xf32>
    %1084 = arith.mulf %1075, %999 : vector<2x32xf32>
    %1085 = arith.mulf %1069, %1077 : vector<2x32xf32>
    %1086 = arith.addf %1084, %1085 : vector<2x32xf32>
    %1087 = math.tanh %1086 : vector<2x32xf32>
    %1088 = arith.mulf %1083, %1087 : vector<2x32xf32>
    %1089 = tpu.concatenate %1030, %1059, %1088, %1028, %1057, %1086 in 0 : vector<2x32xf32>, vector<2x32xf32>, vector<2x32xf32>, vector<2x32xf32>, vector<2x32xf32>, vector<2x32xf32> -> vector<12x32xf32>
    %c0_189 = arith.constant 0 : index
    %c0_190 = arith.constant 0 : index
    %1090 = vector.load %arg9[%c0_189, %c0_190] : memref<32x64xf32, #tpu.memory_space<vmem>>, vector<32x64xf32>
    %cst_191 = arith.constant dense<0.000000e+00> : vector<12x64xf32>
    %1091 = tpu.matmul %1089, %1090, %cst_191 {dimension_numbers = #tpu.dot_dimension_numbers<[1], [0], [0], [1], [0, 0, 1, 1], [], []>} : vector<12x32xf32>, vector<32x64xf32>, vector<12x64xf32> -> vector<12x64xf32>
    %c0_192 = arith.constant 0 : index
    %c0_193 = arith.constant 0 : index
    %1092 = vector.load %arg10[%c0_192, %c0_193] : memref<1x64xf32, #tpu.memory_space<vmem>>, vector<1x64xf32>
    %1093 = vector.broadcast %1092 : vector<1x64xf32> to vector<12x64xf32>
    %1094 = arith.addf %1091, %1093 : vector<12x64xf32>
    %1095 = vector.extract_strided_slice %1094 {offsets = [0, 0], sizes = [2, 32], strides = [1, 1]} : vector<12x64xf32> to vector<2x32xf32>
    %1096 = vector.extract_strided_slice %1094 {offsets = [2, 0], sizes = [2, 32], strides = [1, 1]} : vector<12x64xf32> to vector<2x32xf32>
    %1097 = vector.extract_strided_slice %1094 {offsets = [4, 0], sizes = [2, 32], strides = [1, 1]} : vector<12x64xf32> to vector<2x32xf32>
    %1098 = vector.extract_strided_slice %1094 {offsets = [6, 32], sizes = [2, 32], strides = [1, 1]} : vector<12x64xf32> to vector<2x32xf32>
    %1099 = vector.extract_strided_slice %1094 {offsets = [8, 32], sizes = [2, 32], strides = [1, 1]} : vector<12x64xf32> to vector<2x32xf32>
    %1100 = vector.extract_strided_slice %1094 {offsets = [10, 32], sizes = [2, 32], strides = [1, 1]} : vector<12x64xf32> to vector<2x32xf32>
    %c0_194 = arith.constant 0 : index
    %c0_195 = arith.constant 0 : index
    %1101 = vector.load %arg15[%c0_194, %c0_195] : memref<32x128xf32, #tpu.memory_space<vmem>>, vector<32x128xf32>
    %c0_196 = arith.constant 0 : index
    %c0_197 = arith.constant 0 : index
    %c0_198 = arith.constant 0 : index
    %1102 = vector.load %arg16[%c0_196, %c0_197, %c0_198] : memref<2x64x128xf32, #tpu.memory_space<vmem>>, vector<1x64x128xf32>
    %1103 = vector.shape_cast %1102 : vector<1x64x128xf32> to vector<64x128xf32>
    %c1_199 = arith.constant 1 : index
    %c0_200 = arith.constant 0 : index
    %c0_201 = arith.constant 0 : index
    %1104 = vector.load %arg16[%c1_199, %c0_200, %c0_201] : memref<2x64x128xf32, #tpu.memory_space<vmem>>, vector<1x64x128xf32>
    %1105 = vector.shape_cast %1104 : vector<1x64x128xf32> to vector<64x128xf32>
    %c0_202 = arith.constant 0 : index
    %c0_203 = arith.constant 0 : index
    %c0_204 = arith.constant 0 : index
    %1106 = vector.load %arg17[%c0_202, %c0_203, %c0_204] : memref<2x1x128xf32, #tpu.memory_space<vmem>>, vector<1x1x128xf32>
    %1107 = vector.shape_cast %1106 : vector<1x1x128xf32> to vector<1x128xf32>
    %c1_205 = arith.constant 1 : index
    %c0_206 = arith.constant 0 : index
    %c0_207 = arith.constant 0 : index
    %1108 = vector.load %arg17[%c1_205, %c0_206, %c0_207] : memref<2x1x128xf32, #tpu.memory_space<vmem>>, vector<1x1x128xf32>
    %1109 = vector.shape_cast %1108 : vector<1x1x128xf32> to vector<1x128xf32>
    %1110 = vector.extract_strided_slice %29 {offsets = [0, 0, 0], sizes = [2, 1, 128], strides = [1, 1, 1]} : vector<2x8x128xf32> to vector<2x1x128xf32>
    %1111 = vector.shape_cast %1110 : vector<2x1x128xf32> to vector<2x128xf32>
    %cst_208 = arith.constant dense<0.000000e+00> : vector<2x128xf32>
    %1112 = tpu.matmul %1095, %1101, %cst_208 {dimension_numbers = #tpu.dot_dimension_numbers<[1], [0], [0], [1], [0, 0, 1, 1], [], []>} : vector<2x32xf32>, vector<32x128xf32>, vector<2x128xf32> -> vector<2x128xf32>
    %1113 = arith.addf %1111, %1112 : vector<2x128xf32>
    %1114 = vector.extract_strided_slice %1113 {offsets = [0, 0], sizes = [2, 32], strides = [1, 1]} : vector<2x128xf32> to vector<2x32xf32>
    %1115 = arith.negf %1114 : vector<2x32xf32>
    %1116 = math.exp %1115 : vector<2x32xf32>
    %cst_209 = arith.constant 1.000000e+00 : f32
    %1117 = vector.broadcast %cst_209 : f32 to vector<2x32xf32>
    %1118 = arith.addf %1117, %1116 : vector<2x32xf32>
    %1119 = arith.divf %1117, %1118 : vector<2x32xf32>
    %1120 = vector.extract_strided_slice %1113 {offsets = [0, 32], sizes = [2, 32], strides = [1, 1]} : vector<2x128xf32> to vector<2x32xf32>
    %1121 = arith.negf %1120 : vector<2x32xf32>
    %1122 = math.exp %1121 : vector<2x32xf32>
    %cst_210 = arith.constant 1.000000e+00 : f32
    %1123 = vector.broadcast %cst_210 : f32 to vector<2x32xf32>
    %1124 = arith.addf %1123, %1122 : vector<2x32xf32>
    %1125 = arith.divf %1123, %1124 : vector<2x32xf32>
    %1126 = vector.extract_strided_slice %1113 {offsets = [0, 64], sizes = [2, 32], strides = [1, 1]} : vector<2x128xf32> to vector<2x32xf32>
    %1127 = math.tanh %1126 : vector<2x32xf32>
    %1128 = vector.extract_strided_slice %1113 {offsets = [0, 96], sizes = [2, 32], strides = [1, 1]} : vector<2x128xf32> to vector<2x32xf32>
    %1129 = arith.negf %1128 : vector<2x32xf32>
    %1130 = math.exp %1129 : vector<2x32xf32>
    %cst_211 = arith.constant 1.000000e+00 : f32
    %1131 = vector.broadcast %cst_211 : f32 to vector<2x32xf32>
    %1132 = arith.addf %1131, %1130 : vector<2x32xf32>
    %1133 = arith.divf %1131, %1132 : vector<2x32xf32>
    %1134 = arith.mulf %1125, %1098 : vector<2x32xf32>
    %1135 = arith.mulf %1119, %1127 : vector<2x32xf32>
    %1136 = arith.addf %1134, %1135 : vector<2x32xf32>
    %1137 = math.tanh %1136 : vector<2x32xf32>
    %1138 = arith.mulf %1133, %1137 : vector<2x32xf32>
    %1139 = tpu.concatenate %1138, %1096 in 1 : vector<2x32xf32>, vector<2x32xf32> -> vector<2x64xf32>
    %cst_212 = arith.constant dense<0.000000e+00> : vector<2x128xf32>
    %1140 = tpu.matmul %1139, %1103, %cst_212 {dimension_numbers = #tpu.dot_dimension_numbers<[1], [0], [0], [1], [0, 0, 1, 1], [], []>} : vector<2x64xf32>, vector<64x128xf32>, vector<2x128xf32> -> vector<2x128xf32>
    %1141 = vector.broadcast %1107 : vector<1x128xf32> to vector<2x128xf32>
    %1142 = arith.addf %1140, %1141 : vector<2x128xf32>
    %1143 = vector.extract_strided_slice %1142 {offsets = [0, 0], sizes = [2, 32], strides = [1, 1]} : vector<2x128xf32> to vector<2x32xf32>
    %1144 = arith.negf %1143 : vector<2x32xf32>
    %1145 = math.exp %1144 : vector<2x32xf32>
    %cst_213 = arith.constant 1.000000e+00 : f32
    %1146 = vector.broadcast %cst_213 : f32 to vector<2x32xf32>
    %1147 = arith.addf %1146, %1145 : vector<2x32xf32>
    %1148 = arith.divf %1146, %1147 : vector<2x32xf32>
    %1149 = vector.extract_strided_slice %1142 {offsets = [0, 32], sizes = [2, 32], strides = [1, 1]} : vector<2x128xf32> to vector<2x32xf32>
    %1150 = arith.negf %1149 : vector<2x32xf32>
    %1151 = math.exp %1150 : vector<2x32xf32>
    %cst_214 = arith.constant 1.000000e+00 : f32
    %1152 = vector.broadcast %cst_214 : f32 to vector<2x32xf32>
    %1153 = arith.addf %1152, %1151 : vector<2x32xf32>
    %1154 = arith.divf %1152, %1153 : vector<2x32xf32>
    %1155 = vector.extract_strided_slice %1142 {offsets = [0, 64], sizes = [2, 32], strides = [1, 1]} : vector<2x128xf32> to vector<2x32xf32>
    %1156 = math.tanh %1155 : vector<2x32xf32>
    %1157 = vector.extract_strided_slice %1142 {offsets = [0, 96], sizes = [2, 32], strides = [1, 1]} : vector<2x128xf32> to vector<2x32xf32>
    %1158 = arith.negf %1157 : vector<2x32xf32>
    %1159 = math.exp %1158 : vector<2x32xf32>
    %cst_215 = arith.constant 1.000000e+00 : f32
    %1160 = vector.broadcast %cst_215 : f32 to vector<2x32xf32>
    %1161 = arith.addf %1160, %1159 : vector<2x32xf32>
    %1162 = arith.divf %1160, %1161 : vector<2x32xf32>
    %1163 = arith.mulf %1154, %1099 : vector<2x32xf32>
    %1164 = arith.mulf %1148, %1156 : vector<2x32xf32>
    %1165 = arith.addf %1163, %1164 : vector<2x32xf32>
    %1166 = math.tanh %1165 : vector<2x32xf32>
    %1167 = arith.mulf %1162, %1166 : vector<2x32xf32>
    %1168 = tpu.concatenate %1167, %1097 in 1 : vector<2x32xf32>, vector<2x32xf32> -> vector<2x64xf32>
    %cst_216 = arith.constant dense<0.000000e+00> : vector<2x128xf32>
    %1169 = tpu.matmul %1168, %1105, %cst_216 {dimension_numbers = #tpu.dot_dimension_numbers<[1], [0], [0], [1], [0, 0, 1, 1], [], []>} : vector<2x64xf32>, vector<64x128xf32>, vector<2x128xf32> -> vector<2x128xf32>
    %1170 = vector.broadcast %1109 : vector<1x128xf32> to vector<2x128xf32>
    %1171 = arith.addf %1169, %1170 : vector<2x128xf32>
    %1172 = vector.extract_strided_slice %1171 {offsets = [0, 0], sizes = [2, 32], strides = [1, 1]} : vector<2x128xf32> to vector<2x32xf32>
    %1173 = arith.negf %1172 : vector<2x32xf32>
    %1174 = math.exp %1173 : vector<2x32xf32>
    %cst_217 = arith.constant 1.000000e+00 : f32
    %1175 = vector.broadcast %cst_217 : f32 to vector<2x32xf32>
    %1176 = arith.addf %1175, %1174 : vector<2x32xf32>
    %1177 = arith.divf %1175, %1176 : vector<2x32xf32>
    %1178 = vector.extract_strided_slice %1171 {offsets = [0, 32], sizes = [2, 32], strides = [1, 1]} : vector<2x128xf32> to vector<2x32xf32>
    %1179 = arith.negf %1178 : vector<2x32xf32>
    %1180 = math.exp %1179 : vector<2x32xf32>
    %cst_218 = arith.constant 1.000000e+00 : f32
    %1181 = vector.broadcast %cst_218 : f32 to vector<2x32xf32>
    %1182 = arith.addf %1181, %1180 : vector<2x32xf32>
    %1183 = arith.divf %1181, %1182 : vector<2x32xf32>
    %1184 = vector.extract_strided_slice %1171 {offsets = [0, 64], sizes = [2, 32], strides = [1, 1]} : vector<2x128xf32> to vector<2x32xf32>
    %1185 = math.tanh %1184 : vector<2x32xf32>
    %1186 = vector.extract_strided_slice %1171 {offsets = [0, 96], sizes = [2, 32], strides = [1, 1]} : vector<2x128xf32> to vector<2x32xf32>
    %1187 = arith.negf %1186 : vector<2x32xf32>
    %1188 = math.exp %1187 : vector<2x32xf32>
    %cst_219 = arith.constant 1.000000e+00 : f32
    %1189 = vector.broadcast %cst_219 : f32 to vector<2x32xf32>
    %1190 = arith.addf %1189, %1188 : vector<2x32xf32>
    %1191 = arith.divf %1189, %1190 : vector<2x32xf32>
    %1192 = arith.mulf %1183, %1100 : vector<2x32xf32>
    %1193 = arith.mulf %1177, %1185 : vector<2x32xf32>
    %1194 = arith.addf %1192, %1193 : vector<2x32xf32>
    %1195 = math.tanh %1194 : vector<2x32xf32>
    %1196 = arith.mulf %1191, %1195 : vector<2x32xf32>
    %1197 = vector.shape_cast %1196 : vector<2x32xf32> to vector<2x1x32xf32>
    %c0_220 = arith.constant 0 : index
    %c0_221 = arith.constant 0 : index
    %c0_222 = arith.constant 0 : index
    %1198 = vector.load %arg23[%c0_220, %c0_221, %c0_222] : memref<2x8x32xf32, #tpu.memory_space<vmem>>, vector<2x1x32xf32>
    tpu.vector_store %arg23[%c0_220, %c0_221, %c0_222], %1197 {strides = array<i32>} : memref<2x8x32xf32, #tpu.memory_space<vmem>>, vector<2x1x32xf32>,
    %1199 = vector.extract_strided_slice %29 {offsets = [0, 1, 0], sizes = [2, 1, 128], strides = [1, 1, 1]} : vector<2x8x128xf32> to vector<2x1x128xf32>
    %1200 = vector.shape_cast %1199 : vector<2x1x128xf32> to vector<2x128xf32>
    %cst_223 = arith.constant dense<0.000000e+00> : vector<2x128xf32>
    %1201 = tpu.matmul %1138, %1101, %cst_223 {dimension_numbers = #tpu.dot_dimension_numbers<[1], [0], [0], [1], [0, 0, 1, 1], [], []>} : vector<2x32xf32>, vector<32x128xf32>, vector<2x128xf32> -> vector<2x128xf32>
    %1202 = arith.addf %1200, %1201 : vector<2x128xf32>
    %1203 = vector.extract_strided_slice %1202 {offsets = [0, 0], sizes = [2, 32], strides = [1, 1]} : vector<2x128xf32> to vector<2x32xf32>
    %1204 = arith.negf %1203 : vector<2x32xf32>
    %1205 = math.exp %1204 : vector<2x32xf32>
    %cst_224 = arith.constant 1.000000e+00 : f32
    %1206 = vector.broadcast %cst_224 : f32 to vector<2x32xf32>
    %1207 = arith.addf %1206, %1205 : vector<2x32xf32>
    %1208 = arith.divf %1206, %1207 : vector<2x32xf32>
    %1209 = vector.extract_strided_slice %1202 {offsets = [0, 32], sizes = [2, 32], strides = [1, 1]} : vector<2x128xf32> to vector<2x32xf32>
    %1210 = arith.negf %1209 : vector<2x32xf32>
    %1211 = math.exp %1210 : vector<2x32xf32>
    %cst_225 = arith.constant 1.000000e+00 : f32
    %1212 = vector.broadcast %cst_225 : f32 to vector<2x32xf32>
    %1213 = arith.addf %1212, %1211 : vector<2x32xf32>
    %1214 = arith.divf %1212, %1213 : vector<2x32xf32>
    %1215 = vector.extract_strided_slice %1202 {offsets = [0, 64], sizes = [2, 32], strides = [1, 1]} : vector<2x128xf32> to vector<2x32xf32>
    %1216 = math.tanh %1215 : vector<2x32xf32>
    %1217 = vector.extract_strided_slice %1202 {offsets = [0, 96], sizes = [2, 32], strides = [1, 1]} : vector<2x128xf32> to vector<2x32xf32>
    %1218 = arith.negf %1217 : vector<2x32xf32>
    %1219 = math.exp %1218 : vector<2x32xf32>
    %cst_226 = arith.constant 1.000000e+00 : f32
    %1220 = vector.broadcast %cst_226 : f32 to vector<2x32xf32>
    %1221 = arith.addf %1220, %1219 : vector<2x32xf32>
    %1222 = arith.divf %1220, %1221 : vector<2x32xf32>
    %1223 = arith.mulf %1214, %1136 : vector<2x32xf32>
    %1224 = arith.mulf %1208, %1216 : vector<2x32xf32>
    %1225 = arith.addf %1223, %1224 : vector<2x32xf32>
    %1226 = math.tanh %1225 : vector<2x32xf32>
    %1227 = arith.mulf %1222, %1226 : vector<2x32xf32>
    %1228 = tpu.concatenate %1227, %1167 in 1 : vector<2x32xf32>, vector<2x32xf32> -> vector<2x64xf32>
    %cst_227 = arith.constant dense<0.000000e+00> : vector<2x128xf32>
    %1229 = tpu.matmul %1228, %1103, %cst_227 {dimension_numbers = #tpu.dot_dimension_numbers<[1], [0], [0], [1], [0, 0, 1, 1], [], []>} : vector<2x64xf32>, vector<64x128xf32>, vector<2x128xf32> -> vector<2x128xf32>
    %1230 = vector.broadcast %1107 : vector<1x128xf32> to vector<2x128xf32>
    %1231 = arith.addf %1229, %1230 : vector<2x128xf32>
    %1232 = vector.extract_strided_slice %1231 {offsets = [0, 0], sizes = [2, 32], strides = [1, 1]} : vector<2x128xf32> to vector<2x32xf32>
    %1233 = arith.negf %1232 : vector<2x32xf32>
    %1234 = math.exp %1233 : vector<2x32xf32>
    %cst_228 = arith.constant 1.000000e+00 : f32
    %1235 = vector.broadcast %cst_228 : f32 to vector<2x32xf32>
    %1236 = arith.addf %1235, %1234 : vector<2x32xf32>
    %1237 = arith.divf %1235, %1236 : vector<2x32xf32>
    %1238 = vector.extract_strided_slice %1231 {offsets = [0, 32], sizes = [2, 32], strides = [1, 1]} : vector<2x128xf32> to vector<2x32xf32>
    %1239 = arith.negf %1238 : vector<2x32xf32>
    %1240 = math.exp %1239 : vector<2x32xf32>
    %cst_229 = arith.constant 1.000000e+00 : f32
    %1241 = vector.broadcast %cst_229 : f32 to vector<2x32xf32>
    %1242 = arith.addf %1241, %1240 : vector<2x32xf32>
    %1243 = arith.divf %1241, %1242 : vector<2x32xf32>
    %1244 = vector.extract_strided_slice %1231 {offsets = [0, 64], sizes = [2, 32], strides = [1, 1]} : vector<2x128xf32> to vector<2x32xf32>
    %1245 = math.tanh %1244 : vector<2x32xf32>
    %1246 = vector.extract_strided_slice %1231 {offsets = [0, 96], sizes = [2, 32], strides = [1, 1]} : vector<2x128xf32> to vector<2x32xf32>
    %1247 = arith.negf %1246 : vector<2x32xf32>
    %1248 = math.exp %1247 : vector<2x32xf32>
    %cst_230 = arith.constant 1.000000e+00 : f32
    %1249 = vector.broadcast %cst_230 : f32 to vector<2x32xf32>
    %1250 = arith.addf %1249, %1248 : vector<2x32xf32>
    %1251 = arith.divf %1249, %1250 : vector<2x32xf32>
    %1252 = arith.mulf %1243, %1165 : vector<2x32xf32>
    %1253 = arith.mulf %1237, %1245 : vector<2x32xf32>
    %1254 = arith.addf %1252, %1253 : vector<2x32xf32>
    %1255 = math.tanh %1254 : vector<2x32xf32>
    %1256 = arith.mulf %1251, %1255 : vector<2x32xf32>
    %1257 = tpu.concatenate %1256, %1196 in 1 : vector<2x32xf32>, vector<2x32xf32> -> vector<2x64xf32>
    %cst_231 = arith.constant dense<0.000000e+00> : vector<2x128xf32>
    %1258 = tpu.matmul %1257, %1105, %cst_231 {dimension_numbers = #tpu.dot_dimension_numbers<[1], [0], [0], [1], [0, 0, 1, 1], [], []>} : vector<2x64xf32>, vector<64x128xf32>, vector<2x128xf32> -> vector<2x128xf32>
    %1259 = vector.broadcast %1109 : vector<1x128xf32> to vector<2x128xf32>
    %1260 = arith.addf %1258, %1259 : vector<2x128xf32>
    %1261 = vector.extract_strided_slice %1260 {offsets = [0, 0], sizes = [2, 32], strides = [1, 1]} : vector<2x128xf32> to vector<2x32xf32>
    %1262 = arith.negf %1261 : vector<2x32xf32>
    %1263 = math.exp %1262 : vector<2x32xf32>
    %cst_232 = arith.constant 1.000000e+00 : f32
    %1264 = vector.broadcast %cst_232 : f32 to vector<2x32xf32>
    %1265 = arith.addf %1264, %1263 : vector<2x32xf32>
    %1266 = arith.divf %1264, %1265 : vector<2x32xf32>
    %1267 = vector.extract_strided_slice %1260 {offsets = [0, 32], sizes = [2, 32], strides = [1, 1]} : vector<2x128xf32> to vector<2x32xf32>
    %1268 = arith.negf %1267 : vector<2x32xf32>
    %1269 = math.exp %1268 : vector<2x32xf32>
    %cst_233 = arith.constant 1.000000e+00 : f32
    %1270 = vector.broadcast %cst_233 : f32 to vector<2x32xf32>
    %1271 = arith.addf %1270, %1269 : vector<2x32xf32>
    %1272 = arith.divf %1270, %1271 : vector<2x32xf32>
    %1273 = vector.extract_strided_slice %1260 {offsets = [0, 64], sizes = [2, 32], strides = [1, 1]} : vector<2x128xf32> to vector<2x32xf32>
    %1274 = math.tanh %1273 : vector<2x32xf32>
    %1275 = vector.extract_strided_slice %1260 {offsets = [0, 96], sizes = [2, 32], strides = [1, 1]} : vector<2x128xf32> to vector<2x32xf32>
    %1276 = arith.negf %1275 : vector<2x32xf32>
    %1277 = math.exp %1276 : vector<2x32xf32>
    %cst_234 = arith.constant 1.000000e+00 : f32
    %1278 = vector.broadcast %cst_234 : f32 to vector<2x32xf32>
    %1279 = arith.addf %1278, %1277 : vector<2x32xf32>
    %1280 = arith.divf %1278, %1279 : vector<2x32xf32>
    %1281 = arith.mulf %1272, %1194 : vector<2x32xf32>
    %1282 = arith.mulf %1266, %1274 : vector<2x32xf32>
    %1283 = arith.addf %1281, %1282 : vector<2x32xf32>
    %1284 = math.tanh %1283 : vector<2x32xf32>
    %1285 = arith.mulf %1280, %1284 : vector<2x32xf32>
    %1286 = vector.shape_cast %1285 : vector<2x32xf32> to vector<2x1x32xf32>
    %c0_235 = arith.constant 0 : index
    %c1_236 = arith.constant 1 : index
    %c0_237 = arith.constant 0 : index
    %1287 = vector.load %arg23[%c0_235, %c1_236, %c0_237] : memref<2x8x32xf32, #tpu.memory_space<vmem>>, vector<2x1x32xf32>
    tpu.vector_store %arg23[%c0_235, %c1_236, %c0_237], %1286 {strides = array<i32>} : memref<2x8x32xf32, #tpu.memory_space<vmem>>, vector<2x1x32xf32>,
    %1288 = vector.extract_strided_slice %29 {offsets = [0, 2, 0], sizes = [2, 1, 128], strides = [1, 1, 1]} : vector<2x8x128xf32> to vector<2x1x128xf32>
    %1289 = vector.shape_cast %1288 : vector<2x1x128xf32> to vector<2x128xf32>
    %cst_238 = arith.constant dense<0.000000e+00> : vector<2x128xf32>
    %1290 = tpu.matmul %1227, %1101, %cst_238 {dimension_numbers = #tpu.dot_dimension_numbers<[1], [0], [0], [1], [0, 0, 1, 1], [], []>} : vector<2x32xf32>, vector<32x128xf32>, vector<2x128xf32> -> vector<2x128xf32>
    %1291 = arith.addf %1289, %1290 : vector<2x128xf32>
    %1292 = vector.extract_strided_slice %1291 {offsets = [0, 0], sizes = [2, 32], strides = [1, 1]} : vector<2x128xf32> to vector<2x32xf32>
    %1293 = arith.negf %1292 : vector<2x32xf32>
    %1294 = math.exp %1293 : vector<2x32xf32>
    %cst_239 = arith.constant 1.000000e+00 : f32
    %1295 = vector.broadcast %cst_239 : f32 to vector<2x32xf32>
    %1296 = arith.addf %1295, %1294 : vector<2x32xf32>
    %1297 = arith.divf %1295, %1296 : vector<2x32xf32>
    %1298 = vector.extract_strided_slice %1291 {offsets = [0, 32], sizes = [2, 32], strides = [1, 1]} : vector<2x128xf32> to vector<2x32xf32>
    %1299 = arith.negf %1298 : vector<2x32xf32>
    %1300 = math.exp %1299 : vector<2x32xf32>
    %cst_240 = arith.constant 1.000000e+00 : f32
    %1301 = vector.broadcast %cst_240 : f32 to vector<2x32xf32>
    %1302 = arith.addf %1301, %1300 : vector<2x32xf32>
    %1303 = arith.divf %1301, %1302 : vector<2x32xf32>
    %1304 = vector.extract_strided_slice %1291 {offsets = [0, 64], sizes = [2, 32], strides = [1, 1]} : vector<2x128xf32> to vector<2x32xf32>
    %1305 = math.tanh %1304 : vector<2x32xf32>
    %1306 = vector.extract_strided_slice %1291 {offsets = [0, 96], sizes = [2, 32], strides = [1, 1]} : vector<2x128xf32> to vector<2x32xf32>
    %1307 = arith.negf %1306 : vector<2x32xf32>
    %1308 = math.exp %1307 : vector<2x32xf32>
    %cst_241 = arith.constant 1.000000e+00 : f32
    %1309 = vector.broadcast %cst_241 : f32 to vector<2x32xf32>
    %1310 = arith.addf %1309, %1308 : vector<2x32xf32>
    %1311 = arith.divf %1309, %1310 : vector<2x32xf32>
    %1312 = arith.mulf %1303, %1225 : vector<2x32xf32>
    %1313 = arith.mulf %1297, %1305 : vector<2x32xf32>
    %1314 = arith.addf %1312, %1313 : vector<2x32xf32>
    %1315 = math.tanh %1314 : vector<2x32xf32>
    %1316 = arith.mulf %1311, %1315 : vector<2x32xf32>
    %1317 = tpu.concatenate %1316, %1256 in 1 : vector<2x32xf32>, vector<2x32xf32> -> vector<2x64xf32>
    %cst_242 = arith.constant dense<0.000000e+00> : vector<2x128xf32>
    %1318 = tpu.matmul %1317, %1103, %cst_242 {dimension_numbers = #tpu.dot_dimension_numbers<[1], [0], [0], [1], [0, 0, 1, 1], [], []>} : vector<2x64xf32>, vector<64x128xf32>, vector<2x128xf32> -> vector<2x128xf32>
    %1319 = vector.broadcast %1107 : vector<1x128xf32> to vector<2x128xf32>
    %1320 = arith.addf %1318, %1319 : vector<2x128xf32>
    %1321 = vector.extract_strided_slice %1320 {offsets = [0, 0], sizes = [2, 32], strides = [1, 1]} : vector<2x128xf32> to vector<2x32xf32>
    %1322 = arith.negf %1321 : vector<2x32xf32>
    %1323 = math.exp %1322 : vector<2x32xf32>
    %cst_243 = arith.constant 1.000000e+00 : f32
    %1324 = vector.broadcast %cst_243 : f32 to vector<2x32xf32>
    %1325 = arith.addf %1324, %1323 : vector<2x32xf32>
    %1326 = arith.divf %1324, %1325 : vector<2x32xf32>
    %1327 = vector.extract_strided_slice %1320 {offsets = [0, 32], sizes = [2, 32], strides = [1, 1]} : vector<2x128xf32> to vector<2x32xf32>
    %1328 = arith.negf %1327 : vector<2x32xf32>
    %1329 = math.exp %1328 : vector<2x32xf32>
    %cst_244 = arith.constant 1.000000e+00 : f32
    %1330 = vector.broadcast %cst_244 : f32 to vector<2x32xf32>
    %1331 = arith.addf %1330, %1329 : vector<2x32xf32>
    %1332 = arith.divf %1330, %1331 : vector<2x32xf32>
    %1333 = vector.extract_strided_slice %1320 {offsets = [0, 64], sizes = [2, 32], strides = [1, 1]} : vector<2x128xf32> to vector<2x32xf32>
    %1334 = math.tanh %1333 : vector<2x32xf32>
    %1335 = vector.extract_strided_slice %1320 {offsets = [0, 96], sizes = [2, 32], strides = [1, 1]} : vector<2x128xf32> to vector<2x32xf32>
    %1336 = arith.negf %1335 : vector<2x32xf32>
    %1337 = math.exp %1336 : vector<2x32xf32>
    %cst_245 = arith.constant 1.000000e+00 : f32
    %1338 = vector.broadcast %cst_245 : f32 to vector<2x32xf32>
    %1339 = arith.addf %1338, %1337 : vector<2x32xf32>
    %1340 = arith.divf %1338, %1339 : vector<2x32xf32>
    %1341 = arith.mulf %1332, %1254 : vector<2x32xf32>
    %1342 = arith.mulf %1326, %1334 : vector<2x32xf32>
    %1343 = arith.addf %1341, %1342 : vector<2x32xf32>
    %1344 = math.tanh %1343 : vector<2x32xf32>
    %1345 = arith.mulf %1340, %1344 : vector<2x32xf32>
    %1346 = tpu.concatenate %1345, %1285 in 1 : vector<2x32xf32>, vector<2x32xf32> -> vector<2x64xf32>
    %cst_246 = arith.constant dense<0.000000e+00> : vector<2x128xf32>
    %1347 = tpu.matmul %1346, %1105, %cst_246 {dimension_numbers = #tpu.dot_dimension_numbers<[1], [0], [0], [1], [0, 0, 1, 1], [], []>} : vector<2x64xf32>, vector<64x128xf32>, vector<2x128xf32> -> vector<2x128xf32>
    %1348 = vector.broadcast %1109 : vector<1x128xf32> to vector<2x128xf32>
    %1349 = arith.addf %1347, %1348 : vector<2x128xf32>
    %1350 = vector.extract_strided_slice %1349 {offsets = [0, 0], sizes = [2, 32], strides = [1, 1]} : vector<2x128xf32> to vector<2x32xf32>
    %1351 = arith.negf %1350 : vector<2x32xf32>
    %1352 = math.exp %1351 : vector<2x32xf32>
    %cst_247 = arith.constant 1.000000e+00 : f32
    %1353 = vector.broadcast %cst_247 : f32 to vector<2x32xf32>
    %1354 = arith.addf %1353, %1352 : vector<2x32xf32>
    %1355 = arith.divf %1353, %1354 : vector<2x32xf32>
    %1356 = vector.extract_strided_slice %1349 {offsets = [0, 32], sizes = [2, 32], strides = [1, 1]} : vector<2x128xf32> to vector<2x32xf32>
    %1357 = arith.negf %1356 : vector<2x32xf32>
    %1358 = math.exp %1357 : vector<2x32xf32>
    %cst_248 = arith.constant 1.000000e+00 : f32
    %1359 = vector.broadcast %cst_248 : f32 to vector<2x32xf32>
    %1360 = arith.addf %1359, %1358 : vector<2x32xf32>
    %1361 = arith.divf %1359, %1360 : vector<2x32xf32>
    %1362 = vector.extract_strided_slice %1349 {offsets = [0, 64], sizes = [2, 32], strides = [1, 1]} : vector<2x128xf32> to vector<2x32xf32>
    %1363 = math.tanh %1362 : vector<2x32xf32>
    %1364 = vector.extract_strided_slice %1349 {offsets = [0, 96], sizes = [2, 32], strides = [1, 1]} : vector<2x128xf32> to vector<2x32xf32>
    %1365 = arith.negf %1364 : vector<2x32xf32>
    %1366 = math.exp %1365 : vector<2x32xf32>
    %cst_249 = arith.constant 1.000000e+00 : f32
    %1367 = vector.broadcast %cst_249 : f32 to vector<2x32xf32>
    %1368 = arith.addf %1367, %1366 : vector<2x32xf32>
    %1369 = arith.divf %1367, %1368 : vector<2x32xf32>
    %1370 = arith.mulf %1361, %1283 : vector<2x32xf32>
    %1371 = arith.mulf %1355, %1363 : vector<2x32xf32>
    %1372 = arith.addf %1370, %1371 : vector<2x32xf32>
    %1373 = math.tanh %1372 : vector<2x32xf32>
    %1374 = arith.mulf %1369, %1373 : vector<2x32xf32>
    %1375 = vector.shape_cast %1374 : vector<2x32xf32> to vector<2x1x32xf32>
    %c0_250 = arith.constant 0 : index
    %c2 = arith.constant 2 : index
    %c0_251 = arith.constant 0 : index
    %1376 = vector.load %arg23[%c0_250, %c2, %c0_251] : memref<2x8x32xf32, #tpu.memory_space<vmem>>, vector<2x1x32xf32>
    tpu.vector_store %arg23[%c0_250, %c2, %c0_251], %1375 {strides = array<i32>} : memref<2x8x32xf32, #tpu.memory_space<vmem>>, vector<2x1x32xf32>,
    %1377 = vector.extract_strided_slice %29 {offsets = [0, 3, 0], sizes = [2, 1, 128], strides = [1, 1, 1]} : vector<2x8x128xf32> to vector<2x1x128xf32>
    %1378 = vector.shape_cast %1377 : vector<2x1x128xf32> to vector<2x128xf32>
    %cst_252 = arith.constant dense<0.000000e+00> : vector<2x128xf32>
    %1379 = tpu.matmul %1316, %1101, %cst_252 {dimension_numbers = #tpu.dot_dimension_numbers<[1], [0], [0], [1], [0, 0, 1, 1], [], []>} : vector<2x32xf32>, vector<32x128xf32>, vector<2x128xf32> -> vector<2x128xf32>
    %1380 = arith.addf %1378, %1379 : vector<2x128xf32>
    %1381 = vector.extract_strided_slice %1380 {offsets = [0, 0], sizes = [2, 32], strides = [1, 1]} : vector<2x128xf32> to vector<2x32xf32>
    %1382 = arith.negf %1381 : vector<2x32xf32>
    %1383 = math.exp %1382 : vector<2x32xf32>
    %cst_253 = arith.constant 1.000000e+00 : f32
    %1384 = vector.broadcast %cst_253 : f32 to vector<2x32xf32>
    %1385 = arith.addf %1384, %1383 : vector<2x32xf32>
    %1386 = arith.divf %1384, %1385 : vector<2x32xf32>
    %1387 = vector.extract_strided_slice %1380 {offsets = [0, 32], sizes = [2, 32], strides = [1, 1]} : vector<2x128xf32> to vector<2x32xf32>
    %1388 = arith.negf %1387 : vector<2x32xf32>
    %1389 = math.exp %1388 : vector<2x32xf32>
    %cst_254 = arith.constant 1.000000e+00 : f32
    %1390 = vector.broadcast %cst_254 : f32 to vector<2x32xf32>
    %1391 = arith.addf %1390, %1389 : vector<2x32xf32>
    %1392 = arith.divf %1390, %1391 : vector<2x32xf32>
    %1393 = vector.extract_strided_slice %1380 {offsets = [0, 64], sizes = [2, 32], strides = [1, 1]} : vector<2x128xf32> to vector<2x32xf32>
    %1394 = math.tanh %1393 : vector<2x32xf32>
    %1395 = vector.extract_strided_slice %1380 {offsets = [0, 96], sizes = [2, 32], strides = [1, 1]} : vector<2x128xf32> to vector<2x32xf32>
    %1396 = arith.negf %1395 : vector<2x32xf32>
    %1397 = math.exp %1396 : vector<2x32xf32>
    %cst_255 = arith.constant 1.000000e+00 : f32
    %1398 = vector.broadcast %cst_255 : f32 to vector<2x32xf32>
    %1399 = arith.addf %1398, %1397 : vector<2x32xf32>
    %1400 = arith.divf %1398, %1399 : vector<2x32xf32>
    %1401 = arith.mulf %1392, %1314 : vector<2x32xf32>
    %1402 = arith.mulf %1386, %1394 : vector<2x32xf32>
    %1403 = arith.addf %1401, %1402 : vector<2x32xf32>
    %1404 = math.tanh %1403 : vector<2x32xf32>
    %1405 = arith.mulf %1400, %1404 : vector<2x32xf32>
    %1406 = tpu.concatenate %1405, %1345 in 1 : vector<2x32xf32>, vector<2x32xf32> -> vector<2x64xf32>
    %cst_256 = arith.constant dense<0.000000e+00> : vector<2x128xf32>
    %1407 = tpu.matmul %1406, %1103, %cst_256 {dimension_numbers = #tpu.dot_dimension_numbers<[1], [0], [0], [1], [0, 0, 1, 1], [], []>} : vector<2x64xf32>, vector<64x128xf32>, vector<2x128xf32> -> vector<2x128xf32>
    %1408 = vector.broadcast %1107 : vector<1x128xf32> to vector<2x128xf32>
    %1409 = arith.addf %1407, %1408 : vector<2x128xf32>
    %1410 = vector.extract_strided_slice %1409 {offsets = [0, 0], sizes = [2, 32], strides = [1, 1]} : vector<2x128xf32> to vector<2x32xf32>
    %1411 = arith.negf %1410 : vector<2x32xf32>
    %1412 = math.exp %1411 : vector<2x32xf32>
    %cst_257 = arith.constant 1.000000e+00 : f32
    %1413 = vector.broadcast %cst_257 : f32 to vector<2x32xf32>
    %1414 = arith.addf %1413, %1412 : vector<2x32xf32>
    %1415 = arith.divf %1413, %1414 : vector<2x32xf32>
    %1416 = vector.extract_strided_slice %1409 {offsets = [0, 32], sizes = [2, 32], strides = [1, 1]} : vector<2x128xf32> to vector<2x32xf32>
    %1417 = arith.negf %1416 : vector<2x32xf32>
    %1418 = math.exp %1417 : vector<2x32xf32>
    %cst_258 = arith.constant 1.000000e+00 : f32
    %1419 = vector.broadcast %cst_258 : f32 to vector<2x32xf32>
    %1420 = arith.addf %1419, %1418 : vector<2x32xf32>
    %1421 = arith.divf %1419, %1420 : vector<2x32xf32>
    %1422 = vector.extract_strided_slice %1409 {offsets = [0, 64], sizes = [2, 32], strides = [1, 1]} : vector<2x128xf32> to vector<2x32xf32>
    %1423 = math.tanh %1422 : vector<2x32xf32>
    %1424 = vector.extract_strided_slice %1409 {offsets = [0, 96], sizes = [2, 32], strides = [1, 1]} : vector<2x128xf32> to vector<2x32xf32>
    %1425 = arith.negf %1424 : vector<2x32xf32>
    %1426 = math.exp %1425 : vector<2x32xf32>
    %cst_259 = arith.constant 1.000000e+00 : f32
    %1427 = vector.broadcast %cst_259 : f32 to vector<2x32xf32>
    %1428 = arith.addf %1427, %1426 : vector<2x32xf32>
    %1429 = arith.divf %1427, %1428 : vector<2x32xf32>
    %1430 = arith.mulf %1421, %1343 : vector<2x32xf32>
    %1431 = arith.mulf %1415, %1423 : vector<2x32xf32>
    %1432 = arith.addf %1430, %1431 : vector<2x32xf32>
    %1433 = math.tanh %1432 : vector<2x32xf32>
    %1434 = arith.mulf %1429, %1433 : vector<2x32xf32>
    %1435 = tpu.concatenate %1434, %1374 in 1 : vector<2x32xf32>, vector<2x32xf32> -> vector<2x64xf32>
    %cst_260 = arith.constant dense<0.000000e+00> : vector<2x128xf32>
    %1436 = tpu.matmul %1435, %1105, %cst_260 {dimension_numbers = #tpu.dot_dimension_numbers<[1], [0], [0], [1], [0, 0, 1, 1], [], []>} : vector<2x64xf32>, vector<64x128xf32>, vector<2x128xf32> -> vector<2x128xf32>
    %1437 = vector.broadcast %1109 : vector<1x128xf32> to vector<2x128xf32>
    %1438 = arith.addf %1436, %1437 : vector<2x128xf32>
    %1439 = vector.extract_strided_slice %1438 {offsets = [0, 0], sizes = [2, 32], strides = [1, 1]} : vector<2x128xf32> to vector<2x32xf32>
    %1440 = arith.negf %1439 : vector<2x32xf32>
    %1441 = math.exp %1440 : vector<2x32xf32>
    %cst_261 = arith.constant 1.000000e+00 : f32
    %1442 = vector.broadcast %cst_261 : f32 to vector<2x32xf32>
    %1443 = arith.addf %1442, %1441 : vector<2x32xf32>
    %1444 = arith.divf %1442, %1443 : vector<2x32xf32>
    %1445 = vector.extract_strided_slice %1438 {offsets = [0, 32], sizes = [2, 32], strides = [1, 1]} : vector<2x128xf32> to vector<2x32xf32>
    %1446 = arith.negf %1445 : vector<2x32xf32>
    %1447 = math.exp %1446 : vector<2x32xf32>
    %cst_262 = arith.constant 1.000000e+00 : f32
    %1448 = vector.broadcast %cst_262 : f32 to vector<2x32xf32>
    %1449 = arith.addf %1448, %1447 : vector<2x32xf32>
    %1450 = arith.divf %1448, %1449 : vector<2x32xf32>
    %1451 = vector.extract_strided_slice %1438 {offsets = [0, 64], sizes = [2, 32], strides = [1, 1]} : vector<2x128xf32> to vector<2x32xf32>
    %1452 = math.tanh %1451 : vector<2x32xf32>
    %1453 = vector.extract_strided_slice %1438 {offsets = [0, 96], sizes = [2, 32], strides = [1, 1]} : vector<2x128xf32> to vector<2x32xf32>
    %1454 = arith.negf %1453 : vector<2x32xf32>
    %1455 = math.exp %1454 : vector<2x32xf32>
    %cst_263 = arith.constant 1.000000e+00 : f32
    %1456 = vector.broadcast %cst_263 : f32 to vector<2x32xf32>
    %1457 = arith.addf %1456, %1455 : vector<2x32xf32>
    %1458 = arith.divf %1456, %1457 : vector<2x32xf32>
    %1459 = arith.mulf %1450, %1372 : vector<2x32xf32>
    %1460 = arith.mulf %1444, %1452 : vector<2x32xf32>
    %1461 = arith.addf %1459, %1460 : vector<2x32xf32>
    %1462 = math.tanh %1461 : vector<2x32xf32>
    %1463 = arith.mulf %1458, %1462 : vector<2x32xf32>
    %1464 = vector.shape_cast %1463 : vector<2x32xf32> to vector<2x1x32xf32>
    %c0_264 = arith.constant 0 : index
    %c3 = arith.constant 3 : index
    %c0_265 = arith.constant 0 : index
    %1465 = vector.load %arg23[%c0_264, %c3, %c0_265] : memref<2x8x32xf32, #tpu.memory_space<vmem>>, vector<2x1x32xf32>
    tpu.vector_store %arg23[%c0_264, %c3, %c0_265], %1464 {strides = array<i32>} : memref<2x8x32xf32, #tpu.memory_space<vmem>>, vector<2x1x32xf32>,
    %1466 = vector.extract_strided_slice %29 {offsets = [0, 4, 0], sizes = [2, 1, 128], strides = [1, 1, 1]} : vector<2x8x128xf32> to vector<2x1x128xf32>
    %1467 = vector.shape_cast %1466 : vector<2x1x128xf32> to vector<2x128xf32>
    %cst_266 = arith.constant dense<0.000000e+00> : vector<2x128xf32>
    %1468 = tpu.matmul %1405, %1101, %cst_266 {dimension_numbers = #tpu.dot_dimension_numbers<[1], [0], [0], [1], [0, 0, 1, 1], [], []>} : vector<2x32xf32>, vector<32x128xf32>, vector<2x128xf32> -> vector<2x128xf32>
    %1469 = arith.addf %1467, %1468 : vector<2x128xf32>
    %1470 = vector.extract_strided_slice %1469 {offsets = [0, 0], sizes = [2, 32], strides = [1, 1]} : vector<2x128xf32> to vector<2x32xf32>
    %1471 = arith.negf %1470 : vector<2x32xf32>
    %1472 = math.exp %1471 : vector<2x32xf32>
    %cst_267 = arith.constant 1.000000e+00 : f32
    %1473 = vector.broadcast %cst_267 : f32 to vector<2x32xf32>
    %1474 = arith.addf %1473, %1472 : vector<2x32xf32>
    %1475 = arith.divf %1473, %1474 : vector<2x32xf32>
    %1476 = vector.extract_strided_slice %1469 {offsets = [0, 32], sizes = [2, 32], strides = [1, 1]} : vector<2x128xf32> to vector<2x32xf32>
    %1477 = arith.negf %1476 : vector<2x32xf32>
    %1478 = math.exp %1477 : vector<2x32xf32>
    %cst_268 = arith.constant 1.000000e+00 : f32
    %1479 = vector.broadcast %cst_268 : f32 to vector<2x32xf32>
    %1480 = arith.addf %1479, %1478 : vector<2x32xf32>
    %1481 = arith.divf %1479, %1480 : vector<2x32xf32>
    %1482 = vector.extract_strided_slice %1469 {offsets = [0, 64], sizes = [2, 32], strides = [1, 1]} : vector<2x128xf32> to vector<2x32xf32>
    %1483 = math.tanh %1482 : vector<2x32xf32>
    %1484 = vector.extract_strided_slice %1469 {offsets = [0, 96], sizes = [2, 32], strides = [1, 1]} : vector<2x128xf32> to vector<2x32xf32>
    %1485 = arith.negf %1484 : vector<2x32xf32>
    %1486 = math.exp %1485 : vector<2x32xf32>
    %cst_269 = arith.constant 1.000000e+00 : f32
    %1487 = vector.broadcast %cst_269 : f32 to vector<2x32xf32>
    %1488 = arith.addf %1487, %1486 : vector<2x32xf32>
    %1489 = arith.divf %1487, %1488 : vector<2x32xf32>
    %1490 = arith.mulf %1481, %1403 : vector<2x32xf32>
    %1491 = arith.mulf %1475, %1483 : vector<2x32xf32>
    %1492 = arith.addf %1490, %1491 : vector<2x32xf32>
    %1493 = math.tanh %1492 : vector<2x32xf32>
    %1494 = arith.mulf %1489, %1493 : vector<2x32xf32>
    %1495 = tpu.concatenate %1494, %1434 in 1 : vector<2x32xf32>, vector<2x32xf32> -> vector<2x64xf32>
    %cst_270 = arith.constant dense<0.000000e+00> : vector<2x128xf32>
    %1496 = tpu.matmul %1495, %1103, %cst_270 {dimension_numbers = #tpu.dot_dimension_numbers<[1], [0], [0], [1], [0, 0, 1, 1], [], []>} : vector<2x64xf32>, vector<64x128xf32>, vector<2x128xf32> -> vector<2x128xf32>
    %1497 = vector.broadcast %1107 : vector<1x128xf32> to vector<2x128xf32>
    %1498 = arith.addf %1496, %1497 : vector<2x128xf32>
    %1499 = vector.extract_strided_slice %1498 {offsets = [0, 0], sizes = [2, 32], strides = [1, 1]} : vector<2x128xf32> to vector<2x32xf32>
    %1500 = arith.negf %1499 : vector<2x32xf32>
    %1501 = math.exp %1500 : vector<2x32xf32>
    %cst_271 = arith.constant 1.000000e+00 : f32
    %1502 = vector.broadcast %cst_271 : f32 to vector<2x32xf32>
    %1503 = arith.addf %1502, %1501 : vector<2x32xf32>
    %1504 = arith.divf %1502, %1503 : vector<2x32xf32>
    %1505 = vector.extract_strided_slice %1498 {offsets = [0, 32], sizes = [2, 32], strides = [1, 1]} : vector<2x128xf32> to vector<2x32xf32>
    %1506 = arith.negf %1505 : vector<2x32xf32>
    %1507 = math.exp %1506 : vector<2x32xf32>
    %cst_272 = arith.constant 1.000000e+00 : f32
    %1508 = vector.broadcast %cst_272 : f32 to vector<2x32xf32>
    %1509 = arith.addf %1508, %1507 : vector<2x32xf32>
    %1510 = arith.divf %1508, %1509 : vector<2x32xf32>
    %1511 = vector.extract_strided_slice %1498 {offsets = [0, 64], sizes = [2, 32], strides = [1, 1]} : vector<2x128xf32> to vector<2x32xf32>
    %1512 = math.tanh %1511 : vector<2x32xf32>
    %1513 = vector.extract_strided_slice %1498 {offsets = [0, 96], sizes = [2, 32], strides = [1, 1]} : vector<2x128xf32> to vector<2x32xf32>
    %1514 = arith.negf %1513 : vector<2x32xf32>
    %1515 = math.exp %1514 : vector<2x32xf32>
    %cst_273 = arith.constant 1.000000e+00 : f32
    %1516 = vector.broadcast %cst_273 : f32 to vector<2x32xf32>
    %1517 = arith.addf %1516, %1515 : vector<2x32xf32>
    %1518 = arith.divf %1516, %1517 : vector<2x32xf32>
    %1519 = arith.mulf %1510, %1432 : vector<2x32xf32>
    %1520 = arith.mulf %1504, %1512 : vector<2x32xf32>
    %1521 = arith.addf %1519, %1520 : vector<2x32xf32>
    %1522 = math.tanh %1521 : vector<2x32xf32>
    %1523 = arith.mulf %1518, %1522 : vector<2x32xf32>
    %1524 = tpu.concatenate %1523, %1463 in 1 : vector<2x32xf32>, vector<2x32xf32> -> vector<2x64xf32>
    %cst_274 = arith.constant dense<0.000000e+00> : vector<2x128xf32>
    %1525 = tpu.matmul %1524, %1105, %cst_274 {dimension_numbers = #tpu.dot_dimension_numbers<[1], [0], [0], [1], [0, 0, 1, 1], [], []>} : vector<2x64xf32>, vector<64x128xf32>, vector<2x128xf32> -> vector<2x128xf32>
    %1526 = vector.broadcast %1109 : vector<1x128xf32> to vector<2x128xf32>
    %1527 = arith.addf %1525, %1526 : vector<2x128xf32>
    %1528 = vector.extract_strided_slice %1527 {offsets = [0, 0], sizes = [2, 32], strides = [1, 1]} : vector<2x128xf32> to vector<2x32xf32>
    %1529 = arith.negf %1528 : vector<2x32xf32>
    %1530 = math.exp %1529 : vector<2x32xf32>
    %cst_275 = arith.constant 1.000000e+00 : f32
    %1531 = vector.broadcast %cst_275 : f32 to vector<2x32xf32>
    %1532 = arith.addf %1531, %1530 : vector<2x32xf32>
    %1533 = arith.divf %1531, %1532 : vector<2x32xf32>
    %1534 = vector.extract_strided_slice %1527 {offsets = [0, 32], sizes = [2, 32], strides = [1, 1]} : vector<2x128xf32> to vector<2x32xf32>
    %1535 = arith.negf %1534 : vector<2x32xf32>
    %1536 = math.exp %1535 : vector<2x32xf32>
    %cst_276 = arith.constant 1.000000e+00 : f32
    %1537 = vector.broadcast %cst_276 : f32 to vector<2x32xf32>
    %1538 = arith.addf %1537, %1536 : vector<2x32xf32>
    %1539 = arith.divf %1537, %1538 : vector<2x32xf32>
    %1540 = vector.extract_strided_slice %1527 {offsets = [0, 64], sizes = [2, 32], strides = [1, 1]} : vector<2x128xf32> to vector<2x32xf32>
    %1541 = math.tanh %1540 : vector<2x32xf32>
    %1542 = vector.extract_strided_slice %1527 {offsets = [0, 96], sizes = [2, 32], strides = [1, 1]} : vector<2x128xf32> to vector<2x32xf32>
    %1543 = arith.negf %1542 : vector<2x32xf32>
    %1544 = math.exp %1543 : vector<2x32xf32>
    %cst_277 = arith.constant 1.000000e+00 : f32
    %1545 = vector.broadcast %cst_277 : f32 to vector<2x32xf32>
    %1546 = arith.addf %1545, %1544 : vector<2x32xf32>
    %1547 = arith.divf %1545, %1546 : vector<2x32xf32>
    %1548 = arith.mulf %1539, %1461 : vector<2x32xf32>
    %1549 = arith.mulf %1533, %1541 : vector<2x32xf32>
    %1550 = arith.addf %1548, %1549 : vector<2x32xf32>
    %1551 = math.tanh %1550 : vector<2x32xf32>
    %1552 = arith.mulf %1547, %1551 : vector<2x32xf32>
    %1553 = vector.shape_cast %1552 : vector<2x32xf32> to vector<2x1x32xf32>
    %c0_278 = arith.constant 0 : index
    %c4 = arith.constant 4 : index
    %c0_279 = arith.constant 0 : index
    %1554 = vector.load %arg23[%c0_278, %c4, %c0_279] : memref<2x8x32xf32, #tpu.memory_space<vmem>>, vector<2x1x32xf32>
    tpu.vector_store %arg23[%c0_278, %c4, %c0_279], %1553 {strides = array<i32>} : memref<2x8x32xf32, #tpu.memory_space<vmem>>, vector<2x1x32xf32>,
    %1555 = vector.extract_strided_slice %29 {offsets = [0, 5, 0], sizes = [2, 1, 128], strides = [1, 1, 1]} : vector<2x8x128xf32> to vector<2x1x128xf32>
    %1556 = vector.shape_cast %1555 : vector<2x1x128xf32> to vector<2x128xf32>
    %cst_280 = arith.constant dense<0.000000e+00> : vector<2x128xf32>
    %1557 = tpu.matmul %1494, %1101, %cst_280 {dimension_numbers = #tpu.dot_dimension_numbers<[1], [0], [0], [1], [0, 0, 1, 1], [], []>} : vector<2x32xf32>, vector<32x128xf32>, vector<2x128xf32> -> vector<2x128xf32>
    %1558 = arith.addf %1556, %1557 : vector<2x128xf32>
    %1559 = vector.extract_strided_slice %1558 {offsets = [0, 0], sizes = [2, 32], strides = [1, 1]} : vector<2x128xf32> to vector<2x32xf32>
    %1560 = arith.negf %1559 : vector<2x32xf32>
    %1561 = math.exp %1560 : vector<2x32xf32>
    %cst_281 = arith.constant 1.000000e+00 : f32
    %1562 = vector.broadcast %cst_281 : f32 to vector<2x32xf32>
    %1563 = arith.addf %1562, %1561 : vector<2x32xf32>
    %1564 = arith.divf %1562, %1563 : vector<2x32xf32>
    %1565 = vector.extract_strided_slice %1558 {offsets = [0, 32], sizes = [2, 32], strides = [1, 1]} : vector<2x128xf32> to vector<2x32xf32>
    %1566 = arith.negf %1565 : vector<2x32xf32>
    %1567 = math.exp %1566 : vector<2x32xf32>
    %cst_282 = arith.constant 1.000000e+00 : f32
    %1568 = vector.broadcast %cst_282 : f32 to vector<2x32xf32>
    %1569 = arith.addf %1568, %1567 : vector<2x32xf32>
    %1570 = arith.divf %1568, %1569 : vector<2x32xf32>
    %1571 = vector.extract_strided_slice %1558 {offsets = [0, 64], sizes = [2, 32], strides = [1, 1]} : vector<2x128xf32> to vector<2x32xf32>
    %1572 = math.tanh %1571 : vector<2x32xf32>
    %1573 = vector.extract_strided_slice %1558 {offsets = [0, 96], sizes = [2, 32], strides = [1, 1]} : vector<2x128xf32> to vector<2x32xf32>
    %1574 = arith.negf %1573 : vector<2x32xf32>
    %1575 = math.exp %1574 : vector<2x32xf32>
    %cst_283 = arith.constant 1.000000e+00 : f32
    %1576 = vector.broadcast %cst_283 : f32 to vector<2x32xf32>
    %1577 = arith.addf %1576, %1575 : vector<2x32xf32>
    %1578 = arith.divf %1576, %1577 : vector<2x32xf32>
    %1579 = arith.mulf %1570, %1492 : vector<2x32xf32>
    %1580 = arith.mulf %1564, %1572 : vector<2x32xf32>
    %1581 = arith.addf %1579, %1580 : vector<2x32xf32>
    %1582 = math.tanh %1581 : vector<2x32xf32>
    %1583 = arith.mulf %1578, %1582 : vector<2x32xf32>
    %1584 = tpu.concatenate %1583, %1523 in 1 : vector<2x32xf32>, vector<2x32xf32> -> vector<2x64xf32>
    %cst_284 = arith.constant dense<0.000000e+00> : vector<2x128xf32>
    %1585 = tpu.matmul %1584, %1103, %cst_284 {dimension_numbers = #tpu.dot_dimension_numbers<[1], [0], [0], [1], [0, 0, 1, 1], [], []>} : vector<2x64xf32>, vector<64x128xf32>, vector<2x128xf32> -> vector<2x128xf32>
    %1586 = vector.broadcast %1107 : vector<1x128xf32> to vector<2x128xf32>
    %1587 = arith.addf %1585, %1586 : vector<2x128xf32>
    %1588 = vector.extract_strided_slice %1587 {offsets = [0, 0], sizes = [2, 32], strides = [1, 1]} : vector<2x128xf32> to vector<2x32xf32>
    %1589 = arith.negf %1588 : vector<2x32xf32>
    %1590 = math.exp %1589 : vector<2x32xf32>
    %cst_285 = arith.constant 1.000000e+00 : f32
    %1591 = vector.broadcast %cst_285 : f32 to vector<2x32xf32>
    %1592 = arith.addf %1591, %1590 : vector<2x32xf32>
    %1593 = arith.divf %1591, %1592 : vector<2x32xf32>
    %1594 = vector.extract_strided_slice %1587 {offsets = [0, 32], sizes = [2, 32], strides = [1, 1]} : vector<2x128xf32> to vector<2x32xf32>
    %1595 = arith.negf %1594 : vector<2x32xf32>
    %1596 = math.exp %1595 : vector<2x32xf32>
    %cst_286 = arith.constant 1.000000e+00 : f32
    %1597 = vector.broadcast %cst_286 : f32 to vector<2x32xf32>
    %1598 = arith.addf %1597, %1596 : vector<2x32xf32>
    %1599 = arith.divf %1597, %1598 : vector<2x32xf32>
    %1600 = vector.extract_strided_slice %1587 {offsets = [0, 64], sizes = [2, 32], strides = [1, 1]} : vector<2x128xf32> to vector<2x32xf32>
    %1601 = math.tanh %1600 : vector<2x32xf32>
    %1602 = vector.extract_strided_slice %1587 {offsets = [0, 96], sizes = [2, 32], strides = [1, 1]} : vector<2x128xf32> to vector<2x32xf32>
    %1603 = arith.negf %1602 : vector<2x32xf32>
    %1604 = math.exp %1603 : vector<2x32xf32>
    %cst_287 = arith.constant 1.000000e+00 : f32
    %1605 = vector.broadcast %cst_287 : f32 to vector<2x32xf32>
    %1606 = arith.addf %1605, %1604 : vector<2x32xf32>
    %1607 = arith.divf %1605, %1606 : vector<2x32xf32>
    %1608 = arith.mulf %1599, %1521 : vector<2x32xf32>
    %1609 = arith.mulf %1593, %1601 : vector<2x32xf32>
    %1610 = arith.addf %1608, %1609 : vector<2x32xf32>
    %1611 = math.tanh %1610 : vector<2x32xf32>
    %1612 = arith.mulf %1607, %1611 : vector<2x32xf32>
    %1613 = tpu.concatenate %1612, %1552 in 1 : vector<2x32xf32>, vector<2x32xf32> -> vector<2x64xf32>
    %cst_288 = arith.constant dense<0.000000e+00> : vector<2x128xf32>
    %1614 = tpu.matmul %1613, %1105, %cst_288 {dimension_numbers = #tpu.dot_dimension_numbers<[1], [0], [0], [1], [0, 0, 1, 1], [], []>} : vector<2x64xf32>, vector<64x128xf32>, vector<2x128xf32> -> vector<2x128xf32>
    %1615 = vector.broadcast %1109 : vector<1x128xf32> to vector<2x128xf32>
    %1616 = arith.addf %1614, %1615 : vector<2x128xf32>
    %1617 = vector.extract_strided_slice %1616 {offsets = [0, 0], sizes = [2, 32], strides = [1, 1]} : vector<2x128xf32> to vector<2x32xf32>
    %1618 = arith.negf %1617 : vector<2x32xf32>
    %1619 = math.exp %1618 : vector<2x32xf32>
    %cst_289 = arith.constant 1.000000e+00 : f32
    %1620 = vector.broadcast %cst_289 : f32 to vector<2x32xf32>
    %1621 = arith.addf %1620, %1619 : vector<2x32xf32>
    %1622 = arith.divf %1620, %1621 : vector<2x32xf32>
    %1623 = vector.extract_strided_slice %1616 {offsets = [0, 32], sizes = [2, 32], strides = [1, 1]} : vector<2x128xf32> to vector<2x32xf32>
    %1624 = arith.negf %1623 : vector<2x32xf32>
    %1625 = math.exp %1624 : vector<2x32xf32>
    %cst_290 = arith.constant 1.000000e+00 : f32
    %1626 = vector.broadcast %cst_290 : f32 to vector<2x32xf32>
    %1627 = arith.addf %1626, %1625 : vector<2x32xf32>
    %1628 = arith.divf %1626, %1627 : vector<2x32xf32>
    %1629 = vector.extract_strided_slice %1616 {offsets = [0, 64], sizes = [2, 32], strides = [1, 1]} : vector<2x128xf32> to vector<2x32xf32>
    %1630 = math.tanh %1629 : vector<2x32xf32>
    %1631 = vector.extract_strided_slice %1616 {offsets = [0, 96], sizes = [2, 32], strides = [1, 1]} : vector<2x128xf32> to vector<2x32xf32>
    %1632 = arith.negf %1631 : vector<2x32xf32>
    %1633 = math.exp %1632 : vector<2x32xf32>
    %cst_291 = arith.constant 1.000000e+00 : f32
    %1634 = vector.broadcast %cst_291 : f32 to vector<2x32xf32>
    %1635 = arith.addf %1634, %1633 : vector<2x32xf32>
    %1636 = arith.divf %1634, %1635 : vector<2x32xf32>
    %1637 = arith.mulf %1628, %1550 : vector<2x32xf32>
    %1638 = arith.mulf %1622, %1630 : vector<2x32xf32>
    %1639 = arith.addf %1637, %1638 : vector<2x32xf32>
    %1640 = math.tanh %1639 : vector<2x32xf32>
    %1641 = arith.mulf %1636, %1640 : vector<2x32xf32>
    %1642 = vector.shape_cast %1641 : vector<2x32xf32> to vector<2x1x32xf32>
    %c0_292 = arith.constant 0 : index
    %c5 = arith.constant 5 : index
    %c0_293 = arith.constant 0 : index
    %1643 = vector.load %arg23[%c0_292, %c5, %c0_293] : memref<2x8x32xf32, #tpu.memory_space<vmem>>, vector<2x1x32xf32>
    tpu.vector_store %arg23[%c0_292, %c5, %c0_293], %1642 {strides = array<i32>} : memref<2x8x32xf32, #tpu.memory_space<vmem>>, vector<2x1x32xf32>,
    %1644 = vector.extract_strided_slice %29 {offsets = [0, 6, 0], sizes = [2, 1, 128], strides = [1, 1, 1]} : vector<2x8x128xf32> to vector<2x1x128xf32>
    %1645 = vector.shape_cast %1644 : vector<2x1x128xf32> to vector<2x128xf32>
    %cst_294 = arith.constant dense<0.000000e+00> : vector<2x128xf32>
    %1646 = tpu.matmul %1583, %1101, %cst_294 {dimension_numbers = #tpu.dot_dimension_numbers<[1], [0], [0], [1], [0, 0, 1, 1], [], []>} : vector<2x32xf32>, vector<32x128xf32>, vector<2x128xf32> -> vector<2x128xf32>
    %1647 = arith.addf %1645, %1646 : vector<2x128xf32>
    %1648 = vector.extract_strided_slice %1647 {offsets = [0, 0], sizes = [2, 32], strides = [1, 1]} : vector<2x128xf32> to vector<2x32xf32>
    %1649 = arith.negf %1648 : vector<2x32xf32>
    %1650 = math.exp %1649 : vector<2x32xf32>
    %cst_295 = arith.constant 1.000000e+00 : f32
    %1651 = vector.broadcast %cst_295 : f32 to vector<2x32xf32>
    %1652 = arith.addf %1651, %1650 : vector<2x32xf32>
    %1653 = arith.divf %1651, %1652 : vector<2x32xf32>
    %1654 = vector.extract_strided_slice %1647 {offsets = [0, 32], sizes = [2, 32], strides = [1, 1]} : vector<2x128xf32> to vector<2x32xf32>
    %1655 = arith.negf %1654 : vector<2x32xf32>
    %1656 = math.exp %1655 : vector<2x32xf32>
    %cst_296 = arith.constant 1.000000e+00 : f32
    %1657 = vector.broadcast %cst_296 : f32 to vector<2x32xf32>
    %1658 = arith.addf %1657, %1656 : vector<2x32xf32>
    %1659 = arith.divf %1657, %1658 : vector<2x32xf32>
    %1660 = vector.extract_strided_slice %1647 {offsets = [0, 64], sizes = [2, 32], strides = [1, 1]} : vector<2x128xf32> to vector<2x32xf32>
    %1661 = math.tanh %1660 : vector<2x32xf32>
    %1662 = vector.extract_strided_slice %1647 {offsets = [0, 96], sizes = [2, 32], strides = [1, 1]} : vector<2x128xf32> to vector<2x32xf32>
    %1663 = arith.negf %1662 : vector<2x32xf32>
    %1664 = math.exp %1663 : vector<2x32xf32>
    %cst_297 = arith.constant 1.000000e+00 : f32
    %1665 = vector.broadcast %cst_297 : f32 to vector<2x32xf32>
    %1666 = arith.addf %1665, %1664 : vector<2x32xf32>
    %1667 = arith.divf %1665, %1666 : vector<2x32xf32>
    %1668 = arith.mulf %1659, %1581 : vector<2x32xf32>
    %1669 = arith.mulf %1653, %1661 : vector<2x32xf32>
    %1670 = arith.addf %1668, %1669 : vector<2x32xf32>
    %1671 = math.tanh %1670 : vector<2x32xf32>
    %1672 = arith.mulf %1667, %1671 : vector<2x32xf32>
    %1673 = tpu.concatenate %1672, %1612 in 1 : vector<2x32xf32>, vector<2x32xf32> -> vector<2x64xf32>
    %cst_298 = arith.constant dense<0.000000e+00> : vector<2x128xf32>
    %1674 = tpu.matmul %1673, %1103, %cst_298 {dimension_numbers = #tpu.dot_dimension_numbers<[1], [0], [0], [1], [0, 0, 1, 1], [], []>} : vector<2x64xf32>, vector<64x128xf32>, vector<2x128xf32> -> vector<2x128xf32>
    %1675 = vector.broadcast %1107 : vector<1x128xf32> to vector<2x128xf32>
    %1676 = arith.addf %1674, %1675 : vector<2x128xf32>
    %1677 = vector.extract_strided_slice %1676 {offsets = [0, 0], sizes = [2, 32], strides = [1, 1]} : vector<2x128xf32> to vector<2x32xf32>
    %1678 = arith.negf %1677 : vector<2x32xf32>
    %1679 = math.exp %1678 : vector<2x32xf32>
    %cst_299 = arith.constant 1.000000e+00 : f32
    %1680 = vector.broadcast %cst_299 : f32 to vector<2x32xf32>
    %1681 = arith.addf %1680, %1679 : vector<2x32xf32>
    %1682 = arith.divf %1680, %1681 : vector<2x32xf32>
    %1683 = vector.extract_strided_slice %1676 {offsets = [0, 32], sizes = [2, 32], strides = [1, 1]} : vector<2x128xf32> to vector<2x32xf32>
    %1684 = arith.negf %1683 : vector<2x32xf32>
    %1685 = math.exp %1684 : vector<2x32xf32>
    %cst_300 = arith.constant 1.000000e+00 : f32
    %1686 = vector.broadcast %cst_300 : f32 to vector<2x32xf32>
    %1687 = arith.addf %1686, %1685 : vector<2x32xf32>
    %1688 = arith.divf %1686, %1687 : vector<2x32xf32>
    %1689 = vector.extract_strided_slice %1676 {offsets = [0, 64], sizes = [2, 32], strides = [1, 1]} : vector<2x128xf32> to vector<2x32xf32>
    %1690 = math.tanh %1689 : vector<2x32xf32>
    %1691 = vector.extract_strided_slice %1676 {offsets = [0, 96], sizes = [2, 32], strides = [1, 1]} : vector<2x128xf32> to vector<2x32xf32>
    %1692 = arith.negf %1691 : vector<2x32xf32>
    %1693 = math.exp %1692 : vector<2x32xf32>
    %cst_301 = arith.constant 1.000000e+00 : f32
    %1694 = vector.broadcast %cst_301 : f32 to vector<2x32xf32>
    %1695 = arith.addf %1694, %1693 : vector<2x32xf32>
    %1696 = arith.divf %1694, %1695 : vector<2x32xf32>
    %1697 = arith.mulf %1688, %1610 : vector<2x32xf32>
    %1698 = arith.mulf %1682, %1690 : vector<2x32xf32>
    %1699 = arith.addf %1697, %1698 : vector<2x32xf32>
    %1700 = math.tanh %1699 : vector<2x32xf32>
    %1701 = arith.mulf %1696, %1700 : vector<2x32xf32>
    %1702 = tpu.concatenate %1701, %1641 in 1 : vector<2x32xf32>, vector<2x32xf32> -> vector<2x64xf32>
    %cst_302 = arith.constant dense<0.000000e+00> : vector<2x128xf32>
    %1703 = tpu.matmul %1702, %1105, %cst_302 {dimension_numbers = #tpu.dot_dimension_numbers<[1], [0], [0], [1], [0, 0, 1, 1], [], []>} : vector<2x64xf32>, vector<64x128xf32>, vector<2x128xf32> -> vector<2x128xf32>
    %1704 = vector.broadcast %1109 : vector<1x128xf32> to vector<2x128xf32>
    %1705 = arith.addf %1703, %1704 : vector<2x128xf32>
    %1706 = vector.extract_strided_slice %1705 {offsets = [0, 0], sizes = [2, 32], strides = [1, 1]} : vector<2x128xf32> to vector<2x32xf32>
    %1707 = arith.negf %1706 : vector<2x32xf32>
    %1708 = math.exp %1707 : vector<2x32xf32>
    %cst_303 = arith.constant 1.000000e+00 : f32
    %1709 = vector.broadcast %cst_303 : f32 to vector<2x32xf32>
    %1710 = arith.addf %1709, %1708 : vector<2x32xf32>
    %1711 = arith.divf %1709, %1710 : vector<2x32xf32>
    %1712 = vector.extract_strided_slice %1705 {offsets = [0, 32], sizes = [2, 32], strides = [1, 1]} : vector<2x128xf32> to vector<2x32xf32>
    %1713 = arith.negf %1712 : vector<2x32xf32>
    %1714 = math.exp %1713 : vector<2x32xf32>
    %cst_304 = arith.constant 1.000000e+00 : f32
    %1715 = vector.broadcast %cst_304 : f32 to vector<2x32xf32>
    %1716 = arith.addf %1715, %1714 : vector<2x32xf32>
    %1717 = arith.divf %1715, %1716 : vector<2x32xf32>
    %1718 = vector.extract_strided_slice %1705 {offsets = [0, 64], sizes = [2, 32], strides = [1, 1]} : vector<2x128xf32> to vector<2x32xf32>
    %1719 = math.tanh %1718 : vector<2x32xf32>
    %1720 = vector.extract_strided_slice %1705 {offsets = [0, 96], sizes = [2, 32], strides = [1, 1]} : vector<2x128xf32> to vector<2x32xf32>
    %1721 = arith.negf %1720 : vector<2x32xf32>
    %1722 = math.exp %1721 : vector<2x32xf32>
    %cst_305 = arith.constant 1.000000e+00 : f32
    %1723 = vector.broadcast %cst_305 : f32 to vector<2x32xf32>
    %1724 = arith.addf %1723, %1722 : vector<2x32xf32>
    %1725 = arith.divf %1723, %1724 : vector<2x32xf32>
    %1726 = arith.mulf %1717, %1639 : vector<2x32xf32>
    %1727 = arith.mulf %1711, %1719 : vector<2x32xf32>
    %1728 = arith.addf %1726, %1727 : vector<2x32xf32>
    %1729 = math.tanh %1728 : vector<2x32xf32>
    %1730 = arith.mulf %1725, %1729 : vector<2x32xf32>
    %1731 = vector.shape_cast %1730 : vector<2x32xf32> to vector<2x1x32xf32>
    %c0_306 = arith.constant 0 : index
    %c6 = arith.constant 6 : index
    %c0_307 = arith.constant 0 : index
    %1732 = vector.load %arg23[%c0_306, %c6, %c0_307] : memref<2x8x32xf32, #tpu.memory_space<vmem>>, vector<2x1x32xf32>
    tpu.vector_store %arg23[%c0_306, %c6, %c0_307], %1731 {strides = array<i32>} : memref<2x8x32xf32, #tpu.memory_space<vmem>>, vector<2x1x32xf32>,
    %1733 = vector.extract_strided_slice %29 {offsets = [0, 7, 0], sizes = [2, 1, 128], strides = [1, 1, 1]} : vector<2x8x128xf32> to vector<2x1x128xf32>
    %1734 = vector.shape_cast %1733 : vector<2x1x128xf32> to vector<2x128xf32>
    %cst_308 = arith.constant dense<0.000000e+00> : vector<2x128xf32>
    %1735 = tpu.matmul %1672, %1101, %cst_308 {dimension_numbers = #tpu.dot_dimension_numbers<[1], [0], [0], [1], [0, 0, 1, 1], [], []>} : vector<2x32xf32>, vector<32x128xf32>, vector<2x128xf32> -> vector<2x128xf32>
    %1736 = arith.addf %1734, %1735 : vector<2x128xf32>
    %1737 = vector.extract_strided_slice %1736 {offsets = [0, 0], sizes = [2, 32], strides = [1, 1]} : vector<2x128xf32> to vector<2x32xf32>
    %1738 = arith.negf %1737 : vector<2x32xf32>
    %1739 = math.exp %1738 : vector<2x32xf32>
    %cst_309 = arith.constant 1.000000e+00 : f32
    %1740 = vector.broadcast %cst_309 : f32 to vector<2x32xf32>
    %1741 = arith.addf %1740, %1739 : vector<2x32xf32>
    %1742 = arith.divf %1740, %1741 : vector<2x32xf32>
    %1743 = vector.extract_strided_slice %1736 {offsets = [0, 32], sizes = [2, 32], strides = [1, 1]} : vector<2x128xf32> to vector<2x32xf32>
    %1744 = arith.negf %1743 : vector<2x32xf32>
    %1745 = math.exp %1744 : vector<2x32xf32>
    %cst_310 = arith.constant 1.000000e+00 : f32
    %1746 = vector.broadcast %cst_310 : f32 to vector<2x32xf32>
    %1747 = arith.addf %1746, %1745 : vector<2x32xf32>
    %1748 = arith.divf %1746, %1747 : vector<2x32xf32>
    %1749 = vector.extract_strided_slice %1736 {offsets = [0, 64], sizes = [2, 32], strides = [1, 1]} : vector<2x128xf32> to vector<2x32xf32>
    %1750 = math.tanh %1749 : vector<2x32xf32>
    %1751 = vector.extract_strided_slice %1736 {offsets = [0, 96], sizes = [2, 32], strides = [1, 1]} : vector<2x128xf32> to vector<2x32xf32>
    %1752 = arith.negf %1751 : vector<2x32xf32>
    %1753 = math.exp %1752 : vector<2x32xf32>
    %cst_311 = arith.constant 1.000000e+00 : f32
    %1754 = vector.broadcast %cst_311 : f32 to vector<2x32xf32>
    %1755 = arith.addf %1754, %1753 : vector<2x32xf32>
    %1756 = arith.divf %1754, %1755 : vector<2x32xf32>
    %1757 = arith.mulf %1748, %1670 : vector<2x32xf32>
    %1758 = arith.mulf %1742, %1750 : vector<2x32xf32>
    %1759 = arith.addf %1757, %1758 : vector<2x32xf32>
    %1760 = math.tanh %1759 : vector<2x32xf32>
    %1761 = arith.mulf %1756, %1760 : vector<2x32xf32>
    %1762 = tpu.concatenate %1761, %1701 in 1 : vector<2x32xf32>, vector<2x32xf32> -> vector<2x64xf32>
    %cst_312 = arith.constant dense<0.000000e+00> : vector<2x128xf32>
    %1763 = tpu.matmul %1762, %1103, %cst_312 {dimension_numbers = #tpu.dot_dimension_numbers<[1], [0], [0], [1], [0, 0, 1, 1], [], []>} : vector<2x64xf32>, vector<64x128xf32>, vector<2x128xf32> -> vector<2x128xf32>
    %1764 = vector.broadcast %1107 : vector<1x128xf32> to vector<2x128xf32>
    %1765 = arith.addf %1763, %1764 : vector<2x128xf32>
    %1766 = vector.extract_strided_slice %1765 {offsets = [0, 0], sizes = [2, 32], strides = [1, 1]} : vector<2x128xf32> to vector<2x32xf32>
    %1767 = arith.negf %1766 : vector<2x32xf32>
    %1768 = math.exp %1767 : vector<2x32xf32>
    %cst_313 = arith.constant 1.000000e+00 : f32
    %1769 = vector.broadcast %cst_313 : f32 to vector<2x32xf32>
    %1770 = arith.addf %1769, %1768 : vector<2x32xf32>
    %1771 = arith.divf %1769, %1770 : vector<2x32xf32>
    %1772 = vector.extract_strided_slice %1765 {offsets = [0, 32], sizes = [2, 32], strides = [1, 1]} : vector<2x128xf32> to vector<2x32xf32>
    %1773 = arith.negf %1772 : vector<2x32xf32>
    %1774 = math.exp %1773 : vector<2x32xf32>
    %cst_314 = arith.constant 1.000000e+00 : f32
    %1775 = vector.broadcast %cst_314 : f32 to vector<2x32xf32>
    %1776 = arith.addf %1775, %1774 : vector<2x32xf32>
    %1777 = arith.divf %1775, %1776 : vector<2x32xf32>
    %1778 = vector.extract_strided_slice %1765 {offsets = [0, 64], sizes = [2, 32], strides = [1, 1]} : vector<2x128xf32> to vector<2x32xf32>
    %1779 = math.tanh %1778 : vector<2x32xf32>
    %1780 = vector.extract_strided_slice %1765 {offsets = [0, 96], sizes = [2, 32], strides = [1, 1]} : vector<2x128xf32> to vector<2x32xf32>
    %1781 = arith.negf %1780 : vector<2x32xf32>
    %1782 = math.exp %1781 : vector<2x32xf32>
    %cst_315 = arith.constant 1.000000e+00 : f32
    %1783 = vector.broadcast %cst_315 : f32 to vector<2x32xf32>
    %1784 = arith.addf %1783, %1782 : vector<2x32xf32>
    %1785 = arith.divf %1783, %1784 : vector<2x32xf32>
    %1786 = arith.mulf %1777, %1699 : vector<2x32xf32>
    %1787 = arith.mulf %1771, %1779 : vector<2x32xf32>
    %1788 = arith.addf %1786, %1787 : vector<2x32xf32>
    %1789 = math.tanh %1788 : vector<2x32xf32>
    %1790 = arith.mulf %1785, %1789 : vector<2x32xf32>
    %1791 = tpu.concatenate %1790, %1730 in 1 : vector<2x32xf32>, vector<2x32xf32> -> vector<2x64xf32>
    %cst_316 = arith.constant dense<0.000000e+00> : vector<2x128xf32>
    %1792 = tpu.matmul %1791, %1105, %cst_316 {dimension_numbers = #tpu.dot_dimension_numbers<[1], [0], [0], [1], [0, 0, 1, 1], [], []>} : vector<2x64xf32>, vector<64x128xf32>, vector<2x128xf32> -> vector<2x128xf32>
    %1793 = vector.broadcast %1109 : vector<1x128xf32> to vector<2x128xf32>
    %1794 = arith.addf %1792, %1793 : vector<2x128xf32>
    %1795 = vector.extract_strided_slice %1794 {offsets = [0, 0], sizes = [2, 32], strides = [1, 1]} : vector<2x128xf32> to vector<2x32xf32>
    %1796 = arith.negf %1795 : vector<2x32xf32>
    %1797 = math.exp %1796 : vector<2x32xf32>
    %cst_317 = arith.constant 1.000000e+00 : f32
    %1798 = vector.broadcast %cst_317 : f32 to vector<2x32xf32>
    %1799 = arith.addf %1798, %1797 : vector<2x32xf32>
    %1800 = arith.divf %1798, %1799 : vector<2x32xf32>
    %1801 = vector.extract_strided_slice %1794 {offsets = [0, 32], sizes = [2, 32], strides = [1, 1]} : vector<2x128xf32> to vector<2x32xf32>
    %1802 = arith.negf %1801 : vector<2x32xf32>
    %1803 = math.exp %1802 : vector<2x32xf32>
    %cst_318 = arith.constant 1.000000e+00 : f32
    %1804 = vector.broadcast %cst_318 : f32 to vector<2x32xf32>
    %1805 = arith.addf %1804, %1803 : vector<2x32xf32>
    %1806 = arith.divf %1804, %1805 : vector<2x32xf32>
    %1807 = vector.extract_strided_slice %1794 {offsets = [0, 64], sizes = [2, 32], strides = [1, 1]} : vector<2x128xf32> to vector<2x32xf32>
    %1808 = math.tanh %1807 : vector<2x32xf32>
    %1809 = vector.extract_strided_slice %1794 {offsets = [0, 96], sizes = [2, 32], strides = [1, 1]} : vector<2x128xf32> to vector<2x32xf32>
    %1810 = arith.negf %1809 : vector<2x32xf32>
    %1811 = math.exp %1810 : vector<2x32xf32>
    %cst_319 = arith.constant 1.000000e+00 : f32
    %1812 = vector.broadcast %cst_319 : f32 to vector<2x32xf32>
    %1813 = arith.addf %1812, %1811 : vector<2x32xf32>
    %1814 = arith.divf %1812, %1813 : vector<2x32xf32>
    %1815 = arith.mulf %1806, %1728 : vector<2x32xf32>
    %1816 = arith.mulf %1800, %1808 : vector<2x32xf32>
    %1817 = arith.addf %1815, %1816 : vector<2x32xf32>
    %1818 = math.tanh %1817 : vector<2x32xf32>
    %1819 = arith.mulf %1814, %1818 : vector<2x32xf32>
    %1820 = vector.shape_cast %1819 : vector<2x32xf32> to vector<2x1x32xf32>
    %c0_320 = arith.constant 0 : index
    %c7 = arith.constant 7 : index
    %c0_321 = arith.constant 0 : index
    %1821 = vector.load %arg23[%c0_320, %c7, %c0_321] : memref<2x8x32xf32, #tpu.memory_space<vmem>>, vector<2x1x32xf32>
    tpu.vector_store %arg23[%c0_320, %c7, %c0_321], %1820 {strides = array<i32>} : memref<2x8x32xf32, #tpu.memory_space<vmem>>, vector<2x1x32xf32>,
    %c0_322 = arith.constant 0 : index
    %c0_323 = arith.constant 0 : index
    %c0_324 = arith.constant 0 : index
    %1822 = vector.load %arg23[%c0_322, %c0_323, %c0_324] : memref<2x8x32xf32, #tpu.memory_space<vmem>>, vector<2x8x32xf32>
    %1823 = vector.shape_cast %1822 : vector<2x8x32xf32> to vector<16x32xf32>
    %c0_325 = arith.constant 0 : index
    %c0_326 = arith.constant 0 : index
    %1824 = vector.load %arg18[%c0_325, %c0_326] : memref<32x64xf32, #tpu.memory_space<vmem>>, vector<32x64xf32>
    %cst_327 = arith.constant dense<0.000000e+00> : vector<16x64xf32>
    %1825 = tpu.matmul %1823, %1824, %cst_327 {dimension_numbers = #tpu.dot_dimension_numbers<[1], [0], [0], [1], [0, 0, 1, 1], [], []>} : vector<16x32xf32>, vector<32x64xf32>, vector<16x64xf32> -> vector<16x64xf32>
    %c0_328 = arith.constant 0 : index
    %c0_329 = arith.constant 0 : index
    %1826 = vector.load %arg19[%c0_328, %c0_329] : memref<1x64xf32, #tpu.memory_space<vmem>>, vector<1x64xf32>
    %1827 = vector.broadcast %1826 : vector<1x64xf32> to vector<16x64xf32>
    %1828 = arith.addf %1825, %1827 : vector<16x64xf32>
    %cst_330 = arith.constant 0.000000e+00 : f32
    %1829 = vector.broadcast %cst_330 : f32 to vector<16x64xf32>
    %1830 = arith.maximumf %1828, %1829 : vector<16x64xf32>
    %c0_331 = arith.constant 0 : index
    %c0_332 = arith.constant 0 : index
    %1831 = vector.load %arg20[%c0_331, %c0_332] : memref<64x4xf32, #tpu.memory_space<vmem>>, vector<64x4xf32>
    %cst_333 = arith.constant dense<0.000000e+00> : vector<16x4xf32>
    %1832 = tpu.matmul %1830, %1831, %cst_333 {dimension_numbers = #tpu.dot_dimension_numbers<[1], [0], [0], [1], [0, 0, 1, 1], [], []>} : vector<16x64xf32>, vector<64x4xf32>, vector<16x4xf32> -> vector<16x4xf32>
    %c0_334 = arith.constant 0 : index
    %c0_335 = arith.constant 0 : index
    %1833 = vector.load %arg21[%c0_334, %c0_335] : memref<1x4xf32, #tpu.memory_space<vmem>>, vector<1x4xf32>
    %1834 = vector.broadcast %1833 : vector<1x4xf32> to vector<16x4xf32>
    %1835 = arith.addf %1832, %1834 : vector<16x4xf32>
    %1836 = vector.extract_strided_slice %1835 {offsets = [0, 0], sizes = [16, 1], strides = [1, 1]} : vector<16x4xf32> to vector<16x1xf32>
    %1837 = vector.extract_strided_slice %1835 {offsets = [0, 1], sizes = [16, 1], strides = [1, 1]} : vector<16x4xf32> to vector<16x1xf32>
    %1838 = vector.extract_strided_slice %1835 {offsets = [0, 2], sizes = [16, 1], strides = [1, 1]} : vector<16x4xf32> to vector<16x1xf32>
    %1839 = vector.extract_strided_slice %1835 {offsets = [0, 3], sizes = [16, 1], strides = [1, 1]} : vector<16x4xf32> to vector<16x1xf32>
    %cst_336 = arith.constant 0.000000e+00 : f32
    %1840 = vector.broadcast %cst_336 : f32 to vector<16x1xf32>
    %1841 = arith.maximumf %1837, %1840 : vector<16x1xf32>
    %cst_337 = arith.constant 2.000000e+00 : f32
    %1842 = vector.broadcast %cst_337 : f32 to vector<16x1xf32>
    %1843 = arith.mulf %1842, %1837 : vector<16x1xf32>
    %1844 = math.absf %1843 : vector<16x1xf32>
    %cst_338 = arith.constant 0.000000e+00 : f32
    %1845 = vector.broadcast %cst_338 : f32 to vector<16x1xf32>
    %1846 = arith.subf %1845, %1844 : vector<16x1xf32>
    %1847 = math.exp %1846 : vector<16x1xf32>
    %cst_339 = arith.constant 1.000000e+00 : f32
    %1848 = vector.broadcast %cst_339 : f32 to vector<16x1xf32>
    %1849 = arith.addf %1848, %1847 : vector<16x1xf32>
    %1850 = math.log %1849 : vector<16x1xf32>
    %cst_340 = arith.constant 5.000000e-01 : f32
    %1851 = vector.broadcast %cst_340 : f32 to vector<16x1xf32>
    %1852 = arith.mulf %1851, %1850 : vector<16x1xf32>
    %1853 = arith.addf %1841, %1852 : vector<16x1xf32>
    %cst_341 = arith.constant 9.99999974E-6 : f32
    %1854 = vector.broadcast %cst_341 : f32 to vector<16x1xf32>
    %1855 = arith.addf %1853, %1854 : vector<16x1xf32>
    %1856 = arith.negf %1838 : vector<16x1xf32>
    %1857 = math.exp %1856 : vector<16x1xf32>
    %cst_342 = arith.constant 1.000000e+00 : f32
    %1858 = vector.broadcast %cst_342 : f32 to vector<16x1xf32>
    %1859 = arith.addf %1858, %1857 : vector<16x1xf32>
    %1860 = arith.divf %1858, %1859 : vector<16x1xf32>
    %cst_343 = arith.constant 0.999989986 : f32
    %1861 = vector.broadcast %cst_343 : f32 to vector<16x1xf32>
    %1862 = arith.mulf %1861, %1860 : vector<16x1xf32>
    %cst_344 = arith.constant 9.99999974E-6 : f32
    %1863 = vector.broadcast %cst_344 : f32 to vector<16x1xf32>
    %1864 = arith.addf %1862, %1863 : vector<16x1xf32>
    %cst_345 = arith.constant dense<0xFF800000> : vector<16xf32>
    %1865 = vector.multi_reduction <maximumf>, %1839, %cst_345 [1] : vector<16x1xf32> to vector<16xf32>
    %1866 = vector.shape_cast %1865 : vector<16xf32> to vector<16x1xf32>
    %1867 = arith.subf %1839, %1866 : vector<16x1xf32>
    %1868 = math.exp %1867 : vector<16x1xf32>
    %cst_346 = arith.constant dense<0.000000e+00> : vector<16xf32>
    %1869 = vector.multi_reduction <add>, %1868, %cst_346 [1] : vector<16x1xf32> to vector<16xf32>
    %1870 = vector.shape_cast %1869 : vector<16xf32> to vector<16x1xf32>
    %1871 = arith.divf %1868, %1870 : vector<16x1xf32>
    %cst_347 = arith.constant 0.999989986 : f32
    %1872 = vector.broadcast %cst_347 : f32 to vector<16x1xf32>
    %1873 = arith.mulf %1872, %1871 : vector<16x1xf32>
    %cst_348 = arith.constant 9.99999974E-6 : f32
    %1874 = vector.broadcast %cst_348 : f32 to vector<16x1xf32>
    %1875 = arith.addf %1873, %1874 : vector<16x1xf32>
    %1876 = tpu.concatenate %1836, %1855, %1864, %1875 in 1 : vector<16x1xf32>, vector<16x1xf32>, vector<16x1xf32>, vector<16x1xf32> -> vector<16x4xf32>
    %1877 = vector.shape_cast %1876 : vector<16x4xf32> to vector<2x8x4xf32>
    %c0_349 = arith.constant 0 : index
    %c0_350 = arith.constant 0 : index
    %c0_351 = arith.constant 0 : index
    %1878 = vector.load %arg22[%c0_349, %c0_350, %c0_351] : memref<2x8x4xf32, #tpu.memory_space<vmem>>, vector<2x8x4xf32>
    tpu.vector_store %arg22[%c0_349, %c0_350, %c0_351], %1877 {strides = array<i32>} : memref<2x8x4xf32, #tpu.memory_space<vmem>>, vector<2x8x4xf32>,
    return
  }
}

</mosaic_0001>

<bundles_post_ra>
// kernel: stacked_lstm_forward.1
= control target key start
LH: loop header
LB: loop body
LE: loop exit
PB: predicated region body
PF: predicated region fallthrough
CT: control target
= control target key end

     0   :  { %s9003_s0 = inlined_call_operand.vmem [shape: f32[2,12,6], index: 0, kind: input, shape index: {}]   ;;  %s9004_s1 = inlined_call_operand.vmem [shape: f32[2,8,4], index: 1, kind: input, shape index: {}]   ;;  %s9005_s2 = inlined_call_operand.vmem [shape: f32[6,32], index: 2, kind: input, shape index: {}]   ;;  %s9006_s3 = inlined_call_operand.vmem [shape: f32[1,32], index: 3, kind: input, shape index: {}]   ;;  %s9007_s4 = inlined_call_operand.vmem [shape: f32[32,128], index: 4, kind: input, shape index: {}]   ;;  %s9008_s5 = inlined_call_operand.vmem [shape: f32[1,128], index: 5, kind: input, shape index: {}]   ;;  %s9009_s6 = inlined_call_operand.vmem [shape: f32[32,128], index: 6, kind: input, shape index: {}]   ;;  %s9010_s7 = inlined_call_operand.hbm [shape: f32[2,64,128], index: 7, kind: input, shape index: {}]   ;;  %s9011_s8 = inlined_call_operand.vmem [shape: f32[2,1,128], index: 8, kind: input, shape index: {}]   ;;  %s9012_s9 = inlined_call_operand.vmem [shape: f32[32,64], index: 9, kind: input, shape index: {}]   ;;  %s9013_s10 = inlined_call_operand.vmem [shape: f32[1,64], index: 10, kind: input, shape index: {}]   ;;  %s9014_s11 = inlined_call_operand.vmem [shape: f32[4,32], index: 11, kind: input, shape index: {}]   ;;  %s9015_s12 = inlined_call_operand.vmem [shape: f32[1,32], index: 12, kind: input, shape index: {}]   ;;  %s9016_s13 = inlined_call_operand.hbm [shape: f32[32,128], index: 13, kind: input, shape index: {}]   ;;  %s9017_s14 = inlined_call_operand.vmem [shape: f32[1,128], index: 14, kind: input, shape index: {}]   ;;  %s9018_s15 = inlined_call_operand.hbm [shape: f32[32,128], index: 15, kind: input, shape index: {}]   ;;  %s9019_s16 = inlined_call_operand.hbm [shape: f32[2,64,128], index: 16, kind: input, shape index: {}]   ;;  %s9020_s17 = inlined_call_operand.vmem [shape: f32[2,1,128], index: 17, kind: input, shape index: {}]   ;;  %s9021_s18 = inlined_call_operand.hbm [shape: f32[32,64], index: 18, kind: input, shape index: {}]   ;;  %s9022_s19 = inlined_call_operand.vmem [shape: f32[1,64], index: 19, kind: input, shape index: {}]   ;;  %s9023_s20 = inlined_call_operand.vmem [shape: f32[64,4], index: 20, kind: input, shape index: {}]   ;;  %s9024_s21 = inlined_call_operand.vmem [shape: f32[1,4], index: 21, kind: input, shape index: {}]   ;;  %s9025_s22 = inlined_call_operand.vmem [shape: f32[2,8,4], index: 22, kind: output, shape index: {}]  }
   0x1   :  { %9033 = sst [smem:[#allocation14_spill]] %s9003_s0 }
   0x2   :  { %9034 = sst [smem:[#allocation15_spill]] %s9004_s1 }
   0x3   :  { %9035 = sst [smem:[#allocation16_spill]] %s9005_s2 }
   0x4   :  { %9036 = sst [smem:[#allocation17_spill]] %s9006_s3 }
   0x5   :  { %9037 = sst [smem:[#allocation18_spill]] %s9007_s4 }
   0x6   :  { %9038 = sst [smem:[#allocation19_spill]] %s9008_s5 }
   0x7   :  { %9039 = sst [smem:[#allocation20_spill]] %s9009_s6 }
   0x8   :  { %27 = vsyncpa [#allocation4], 0 }
   0x9   :  { %28 = vsyncpa [#allocation6], 0 }
   0xa   :  { %29 = vsyncpa [#allocation9], 0  ;;  %s71_s29 = sshll.u32 %s9016_s13, 4  ;;  %s6910_s30 = smov [#allocation5]   ;;  %s72_s29 = int_to_ptr.hbm [resolvable:$true] %s71_s29 }
   0xb   :  { %s73_s4 = sshll.u32 %s6910_s30, 4  ;;  %s99_s1 = sshll.u32 %s9019_s16, 4  ;;  %s74_s4 = int_to_ptr.vmem [resolvable:$true] %s73_s4  ;;  %s100_s1 = int_to_ptr.hbm [resolvable:$true] %s99_s1 }
   0xc   :  { %s6911_s5 = smov 128   ;;  %s6912_s24 = smov 8  }
   0xd   :  { %79 = dma.hbm_to_vmem [thread:$0]  %s72_s29, 512, %s74_s4, [#allocation6], %s6911_s5, %s6911_s5, %s6912_s24  }
   0xe   :  { %s6913_s6 = smov [#allocation8]   ;;  %s48_s27 = sshll.u32 %s9010_s7, 4  ;;  %s49_s27 = int_to_ptr.hbm [resolvable:$true] %s48_s27 }
   0xf   :  { %s101_s25 = sshll.u32 %s6913_s6, 4  ;;  %s86_s28 = sshll.u32 %s9018_s15, 4  ;;  %s102_s25 = int_to_ptr.vmem [resolvable:$true] %s101_s25  ;;  %s87_s28 = int_to_ptr.hbm [resolvable:$true] %s86_s28 }
  0x10   :  { %107 = dma.hbm_to_vmem [thread:$0]  %s100_s1, 2048, %s102_s25, [#allocation9], %s6911_s5, %s6911_s5, %s6912_s24  }
  0x11   :  { %s6914_s30 = smov [#allocation3]   ;;  %s6915_s16 = smov [#allocation7]  }
  0x12   :  { %s50_s0 = sshll.u32 %s6914_s30, 4  ;;  %s88_s29 = sshll.u32 %s6915_s16, 4  ;;  %s51_s0 = int_to_ptr.vmem [resolvable:$true] %s50_s0  ;;  %s89_s29 = int_to_ptr.vmem [resolvable:$true] %s88_s29 }
  0x13   :  { %56 = dma.hbm_to_vmem [thread:$0]  %s49_s27, 2048, %s51_s0, [#allocation4], %s6911_s5, %s6911_s5, %s6912_s24  }
  0x14   :  { %s114_s6 = sshll.u32 %s9021_s18, 4  ;;  %s6916_s7 = smov [#allocation10]   ;;  %s115_s6 = int_to_ptr.hbm [resolvable:$true] %s114_s6 }
  0x15   :  { %94 = dma.hbm_to_vmem [thread:$0]  %s87_s28, 512, %s89_s29, [#allocation6], %s6911_s5, %s6911_s5, %s6912_s24  }
  0x16   :  { %s116_s1 = sshll.u32 %s6916_s7, 4  ;;  %s117_s1 = int_to_ptr.vmem [resolvable:$true] %s116_s1 }
  0x17   :  { %122 = dma.hbm_to_vmem [thread:$0]  %s115_s6, 512, %s117_s1, [#allocation9], %s6911_s5, %s6911_s5, %s6912_s24  }
  0x18   :  { %6904 = dma.done.wait [#allocation4], 2048  }
  0x19   :  { %6905 = vsyncadd [#allocation4], 4294965248 }
  0x1a   :  { %6906 = dma.done.wait [#allocation6], 1024  }
  0x1b   :  { %6907 = vsyncadd [#allocation6], 4294966272 }
  0x1c   :  { %6908 = dma.done.wait [#allocation9], 2560  }
  0x1d   :  { %6909 = vsyncadd [#allocation9], 4294964736  ;;  %vm9032_vm0 = vcmask 1045504   ;;  %vm285_vm1 = vcmask 1043456   ;;  %s9040_s26 = sld [smem:[#allocation16_spill]]  ;;  %vm9031_vm2 = vcmask 31744  }
  0x1e   :  { %s9041_s27 = sld [smem:[#allocation14_spill]]  ;;  %v273_v5 = vld [vmem:[%s9014_s11] sm:$0xf]  ;;  %vm178_vm3 = vcmask 48128   ;;  %v6917_v16 = vmov 0.0   ;;  %v317_v21 = vld [vmem:[#allocation5 + $0x18] sm:$0xff] }
  0x1f   :  { %5865 = vmatpush.msk.msra.mxu2 %vm285_vm1, %v273_v5  ;;  %s9042_s29 = sld [smem:[#allocation15_spill]]  ;;  %v316_v22 = vld [vmem:[#allocation5 + $0x10] sm:$0xff]  ;;  %v315_v23 = vld [vmem:[#allocation5 + $0x8] sm:$0xff]  ;;  %v314_v24 = vld [vmem:[#allocation5] sm:$0xff]  ;;  %vm226_vm4 = vcmask 261120   ;;  %s6918_s18 = smov 64  }
  0x20   :  { %s9043_s6 = sld [smem:[#allocation20_spill]]  ;;  %v6035_v26 = vld [vmem:[%s9015_s12] ss:$0 sm:$0xff]  ;;  %s6919_s2 = smov 32   ;;  %vm482_vm13 = vcmask 1041409   ;;  %vm491_vm14 = vcmask 523264  }
  0x21   :  { %s9044_s25 = sld [smem:[#allocation18_spill]] }
  0x22   :  { %s9045_s15 = sld [smem:[#allocation17_spill]] }
  0x23   :  { %v159_v0 = vld [vmem:[%s9040_s26] sm:$0x3f]  ;;  %s9046_s26 = sld [smem:[#allocation19_spill]] }
  0x24   :  { %v149_v1 = vld [vmem:[%s9041_s27] sm:$0xff]  ;;  %v150_v2 = vld [vmem:[%s9041_s27 + $0x8] sm:$0xf]  ;;  %5858 = vmatpush.msk.msra.mxu0 %vm9032_vm0, %v159_v0  ;;  %v151_v4 = vld [vmem:[%s9041_s27 + $0x10] sm:$0xff]  ;;  %6023 = vmatpush.msk.msra.mxu3 %vm9032_vm0, %v159_v0 }
  0x25   :  { %v157_v3 = vrot.slane %v149_v1, 4  ;;  %164 = vst [vmem:[#allocation1] ss:$2 sm:$0xff] %v149_v1  ;;  %v271_v6 = vld [vmem:[%s9042_s29] sm:$0xff]  ;;  %v272_v12 = vld [vmem:[%s9042_s29 + $0x8] sm:$0xff]  ;;  %v158_v20 = vrot.slane %v151_v4, 4 }
  0x26   :  { %168 = vst [vmem:[#allocation1 + $0x10] ss:$2 sm:$0xff] %v150_v2  ;;  %v7074_v7 = vld [vmem:[%s9043_s6 + $0x18] sm:$0xff]  ;;  %5866 = vmatmul.msk.f32.vlgmr.msra.gmra.mxu2 %vm9031_vm2, %v271_v6  ;;  %v7080_v8 = vld [vmem:[%s9043_s6 + $0x10] sm:$0xff]  ;;  %v7089_v10 = vld [vmem:[%s9043_s6 + $0x8] sm:$0xff]  ;;  %340 = vmatpush.msrb.mxu3 %v317_v21 }
  0x27   :  { %166 = vst [vmem:[#allocation1 + $0x1] ss:$2 sm:$0xff] %v157_v3  ;;  %v221_v9 = vld [vmem:[%s9044_s25 + $0x18] sm:$0xff]  ;;  %390 = vmatpush.msrb.mxu2 %v7074_v7  ;;  %v7094_v11 = vld [vmem:[%s9043_s6] sm:$0xff]  ;;  %v220_v15 = vld [vmem:[%s9044_s25 + $0x10] sm:$0xff] }
  0x28   :  { %170 = vst [vmem:[#allocation1 + $0x11] ss:$2 sm:$0xff] %v151_v4  ;;  %248 = vmatpush.msra.mxu1 %v221_v9  ;;  %v219_v17 = vld [vmem:[%s9044_s25 + $0x8] sm:$0xff]  ;;  %v218_v18 = vld [vmem:[%s9044_s25] sm:$0xff]  ;;  %v152_v19 = vld [vmem:[%s9041_s27 + $0x18] sm:$0xf]  ;;  %341 = vmatpush.msrb.mxu3 %v316_v22 }
  0x29   :  { %391 = vmatpush.msrb.mxu2 %v7080_v8  ;;  %174 = vst [vmem:[#allocation1 + $0x21] ss:$2 sm:$0xff] %v152_v19  ;;  %v6034_v27 = vld [vmem:[%s9045_s15] ss:$0 sm:$0xff] }
  0x2a   :  { %249 = vmatpush.msra.mxu1 %v220_v15  ;;  %172 = vst [vmem:[#allocation1 + $0x20] ss:$2 sm:$0xff] %v158_v20  ;;  %342 = vmatpush.msrb.mxu3 %v315_v23  ;;  %v6036_v43 = vld [vmem:[%s9046_s26] ss:$0 sm:$0xff] }
  0x2b   :  { %392 = vmatpush.msrb.mxu2 %v7089_v10 }
  0x2c   :  { %250 = vmatpush.msra.mxu1 %v219_v17  ;;  %343 = vmatpush.msrb.mxu3 %v314_v24 }
  0x2d   :  { %393 = vmatpush.msrb.mxu2 %v7094_v11 }
  0x2e   :  { %v175_v13 = vld.sshfl [vmem:[#allocation1] sm:$0xff pattern:$0x75316420]  ;;  %5867 = vmatmul.msk.f32.gmra.mxu2 %vm9031_vm2, %v272_v12  ;;  %251 = vmatpush.msra.mxu1 %v218_v18 }
  0x2f   :  { %5859 = vmatmul.msk.f32.vlgmr.msra.gmra.mxu0 %vm178_vm3, %v175_v13  ;;  %634 = vmatpush.msra.mxu2 %v7074_v7  ;;  %v176_v14 = vld.sshfl [vmem:[#allocation1 + $0x10] sm:$0xff pattern:$0x75316420] }
  0x31   :  { %635 = vmatpush.msra.mxu2 %v7080_v8  ;;  %v177_v25 = vld.sshfl [vmem:[#allocation1 + $0x20] sm:$0xff pattern:$0x75316420] }
  0x32   :  { %5861 = vmatmul.msk.f32.vlgmr.msra.gmra.mxu3 %vm178_vm3, %v177_v25 }
  0x33   :  { %636 = vmatpush.msra.mxu2 %v7089_v10 }
  0x35   :  { %637 = vmatpush.msra.mxu2 %v7094_v11 }
  0x36   :  { %394 = vmatmul.f32.vlgmr.msrb.gmra.mxu2 %v6917_v16 }
  0x37   :  { %5860 = vmatmul.msk.f32.gmra.mxu0 %vm178_vm3, %v176_v14 }
  0xa9   :  { %v306_v28 = vpop.f32.mrf.mxu2 }
  0xaa   :  { %v307_v29 = vadd.f32 %v6035_v26, %v306_v28 }
  0xac   :  { %v206_v30 = vpop.f32.mrf.mxu0  ;;  %v312_v32 = vmax.f32 %v307_v29, 0.0 }
  0xad   :  { %v207_v31 = vadd.f32 %v6034_v27, %v206_v30 }
  0xae   :  { %5868 = vmatmul.msk.f32.vlgmr.msrb.gmra.mxu3 %vm226_vm4, %v312_v32 }
  0xaf   :  { %v215_v33 = vmax.f32 %v207_v31, 0.0 }
  0xb1   :  { %5862 = vmatmul.msk.f32.vlgmr.msra.gmra.mxu1 %vm226_vm4, %v215_v33  ;;  %v309_v34 = vpop.f32.mrf.mxu2  ;;  %v7157_v33 = vld [vmem:[#allocation3 + $0x38] sm:$0xff] }
  0xb2   :  { %v310_v35 = vadd.f32 %v6035_v26, %v309_v34  ;;  %v7159_v34 = vld [vmem:[#allocation3 + $0x30] sm:$0xff]  ;;  %503 = vmatpush.msra.mxu3 %v7157_v33  ;;  %754 = vmatpush.msrb.mxu1 %v7157_v33 }
  0xb3   :  { %1010 = vmatpush.msrb.mxu2 %v7157_v33 }
  0xb4   :  { %v209_v36 = vpop.f32.mrf.mxu0  ;;  %v313_v38 = vmax.f32 %v310_v35, 0.0  ;;  %v7163_v35 = vld [vmem:[#allocation3 + $0x28] sm:$0xff]  ;;  %504 = vmatpush.msra.mxu3 %v7159_v34  ;;  %755 = vmatpush.msrb.mxu1 %v7159_v34 }
  0xb5   :  { %v210_v37 = vadd.f32 %v6034_v27, %v209_v36  ;;  %v212_v40 = vpop.f32.mrf.mxu3  ;;  %v7168_v36 = vld [vmem:[#allocation3 + $0x20] sm:$0xff]  ;;  %1011 = vmatpush.msrb.mxu2 %v7159_v34 }
  0xb6   :  { %5869 = vmatmul.msk.f32.gmra.mxu3 %vm226_vm4, %v313_v38  ;;  %v213_v41 = vadd.f32 %v6034_v27, %v212_v40  ;;  %756 = vmatpush.msrb.mxu1 %v7163_v35  ;;  %v7178_v38 = vld [vmem:[#allocation3 + $0x10] sm:$0xff]  ;;  %v7188_v40 = vld [vmem:[#allocation3] sm:$0xff] }
  0xb7   :  { %v216_v39 = vmax.f32 %v210_v37, 0.0  ;;  %505 = vmatpush.msra.mxu3 %v7163_v35  ;;  %v7173_v37 = vld [vmem:[#allocation3 + $0x18] sm:$0xff]  ;;  %1012 = vmatpush.msrb.mxu2 %v7163_v35 }
  0xb8   :  { %v217_v42 = vmax.f32 %v213_v41, 0.0  ;;  %757 = vmatpush.msrb.mxu1 %v7168_v36 }
  0xb9   :  { %5863 = vmatmul.msk.f32.gmra.mxu1 %vm226_vm4, %v216_v39  ;;  %v395_v45 = vpop.f32.mrf.mxu2  ;;  %506 = vmatpush.msra.mxu3 %v7168_v36  ;;  %v7183_v39 = vld [vmem:[#allocation3 + $0x8] sm:$0xff] }
  0xba   :  { %v399_v51 = vrot.slane %v395_v45, 1  ;;  %1013 = vmatpush.msrb.mxu2 %v7168_v36  ;;  %758 = vmatpush.msrb.mxu1 %v7173_v37 }
  0xbb   :  { %507 = vmatpush.msra.mxu3 %v7173_v37 }
  0xbc   :  { %1014 = vmatpush.msrb.mxu2 %v7173_v37  ;;  %759 = vmatpush.msrb.mxu1 %v7178_v38 }
  0xbd   :  { %508 = vmatpush.msra.mxu3 %v7178_v38 }
  0xbe   :  { %1015 = vmatpush.msrb.mxu2 %v7178_v38  ;;  %760 = vmatpush.msrb.mxu1 %v7183_v39 }
  0xbf   :  { %509 = vmatpush.msra.mxu3 %v7183_v39 }
  0xc0   :  { %1016 = vmatpush.msrb.mxu2 %v7183_v39  ;;  %761 = vmatpush.msrb.mxu1 %v7188_v40 }
  0xc1   :  { %5864 = vmatmul.msk.f32.gmra.mxu1 %vm226_vm4, %v217_v42  ;;  %510 = vmatpush.msra.mxu3 %v7188_v40 }
  0xc2   :  { %1017 = vmatpush.msrb.mxu2 %v7188_v40 }
 0x12e   :  { %v253_v44 = vpop.f32.mrf.mxu1 }
 0x12f   :  { %v7136_v46 = vadd.f32 %v6036_v43, %v253_v44 }
 0x131   :  { %v402_v47 = vadd.f32 %v395_v45, %v7136_v46 }
 0x133   :  { %6045 = vtanh.f32 %v402_v47  ;;  %v5871_v55 = vmul.f32 -1.442695, %v402_v47 }
 0x136   :  { %v256_v48 = vpop.f32.mrf.mxu1 }
 0x137   :  { %v7139_v49 = vadd.f32 %v6036_v43, %v256_v48 }
 0x139   :  { %v6046_v50 = vpop.eup %6045  ;;  %v7142_v52 = vrot.slane %v7139_v49, 4 }
 0x13a   :  { %448 = vrot.lane.b32.xlu0 %v6046_v50, %s6918_s18 }
 0x13b   :  { %v403_v53 = vadd.f32 %v399_v51, %v7142_v52 }
 0x13d   :  { %6047 = vtanh.f32 %v403_v53  ;;  %v5872_v57 = vmul.f32 -1.442695, %v403_v53  ;;  %v7206_v53 = vpop.f32.mrf.mxu3 }
 0x13e   :  { %6049 = vpow2.f32 %v5871_v55  ;;  %v7213_v55 = vld [vmem:[%s9011_s8] ss:$0 sm:$0xff] }
 0x13f   :  { %6051 = vpow2.f32 %v5872_v57 }
 0x143   :  { %v6048_v54 = vpop.eup %6047 }
 0x144   :  { %450 = vrot.lane.b32.xlu0 %v6048_v54, %s6918_s18  ;;  %v6050_v56 = vpop.eup %6049 }
 0x145   :  { %v410_v58 = vadd.f32 1.0, %v6050_v56  ;;  %v6052_v59 = vpop.eup %6051  ;;  %v7208_v54 = vpop.f32.mrf.mxu3 }
 0x146   :  { %v411_v61 = vadd.f32 1.0, %v6052_v59 }
 0x147   :  { %6053 = vrcp.f32 %v410_v58  ;;  %v423_v4 = vand.u32 2147483648, %v410_v58  ;;  %vm417_vm6 = vweird.f32 %v410_v58  ;;  %v421_v5 = vand.u32 2147483647, %v410_v58 }
 0x148   :  { %6055 = vrcp.f32 %v411_v61  ;;  %v438_v18 = vand.u32 2147483648, %v411_v61  ;;  %vm432_vm10 = vweird.f32 %v411_v61  ;;  %v436_v19 = vand.u32 2147483647, %v411_v61 }
 0x149   :  { %v424_v12 = vor.u32 1.1754944e-38, %v423_v4  ;;  %vm422_vm8 = vcmp.eq.f32.partialorder %v421_v5, 8.507059e+37 }
 0x14a   :  { %v439_v21 = vor.u32 1.1754944e-38, %v438_v18  ;;  %vm437_vm12 = vcmp.eq.f32.partialorder %v436_v19, 8.507059e+37 }
 0x14d   :  { %v6054_v60 = vpop.eup %6053 }
 0x14e   :  { %v413_v62 = vmul.f32 %v6054_v60, %v410_v58  ;;  %v6056_v0 = vpop.eup %6055  ;;  %vm418_vm5 = vweird.f32 %v6054_v60 }
 0x14f   :  { %v428_v2 = vmul.f32 %v6056_v0, %v411_v61  ;;  %vm419_vm7 = vmor %vm417_vm6, %vm418_vm5  ;;  %vm433_vm9 = vweird.f32 %v6056_v0 }
 0x150   :  { %v414_v63 = vsub.f32 1.0, %v413_v62  ;;  %vm434_vm11 = vmor %vm432_vm10, %vm433_vm9 }
 0x151   :  { %v429_v6 = vsub.f32 1.0, %v428_v2 }
 0x152   :  { %v415_v1 = vmul.f32 %v6054_v60, %v414_v63 }
 0x153   :  { %v430_v13 = vmul.f32 %v6056_v0, %v429_v6 }
 0x154   :  { %v416_v3 = vadd.f32 %v6054_v60, %v415_v1 }
 0x155   :  { %v431_v17 = vadd.f32 %v6056_v0, %v430_v13 }
 0x156   :  { %v420_v9 = vsel %vm419_vm7, %v6054_v60, %v416_v3 }
 0x157   :  { %v425_v15 = vsel %vm422_vm8, %v424_v12, %v420_v9  ;;  %v435_v20 = vsel %vm434_vm11, %v6056_v0, %v431_v17 }
 0x158   :  { %v440_v22 = vsel %vm437_vm12, %v439_v21, %v435_v20  ;;  %v444_v25 = vmul.f32 0.0, %v425_v15 }
 0x159   :  { %v445_v29 = vmul.f32 0.0, %v440_v22 }
 0x1ac   :  { %v449_v14 = vpop.permute.xlu0 %448 }
 0x1ad   :  { %v454_v16 = vmul.f32 %v449_v14, %v425_v15 }
 0x1af   :  { %458 = vrot.lane.b32.xlu1 %v454_v16, %s6919_s2 }
 0x1b6   :  { %v451_v23 = vpop.permute.xlu0 %450 }
 0x1b7   :  { %v455_v24 = vmul.f32 %v451_v23, %v440_v22 }
 0x1b9   :  { %460 = vrot.lane.b32.xlu1 %v455_v24, %s6919_s2 }
 0x221   :  { %v459_v26 = vpop.permute.xlu1 %458 }
 0x222   :  { %v7149_v27 = vadd.f32 %v459_v26, %v444_v25 }
 0x224   :  { %6057 = vtanh.f32 %v7149_v27 }
 0x22a   :  { %v6058_v28 = vpop.eup %6057 }
 0x22b   :  { %v461_v30 = vpop.permute.xlu1 %460  ;;  %470 = vrot.lane.b32.xlu2 %v6058_v28, %s6918_s18 }
 0x22c   :  { %v7153_v31 = vadd.f32 %v461_v30, %v445_v29 }
 0x22e   :  { %6059 = vtanh.f32 %v7153_v31 }
 0x234   :  { %v6060_v32 = vpop.eup %6059 }
 0x235   :  { %472 = vrot.lane.b32.xlu2 %v6060_v32, %s6918_s18 }
 0x285   :  { %v471_v41 = vpop.permute.xlu2 %470 }
 0x286   :  { %v476_v42 = vmul.f32 %v471_v41, %v425_v15 }
 0x288   :  { %v480_v45 = vperm.slane %v476_v42, 0 }
 0x28f   :  { %v473_v43 = vpop.permute.xlu2 %472 }
 0x290   :  { %v477_v44 = vmul.f32 %v473_v43, %v440_v22 }
 0x292   :  { %v481_v47 = vperm.slane %v477_v44, 0 }
 0x294   :  { %v483_v48 = vsel %vm482_vm13, %v481_v47, %v480_v45 }
 0x295   :  { %484 = vrot.lane.b32.xlu0 %v483_v48, %s6919_s2 }
 0x307   :  { %v485_v50 = vpop.permute.xlu0 %484 }
 0x308   :  { %v487_v51 = vsel %vm226_vm4, %v485_v50, 0.0  ;;  %5877 = vmatmul.msk.f32.vlgmr.msra.gmra.mxu2 %vm226_vm4, %v485_v50 }
 0x309   :  { %5873 = vmatmul.msk.f32.vlgmr.msra.gmra.mxu3 %vm491_vm14, %v487_v51  ;;  %1401 = vmatpush.msra.mxu2 %v7074_v7 }
 0x30b   :  { %1402 = vmatpush.msra.mxu2 %v7080_v8 }
 0x30d   :  { %1403 = vmatpush.msra.mxu2 %v7089_v10 }
 0x30f   :  { %1404 = vmatpush.msra.mxu2 %v7094_v11 }
 0x38b   :  { %v639_v56 = vpop.f32.mrf.mxu2 }
 0x38c   :  { %v643_v57 = vrot.slane %v639_v56, 7  ;;  %v647_v58 = vadd.f32 %v639_v56, %v7142_v52  ;;  %v512_v59 = vpop.f32.mrf.mxu3 }
 0x38d   :  { %v513_v60 = vadd.f32 %v7213_v55, %v512_v59 }
 0x38e   :  { %v646_v61 = vadd.f32 %v643_v57, %v7136_v46  ;;  %6061 = vtanh.f32 %v647_v58  ;;  %v5879_v4 = vmul.f32 -1.442695, %v647_v58 }
 0x38f   :  { %6063 = vtanh.f32 %v513_v60  ;;  %v5874_v5 = vmul.f32 -1.442695, %v513_v60 }
 0x390   :  { %6065 = vtanh.f32 %v646_v61  ;;  %v5878_v1 = vmul.f32 -1.442695, %v646_v61 }
 0x392   :  { %6067 = vpow2.f32 %v5878_v1 }
 0x394   :  { %v6062_v62 = vpop.eup %6061 }
 0x395   :  { %v6064_v63 = vpop.eup %6063  ;;  %700 = vrot.lane.b32.xlu0 %v6062_v62, %s6918_s18 }
 0x396   :  { %537 = vrot.lane.b32.xlu1 %v6064_v63, %s6918_s18  ;;  %v6066_v0 = vpop.eup %6065 }
 0x397   :  { %698 = vrot.lane.b32.xlu2 %v6066_v0, %s6918_s18 }
 0x398   :  { %v6068_v2 = vpop.eup %6067 }
 0x399   :  { %v654_v3 = vadd.f32 1.0, %v6068_v2  ;;  %v690_v2 = vrot.slane %v7149_v27, 7 }
 0x39b   :  { %6069 = vrcp.f32 %v654_v3  ;;  %v667_v19 = vand.u32 2147483648, %v654_v3  ;;  %vm661_vm3 = vweird.f32 %v654_v3  ;;  %v665_v20 = vand.u32 2147483647, %v654_v3 }
 0x39c   :  { %6071 = vpow2.f32 %v5879_v4 }
 0x39d   :  { %6073 = vpow2.f32 %v5874_v5  ;;  %v668_v22 = vor.u32 1.1754944e-38, %v667_v19  ;;  %vm666_vm6 = vcmp.eq.f32.partialorder %v665_v20, 8.507059e+37 }
 0x3a1   :  { %v6070_v6 = vpop.eup %6069 }
 0x3a2   :  { %v657_v9 = vmul.f32 %v6070_v6, %v654_v3  ;;  %v6072_v13 = vpop.eup %6071  ;;  %vm662_vm15 = vweird.f32 %v6070_v6 }
 0x3a3   :  { %v6074_v14 = vpop.eup %6073  ;;  %v655_v15 = vadd.f32 1.0, %v6072_v13  ;;  %vm663_vm5 = vmor %vm661_vm3, %vm662_vm15 }
 0x3a4   :  { %v658_v12 = vsub.f32 1.0, %v657_v9  ;;  %v518_v17 = vadd.f32 1.0, %v6074_v14  ;;  %v691_v9 = vrot.slane %v7153_v31, 7 }
 0x3a5   :  { %6075 = vrcp.f32 %v655_v15  ;;  %v682_v45 = vand.u32 2147483648, %v655_v15  ;;  %vm676_vm9 = vweird.f32 %v655_v15  ;;  %v680_v48 = vand.u32 2147483647, %v655_v15 }
 0x3a6   :  { %v659_v16 = vmul.f32 %v6070_v6, %v658_v12  ;;  %6077 = vrcp.f32 %v518_v17  ;;  %v530_v50 = vand.u32 2147483648, %v518_v17  ;;  %vm524_vm11 = vweird.f32 %v518_v17 }
 0x3a7   :  { %v528_v51 = vand.u32 2147483647, %v518_v17  ;;  %v683_v57 = vor.u32 1.1754944e-38, %v682_v45  ;;  %vm681_vm15 = vcmp.eq.f32.partialorder %v680_v48, 8.507059e+37  ;;  %v7270_v45 = vld [vmem:[#allocation3 + $0x48] sm:$0xff] }
 0x3a8   :  { %v660_v18 = vadd.f32 %v6070_v6, %v659_v16  ;;  %v531_v59 = vor.u32 1.1754944e-38, %v530_v50 }
 0x3a9   :  { %vm529_vm3 = vcmp.eq.f32.partialorder %v528_v51, 8.507059e+37 }
 0x3aa   :  { %v664_v21 = vsel %vm663_vm5, %v6070_v6, %v660_v18  ;;  %vm732_vm5 = vcmask 1042434  }
 0x3ab   :  { %v6076_v23 = vpop.eup %6075  ;;  %v669_v26 = vsel %vm666_vm6, %v668_v22, %v664_v21 }
 0x3ac   :  { %v6078_v24 = vpop.eup %6077  ;;  %v672_v29 = vmul.f32 %v6076_v23, %v655_v15  ;;  %vm677_vm7 = vweird.f32 %v6076_v23  ;;  %v694_v3 = vmul.f32 %v690_v2, %v669_v26  ;;  %v7329_v2 = vld [vmem:[%s9011_s8 + $0x1] ss:$0 sm:$0xff] }
 0x3ad   :  { %v520_v30 = vmul.f32 %v6078_v24, %v518_v17  ;;  %vm525_vm8 = vweird.f32 %v6078_v24  ;;  %vm678_vm10 = vmor %vm676_vm9, %vm677_vm7 }
 0x3ae   :  { %v673_v32 = vsub.f32 1.0, %v672_v29  ;;  %vm526_vm12 = vmor %vm524_vm11, %vm525_vm8 }
 0x3af   :  { %v521_v41 = vsub.f32 1.0, %v520_v30 }
 0x3b0   :  { %v674_v42 = vmul.f32 %v6076_v23, %v673_v32  ;;  %v7246_v32 = vld [vmem:[#allocation3 + $0x70] sm:$0xff] }
 0x3b1   :  { %v522_v43 = vmul.f32 %v6078_v24, %v521_v41  ;;  %v7250_v41 = vld [vmem:[#allocation3 + $0x68] sm:$0xff] }
 0x3b2   :  { %v675_v44 = vadd.f32 %v6076_v23, %v674_v42  ;;  %v7255_v42 = vld [vmem:[#allocation3 + $0x60] sm:$0xff] }
 0x3b3   :  { %v523_v47 = vadd.f32 %v6078_v24, %v522_v43  ;;  %v7260_v43 = vld [vmem:[#allocation3 + $0x58] sm:$0xff] }
 0x3b4   :  { %v679_v56 = vsel %vm678_vm10, %v6076_v23, %v675_v44  ;;  %v7265_v44 = vld [vmem:[#allocation3 + $0x50] sm:$0xff] }
 0x3b5   :  { %v527_v58 = vsel %vm526_vm12, %v6078_v24, %v523_v47  ;;  %v684_v61 = vsel %vm681_vm15, %v683_v57, %v679_v56  ;;  %v7275_v47 = vld [vmem:[#allocation3 + $0x40] sm:$0xff] }
 0x3b6   :  { %v532_v0 = vsel %vm529_vm3, %v531_v59, %v527_v58  ;;  %v695_v12 = vmul.f32 %v691_v9, %v684_v61 }
 0x3b7   :  { %v535_v14 = vmul.f32 0.0, %v532_v0 }
 0x3f1   :  { %v699_v25 = vpop.permute.xlu2 %698 }
 0x3f2   :  { %v704_v28 = vmul.f32 %v699_v25, %v669_v26 }
 0x3f4   :  { %708 = vrot.lane.b32.xlu2 %v704_v28, %s6919_s2 }
 0x407   :  { %v701_v60 = vpop.permute.xlu0 %700 }
 0x408   :  { %v705_v62 = vmul.f32 %v701_v60, %v684_v61  ;;  %v538_v63 = vpop.permute.xlu1 %537 }
 0x409   :  { %v540_v1 = vmul.f32 %v538_v63, %v532_v0 }
 0x40a   :  { %710 = vrot.lane.b32.xlu0 %v705_v62, %s6919_s2 }
 0x40b   :  { %542 = vrot.lane.b32.xlu1 %v540_v1, %s6919_s2 }
 0x44e   :  { %v709_v4 = vpop.permute.xlu2 %708 }
 0x44f   :  { %v7225_v5 = vadd.f32 %v709_v4, %v694_v3 }
 0x451   :  { %6079 = vtanh.f32 %v7225_v5 }
 0x457   :  { %v6080_v6 = vpop.eup %6079 }
 0x458   :  { %720 = vrot.lane.b32.xlu2 %v6080_v6, %s6918_s18 }
 0x47c   :  { %v711_v13 = vpop.permute.xlu0 %710 }
 0x47d   :  { %v7230_v15 = vadd.f32 %v711_v13, %v695_v12  ;;  %v543_v16 = vpop.permute.xlu1 %542 }
 0x47e   :  { %v7232_v17 = vadd.f32 %v543_v16, %v535_v14 }
 0x47f   :  { %6081 = vtanh.f32 %v7230_v15 }
 0x480   :  { %6083 = vtanh.f32 %v7232_v17 }
 0x485   :  { %v6082_v27 = vpop.eup %6081 }
 0x486   :  { %v6084_v18 = vpop.eup %6083  ;;  %722 = vrot.lane.b32.xlu0 %v6082_v27, %s6918_s18 }
 0x487   :  { %548 = vrot.lane.b32.xlu1 %v6084_v18, %s6918_s18 }
 0x4b2   :  { %v721_v19 = vpop.permute.xlu2 %720 }
 0x4b3   :  { %v726_v31 = vmul.f32 %v721_v19, %v669_v26  ;;  %v7244_v26 = vld [vmem:[#allocation3 + $0x78] sm:$0xff] }
 0x4b4   :  { %571 = vmatpush.msrb.mxu0 %v7244_v26  ;;  %823 = vmatpush.msrb.mxu3 %v7244_v26 }
 0x4b5   :  { %v730_v24 = vperm.slane %v726_v31, 1  ;;  %1079 = vmatpush.msra.mxu1 %v7244_v26 }
 0x4b6   :  { %572 = vmatpush.msrb.mxu0 %v7246_v32  ;;  %824 = vmatpush.msrb.mxu3 %v7246_v32 }
 0x4b7   :  { %1080 = vmatpush.msra.mxu1 %v7246_v32 }
 0x4b8   :  { %573 = vmatpush.msrb.mxu0 %v7250_v41  ;;  %825 = vmatpush.msrb.mxu3 %v7250_v41 }
 0x4b9   :  { %1081 = vmatpush.msra.mxu1 %v7250_v41 }
 0x4ba   :  { %574 = vmatpush.msrb.mxu0 %v7255_v42  ;;  %826 = vmatpush.msrb.mxu3 %v7255_v42 }
 0x4bb   :  { %1082 = vmatpush.msra.mxu1 %v7255_v42 }
 0x4bc   :  { %575 = vmatpush.msrb.mxu0 %v7260_v43  ;;  %827 = vmatpush.msrb.mxu3 %v7260_v43 }
 0x4bd   :  { %1083 = vmatpush.msra.mxu1 %v7260_v43 }
 0x4be   :  { %576 = vmatpush.msrb.mxu0 %v7265_v44  ;;  %828 = vmatpush.msrb.mxu3 %v7265_v44 }
 0x4bf   :  { %1084 = vmatpush.msra.mxu1 %v7265_v44 }
 0x4c0   :  { %577 = vmatpush.msrb.mxu0 %v7270_v45  ;;  %829 = vmatpush.msrb.mxu3 %v7270_v45 }
 0x4c1   :  { %1085 = vmatpush.msra.mxu1 %v7270_v45 }
 0x4c2   :  { %578 = vmatpush.msrb.mxu0 %v7275_v47  ;;  %830 = vmatpush.msrb.mxu3 %v7275_v47 }
 0x4c3   :  { %1086 = vmatpush.msra.mxu1 %v7275_v47 }
 0x4c4   :  { %889 = vmatpush.msra.mxu0 %v7074_v7  ;;  %1266 = vmatpush.msra.mxu3 %v7157_v33 }
 0x4c6   :  { %890 = vmatpush.msra.mxu0 %v7080_v8  ;;  %1267 = vmatpush.msra.mxu3 %v7159_v34 }
 0x4c8   :  { %891 = vmatpush.msra.mxu0 %v7089_v10  ;;  %1268 = vmatpush.msra.mxu3 %v7163_v35 }
 0x4ca   :  { %892 = vmatpush.msra.mxu0 %v7094_v11  ;;  %1269 = vmatpush.msra.mxu3 %v7168_v36 }
 0x4cc   :  { %1270 = vmatpush.msra.mxu3 %v7173_v37 }
 0x4ce   :  { %1271 = vmatpush.msra.mxu3 %v7178_v38 }
 0x4d0   :  { %1272 = vmatpush.msra.mxu3 %v7183_v39 }
 0x4d2   :  { %1273 = vmatpush.msra.mxu3 %v7188_v40 }
 0x4f8   :  { %v723_v20 = vpop.permute.xlu0 %722 }
 0x4f9   :  { %v727_v21 = vmul.f32 %v723_v20, %v684_v61  ;;  %v549_v22 = vpop.permute.xlu1 %548 }
 0x4fa   :  { %v551_v23 = vmul.f32 %v549_v22, %v532_v0 }
 0x4fb   :  { %v731_v25 = vperm.slane %v727_v21, 1 }
 0x4fc   :  { %553 = vrot.lane.b32.xlu1 %v551_v23, %s6919_s2  ;;  %v737_v30 = vrot.slane %v551_v23, 7 }
 0x4fd   :  { %v872_v28 = vsel %vm482_vm13, %v731_v25, %v730_v24  ;;  %v733_v29 = vsel %vm732_vm5, %v731_v25, %v730_v24 }
 0x4fe   :  { %873 = vrot.lane.b32.xlu2 %v872_v28, %s6919_s2  ;;  %734 = vrot.lane.b32.xlu0 %v733_v29, %s6919_s2 }
 0x504   :  { %738 = vrot.lane.b32.xlu1 %v737_v30, %s6918_s18 }
 0x558   :  { %v874_v57 = vpop.permute.xlu2 %873 }
 0x56e   :  { %v554_v48 = vpop.permute.xlu1 %553 }
 0x56f   :  { %v556_v50 = vsel %vm226_vm4, %v554_v48, 0.0 }
 0x570   :  { %5875 = vmatmul.msk.f32.vlgmr.msrb.gmra.mxu0 %vm491_vm14, %v556_v50  ;;  %v735_v51 = vpop.permute.xlu0 %734 }
 0x571   :  { %1145 = vmatpush.msrb.mxu0 %v7074_v7 }
 0x573   :  { %1146 = vmatpush.msrb.mxu0 %v7080_v8  ;;  %v7321_v8 = vpop.f32.mrf.mxu1 }
 0x575   :  { %1147 = vmatpush.msrb.mxu0 %v7089_v10 }
 0x576   :  { %v739_v56 = vpop.permute.xlu1 %738 }
 0x577   :  { %v741_v58 = vsel %vm226_vm4, %v735_v51, %v739_v56  ;;  %1148 = vmatpush.msrb.mxu0 %v7094_v11 }
 0x578   :  { %v743_v59 = vrot.slane %v741_v58, 1  ;;  %5884 = vmatmul.msk.f32.vlgmr.msra.gmra.mxu0 %vm226_vm4, %v874_v57 }
 0x579   :  { %1335 = vmatpush.msra.mxu0 %v7244_v26 }
 0x57a   :  { %5880 = vmatmul.msk.f32.vlgmr.msrb.gmra.mxu1 %vm491_vm14, %v743_v59 }
 0x57b   :  { %1336 = vmatpush.msra.mxu0 %v7246_v32  ;;  %1520 = vmatpush.msrb.mxu1 %v7157_v33 }
 0x57d   :  { %1337 = vmatpush.msra.mxu0 %v7250_v41  ;;  %1521 = vmatpush.msrb.mxu1 %v7159_v34 }
 0x57f   :  { %1338 = vmatpush.msra.mxu0 %v7255_v42  ;;  %1522 = vmatpush.msrb.mxu1 %v7163_v35 }
 0x581   :  { %1339 = vmatpush.msra.mxu0 %v7260_v43  ;;  %1523 = vmatpush.msrb.mxu1 %v7168_v36 }
 0x583   :  { %1340 = vmatpush.msra.mxu0 %v7265_v44  ;;  %1524 = vmatpush.msrb.mxu1 %v7173_v37 }
 0x585   :  { %1341 = vmatpush.msra.mxu0 %v7270_v45  ;;  %1525 = vmatpush.msrb.mxu1 %v7178_v38 }
 0x587   :  { %1342 = vmatpush.msra.mxu0 %v7275_v47  ;;  %1526 = vmatpush.msrb.mxu1 %v7183_v39 }
 0x589   :  { %1527 = vmatpush.msrb.mxu1 %v7188_v40 }
 0x5ed   :  { %v580_v7 = vpop.f32.mrf.mxu0 }
 0x5ee   :  { %v581_v4 = vadd.f32 %v7329_v2, %v580_v7 }
 0x5f0   :  { %v5876_v21 = vmul.f32 -1.442695, %v581_v4 }
 0x5f5   :  { %v894_v10 = vpop.f32.mrf.mxu0 }
 0x5f6   :  { %v898_v11 = vrot.slane %v894_v10, 6  ;;  %v899_v60 = vrot.slane %v894_v10, 7 }
 0x5f7   :  { %v763_v62 = vpop.f32.mrf.mxu1 }
 0x5f8   :  { %v902_v61 = vadd.f32 %v898_v11, %v7136_v46  ;;  %v903_v63 = vadd.f32 %v899_v60, %v7142_v52  ;;  %v764_v0 = vadd.f32 %v7213_v55, %v763_v62 }
 0x5fa   :  { %6085 = vtanh.f32 %v902_v61  ;;  %v5885_v12 = vmul.f32 -1.442695, %v902_v61  ;;  %v5886_v18 = vmul.f32 -1.442695, %v903_v63  ;;  %v5881_v19 = vmul.f32 -1.442695, %v764_v0 }
 0x5fb   :  { %6087 = vtanh.f32 %v903_v63 }
 0x5fc   :  { %6089 = vtanh.f32 %v764_v0 }
 0x5fd   :  { %6091 = vtanh.f32 %v581_v4 }
 0x5fe   :  { %6093 = vpow2.f32 %v5885_v12 }
 0x600   :  { %v6086_v1 = vpop.eup %6085 }
 0x601   :  { %954 = vrot.lane.b32.xlu2 %v6086_v1, %s6918_s18  ;;  %v6088_v3 = vpop.eup %6087 }
 0x602   :  { %956 = vrot.lane.b32.xlu0 %v6088_v3, %s6918_s18  ;;  %v6090_v6 = vpop.eup %6089 }
 0x603   :  { %788 = vrot.lane.b32.xlu1 %v6090_v6, %s6918_s18  ;;  %v6092_v9 = vpop.eup %6091 }
 0x604   :  { %v6094_v13 = vpop.eup %6093 }
 0x605   :  { %v910_v14 = vadd.f32 1.0, %v6094_v13 }
 0x607   :  { %6095 = vrcp.f32 %v910_v14  ;;  %v923_v24 = vand.u32 2147483648, %v910_v14  ;;  %vm917_vm7 = vweird.f32 %v910_v14  ;;  %v921_v28 = vand.u32 2147483647, %v910_v14 }
 0x608   :  { %6097 = vpow2.f32 %v5886_v18 }
 0x609   :  { %6099 = vpow2.f32 %v5881_v19  ;;  %v924_v50 = vor.u32 1.1754944e-38, %v923_v24  ;;  %vm922_vm9 = vcmp.eq.f32.partialorder %v921_v28, 8.507059e+37 }
 0x60a   :  { %6101 = vpow2.f32 %v5876_v21 }
 0x60b   :  { %605 = vrot.lane.b32.xlu1 %v6092_v9, %s6918_s18 }
 0x60d   :  { %v6096_v16 = vpop.eup %6095 }
 0x60e   :  { %v913_v27 = vmul.f32 %v6096_v16, %v910_v14  ;;  %v6098_v22 = vpop.eup %6097  ;;  %vm918_vm6 = vweird.f32 %v6096_v16 }
 0x60f   :  { %v6100_v25 = vpop.eup %6099  ;;  %v911_v29 = vadd.f32 1.0, %v6098_v22  ;;  %vm919_vm8 = vmor %vm917_vm7, %vm918_vm6 }
 0x610   :  { %v914_v31 = vsub.f32 1.0, %v913_v27  ;;  %v769_v48 = vadd.f32 1.0, %v6100_v25  ;;  %v6102_v58 = vpop.eup %6101 }
 0x611   :  { %6103 = vrcp.f32 %v911_v29  ;;  %v586_v59 = vadd.f32 1.0, %v6102_v58  ;;  %v938_v6 = vand.u32 2147483648, %v911_v29  ;;  %vm932_vm11 = vweird.f32 %v911_v29 }
 0x612   :  { %v915_v20 = vmul.f32 %v6096_v16, %v914_v31  ;;  %6105 = vrcp.f32 %v769_v48  ;;  %v936_v12 = vand.u32 2147483647, %v911_v29  ;;  %v781_v14 = vand.u32 2147483648, %v769_v48 }
 0x613   :  { %6107 = vrcp.f32 %v586_v59  ;;  %vm775_vm3 = vweird.f32 %v769_v48  ;;  %v779_v27 = vand.u32 2147483647, %v769_v48  ;;  %v939_v18 = vor.u32 1.1754944e-38, %v938_v6 }
 0x614   :  { %v916_v23 = vadd.f32 %v6096_v16, %v915_v20  ;;  %vm937_vm7 = vcmp.eq.f32.partialorder %v936_v12, 8.507059e+37  ;;  %v782_v22 = vor.u32 1.1754944e-38, %v781_v14 }
 0x616   :  { %v920_v30 = vsel %vm919_vm8, %v6096_v16, %v916_v23  ;;  %vm780_vm8 = vcmp.eq.f32.partialorder %v779_v27, 8.507059e+37 }
 0x617   :  { %v7336_v56 = vsel %vm922_vm9, %v924_v50, %v920_v30  ;;  %v6104_v7 = vpop.eup %6103  ;;  %v598_v30 = vand.u32 2147483648, %v586_v59 }
 0x618   :  { %v6106_v10 = vpop.eup %6105  ;;  %v928_v11 = vmul.f32 %v6104_v7, %v911_v29  ;;  %vm933_vm10 = vweird.f32 %v6104_v7 }
 0x619   :  { %v771_v60 = vmul.f32 %v6106_v10, %v769_v48  ;;  %v6108_v62 = vpop.eup %6107  ;;  %vm776_vm12 = vweird.f32 %v6106_v10  ;;  %vm934_vm15 = vmor %vm932_vm11, %vm933_vm10  ;;  %vm592_vm10 = vweird.f32 %v586_v59  ;;  %v596_v48 = vand.u32 2147483647, %v586_v59 }
 0x61a   :  { %v929_v61 = vsub.f32 1.0, %v928_v11  ;;  %v588_v1 = vmul.f32 %v6108_v62, %v586_v59  ;;  %vm777_vm6 = vmor %vm775_vm3, %vm776_vm12  ;;  %vm593_vm9 = vweird.f32 %v6108_v62 }
 0x61b   :  { %v772_v63 = vsub.f32 1.0, %v771_v60  ;;  %vm594_vm11 = vmor %vm592_vm10, %vm593_vm9  ;;  %vm597_vm12 = vcmp.eq.f32.partialorder %v596_v48, 8.507059e+37 }
 0x61c   :  { %v930_v0 = vmul.f32 %v6104_v7, %v929_v61  ;;  %v589_v9 = vsub.f32 1.0, %v588_v1 }
 0x61d   :  { %v773_v3 = vmul.f32 %v6106_v10, %v772_v63 }
 0x61e   :  { %v931_v4 = vadd.f32 %v6104_v7, %v930_v0  ;;  %v590_v31 = vmul.f32 %v6108_v62, %v589_v9  ;;  %v947_v9 = vrot.slane %v7230_v15, 7 }
 0x61f   :  { %v774_v13 = vadd.f32 %v6106_v10, %v773_v3 }
 0x620   :  { %v935_v16 = vsel %vm934_vm15, %v6104_v7, %v931_v4  ;;  %v591_v29 = vadd.f32 %v6108_v62, %v590_v31  ;;  %vm988_vm15 = vcmask 1043459  }
 0x621   :  { %v778_v19 = vsel %vm777_vm6, %v6106_v10, %v774_v13  ;;  %v940_v21 = vsel %vm937_vm7, %v939_v18, %v935_v16  ;;  %v946_v10 = vrot.slane %v7225_v5, 7 }
 0x622   :  { %v783_v25 = vsel %vm780_vm8, %v782_v22, %v778_v19  ;;  %v595_v50 = vsel %vm594_vm11, %v6108_v62, %v591_v29 }
 0x623   :  { %v950_v11 = vmul.f32 %v946_v10, %v7336_v56  ;;  %v786_v59 = vmul.f32 %v783_v25, %v7232_v17  ;;  %v951_v17 = vmul.f32 %v947_v9, %v940_v21 }
 0x65b   :  { %v955_v51 = vpop.permute.xlu2 %954 }
 0x65c   :  { %v960_v57 = vmul.f32 %v955_v51, %v7336_v56  ;;  %v599_v51 = vor.u32 1.1754944e-38, %v598_v30 }
 0x65e   :  { %964 = vrot.lane.b32.xlu2 %v960_v57, %s6919_s2  ;;  %v600_v57 = vsel %vm597_vm12, %v599_v51, %v595_v50 }
 0x65f   :  { %v603_v1 = vmul.f32 0.0, %v600_v57 }
 0x674   :  { %v957_v20 = vpop.permute.xlu0 %956 }
 0x675   :  { %v961_v23 = vmul.f32 %v957_v20, %v940_v21  ;;  %v789_v24 = vpop.permute.xlu1 %788 }
 0x676   :  { %v791_v28 = vmul.f32 %v789_v24, %v783_v25 }
 0x677   :  { %966 = vrot.lane.b32.xlu0 %v961_v23, %s6919_s2 }
 0x678   :  { %793 = vrot.lane.b32.xlu2 %v791_v28, %s6919_s2 }
 0x67d   :  { %v606_v58 = vpop.permute.xlu1 %605 }
 0x67e   :  { %v608_v7 = vmul.f32 %v606_v58, %v600_v57 }
 0x680   :  { %610 = vrot.lane.b32.xlu2 %v608_v7, %s6919_s2 }
 0x6b8   :  { %v965_v60 = vpop.permute.xlu2 %964 }
 0x6b9   :  { %v7345_v61 = vadd.f32 %v965_v60, %v950_v11 }
 0x6bb   :  { %6109 = vtanh.f32 %v7345_v61 }
 0x6c1   :  { %v6110_v63 = vpop.eup %6109 }
 0x6c2   :  { %976 = vrot.lane.b32.xlu0 %v6110_v63, %s6918_s18 }
 0x6d2   :  { %v794_v62 = vpop.permute.xlu2 %793 }
 0x6d3   :  { %v7350_v0 = vadd.f32 %v794_v62, %v786_v59 }
 0x6d5   :  { %6111 = vtanh.f32 %v7350_v0 }
 0x6da   :  { %v611_v3 = vpop.permute.xlu2 %610 }
 0x6db   :  { %v6112_v5 = vpop.eup %6111  ;;  %v7353_v4 = vadd.f32 %v611_v3, %v603_v1 }
 0x6dc   :  { %799 = vrot.lane.b32.xlu0 %v6112_v5, %s6918_s18 }
 0x6dd   :  { %6113 = vtanh.f32 %v7353_v4 }
 0x6e3   :  { %v6114_v6 = vpop.eup %6113 }
 0x6e4   :  { %616 = vrot.lane.b32.xlu2 %v6114_v6, %s6918_s18 }
 0x6e9   :  { %v967_v12 = vpop.permute.xlu0 %966 }
 0x6ea   :  { %v7359_v13 = vadd.f32 %v967_v12, %v951_v17 }
 0x6ec   :  { %6115 = vtanh.f32 %v7359_v13 }
 0x6f2   :  { %v6116_v14 = vpop.eup %6115 }
 0x6f3   :  { %978 = vrot.lane.b32.xlu1 %v6116_v14, %s6918_s18 }
 0x734   :  { %v977_v16 = vpop.permute.xlu0 %976 }
 0x735   :  { %v982_v19 = vmul.f32 %v977_v16, %v7336_v56 }
 0x737   :  { %v986_v15 = vperm.slane %v982_v19, 2 }
 0x73e   :  { %v617_v28 = vpop.permute.xlu2 %616 }
 0x73f   :  { %v619_v29 = vmul.f32 %v617_v28, %v600_v57 }
 0x74e   :  { %v800_v27 = vpop.permute.xlu0 %799 }
 0x74f   :  { %v802_v18 = vmul.f32 %v800_v27, %v783_v25 }
 0x751   :  { %804 = vrot.lane.b32.xlu2 %v802_v18, %s6919_s2  ;;  %v993_v25 = vrot.slane %v802_v18, 6 }
 0x765   :  { %v979_v31 = vpop.permute.xlu1 %978 }
 0x766   :  { %v983_v20 = vmul.f32 %v979_v31, %v940_v21 }
 0x768   :  { %v987_v22 = vperm.slane %v983_v20, 2 }
 0x76a   :  { %v1128_v23 = vsel %vm482_vm13, %v987_v22, %v986_v15  ;;  %v989_v24 = vsel %vm988_vm15, %v987_v22, %v986_v15 }
 0x76b   :  { %1129 = vrot.lane.b32.xlu1 %v1128_v23, %s6919_s2  ;;  %990 = vrot.lane.b32.xlu0 %v989_v24, %s6919_s2 }
 0x773   :  { %808 = vrot.lane.b32.xlu0 %v619_v29, %s6918_s18  ;;  %994 = vrot.lane.b32.xlu1 %v993_v25, %s6918_s18 }
 0x7ab   :  { %v805_v30 = vpop.permute.xlu2 %804 }
 0x7dd   :  { %v1130_v56 = vpop.permute.xlu1 %1129  ;;  %v991_v21 = vpop.permute.xlu0 %990 }
 0x7de   :  { %5891 = vmatmul.msk.f32.vlgmr.msrb.gmra.mxu0 %vm226_vm4, %v1130_v56 }
 0x7df   :  { %1771 = vmatpush.msrb.mxu0 %v7157_v33  ;;  %v7383_v33 = vld [vmem:[%s9043_s6 + $0x18] sm:$0xff] }
 0x7e1   :  { %1772 = vmatpush.msrb.mxu0 %v7159_v34  ;;  %v7391_v34 = vld [vmem:[%s9043_s6 + $0x10] sm:$0xff] }
 0x7e3   :  { %1773 = vmatpush.msrb.mxu0 %v7163_v35  ;;  %v7399_v35 = vld [vmem:[%s9043_s6 + $0x8] sm:$0xff] }
 0x7e5   :  { %v995_v48 = vpop.permute.xlu1 %994  ;;  %v809_v50 = vpop.permute.xlu0 %808  ;;  %1774 = vmatpush.msrb.mxu0 %v7168_v36  ;;  %v7407_v36 = vld [vmem:[%s9043_s6] sm:$0xff] }
 0x7e6   :  { %v997_v51 = vsel %vm226_vm4, %v991_v21, %v995_v48  ;;  %v811_v57 = vsel %vm226_vm4, %v805_v30, %v809_v50 }
 0x7e7   :  { %v999_v58 = vrot.slane %v997_v51, 2  ;;  %5882 = vmatmul.msk.f32.vlgmr.msrb.gmra.mxu3 %vm491_vm14, %v811_v57  ;;  %1775 = vmatpush.msrb.mxu0 %v7173_v37 }
 0x7e8   :  { %1652 = vmatpush.msrb.mxu3 %v7383_v33 }
 0x7e9   :  { %5887 = vmatmul.msk.f32.vlgmr.msrb.gmra.mxu2 %vm491_vm14, %v999_v58  ;;  %1776 = vmatpush.msrb.mxu0 %v7178_v38 }
 0x7ea   :  { %1653 = vmatpush.msrb.mxu3 %v7391_v34  ;;  %1589 = vmatpush.msrb.mxu2 %v7244_v26 }
 0x7eb   :  { %1777 = vmatpush.msrb.mxu0 %v7183_v39 }
 0x7ec   :  { %1654 = vmatpush.msrb.mxu3 %v7399_v35  ;;  %1590 = vmatpush.msrb.mxu2 %v7246_v32 }
 0x7ed   :  { %1778 = vmatpush.msrb.mxu0 %v7188_v40 }
 0x7ee   :  { %1655 = vmatpush.msrb.mxu3 %v7407_v36  ;;  %1591 = vmatpush.msrb.mxu2 %v7250_v41 }
 0x7f0   :  { %1592 = vmatpush.msrb.mxu2 %v7255_v42 }
 0x7f2   :  { %1593 = vmatpush.msrb.mxu2 %v7260_v43 }
 0x7f4   :  { %1594 = vmatpush.msrb.mxu2 %v7265_v44 }
 0x7f6   :  { %1595 = vmatpush.msrb.mxu2 %v7270_v45 }
 0x7f8   :  { %1596 = vmatpush.msrb.mxu2 %v7275_v47 }
 0x85b   :  { %v1150_v37 = vpop.f32.mrf.mxu0 }
 0x85c   :  { %v1154_v38 = vrot.slane %v1150_v37, 5  ;;  %v1155_v39 = vrot.slane %v1150_v37, 6 }
 0x85e   :  { %v1158_v40 = vadd.f32 %v1154_v38, %v7136_v46  ;;  %v1159_v7 = vadd.f32 %v1155_v39, %v7142_v52 }
 0x860   :  { %6117 = vtanh.f32 %v1158_v40  ;;  %v5893_v3 = vmul.f32 -1.442695, %v1159_v7  ;;  %v5892_v17 = vmul.f32 -1.442695, %v1158_v40 }
 0x861   :  { %6119 = vtanh.f32 %v1159_v7 }
 0x866   :  { %v6118_v10 = vpop.eup %6117 }
 0x867   :  { %v6120_v11 = vpop.eup %6119  ;;  %1210 = vrot.lane.b32.xlu1 %v6118_v10, %s6918_s18 }
 0x868   :  { %1212 = vrot.lane.b32.xlu2 %v6120_v11, %s6918_s18 }
 0x86a   :  { %v832_v59 = vpop.f32.mrf.mxu3 }
 0x86b   :  { %v833_v62 = vadd.f32 %v7329_v2, %v832_v59 }
 0x86c   :  { %v1019_v60 = vpop.f32.mrf.mxu2 }
 0x86d   :  { %v1020_v63 = vadd.f32 %v7213_v55, %v1019_v60  ;;  %v5883_v25 = vmul.f32 -1.442695, %v833_v62 }
 0x86f   :  { %6121 = vtanh.f32 %v1020_v63  ;;  %v5888_v19 = vmul.f32 -1.442695, %v1020_v63 }
 0x870   :  { %6123 = vtanh.f32 %v833_v62 }
 0x871   :  { %6125 = vpow2.f32 %v5893_v3 }
 0x875   :  { %v6122_v1 = vpop.eup %6121 }
 0x876   :  { %1044 = vrot.lane.b32.xlu0 %v6122_v1, %s6918_s18  ;;  %v6124_v52 = vpop.eup %6123 }
 0x877   :  { %v6126_v5 = vpop.eup %6125 }
 0x878   :  { %v1167_v6 = vadd.f32 1.0, %v6126_v5 }
 0x87a   :  { %6127 = vrcp.f32 %v1167_v6  ;;  %v1194_v31 = vand.u32 2147483648, %v1167_v6  ;;  %vm1188_vm6 = vweird.f32 %v1167_v6  ;;  %v1192_v20 = vand.u32 2147483647, %v1167_v6 }
 0x87b   :  { %6129 = vpow2.f32 %v5892_v17 }
 0x87c   :  { %v1195_v22 = vor.u32 1.1754944e-38, %v1194_v31  ;;  %vm1193_vm8 = vcmp.eq.f32.partialorder %v1192_v20, 8.507059e+37 }
 0x87e   :  { %857 = vrot.lane.b32.xlu0 %v6124_v52, %s6918_s18 }
 0x880   :  { %v6128_v9 = vpop.eup %6127 }
 0x881   :  { %v1184_v12 = vmul.f32 %v6128_v9, %v1167_v6  ;;  %v6130_v14 = vpop.eup %6129  ;;  %vm1189_vm3 = vweird.f32 %v6128_v9 }
 0x882   :  { %v1166_v27 = vadd.f32 1.0, %v6130_v14  ;;  %vm1190_vm7 = vmor %vm1188_vm6, %vm1189_vm3 }
 0x883   :  { %v1185_v55 = vsub.f32 1.0, %v1184_v12 }
 0x884   :  { %6131 = vrcp.f32 %v1166_v27  ;;  %v1179_v38 = vand.u32 2147483648, %v1166_v27  ;;  %vm1173_vm10 = vweird.f32 %v1166_v27  ;;  %v1177_v39 = vand.u32 2147483647, %v1166_v27 }
 0x885   :  { %v1186_v16 = vmul.f32 %v6128_v9, %v1185_v55  ;;  %6133 = vpow2.f32 %v5888_v19 }
 0x886   :  { %6135 = vpow2.f32 %v5883_v25  ;;  %v1180_v10 = vor.u32 1.1754944e-38, %v1179_v38  ;;  %vm1178_vm12 = vcmp.eq.f32.partialorder %v1177_v39, 8.507059e+37 }
 0x887   :  { %v1187_v18 = vadd.f32 %v6128_v9, %v1186_v16 }
 0x889   :  { %v1191_v15 = vsel %vm1190_vm7, %v6128_v9, %v1187_v18 }
 0x88a   :  { %v7424_v23 = vsel %vm1193_vm8, %v1195_v22, %v1191_v15  ;;  %v6132_v28 = vpop.eup %6131 }
 0x88b   :  { %v6134_v56 = vpop.eup %6133  ;;  %v1169_v21 = vmul.f32 %v6132_v28, %v1166_v27  ;;  %vm1174_vm9 = vweird.f32 %v6132_v28 }
 0x88c   :  { %v1025_v30 = vadd.f32 1.0, %v6134_v56  ;;  %v6136_v50 = vpop.eup %6135  ;;  %vm1175_vm11 = vmor %vm1173_vm10, %vm1174_vm9 }
 0x88d   :  { %v1170_v48 = vsub.f32 1.0, %v1169_v21  ;;  %v838_v57 = vadd.f32 1.0, %v6136_v50 }
 0x88e   :  { %6137 = vrcp.f32 %v1025_v30  ;;  %v1037_v6 = vand.u32 2147483648, %v1025_v30  ;;  %vm1031_vm6 = vweird.f32 %v1025_v30  ;;  %v1035_v9 = vand.u32 2147483647, %v1025_v30 }
 0x88f   :  { %v1171_v51 = vmul.f32 %v6132_v28, %v1170_v48  ;;  %6139 = vrcp.f32 %v838_v57  ;;  %v850_v19 = vand.u32 2147483648, %v838_v57  ;;  %vm844_vm10 = vweird.f32 %v838_v57 }
 0x890   :  { %v1038_v55 = vor.u32 1.1754944e-38, %v1037_v6  ;;  %vm1036_vm8 = vcmp.eq.f32.partialorder %v1035_v9, 8.507059e+37  ;;  %v848_v31 = vand.u32 2147483647, %v838_v57  ;;  %v1202_v48 = vrot.slane %v7345_v61, 7 }
 0x891   :  { %v1172_v58 = vadd.f32 %v6132_v28, %v1171_v51  ;;  %v851_v15 = vor.u32 1.1754944e-38, %v850_v19  ;;  %v7484_v19 = vld [vmem:[#allocation3 + $0x8] sm:$0xff] }
 0x893   :  { %v1176_v40 = vsel %vm1175_vm11, %v6132_v28, %v1172_v58 }
 0x894   :  { %v6138_v37 = vpop.eup %6137  ;;  %v7428_v11 = vsel %vm1178_vm12, %v1180_v10, %v1176_v40  ;;  %vm849_vm12 = vcmp.eq.f32.partialorder %v848_v31, 8.507059e+37 }
 0x895   :  { %v1027_v7 = vmul.f32 %v6138_v37, %v1025_v30  ;;  %v6140_v62 = vpop.eup %6139  ;;  %vm1032_vm3 = vweird.f32 %v6138_v37  ;;  %v1206_v50 = vmul.f32 %v1202_v48, %v7428_v11 }
 0x896   :  { %v840_v52 = vmul.f32 %v6140_v62, %v838_v57  ;;  %vm1033_vm7 = vmor %vm1031_vm6, %vm1032_vm3  ;;  %vm845_vm9 = vweird.f32 %v6140_v62  ;;  %vm1244_vm3 = vcmask 1044484  }
 0x897   :  { %v1028_v59 = vsub.f32 1.0, %v1027_v7  ;;  %vm846_vm11 = vmor %vm844_vm10, %vm845_vm9 }
 0x898   :  { %v841_v5 = vsub.f32 1.0, %v840_v52 }
 0x899   :  { %v1029_v1 = vmul.f32 %v6138_v37, %v1028_v59 }
 0x89a   :  { %v842_v12 = vmul.f32 %v6140_v62, %v841_v5 }
 0x89b   :  { %v1030_v3 = vadd.f32 %v6138_v37, %v1029_v1 }
 0x89c   :  { %v843_v18 = vadd.f32 %v6140_v62, %v842_v12  ;;  %v7469_v12 = vld [vmem:[#allocation3 + $0x30] sm:$0xff] }
 0x89d   :  { %v1034_v17 = vsel %vm1033_vm7, %v6138_v37, %v1030_v3 }
 0x89e   :  { %v1039_v14 = vsel %vm1036_vm8, %v1038_v55, %v1034_v17  ;;  %v847_v20 = vsel %vm846_vm11, %v6140_v62, %v843_v18  ;;  %v7466_v17 = vld [vmem:[#allocation3 + $0x38] sm:$0xff]  ;;  %v7472_v55 = vld [vmem:[#allocation3 + $0x28] sm:$0xff] }
 0x89f   :  { %v852_v22 = vsel %vm849_vm12, %v851_v15, %v847_v20  ;;  %v1042_v58 = vmul.f32 %v1039_v14, %v7350_v0  ;;  %v7488_v15 = vld [vmem:[#allocation3] sm:$0xff] }
 0x8a0   :  { %v855_v39 = vmul.f32 %v852_v22, %v7353_v4 }
 0x8c2   :  { %v1213_v24 = vpop.permute.xlu2 %1212 }
 0x8c3   :  { %v1217_v29 = vmul.f32 %v1213_v24, %v7424_v23 }
 0x8c5   :  { %1222 = vrot.lane.b32.xlu2 %v1217_v29, %s6919_s2  ;;  %v1203_v29 = vrot.slane %v7359_v13, 7 }
 0x8c7   :  { %v1207_v25 = vmul.f32 %v1203_v29, %v7424_v23 }
 0x8d9   :  { %v1211_v60 = vpop.permute.xlu1 %1210 }
 0x8da   :  { %v1216_v63 = vmul.f32 %v1211_v60, %v7428_v11 }
 0x8dc   :  { %1220 = vrot.lane.b32.xlu1 %v1216_v63, %s6919_s2 }
 0x8e8   :  { %v1045_v16 = vpop.permute.xlu0 %1044 }
 0x8e9   :  { %v1047_v27 = vmul.f32 %v1045_v16, %v1039_v14  ;;  %v7478_v16 = vld [vmem:[#allocation3 + $0x18] sm:$0xff] }
 0x8eb   :  { %1049 = vrot.lane.b32.xlu1 %v1047_v27, %s6919_s2  ;;  %v7481_v27 = vld [vmem:[#allocation3 + $0x10] sm:$0xff] }
 0x8f0   :  { %v858_v24 = vpop.permute.xlu0 %857 }
 0x8f1   :  { %v860_v28 = vmul.f32 %v858_v24, %v852_v22 }
 0x8f3   :  { %862 = vrot.lane.b32.xlu1 %v860_v28, %s6919_s2 }
 0x91f   :  { %v1223_v56 = vpop.permute.xlu2 %1222 }
 0x920   :  { %v7436_v21 = vadd.f32 %v1223_v56, %v1207_v25  ;;  %v7507_v25 = vrot.slane %v7136_v46, 4 }
 0x922   :  { %6141 = vtanh.f32 %v7436_v21 }
 0x928   :  { %v6142_v30 = vpop.eup %6141 }
 0x929   :  { %1234 = vrot.lane.b32.xlu0 %v6142_v30, %s6918_s18 }
 0x94e   :  { %v1221_v51 = vpop.permute.xlu1 %1220 }
 0x94f   :  { %v7442_v57 = vadd.f32 %v1221_v51, %v1206_v50 }
 0x951   :  { %6143 = vtanh.f32 %v7442_v57 }
 0x957   :  { %v6144_v13 = vpop.eup %6143 }
 0x958   :  { %1232 = vrot.lane.b32.xlu2 %v6144_v13, %s6918_s18 }
 0x95d   :  { %v1050_v37 = vpop.permute.xlu1 %1049 }
 0x95e   :  { %v7447_v38 = vadd.f32 %v1050_v37, %v1042_v58 }
 0x960   :  { %6145 = vtanh.f32 %v7447_v38 }
 0x965   :  { %v863_v61 = vpop.permute.xlu1 %862 }
 0x966   :  { %v6146_v40 = vpop.eup %6145  ;;  %v7451_v7 = vadd.f32 %v863_v61, %v855_v39 }
 0x967   :  { %1055 = vrot.lane.b32.xlu2 %v6146_v40, %s6918_s18 }
 0x968   :  { %6147 = vtanh.f32 %v7451_v7 }
 0x96e   :  { %v6148_v10 = vpop.eup %6147 }
 0x96f   :  { %868 = vrot.lane.b32.xlu1 %v6148_v10, %s6918_s18 }
 0x99b   :  { %v1235_v60 = vpop.permute.xlu0 %1234 }
 0x99c   :  { %v1239_v0 = vmul.f32 %v1235_v60, %v7424_v23 }
 0x99e   :  { %v1243_v62 = vperm.slane %v1239_v0, 3 }
 0x9b2   :  { %v1233_v63 = vpop.permute.xlu2 %1232 }
 0x9b3   :  { %v1238_v59 = vmul.f32 %v1233_v63, %v7428_v11 }
 0x9b5   :  { %v1242_v4 = vperm.slane %v1238_v59, 3 }
 0x9b7   :  { %v1384_v1 = vsel %vm482_vm13, %v1243_v62, %v1242_v4  ;;  %v1245_v52 = vsel %vm1244_vm3, %v1243_v62, %v1242_v4 }
 0x9b8   :  { %1385 = vrot.lane.b32.xlu0 %v1384_v1, %s6919_s2  ;;  %1246 = vrot.lane.b32.xlu2 %v1245_v52, %s6919_s2 }
 0x9c1   :  { %v1056_v3 = vpop.permute.xlu2 %1055 }
 0x9c2   :  { %v1058_v5 = vmul.f32 %v1056_v3, %v1039_v14  ;;  %v7475_v14 = vld [vmem:[#allocation3 + $0x20] sm:$0xff] }
 0x9c4   :  { %v1249_v6 = vrot.slane %v1058_v5, 5  ;;  %1060 = vrot.lane.b32.xlu1 %v1058_v5, %s6919_s2 }
 0x9c6   :  { %1250 = vrot.lane.b32.xlu0 %v1249_v6, %s6918_s18 }
 0x9e1   :  { %v869_v23 = vpop.permute.xlu1 %868 }
 0x9e2   :  { %v871_v11 = vmul.f32 %v869_v23, %v852_v22 }
 0x9e4   :  { %1064 = vrot.lane.b32.xlu2 %v871_v11, %s6918_s18 }
 0xa12   :  { %v1247_v18 = vpop.permute.xlu2 %1246 }
 0xa2a   :  { %v1386_v9 = vpop.permute.xlu0 %1385 }
 0xa2b   :  { %5898 = vmatmul.msk.f32.vlgmr.msra.gmra.mxu2 %vm226_vm4, %v1386_v9 }
 0xa2c   :  { %2026 = vmatpush.msra.mxu2 %v7466_v17 }
 0xa2e   :  { %2027 = vmatpush.msra.mxu2 %v7469_v12 }
 0xa30   :  { %2028 = vmatpush.msra.mxu2 %v7472_v55 }
 0xa32   :  { %2029 = vmatpush.msra.mxu2 %v7475_v14 }
 0xa34   :  { %2030 = vmatpush.msra.mxu2 %v7478_v16 }
 0xa36   :  { %2031 = vmatpush.msra.mxu2 %v7481_v27  ;;  %v1061_v24 = vpop.permute.xlu1 %1060 }
 0xa38   :  { %2032 = vmatpush.msra.mxu2 %v7484_v19  ;;  %v1251_v31 = vpop.permute.xlu0 %1250 }
 0xa39   :  { %v1253_v20 = vsel %vm226_vm4, %v1247_v18, %v1251_v31 }
 0xa3a   :  { %2033 = vmatpush.msra.mxu2 %v7488_v15  ;;  %v1255_v22 = vrot.slane %v1253_v20, 3 }
 0xa3c   :  { %5894 = vmatmul.msk.f32.vlgmr.msra.gmra.mxu3 %vm491_vm14, %v1255_v22 }
 0xa3d   :  { %1906 = vmatpush.msra.mxu3 %v7383_v33 }
 0xa3e   :  { %v1065_v28 = vpop.permute.xlu2 %1064 }
 0xa3f   :  { %v1067_v29 = vsel %vm226_vm4, %v1061_v24, %v1065_v28  ;;  %1907 = vmatpush.msra.mxu3 %v7391_v34 }
 0xa40   :  { %5889 = vmatmul.msk.f32.vlgmr.msra.gmra.mxu1 %vm491_vm14, %v1067_v29 }
 0xa41   :  { %1908 = vmatpush.msra.mxu3 %v7399_v35  ;;  %1840 = vmatpush.msra.mxu1 %v7244_v26 }
 0xa43   :  { %1909 = vmatpush.msra.mxu3 %v7407_v36  ;;  %1841 = vmatpush.msra.mxu1 %v7246_v32  ;;  %v6721_v32 = vld [vmem:[%s9046_s26] ss:$0 sm:$0xff] }
 0xa45   :  { %1842 = vmatpush.msra.mxu1 %v7250_v41  ;;  %v7513_v41 = vadd.f32 %v6721_v32, %v7321_v8  ;;  %v7523_v8 = vld [vmem:[%s9011_s8] ss:$0 sm:$0xff] }
 0xa47   :  { %1843 = vmatpush.msra.mxu1 %v7255_v42 }
 0xa49   :  { %1844 = vmatpush.msra.mxu1 %v7260_v43 }
 0xa4b   :  { %1845 = vmatpush.msra.mxu1 %v7265_v44 }
 0xa4d   :  { %1846 = vmatpush.msra.mxu1 %v7270_v45 }
 0xa4f   :  { %1847 = vmatpush.msra.mxu1 %v7275_v47 }
 0xaae   :  { %v1406_v26 = vpop.f32.mrf.mxu2 }
 0xaaf   :  { %v1410_v42 = vrot.slane %v1406_v26, 1  ;;  %v1413_v43 = vadd.f32 %v1406_v26, %v7507_v25 }
 0xab1   :  { %v1414_v44 = vadd.f32 %v1410_v42, %v7513_v41  ;;  %6149 = vtanh.f32 %v1413_v43  ;;  %v5899_v58 = vmul.f32 -1.442695, %v1413_v43 }
 0xab3   :  { %6151 = vtanh.f32 %v1414_v44 }
 0xab7   :  { %v6150_v45 = vpop.eup %6149 }
 0xab8   :  { %1467 = vrot.lane.b32.xlu0 %v6150_v45, %s6918_s18 }
 0xab9   :  { %v6152_v46 = vpop.eup %6151 }
 0xaba   :  { %1469 = vrot.lane.b32.xlu1 %v6152_v46, %s6918_s18 }
 0xabd   :  { %v1088_v47 = vpop.f32.mrf.mxu1 }
 0xabe   :  { %v1089_v56 = vadd.f32 %v7329_v2, %v1088_v47  ;;  %v5900_v2 = vmul.f32 -1.442695, %v1414_v44 }
 0xabf   :  { %v1275_v30 = vpop.f32.mrf.mxu3 }
 0xac0   :  { %6153 = vtanh.f32 %v1089_v56  ;;  %v1276_v48 = vadd.f32 %v7523_v8, %v1275_v30  ;;  %v5890_v0 = vmul.f32 -1.442695, %v1089_v56 }
 0xac2   :  { %6155 = vtanh.f32 %v1276_v48  ;;  %v5895_v13 = vmul.f32 -1.442695, %v1276_v48 }
 0xac4   :  { %6157 = vpow2.f32 %v5895_v13 }
 0xac5   :  { %6159 = vpow2.f32 %v5899_v58 }
 0xac6   :  { %v6154_v50 = vpop.eup %6153  ;;  %6161 = vpow2.f32 %v5900_v2 }
 0xac7   :  { %1113 = vrot.lane.b32.xlu0 %v6154_v50, %s6918_s18 }
 0xac8   :  { %v6156_v51 = vpop.eup %6155 }
 0xac9   :  { %1300 = vrot.lane.b32.xlu2 %v6156_v51, %s6918_s18 }
 0xaca   :  { %v6158_v37 = vpop.eup %6157 }
 0xacb   :  { %v1281_v39 = vadd.f32 1.0, %v6158_v37  ;;  %v6160_v61 = vpop.eup %6159 }
 0xacc   :  { %v6162_v40 = vpop.eup %6161  ;;  %v1421_v10 = vadd.f32 1.0, %v6160_v61 }
 0xacd   :  { %6163 = vrcp.f32 %v1281_v39  ;;  %v1422_v60 = vadd.f32 1.0, %v6162_v40  ;;  %v1293_v31 = vand.u32 2147483648, %v1281_v39  ;;  %vm1287_vm7 = vweird.f32 %v1281_v39 }
 0xace   :  { %6165 = vrcp.f32 %v1421_v10  ;;  %v1291_v22 = vand.u32 2147483647, %v1281_v39  ;;  %v1434_v42 = vand.u32 2147483648, %v1421_v10  ;;  %vm1428_vm11 = vweird.f32 %v1421_v10 }
 0xacf   :  { %6167 = vrcp.f32 %v1422_v60  ;;  %v1294_v29 = vor.u32 1.1754944e-38, %v1293_v31  ;;  %v1432_v45 = vand.u32 2147483647, %v1421_v10  ;;  %v1449_v30 = vand.u32 2147483648, %v1422_v60 }
 0xad0   :  { %6169 = vpow2.f32 %v5890_v0  ;;  %vm1292_vm10 = vcmp.eq.f32.partialorder %v1291_v22, 8.507059e+37  ;;  %v1435_v50 = vor.u32 1.1754944e-38, %v1434_v42  ;;  %v1447_v51 = vand.u32 2147483647, %v1422_v60 }
 0xad3   :  { %v6164_v63 = vpop.eup %6163 }
 0xad4   :  { %v1283_v59 = vmul.f32 %v6164_v63, %v1281_v39  ;;  %v6166_v62 = vpop.eup %6165  ;;  %vm1288_vm6 = vweird.f32 %v6164_v63  ;;  %v1450_v39 = vor.u32 1.1754944e-38, %v1449_v30 }
 0xad5   :  { %v6168_v4 = vpop.eup %6167  ;;  %v1424_v3 = vmul.f32 %v6166_v62, %v1421_v10  ;;  %vm1289_vm8 = vmor %vm1287_vm7, %vm1288_vm6  ;;  %vm1429_vm9 = vweird.f32 %v6166_v62  ;;  %vm1443_vm6 = vweird.f32 %v1422_v60  ;;  %vm1433_vm7 = vcmp.eq.f32.partialorder %v1432_v45, 8.507059e+37 }
 0xad6   :  { %v1284_v1 = vsub.f32 1.0, %v1283_v59  ;;  %v6170_v52 = vpop.eup %6169  ;;  %v1439_v23 = vmul.f32 %v6168_v4, %v1422_v60  ;;  %vm1430_vm12 = vmor %vm1428_vm11, %vm1429_vm9  ;;  %vm1444_vm2 = vweird.f32 %v6168_v4 }
 0xad7   :  { %v1094_v5 = vadd.f32 1.0, %v6170_v52  ;;  %v1425_v11 = vsub.f32 1.0, %v1424_v3 }
 0xad8   :  { %v1285_v6 = vmul.f32 %v6164_v63, %v1284_v1  ;;  %v1440_v18 = vsub.f32 1.0, %v1439_v23  ;;  %v5902_v23 = vrot.slane %v7436_v21, 11 }
 0xad9   :  { %6171 = vrcp.f32 %v1094_v5  ;;  %v1426_v20 = vmul.f32 %v6166_v62, %v1425_v11  ;;  %v1106_v60 = vand.u32 2147483648, %v1094_v5  ;;  %vm1100_vm11 = vweird.f32 %v1094_v5 }
 0xada   :  { %v1286_v9 = vadd.f32 %v6164_v63, %v1285_v6  ;;  %v1441_v28 = vmul.f32 %v6168_v4, %v1440_v18 }
 0xadb   :  { %v1427_v26 = vadd.f32 %v6166_v62, %v1426_v20 }
 0xadc   :  { %v1290_v24 = vsel %vm1289_vm8, %v6164_v63, %v1286_v9  ;;  %v1442_v47 = vadd.f32 %v6168_v4, %v1441_v28  ;;  %vm1445_vm8 = vmor %vm1443_vm6, %vm1444_vm2 }
 0xadd   :  { %v7528_v43 = vsel %vm1292_vm10, %v1294_v29, %v1290_v24  ;;  %v1431_v56 = vsel %vm1430_vm12, %v6166_v62, %v1427_v26  ;;  %vm1448_vm10 = vcmp.eq.f32.partialorder %v1447_v51, 8.507059e+37  ;;  %v1104_v62 = vand.u32 2147483647, %v1094_v5 }
 0xade   :  { %v1436_v58 = vsel %vm1433_vm7, %v1435_v50, %v1431_v56  ;;  %v1446_v2 = vsel %vm1445_vm8, %v6168_v4, %v1442_v47  ;;  %v1107_v4 = vor.u32 1.1754944e-38, %v1106_v60  ;;  %v5901_v24 = vrot.slane %v7442_v57, 11 }
 0xadf   :  { %v6172_v32 = vpop.eup %6171  ;;  %v1451_v10 = vsel %vm1448_vm10, %v1450_v39, %v1446_v2  ;;  %vm1105_vm12 = vcmp.eq.f32.partialorder %v1104_v62, 8.507059e+37  ;;  %v7566_v39 = vld [vmem:[#allocation3 + $0x70] sm:$0xff] }
 0xae0   :  { %v1096_v48 = vmul.f32 %v6172_v32, %v1094_v5  ;;  %vm1101_vm9 = vweird.f32 %v6172_v32  ;;  %v1464_v11 = vmul.f32 %v5902_v23, %v1451_v10  ;;  %v1298_v5 = vmul.f32 %v7528_v43, %v7447_v38 }
 0xae1   :  { %vm1102_vm2 = vmor %vm1100_vm11, %vm1101_vm9  ;;  %v1463_v21 = vmul.f32 %v5901_v24, %v1436_v58 }
 0xae2   :  { %v1097_v61 = vsub.f32 1.0, %v1096_v48 }
 0xae4   :  { %v1098_v63 = vmul.f32 %v6172_v32, %v1097_v61  ;;  %v7569_v61 = vld [vmem:[#allocation3 + $0x68] sm:$0xff] }
 0xae6   :  { %v1099_v59 = vadd.f32 %v6172_v32, %v1098_v63 }
 0xae8   :  { %v1103_v1 = vsel %vm1102_vm2, %v6172_v32, %v1099_v59  ;;  %v7580_v59 = vld [vmem:[#allocation3 + $0x50] sm:$0xff] }
 0xae9   :  { %v1108_v52 = vsel %vm1105_vm12, %v1107_v4, %v1103_v1  ;;  %v7585_v1 = vld [vmem:[#allocation3 + $0x48] sm:$0xff]  ;;  %v7591_v4 = vld [vmem:[#allocation3 + $0x40] sm:$0xff] }
 0xaea   :  { %v1111_v38 = vmul.f32 %v1108_v52, %v7451_v7 }
 0xb23   :  { %v1301_v44 = vpop.permute.xlu2 %1300 }
 0xb24   :  { %v1303_v46 = vmul.f32 %v1301_v44, %v7528_v43 }
 0xb26   :  { %1305 = vrot.lane.b32.xlu0 %v1303_v46, %s6919_s2 }
 0xb2a   :  { %v1468_v13 = vpop.permute.xlu0 %1467 }
 0xb2b   :  { %v1473_v37 = vmul.f32 %v1468_v13, %v1436_v58 }
 0xb2c   :  { %v1470_v40 = vpop.permute.xlu1 %1469 }
 0xb2d   :  { %1477 = vrot.lane.b32.xlu1 %v1473_v37, %s6919_s2  ;;  %v1474_v0 = vmul.f32 %v1470_v40, %v1451_v10  ;;  %v7563_v37 = vld [vmem:[#allocation3 + $0x78] sm:$0xff] }
 0xb2f   :  { %1479 = vrot.lane.b32.xlu2 %v1474_v0, %s6919_s2  ;;  %v7575_v0 = vld [vmem:[#allocation3 + $0x58] sm:$0xff] }
 0xb39   :  { %v1114_v3 = vpop.permute.xlu0 %1113 }
 0xb3a   :  { %v1116_v6 = vmul.f32 %v1114_v3, %v1108_v52 }
 0xb3c   :  { %1118 = vrot.lane.b32.xlu1 %v1116_v6, %s6919_s2 }
 0xb89   :  { %v1480_v9 = vpop.permute.xlu2 %1479 }
 0xb8a   :  { %v7536_v18 = vadd.f32 %v1480_v9, %v1464_v11  ;;  %v7609_v11 = vld [vmem:[%s9011_s8 + $0x1] ss:$0 sm:$0xff] }
 0xb8c   :  { %6173 = vtanh.f32 %v7536_v18 }
 0xb92   :  { %v6174_v31 = vpop.eup %6173 }
 0xb93   :  { %1491 = vrot.lane.b32.xlu0 %v6174_v31, %s6918_s18 }
 0xb98   :  { %v1306_v20 = vpop.permute.xlu0 %1305 }
 0xb99   :  { %v7542_v22 = vadd.f32 %v1306_v20, %v1298_v5 }
 0xb9b   :  { %6175 = vtanh.f32 %v7542_v22 }
 0xb9f   :  { %v1478_v28 = vpop.permute.xlu1 %1477 }
 0xba0   :  { %v7546_v29 = vadd.f32 %v1478_v28, %v1463_v21 }
 0xba1   :  { %v6176_v26 = vpop.eup %6175 }
 0xba2   :  { %6177 = vtanh.f32 %v7546_v29  ;;  %1311 = vrot.lane.b32.xlu1 %v6176_v26, %s6918_s18 }
 0xba8   :  { %v6178_v32 = vpop.eup %6177 }
 0xba9   :  { %1489 = vrot.lane.b32.xlu2 %v6178_v32, %s6918_s18 }
 0xbae   :  { %v1119_v42 = vpop.permute.xlu1 %1118 }
 0xbaf   :  { %v7552_v44 = vadd.f32 %v1119_v42, %v1111_v38 }
 0xbb1   :  { %6179 = vtanh.f32 %v7552_v44 }
 0xbb7   :  { %v6180_v57 = vpop.eup %6179 }
 0xbb8   :  { %1124 = vrot.lane.b32.xlu2 %v6180_v57, %s6918_s18 }
 0xc03   :  { %v1490_v45 = vpop.permute.xlu2 %1489 }
 0xc04   :  { %v1495_v46 = vmul.f32 %v1490_v45, %v1436_v58 }
 0xc05   :  { %v1492_v47 = vpop.permute.xlu0 %1491 }
 0xc06   :  { %v1496_v56 = vmul.f32 %v1492_v47, %v1451_v10  ;;  %v1499_v30 = vperm.slane %v1495_v46, 0 }
 0xc08   :  { %v1500_v48 = vperm.slane %v1496_v56, 0 }
 0xc0a   :  { %v1501_v50 = vsel %vm482_vm13, %v1500_v48, %v1499_v30 }
 0xc0b   :  { %1502 = vrot.lane.b32.xlu0 %v1501_v50, %s6919_s2 }
 0xc12   :  { %v1125_v51 = vpop.permute.xlu2 %1124 }
 0xc13   :  { %v1127_v7 = vmul.f32 %v1125_v51, %v1108_v52 }
 0xc14   :  { %v1312_v13 = vpop.permute.xlu1 %1311 }
 0xc15   :  { %1320 = vrot.lane.b32.xlu0 %v1127_v7, %s6918_s18  ;;  %v1314_v2 = vmul.f32 %v1312_v13, %v7528_v43  ;;  %v7572_v43 = vld [vmem:[#allocation3 + $0x60] sm:$0xff] }
 0xc17   :  { %1505 = vrot.lane.b32.xlu1 %v1314_v2, %s6918_s18  ;;  %1316 = vrot.lane.b32.xlu2 %v1314_v2, %s6919_s2 }
 0xc71   :  { %v1317_v40 = vpop.permute.xlu2 %1316 }
 0xc7d   :  { %v1503_v58 = vpop.permute.xlu0 %1502 }
 0xc7e   :  { %5907 = vmatmul.msk.f32.vlgmr.msrb.gmra.mxu3 %vm226_vm4, %v1503_v58 }
 0xc7f   :  { %2095 = vmatpush.msrb.mxu3 %v7563_v37 }
 0xc81   :  { %2096 = vmatpush.msrb.mxu3 %v7566_v39 }
 0xc83   :  { %2097 = vmatpush.msrb.mxu3 %v7569_v61 }
 0xc85   :  { %2098 = vmatpush.msrb.mxu3 %v7572_v43 }
 0xc87   :  { %v1321_v10 = vpop.permute.xlu0 %1320  ;;  %2099 = vmatpush.msrb.mxu3 %v7575_v0 }
 0xc88   :  { %v1323_v63 = vsel %vm226_vm4, %v1317_v40, %v1321_v10 }
 0xc89   :  { %5896 = vmatmul.msk.f32.vlgmr.msra.gmra.mxu0 %vm491_vm14, %v1323_v63  ;;  %2100 = vmatpush.msrb.mxu3 %v7580_v59  ;;  %v1506_v60 = vpop.permute.xlu1 %1505 }
 0xc8a   :  { %2161 = vmatpush.msra.mxu0 %v7383_v33  ;;  %v1508_v62 = vsel %vm226_vm4, %v1503_v58, %v1506_v60 }
 0xc8b   :  { %2101 = vmatpush.msrb.mxu3 %v7585_v1  ;;  %5903 = vmatmul.msk.f32.vlgmr.msrb.gmra.mxu1 %vm491_vm14, %v1508_v62 }
 0xc8c   :  { %2162 = vmatpush.msra.mxu0 %v7391_v34  ;;  %2281 = vmatpush.msrb.mxu1 %v7466_v17 }
 0xc8d   :  { %2102 = vmatpush.msrb.mxu3 %v7591_v4 }
 0xc8e   :  { %2163 = vmatpush.msra.mxu0 %v7399_v35  ;;  %2282 = vmatpush.msrb.mxu1 %v7469_v12 }
 0xc90   :  { %2164 = vmatpush.msra.mxu0 %v7407_v36  ;;  %2283 = vmatpush.msrb.mxu1 %v7472_v55 }
 0xc92   :  { %2284 = vmatpush.msrb.mxu1 %v7475_v14 }
 0xc94   :  { %2285 = vmatpush.msrb.mxu1 %v7478_v16 }
 0xc96   :  { %2286 = vmatpush.msrb.mxu1 %v7481_v27 }
 0xc98   :  { %2287 = vmatpush.msrb.mxu1 %v7484_v19 }
 0xc9a   :  { %2288 = vmatpush.msrb.mxu1 %v7488_v15 }
 0xd01   :  { %v1657_v33 = vpop.f32.mrf.mxu3 }
 0xd02   :  { %v1661_v34 = vrot.slane %v1657_v33, 7  ;;  %v1665_v35 = vadd.f32 %v1657_v33, %v7513_v41 }
 0xd04   :  { %v1664_v52 = vadd.f32 %v1661_v34, %v7507_v25  ;;  %6181 = vtanh.f32 %v1665_v35  ;;  %v5909_v24 = vmul.f32 -1.442695, %v1665_v35 }
 0xd06   :  { %6183 = vtanh.f32 %v1664_v52  ;;  %v1344_v36 = vpop.f32.mrf.mxu0  ;;  %v5908_v38 = vmul.f32 -1.442695, %v1664_v52 }
 0xd07   :  { %v1345_v9 = vadd.f32 %v7609_v11, %v1344_v36 }
 0xd08   :  { %v1529_v3 = vpop.f32.mrf.mxu1 }
 0xd09   :  { %v1530_v23 = vadd.f32 %v7523_v8, %v1529_v3  ;;  %v5897_v46 = vmul.f32 -1.442695, %v1345_v9 }
 0xd0a   :  { %v6182_v6 = vpop.eup %6181 }
 0xd0b   :  { %1718 = vrot.lane.b32.xlu2 %v6182_v6, %s6918_s18  ;;  %6185 = vtanh.f32 %v1530_v23  ;;  %v5904_v57 = vmul.f32 -1.442695, %v1530_v23 }
 0xd0c   :  { %v6184_v31 = vpop.eup %6183  ;;  %6187 = vtanh.f32 %v1345_v9 }
 0xd0d   :  { %1716 = vrot.lane.b32.xlu1 %v6184_v31, %s6918_s18  ;;  %6189 = vpow2.f32 %v5909_v24 }
 0xd11   :  { %v6186_v5 = vpop.eup %6185 }
 0xd12   :  { %1554 = vrot.lane.b32.xlu0 %v6186_v5, %s6918_s18  ;;  %v6188_v20 = vpop.eup %6187 }
 0xd13   :  { %v6190_v21 = vpop.eup %6189 }
 0xd14   :  { %v1673_v28 = vadd.f32 1.0, %v6190_v21 }
 0xd15   :  { %1369 = vrot.lane.b32.xlu1 %v6188_v20, %s6918_s18 }
 0xd16   :  { %6191 = vrcp.f32 %v1673_v28  ;;  %v1700_v30 = vand.u32 2147483648, %v1673_v28  ;;  %vm1694_vm7 = vweird.f32 %v1673_v28  ;;  %v1698_v50 = vand.u32 2147483647, %v1673_v28 }
 0xd17   :  { %6193 = vpow2.f32 %v5908_v38 }
 0xd18   :  { %6195 = vpow2.f32 %v5904_v57  ;;  %v1701_v13 = vor.u32 1.1754944e-38, %v1700_v30  ;;  %vm1699_vm10 = vcmp.eq.f32.partialorder %v1698_v50, 8.507059e+37 }
 0xd19   :  { %6197 = vpow2.f32 %v5897_v46 }
 0xd1c   :  { %v6192_v26 = vpop.eup %6191 }
 0xd1d   :  { %v1690_v32 = vmul.f32 %v6192_v26, %v1673_v28  ;;  %v6194_v47 = vpop.eup %6193  ;;  %vm1695_vm6 = vweird.f32 %v6192_v26 }
 0xd1e   :  { %v1672_v48 = vadd.f32 1.0, %v6194_v47  ;;  %vm1696_vm8 = vmor %vm1694_vm7, %vm1695_vm6  ;;  %v6196_v51 = vpop.eup %6195 }
 0xd1f   :  { %v1691_v42 = vsub.f32 1.0, %v1690_v32  ;;  %v6198_v2 = vpop.eup %6197  ;;  %v1535_v58 = vadd.f32 1.0, %v6196_v51 }
 0xd20   :  { %6199 = vrcp.f32 %v1672_v48  ;;  %v1350_v60 = vadd.f32 1.0, %v6198_v2  ;;  %v1685_v5 = vand.u32 2147483648, %v1672_v48  ;;  %vm1679_vm11 = vweird.f32 %v1672_v48 }
 0xd21   :  { %v1692_v45 = vmul.f32 %v6192_v26, %v1691_v42  ;;  %6201 = vrcp.f32 %v1535_v58  ;;  %v1683_v24 = vand.u32 2147483647, %v1672_v48  ;;  %v1547_v38 = vand.u32 2147483648, %v1535_v58 }
 0xd22   :  { %6203 = vrcp.f32 %v1350_v60  ;;  %vm1541_vm7 = vweird.f32 %v1535_v58  ;;  %v1362_v30 = vand.u32 2147483648, %v1350_v60  ;;  %v1360_v50 = vand.u32 2147483647, %v1350_v60 }
 0xd23   :  { %v1693_v56 = vadd.f32 %v6192_v26, %v1692_v45  ;;  %vm1684_vm6 = vcmp.eq.f32.partialorder %v1683_v24, 8.507059e+37  ;;  %v1545_v45 = vand.u32 2147483647, %v1535_v58 }
 0xd25   :  { %v1697_v7 = vsel %vm1696_vm8, %v6192_v26, %v1693_v56  ;;  %v1686_v26 = vor.u32 1.1754944e-38, %v1685_v5 }
 0xd26   :  { %v7616_v40 = vsel %vm1699_vm10, %v1701_v13, %v1697_v7  ;;  %v6200_v62 = vpop.eup %6199 }
 0xd27   :  { %v1675_v33 = vmul.f32 %v6200_v62, %v1672_v48  ;;  %v6202_v34 = vpop.eup %6201  ;;  %vm1680_vm9 = vweird.f32 %v6200_v62  ;;  %v1548_v48 = vor.u32 1.1754944e-38, %v1547_v38 }
 0xd28   :  { %v6204_v52 = vpop.eup %6203  ;;  %v1537_v36 = vmul.f32 %v6202_v34, %v1535_v58  ;;  %vm1681_vm2 = vmor %vm1679_vm11, %vm1680_vm9  ;;  %vm1542_vm12 = vweird.f32 %v6202_v34  ;;  %vm1356_vm9 = vweird.f32 %v1350_v60  ;;  %vm1546_vm11 = vcmp.eq.f32.partialorder %v1545_v45, 8.507059e+37 }
 0xd29   :  { %v1676_v35 = vsub.f32 1.0, %v1675_v33  ;;  %v1352_v6 = vmul.f32 %v6204_v52, %v1350_v60  ;;  %vm1543_vm8 = vmor %vm1541_vm7, %vm1542_vm12  ;;  %vm1357_vm10 = vweird.f32 %v6204_v52  ;;  %v1709_v33 = vrot.slane %v7536_v18, 7 }
 0xd2a   :  { %v1538_v23 = vsub.f32 1.0, %v1537_v36  ;;  %v1708_v60 = vrot.slane %v7546_v29, 7 }
 0xd2b   :  { %v1677_v3 = vmul.f32 %v6200_v62, %v1676_v35  ;;  %v1353_v31 = vsub.f32 1.0, %v1352_v6 }
 0xd2c   :  { %v1539_v20 = vmul.f32 %v6202_v34, %v1538_v23 }
 0xd2d   :  { %v1678_v9 = vadd.f32 %v6200_v62, %v1677_v3  ;;  %v1354_v28 = vmul.f32 %v6204_v52, %v1353_v31 }
 0xd2e   :  { %v1540_v32 = vadd.f32 %v6202_v34, %v1539_v20 }
 0xd2f   :  { %v1682_v21 = vsel %vm1681_vm2, %v6200_v62, %v1678_v9  ;;  %v1355_v47 = vadd.f32 %v6204_v52, %v1354_v28  ;;  %vm1358_vm2 = vmor %vm1356_vm9, %vm1357_vm10 }
 0xd30   :  { %v1687_v57 = vsel %vm1684_vm6, %v1686_v26, %v1682_v21  ;;  %v1544_v56 = vsel %vm1543_vm8, %v6202_v34, %v1540_v32  ;;  %vm1361_vm6 = vcmp.eq.f32.partialorder %v1360_v50, 8.507059e+37  ;;  %v1713_v34 = vmul.f32 %v1709_v33, %v7616_v40 }
 0xd31   :  { %v1549_v51 = vsel %vm1546_vm11, %v1548_v48, %v1544_v56  ;;  %v1359_v13 = vsel %vm1358_vm2, %v6204_v52, %v1355_v47  ;;  %v1712_v52 = vmul.f32 %v1708_v60, %v1687_v57 }
 0xd32   :  { %v1552_v20 = vmul.f32 %v1549_v51, %v7542_v22 }
 0xd65   :  { %v1719_v10 = vpop.permute.xlu2 %1718 }
 0xd66   :  { %v1723_v63 = vmul.f32 %v1719_v10, %v7616_v40  ;;  %v1363_v10 = vor.u32 1.1754944e-38, %v1362_v30 }
 0xd68   :  { %1728 = vrot.lane.b32.xlu0 %v1723_v63, %s6919_s2  ;;  %v1364_v63 = vsel %vm1361_vm6, %v1363_v10, %v1359_v13 }
 0xd69   :  { %v1367_v18 = vmul.f32 %v1364_v63, %v7552_v44 }
 0xd7f   :  { %v1717_v42 = vpop.permute.xlu1 %1716 }
 0xd80   :  { %v1722_v46 = vmul.f32 %v1717_v42, %v1687_v57 }
 0xd82   :  { %1726 = vrot.lane.b32.xlu2 %v1722_v46, %s6919_s2 }
 0xd84   :  { %v1555_v7 = vpop.permute.xlu0 %1554 }
 0xd85   :  { %v1557_v2 = vmul.f32 %v1555_v7, %v1549_v51 }
 0xd87   :  { %1559 = vrot.lane.b32.xlu1 %v1557_v2, %s6919_s2  ;;  %v1370_v58 = vpop.permute.xlu1 %1369 }
 0xd88   :  { %v1372_v62 = vmul.f32 %v1370_v58, %v1364_v63 }
 0xd8a   :  { %1374 = vrot.lane.b32.xlu2 %v1372_v62, %s6919_s2 }
 0xdda   :  { %v1729_v35 = vpop.permute.xlu0 %1728 }
 0xddb   :  { %v7626_v36 = vadd.f32 %v1729_v35, %v1713_v34 }
 0xddc   :  { %v1727_v3 = vpop.permute.xlu2 %1726 }
 0xddd   :  { %6205 = vtanh.f32 %v7626_v36  ;;  %v7629_v6 = vadd.f32 %v1727_v3, %v1712_v52 }
 0xddf   :  { %6207 = vtanh.f32 %v7629_v6 }
 0xde3   :  { %v6206_v23 = vpop.eup %6205 }
 0xde4   :  { %1740 = vrot.lane.b32.xlu1 %v6206_v23, %s6918_s18  ;;  %v1375_v9 = vpop.permute.xlu2 %1374 }
 0xde5   :  { %v6208_v31 = vpop.eup %6207  ;;  %v7634_v5 = vadd.f32 %v1375_v9, %v1367_v18 }
 0xde6   :  { %1738 = vrot.lane.b32.xlu0 %v6208_v31, %s6918_s18 }
 0xde7   :  { %6209 = vtanh.f32 %v7634_v5 }
 0xded   :  { %v6210_v29 = vpop.eup %6209 }
 0xdee   :  { %1380 = vrot.lane.b32.xlu0 %v6210_v29, %s6918_s18 }
 0xdf9   :  { %v1560_v24 = vpop.permute.xlu1 %1559 }
 0xdfa   :  { %v7640_v21 = vadd.f32 %v1560_v24, %v1552_v20 }
 0xdfc   :  { %6211 = vtanh.f32 %v7640_v21 }
 0xe02   :  { %v6212_v28 = vpop.eup %6211 }
 0xe03   :  { %1565 = vrot.lane.b32.xlu2 %v6212_v28, %s6918_s18 }
 0xe56   :  { %v1741_v44 = vpop.permute.xlu1 %1740 }
 0xe57   :  { %v1745_v26 = vmul.f32 %v1741_v44, %v7616_v40 }
 0xe58   :  { %v1739_v32 = vpop.permute.xlu0 %1738 }
 0xe59   :  { %v1744_v38 = vmul.f32 %v1739_v32, %v1687_v57  ;;  %v1749_v42 = vperm.slane %v1745_v26, 1 }
 0xe5b   :  { %v1748_v45 = vperm.slane %v1744_v38, 1 }
 0xe5d   :  { %v1566_v46 = vpop.permute.xlu2 %1565  ;;  %v1889_v47 = vsel %vm482_vm13, %v1749_v42, %v1748_v45  ;;  %v1750_v22 = vsel %vm732_vm5, %v1749_v42, %v1748_v45 }
 0xe5e   :  { %v1568_v56 = vmul.f32 %v1566_v46, %v1549_v51  ;;  %1890 = vrot.lane.b32.xlu1 %v1889_v47, %s6919_s2  ;;  %1751 = vrot.lane.b32.xlu2 %v1750_v22, %s6919_s2 }
 0xe60   :  { %v1754_v30 = vrot.slane %v1568_v56, 7  ;;  %v1381_v48 = vpop.permute.xlu0 %1380 }
 0xe61   :  { %v1383_v50 = vmul.f32 %v1381_v48, %v1364_v63 }
 0xe62   :  { %1755 = vrot.lane.b32.xlu0 %v1754_v30, %s6918_s18 }
 0xe66   :  { %1574 = vrot.lane.b32.xlu2 %v1383_v50, %s6918_s18  ;;  %1570 = vrot.lane.b32.xlu1 %v1568_v56, %s6919_s2 }
 0xeb8   :  { %v1752_v40 = vpop.permute.xlu2 %1751 }
 0xec0   :  { %v1575_v2 = vpop.permute.xlu2 %1574 }
 0xed0   :  { %v1891_v57 = vpop.permute.xlu1 %1890 }
 0xed1   :  { %5914 = vmatmul.msk.f32.vlgmr.msra.gmra.mxu3 %vm226_vm4, %v1891_v57 }
 0xed2   :  { %2535 = vmatpush.msra.mxu3 %v7466_v17  ;;  %v7666_v17 = vld [vmem:[%s9043_s6 + $0x18] sm:$0xff] }
 0xed4   :  { %v1756_v51 = vpop.permute.xlu0 %1755  ;;  %2536 = vmatpush.msra.mxu3 %v7469_v12  ;;  %v7674_v12 = vld [vmem:[%s9043_s6 + $0x10] sm:$0xff] }
 0xed5   :  { %v1758_v7 = vsel %vm226_vm4, %v1752_v40, %v1756_v51 }
 0xed6   :  { %v1760_v13 = vrot.slane %v1758_v7, 1  ;;  %2537 = vmatpush.msra.mxu3 %v7472_v55  ;;  %v7682_v55 = vld [vmem:[%s9043_s6 + $0x8] sm:$0xff] }
 0xed8   :  { %v1571_v10 = vpop.permute.xlu1 %1570  ;;  %5910 = vmatmul.msk.f32.vlgmr.msrb.gmra.mxu0 %vm491_vm14, %v1760_v13  ;;  %2538 = vmatpush.msra.mxu3 %v7475_v14  ;;  %v7690_v14 = vld [vmem:[%s9043_s6] sm:$0xff] }
 0xed9   :  { %v1577_v58 = vsel %vm226_vm4, %v1571_v10, %v1575_v2  ;;  %2350 = vmatpush.msrb.mxu0 %v7563_v37 }
 0xeda   :  { %5905 = vmatmul.msk.f32.vlgmr.msrb.gmra.mxu2 %vm491_vm14, %v1577_v58  ;;  %2539 = vmatpush.msra.mxu3 %v7478_v16 }
 0xedb   :  { %2416 = vmatpush.msrb.mxu2 %v7666_v17  ;;  %2351 = vmatpush.msrb.mxu0 %v7566_v39 }
 0xedc   :  { %2540 = vmatpush.msra.mxu3 %v7481_v27 }
 0xedd   :  { %2417 = vmatpush.msrb.mxu2 %v7674_v12  ;;  %2352 = vmatpush.msrb.mxu0 %v7569_v61 }
 0xede   :  { %2541 = vmatpush.msra.mxu3 %v7484_v19 }
 0xedf   :  { %2418 = vmatpush.msrb.mxu2 %v7682_v55  ;;  %2353 = vmatpush.msrb.mxu0 %v7572_v43 }
 0xee0   :  { %2542 = vmatpush.msra.mxu3 %v7488_v15 }
 0xee1   :  { %2419 = vmatpush.msrb.mxu2 %v7690_v14  ;;  %2354 = vmatpush.msrb.mxu0 %v7575_v0 }
 0xee3   :  { %2355 = vmatpush.msrb.mxu0 %v7580_v59 }
 0xee5   :  { %2356 = vmatpush.msrb.mxu0 %v7585_v1 }
 0xee7   :  { %2357 = vmatpush.msrb.mxu0 %v7591_v4 }
 0xf54   :  { %v1911_v16 = vpop.f32.mrf.mxu3 }
 0xf55   :  { %v1915_v27 = vrot.slane %v1911_v16, 6  ;;  %v1916_v19 = vrot.slane %v1911_v16, 7  ;;  %v1780_v63 = vpop.f32.mrf.mxu0 }
 0xf56   :  { %v1781_v15 = vadd.f32 %v7523_v8, %v1780_v63 }
 0xf57   :  { %v1919_v62 = vadd.f32 %v1915_v27, %v7507_v25  ;;  %v1920_v33 = vadd.f32 %v1916_v19, %v7513_v41 }
 0xf58   :  { %6213 = vtanh.f32 %v1781_v15  ;;  %v5911_v23 = vmul.f32 -1.442695, %v1781_v15 }
 0xf59   :  { %6215 = vtanh.f32 %v1919_v62  ;;  %v5915_v29 = vmul.f32 -1.442695, %v1919_v62  ;;  %v5916_v20 = vmul.f32 -1.442695, %v1920_v33 }
 0xf5a   :  { %6217 = vtanh.f32 %v1920_v33 }
 0xf5d   :  { %v1598_v34 = vpop.f32.mrf.mxu2 }
 0xf5e   :  { %v6214_v60 = vpop.eup %6213  ;;  %v1599_v35 = vadd.f32 %v7609_v11, %v1598_v34 }
 0xf5f   :  { %v6216_v52 = vpop.eup %6215  ;;  %1805 = vrot.lane.b32.xlu2 %v6214_v60, %s6918_s18 }
 0xf60   :  { %v6218_v3 = vpop.eup %6217  ;;  %6219 = vtanh.f32 %v1599_v35  ;;  %1971 = vrot.lane.b32.xlu0 %v6216_v52, %s6918_s18  ;;  %v5906_v44 = vmul.f32 -1.442695, %v1599_v35 }
 0xf61   :  { %1973 = vrot.lane.b32.xlu1 %v6218_v3, %s6918_s18  ;;  %6221 = vpow2.f32 %v5911_v23 }
 0xf66   :  { %v6220_v8 = vpop.eup %6219 }
 0xf67   :  { %v6222_v18 = vpop.eup %6221 }
 0xf68   :  { %1623 = vrot.lane.b32.xlu0 %v6220_v8, %s6918_s18  ;;  %v1786_v9 = vadd.f32 1.0, %v6222_v18 }
 0xf6a   :  { %6223 = vrcp.f32 %v1786_v9  ;;  %v1798_v47 = vand.u32 2147483648, %v1786_v9  ;;  %vm1792_vm7 = vweird.f32 %v1786_v9  ;;  %v1796_v22 = vand.u32 2147483647, %v1786_v9 }
 0xf6b   :  { %6225 = vpow2.f32 %v5915_v29 }
 0xf6c   :  { %6227 = vpow2.f32 %v5916_v20  ;;  %v1799_v48 = vor.u32 1.1754944e-38, %v1798_v47  ;;  %vm1797_vm10 = vcmp.eq.f32.partialorder %v1796_v22, 8.507059e+37 }
 0xf6d   :  { %6229 = vpow2.f32 %v5906_v44 }
 0xf70   :  { %v6224_v31 = vpop.eup %6223 }
 0xf71   :  { %v1788_v24 = vmul.f32 %v6224_v31, %v1786_v9  ;;  %v6226_v32 = vpop.eup %6225  ;;  %vm1793_vm12 = vweird.f32 %v6224_v31 }
 0xf72   :  { %v6228_v38 = vpop.eup %6227  ;;  %v1927_v42 = vadd.f32 1.0, %v6226_v32  ;;  %vm1794_vm8 = vmor %vm1792_vm7, %vm1793_vm12 }
 0xf73   :  { %v1789_v28 = vsub.f32 1.0, %v1788_v24  ;;  %v1928_v46 = vadd.f32 1.0, %v6228_v38  ;;  %v6230_v30 = vpop.eup %6229 }
 0xf74   :  { %6231 = vrcp.f32 %v1927_v42  ;;  %v1604_v57 = vadd.f32 1.0, %v6230_v30  ;;  %v1940_v60 = vand.u32 2147483648, %v1927_v42  ;;  %vm1934_vm2 = vweird.f32 %v1927_v42 }
 0xf75   :  { %v1790_v26 = vmul.f32 %v6224_v31, %v1789_v28  ;;  %6233 = vrcp.f32 %v1928_v46  ;;  %v1955_v35 = vand.u32 2147483648, %v1928_v46  ;;  %v1938_v52 = vand.u32 2147483647, %v1927_v42 }
 0xf76   :  { %6235 = vrcp.f32 %v1604_v57  ;;  %vm1949_vm6 = vweird.f32 %v1928_v46  ;;  %v1953_v3 = vand.u32 2147483647, %v1928_v46  ;;  %v1941_v9 = vor.u32 1.1754944e-38, %v1940_v60 }
 0xf77   :  { %v1791_v45 = vadd.f32 %v6224_v31, %v1790_v26  ;;  %v1616_v38 = vand.u32 2147483648, %v1604_v57  ;;  %v1964_v30 = vrot.slane %v7626_v36, 7  ;;  %v1963_v36 = vrot.slane %v7629_v6, 7 }
 0xf79   :  { %v1795_v56 = vsel %vm1794_vm8, %v6224_v31, %v1791_v45  ;;  %v1956_v31 = vor.u32 1.1754944e-38, %v1955_v35  ;;  %vm1939_vm8 = vcmp.eq.f32.partialorder %v1938_v52, 8.507059e+37 }
 0xf7a   :  { %v7705_v50 = vsel %vm1797_vm10, %v1799_v48, %v1795_v56  ;;  %v6232_v7 = vpop.eup %6231  ;;  %vm1954_vm10 = vcmp.eq.f32.partialorder %v1953_v3, 8.507059e+37 }
 0xf7b   :  { %v6234_v13 = vpop.eup %6233  ;;  %v1930_v2 = vmul.f32 %v6232_v7, %v1927_v42  ;;  %vm1935_vm9 = vweird.f32 %v6232_v7  ;;  %v1614_v42 = vand.u32 2147483647, %v1604_v57  ;;  %v1803_v48 = vmul.f32 %v7705_v50, %v7640_v21 }
 0xf7c   :  { %v1945_v10 = vmul.f32 %v6234_v13, %v1928_v46  ;;  %v6236_v16 = vpop.eup %6235  ;;  %vm1950_vm11 = vweird.f32 %v6234_v13  ;;  %vm1936_vm12 = vmor %vm1934_vm2, %vm1935_vm9  ;;  %vm1610_vm9 = vweird.f32 %v1604_v57  ;;  %v1617_v46 = vor.u32 1.1754944e-38, %v1616_v38 }
 0xf7d   :  { %v1931_v58 = vsub.f32 1.0, %v1930_v2  ;;  %v1606_v63 = vmul.f32 %v6236_v16, %v1604_v57  ;;  %vm1951_vm7 = vmor %vm1949_vm6, %vm1950_vm11  ;;  %vm1611_vm0 = vweird.f32 %v6236_v16  ;;  %vm1615_vm2 = vcmp.eq.f32.partialorder %v1614_v42, 8.507059e+37 }
 0xf7e   :  { %v1946_v27 = vsub.f32 1.0, %v1945_v10  ;;  %vm1612_vm11 = vmor %vm1610_vm9, %vm1611_vm0 }
 0xf7f   :  { %v1932_v19 = vmul.f32 %v6232_v7, %v1931_v58  ;;  %v1607_v33 = vsub.f32 1.0, %v1606_v63 }
 0xf80   :  { %v1947_v15 = vmul.f32 %v6234_v13, %v1946_v27 }
 0xf81   :  { %v1933_v62 = vadd.f32 %v6232_v7, %v1932_v19  ;;  %v1608_v23 = vmul.f32 %v6236_v16, %v1607_v33 }
 0xf82   :  { %v1948_v34 = vadd.f32 %v6234_v13, %v1947_v15 }
 0xf83   :  { %v1937_v8 = vsel %vm1936_vm12, %v6232_v7, %v1933_v62  ;;  %v1609_v26 = vadd.f32 %v6236_v16, %v1608_v23 }
 0xf84   :  { %v1952_v18 = vsel %vm1951_vm7, %v6234_v13, %v1948_v34  ;;  %v1942_v29 = vsel %vm1939_vm8, %v1941_v9, %v1937_v8 }
 0xf85   :  { %v1957_v24 = vsel %vm1954_vm10, %v1956_v31, %v1952_v18  ;;  %v1613_v45 = vsel %vm1612_vm11, %v6236_v16, %v1609_v26  ;;  %v1967_v21 = vmul.f32 %v1963_v36, %v1942_v29  ;;  %v7747_v26 = vld [vmem:[#allocation3 + $0x30] sm:$0xff] }
 0xf86   :  { %v1618_v22 = vsel %vm1615_vm2, %v1617_v46, %v1613_v45  ;;  %v1968_v57 = vmul.f32 %v1964_v30, %v1957_v24  ;;  %v7755_v45 = vld [vmem:[#allocation3 + $0x20] sm:$0xff] }
 0xf87   :  { %v1621_v27 = vmul.f32 %v1618_v22, %v7634_v5 }
 0xfb9   :  { %v1806_v40 = vpop.permute.xlu2 %1805 }
 0xfba   :  { %v1808_v51 = vmul.f32 %v1806_v40, %v7705_v50 }
 0xfbc   :  { %1810 = vrot.lane.b32.xlu0 %v1808_v51, %s6919_s2 }
 0xfd2   :  { %v1972_v20 = vpop.permute.xlu0 %1971 }
 0xfd3   :  { %v1974_v28 = vpop.permute.xlu1 %1973  ;;  %v1977_v44 = vmul.f32 %v1972_v20, %v1942_v29 }
 0xfd4   :  { %v1978_v32 = vmul.f32 %v1974_v28, %v1957_v24 }
 0xfd5   :  { %1981 = vrot.lane.b32.xlu1 %v1977_v44, %s6919_s2  ;;  %v7743_v44 = vld [vmem:[#allocation3 + $0x38] sm:$0xff] }
 0xfd6   :  { %1983 = vrot.lane.b32.xlu2 %v1978_v32, %s6919_s2  ;;  %v7751_v32 = vld [vmem:[#allocation3 + $0x28] sm:$0xff] }
 0xfda   :  { %v1624_v47 = vpop.permute.xlu0 %1623 }
 0xfdb   :  { %v1626_v56 = vmul.f32 %v1624_v47, %v1618_v22  ;;  %v7761_v47 = vld [vmem:[#allocation3 + $0x18] sm:$0xff] }
 0xfdd   :  { %1628 = vrot.lane.b32.xlu1 %v1626_v56, %s6919_s2 }
0x102e   :  { %v1811_v40 = vpop.permute.xlu0 %1810 }
0x102f   :  { %v7715_v51 = vadd.f32 %v1811_v40, %v1803_v48 }
0x1030   :  { %v1984_v7 = vpop.permute.xlu2 %1983 }
0x1031   :  { %6237 = vtanh.f32 %v7715_v51  ;;  %v7718_v13 = vadd.f32 %v1984_v7, %v1968_v57  ;;  %v7788_v57 = vld [vmem:[%s9011_s8] ss:$0 sm:$0xff] }
0x1033   :  { %6239 = vtanh.f32 %v7718_v13 }
0x1037   :  { %v6238_v2 = vpop.eup %6237 }
0x1038   :  { %1816 = vrot.lane.b32.xlu1 %v6238_v2, %s6918_s18 }
0x1039   :  { %v6240_v10 = vpop.eup %6239 }
0x103a   :  { %1995 = vrot.lane.b32.xlu0 %v6240_v10, %s6918_s18 }
0x1047   :  { %v1982_v58 = vpop.permute.xlu1 %1981 }
0x1048   :  { %v7724_v16 = vadd.f32 %v1982_v58, %v1967_v21 }
0x104a   :  { %6241 = vtanh.f32 %v7724_v16 }
0x104f   :  { %v1629_v19 = vpop.permute.xlu1 %1628 }
0x1050   :  { %v6242_v63 = vpop.eup %6241  ;;  %v7728_v15 = vadd.f32 %v1629_v19, %v1621_v27 }
0x1051   :  { %1993 = vrot.lane.b32.xlu2 %v6242_v63, %s6918_s18 }
0x1052   :  { %6243 = vtanh.f32 %v7728_v15 }
0x1058   :  { %v6244_v62 = vpop.eup %6243 }
0x1059   :  { %1634 = vrot.lane.b32.xlu2 %v6244_v62, %s6918_s18 }
0x10aa   :  { %v1817_v6 = vpop.permute.xlu1 %1816 }
0x10ab   :  { %v1819_v33 = vmul.f32 %v1817_v6, %v7705_v50  ;;  %v1994_v34 = vpop.permute.xlu2 %1993 }
0x10ac   :  { %v1996_v60 = vpop.permute.xlu0 %1995  ;;  %v1999_v35 = vmul.f32 %v1994_v34, %v1942_v29 }
0x10ad   :  { %v2009_v52 = vrot.slane %v1819_v33, 6  ;;  %v2000_v3 = vmul.f32 %v1996_v60, %v1957_v24 }
0x10ae   :  { %v2003_v5 = vperm.slane %v1999_v35, 2 }
0x10af   :  { %v2004_v8 = vperm.slane %v2000_v3, 2  ;;  %2010 = vrot.lane.b32.xlu2 %v2009_v52, %s6918_s18 }
0x10b1   :  { %v2144_v23 = vsel %vm482_vm13, %v2004_v8, %v2003_v5  ;;  %v2005_v18 = vsel %vm988_vm15, %v2004_v8, %v2003_v5 }
0x10b2   :  { %2145 = vrot.lane.b32.xlu0 %v2144_v23, %s6919_s2  ;;  %2006 = vrot.lane.b32.xlu1 %v2005_v18, %s6919_s2 }
0x10b3   :  { %v1635_v9 = vpop.permute.xlu2 %1634 }
0x10b4   :  { %v1637_v31 = vmul.f32 %v1635_v9, %v1618_v22 }
0x10ba   :  { %1821 = vrot.lane.b32.xlu0 %v1819_v33, %s6919_s2  ;;  %1825 = vrot.lane.b32.xlu1 %v1637_v31, %s6918_s18 }
0x1109   :  { %v2011_v50 = vpop.permute.xlu2 %2010 }
0x1124   :  { %v2146_v29 = vpop.permute.xlu0 %2145  ;;  %v2007_v20 = vpop.permute.xlu1 %2006 }
0x1125   :  { %v2013_v24 = vsel %vm226_vm4, %v2007_v20, %v2011_v50  ;;  %5921 = vmatmul.msk.f32.vlgmr.msra.gmra.mxu0 %vm226_vm4, %v2146_v29 }
0x1126   :  { %v2015_v28 = vrot.slane %v2013_v24, 2  ;;  %2786 = vmatpush.msra.mxu0 %v7743_v44 }
0x1128   :  { %5917 = vmatmul.msk.f32.vlgmr.msra.gmra.mxu2 %vm491_vm14, %v2015_v28  ;;  %2787 = vmatpush.msra.mxu0 %v7747_v26 }
0x1129   :  { %2604 = vmatpush.msra.mxu2 %v7563_v37  ;;  %v7766_v37 = vld [vmem:[#allocation3 + $0x10] sm:$0xff] }
0x112a   :  { %2788 = vmatpush.msra.mxu0 %v7751_v32 }
0x112b   :  { %2605 = vmatpush.msra.mxu2 %v7566_v39  ;;  %v7771_v39 = vld [vmem:[#allocation3 + $0x8] sm:$0xff] }
0x112c   :  { %v1822_v38 = vpop.permute.xlu0 %1821  ;;  %v1826_v42 = vpop.permute.xlu1 %1825  ;;  %2789 = vmatpush.msra.mxu0 %v7755_v45 }
0x112d   :  { %v1828_v46 = vsel %vm226_vm4, %v1822_v38, %v1826_v42  ;;  %2606 = vmatpush.msra.mxu2 %v7569_v61  ;;  %v7776_v61 = vld [vmem:[#allocation3] sm:$0xff] }
0x112e   :  { %5912 = vmatmul.msk.f32.vlgmr.msra.gmra.mxu1 %vm491_vm14, %v1828_v46  ;;  %2790 = vmatpush.msra.mxu0 %v7761_v47 }
0x112f   :  { %2667 = vmatpush.msra.mxu1 %v7666_v17  ;;  %2607 = vmatpush.msra.mxu2 %v7572_v43 }
0x1130   :  { %2791 = vmatpush.msra.mxu0 %v7766_v37 }
0x1131   :  { %2668 = vmatpush.msra.mxu1 %v7674_v12  ;;  %2608 = vmatpush.msra.mxu2 %v7575_v0 }
0x1132   :  { %2792 = vmatpush.msra.mxu0 %v7771_v39 }
0x1133   :  { %2669 = vmatpush.msra.mxu1 %v7682_v55  ;;  %2609 = vmatpush.msra.mxu2 %v7580_v59 }
0x1134   :  { %2793 = vmatpush.msra.mxu0 %v7776_v61 }
0x1135   :  { %2670 = vmatpush.msra.mxu1 %v7690_v14  ;;  %2610 = vmatpush.msra.mxu2 %v7585_v1 }
0x1137   :  { %2611 = vmatpush.msra.mxu2 %v7591_v4 }
0x11a2   :  { %v2166_v43 = vpop.f32.mrf.mxu0 }
0x11a3   :  { %v2170_v0 = vrot.slane %v2166_v43, 5  ;;  %v2171_v22 = vrot.slane %v2166_v43, 6 }
0x11a5   :  { %v2174_v56 = vadd.f32 %v2170_v0, %v7507_v25  ;;  %v2175_v30 = vadd.f32 %v2171_v22, %v7513_v41 }
0x11a7   :  { %6245 = vtanh.f32 %v2174_v56  ;;  %v5923_v63 = vmul.f32 -1.442695, %v2175_v30 }
0x11a8   :  { %6247 = vtanh.f32 %v2175_v30 }
0x11ab   :  { %v1849_v59 = vpop.f32.mrf.mxu1  ;;  %v2035_v48 = vpop.f32.mrf.mxu2 }
0x11ac   :  { %v1850_v40 = vadd.f32 %v7609_v11, %v1849_v59  ;;  %v2036_v1 = vadd.f32 %v7788_v57, %v2035_v48  ;;  %v5922_v11 = vmul.f32 -1.442695, %v2174_v56 }
0x11ad   :  { %v6246_v4 = vpop.eup %6245 }
0x11ae   :  { %v6248_v7 = vpop.eup %6247  ;;  %6249 = vtanh.f32 %v1850_v40  ;;  %2226 = vrot.lane.b32.xlu2 %v6246_v4, %s6918_s18  ;;  %v5913_v10 = vmul.f32 -1.442695, %v1850_v40  ;;  %v5918_v34 = vmul.f32 -1.442695, %v2036_v1 }
0x11af   :  { %6251 = vtanh.f32 %v2036_v1  ;;  %2228 = vrot.lane.b32.xlu0 %v6248_v7, %s6918_s18 }
0x11b0   :  { %6253 = vpow2.f32 %v5922_v11 }
0x11b1   :  { %6255 = vpow2.f32 %v5913_v10 }
0x11b4   :  { %v6250_v25 = vpop.eup %6249 }
0x11b5   :  { %v6252_v2 = vpop.eup %6251 }
0x11b6   :  { %2060 = vrot.lane.b32.xlu1 %v6252_v2, %s6918_s18  ;;  %1874 = vrot.lane.b32.xlu2 %v6250_v25, %s6918_s18  ;;  %v6254_v36 = vpop.eup %6253 }
0x11b7   :  { %v2182_v21 = vadd.f32 1.0, %v6254_v36  ;;  %v6256_v58 = vpop.eup %6255 }
0x11b8   :  { %v1855_v27 = vadd.f32 1.0, %v6256_v58 }
0x11b9   :  { %6257 = vrcp.f32 %v2182_v21  ;;  %v2195_v23 = vand.u32 2147483648, %v2182_v21  ;;  %vm2189_vm6 = vweird.f32 %v2182_v21  ;;  %v2193_v18 = vand.u32 2147483647, %v2182_v21 }
0x11ba   :  { %6259 = vrcp.f32 %v1855_v27  ;;  %v1867_v46 = vand.u32 2147483648, %v1855_v27  ;;  %vm1861_vm10 = vweird.f32 %v1855_v27  ;;  %v1865_v0 = vand.u32 2147483647, %v1855_v27 }
0x11bb   :  { %6261 = vpow2.f32 %v5923_v63  ;;  %v2196_v29 = vor.u32 1.1754944e-38, %v2195_v23  ;;  %vm2194_vm7 = vcmp.eq.f32.partialorder %v2193_v18, 8.507059e+37 }
0x11bc   :  { %6263 = vpow2.f32 %v5918_v34  ;;  %v1868_v56 = vor.u32 1.1754944e-38, %v1867_v46  ;;  %vm1866_vm11 = vcmp.eq.f32.partialorder %v1865_v0, 8.507059e+37 }
0x11bf   :  { %v6258_v19 = vpop.eup %6257 }
0x11c0   :  { %v2185_v62 = vmul.f32 %v6258_v19, %v2182_v21  ;;  %v6260_v33 = vpop.eup %6259  ;;  %vm2190_vm0 = vweird.f32 %v6258_v19 }
0x11c1   :  { %v1857_v35 = vmul.f32 %v6260_v33, %v1855_v27  ;;  %v6262_v52 = vpop.eup %6261  ;;  %vm2191_vm12 = vmor %vm2189_vm6, %vm2190_vm0  ;;  %vm1862_vm8 = vweird.f32 %v6260_v33 }
0x11c2   :  { %v2186_v6 = vsub.f32 1.0, %v2185_v62  ;;  %v2183_v3 = vadd.f32 1.0, %v6262_v52  ;;  %v6264_v9 = vpop.eup %6263  ;;  %vm1863_vm9 = vmor %vm1861_vm10, %vm1862_vm8 }
0x11c3   :  { %v1858_v8 = vsub.f32 1.0, %v1857_v35  ;;  %v2041_v20 = vadd.f32 1.0, %v6264_v9 }
0x11c4   :  { %v2187_v60 = vmul.f32 %v6258_v19, %v2186_v6  ;;  %6265 = vrcp.f32 %v2183_v3  ;;  %v2210_v10 = vand.u32 2147483648, %v2183_v3  ;;  %vm2204_vm0 = vweird.f32 %v2183_v3 }
0x11c5   :  { %v1859_v50 = vmul.f32 %v6260_v33, %v1858_v8  ;;  %6267 = vrcp.f32 %v2041_v20  ;;  %v2208_v36 = vand.u32 2147483647, %v2183_v3  ;;  %vm2047_vm8 = vweird.f32 %v2041_v20 }
0x11c6   :  { %v2188_v5 = vadd.f32 %v6258_v19, %v2187_v60  ;;  %v2211_v27 = vor.u32 1.1754944e-38, %v2210_v10  ;;  %v2051_v34 = vand.u32 2147483647, %v2041_v20  ;;  %v2218_v8 = vrot.slane %v7724_v16, 7 }
0x11c7   :  { %v1860_v42 = vadd.f32 %v6260_v33, %v1859_v50 }
0x11c8   :  { %v2192_v31 = vsel %vm2191_vm12, %v6258_v19, %v2188_v5  ;;  %vm2209_vm12 = vcmp.eq.f32.partialorder %v2208_v36, 8.507059e+37 }
0x11c9   :  { %v7795_v24 = vsel %vm2194_vm7, %v2196_v29, %v2192_v31  ;;  %v1864_v22 = vsel %vm1863_vm9, %v6260_v33, %v1860_v42  ;;  %v2053_v33 = vand.u32 2147483648, %v2041_v20  ;;  %vm2052_vm9 = vcmp.eq.f32.partialorder %v2051_v34, 8.507059e+37  ;;  %v7858_v34 = vld [vmem:[#allocation3 + $0x68] sm:$0xff] }
0x11ca   :  { %v6266_v43 = vpop.eup %6265  ;;  %v7799_v59 = vsel %vm1866_vm11, %v1868_v56, %v1864_v22  ;;  %v2222_v23 = vmul.f32 %v2218_v8, %v7795_v24 }
0x11cb   :  { %v2200_v30 = vmul.f32 %v6266_v43, %v2183_v3  ;;  %v6268_v1 = vpop.eup %6267  ;;  %vm2205_vm2 = vweird.f32 %v6266_v43  ;;  %v2054_v35 = vor.u32 1.1754944e-38, %v2053_v33  ;;  %v1872_v50 = vmul.f32 %v7799_v59, %v7728_v15  ;;  %v7854_v33 = vld [vmem:[#allocation3 + $0x70] sm:$0xff] }
0x11cc   :  { %v2043_v7 = vmul.f32 %v6268_v1, %v2041_v20  ;;  %vm2206_vm6 = vmor %vm2204_vm0, %vm2205_vm2  ;;  %vm2048_vm7 = vweird.f32 %v6268_v1 }
0x11cd   :  { %v2201_v4 = vsub.f32 1.0, %v2200_v30  ;;  %vm2049_vm10 = vmor %vm2047_vm8, %vm2048_vm7 }
0x11ce   :  { %v2044_v2 = vsub.f32 1.0, %v2043_v7 }
0x11cf   :  { %v2202_v25 = vmul.f32 %v6266_v43, %v2201_v4 }
0x11d0   :  { %v2045_v21 = vmul.f32 %v6268_v1, %v2044_v2 }
0x11d1   :  { %v2203_v11 = vadd.f32 %v6266_v43, %v2202_v25 }
0x11d2   :  { %v2046_v62 = vadd.f32 %v6268_v1, %v2045_v21 }
0x11d3   :  { %v2207_v58 = vsel %vm2206_vm6, %v6266_v43, %v2203_v11 }
0x11d4   :  { %v2212_v19 = vsel %vm2209_vm12, %v2211_v27, %v2207_v58  ;;  %v2050_v60 = vsel %vm2049_vm10, %v6268_v1, %v2046_v62 }
0x11d5   :  { %v2055_v3 = vsel %vm2052_vm9, %v2054_v35, %v2050_v60  ;;  %v7862_v60 = vld [vmem:[#allocation3 + $0x60] sm:$0xff]  ;;  %v7871_v35 = vld [vmem:[#allocation3 + $0x48] sm:$0xff] }
0x11d6   :  { %v2058_v31 = vmul.f32 %v2055_v3, %v7715_v51  ;;  %v2219_v51 = vrot.slane %v7718_v13, 7 }
0x11d8   :  { %v2223_v15 = vmul.f32 %v2219_v51, %v2212_v19 }
0x1208   :  { %v2227_v28 = vpop.permute.xlu2 %2226 }
0x1209   :  { %v2232_v38 = vmul.f32 %v2227_v28, %v7795_v24 }
0x120b   :  { %2236 = vrot.lane.b32.xlu0 %v2232_v38, %s6919_s2 }
0x1210   :  { %v1875_v48 = vpop.permute.xlu2 %1874 }
0x1211   :  { %v1877_v40 = vmul.f32 %v1875_v48, %v7799_v59 }
0x1213   :  { %1879 = vrot.lane.b32.xlu0 %v1877_v40, %s6919_s2 }
0x1221   :  { %v2229_v63 = vpop.permute.xlu0 %2228 }
0x1222   :  { %v2233_v6 = vmul.f32 %v2229_v63, %v2212_v19 }
0x1224   :  { %2238 = vrot.lane.b32.xlu1 %v2233_v6, %s6919_s2  ;;  %v7850_v6 = vld [vmem:[#allocation3 + $0x78] sm:$0xff] }
0x1228   :  { %v2061_v52 = vpop.permute.xlu1 %2060 }
0x1229   :  { %v2063_v5 = vmul.f32 %v2061_v52, %v2055_v3  ;;  %v7878_v52 = vrot.slane %v7513_v41, 4  ;;  %v7888_v41 = vld [vmem:[%s9011_s8 + $0x1] ss:$0 sm:$0xff] }
0x122b   :  { %2065 = vrot.lane.b32.xlu2 %v2063_v5, %s6919_s2 }
0x127d   :  { %v2237_v18 = vpop.permute.xlu0 %2236 }
0x127e   :  { %v7807_v9 = vadd.f32 %v2237_v18, %v2222_v23 }
0x1280   :  { %6269 = vtanh.f32 %v7807_v9 }
0x1285   :  { %v2066_v29 = vpop.permute.xlu2 %2065  ;;  %v1880_v20 = vpop.permute.xlu0 %1879 }
0x1286   :  { %v6270_v28 = vpop.eup %6269  ;;  %v7813_v38 = vadd.f32 %v2066_v29, %v2058_v31  ;;  %v7815_v42 = vadd.f32 %v1880_v20, %v1872_v50 }
0x1287   :  { %2248 = vrot.lane.b32.xlu1 %v6270_v28, %s6918_s18 }
0x1288   :  { %6271 = vtanh.f32 %v7813_v38 }
0x1289   :  { %6273 = vtanh.f32 %v7815_v42 }
0x128e   :  { %v6272_v16 = vpop.eup %6271 }
0x128f   :  { %v6274_v46 = vpop.eup %6273  ;;  %2071 = vrot.lane.b32.xlu0 %v6272_v16, %s6918_s18 }
0x1290   :  { %1885 = vrot.lane.b32.xlu1 %v6274_v46, %s6918_s18 }
0x1296   :  { %v2239_v43 = vpop.permute.xlu1 %2238 }
0x1297   :  { %v7823_v0 = vadd.f32 %v2239_v43, %v2223_v15 }
0x1299   :  { %6275 = vtanh.f32 %v7823_v0 }
0x129f   :  { %v6276_v22 = vpop.eup %6275 }
0x12a0   :  { %2250 = vrot.lane.b32.xlu2 %v6276_v22, %s6918_s18 }
0x12f9   :  { %v2249_v56 = vpop.permute.xlu1 %2248 }
0x12fa   :  { %v2254_v30 = vmul.f32 %v2249_v56, %v7795_v24  ;;  %v2251_v48 = vpop.permute.xlu2 %2250 }
0x12fb   :  { %v2255_v40 = vmul.f32 %v2251_v48, %v2212_v19 }
0x12fc   :  { %v2258_v1 = vperm.slane %v2254_v30, 3 }
0x12fd   :  { %v2259_v4 = vperm.slane %v2255_v40, 3 }
0x12ff   :  { %v2399_v7 = vsel %vm482_vm13, %v2259_v4, %v2258_v1  ;;  %v2260_v13 = vsel %vm1244_vm3, %v2259_v4, %v2258_v1 }
0x1300   :  { %2400 = vrot.lane.b32.xlu2 %v2399_v7, %s6919_s2  ;;  %2261 = vrot.lane.b32.xlu0 %v2260_v13, %s6919_s2 }
0x1301   :  { %v2072_v25 = vpop.permute.xlu0 %2071 }
0x1302   :  { %v2074_v2 = vmul.f32 %v2072_v25, %v2055_v3  ;;  %v1886_v11 = vpop.permute.xlu1 %1885 }
0x1303   :  { %v1888_v36 = vmul.f32 %v1886_v11, %v7799_v59 }
0x1304   :  { %v2264_v10 = vrot.slane %v2074_v2, 5 }
0x1306   :  { %2265 = vrot.lane.b32.xlu1 %v2264_v10, %s6918_s18 }
0x1308   :  { %2076 = vrot.lane.b32.xlu2 %v2074_v2, %s6919_s2  ;;  %2080 = vrot.lane.b32.xlu0 %v1888_v36, %s6918_s18 }
0x135a   :  { %v2401_v24 = vpop.permute.xlu2 %2400 }
0x135b   :  { %5928 = vmatmul.msk.f32.vlgmr.msrb.gmra.mxu2 %vm226_vm4, %v2401_v24 }
0x135c   :  { %3041 = vmatpush.msrb.mxu2 %v7743_v44 }
0x135e   :  { %3042 = vmatpush.msrb.mxu2 %v7747_v26 }
0x1360   :  { %3043 = vmatpush.msrb.mxu2 %v7751_v32 }
0x1362   :  { %3044 = vmatpush.msrb.mxu2 %v7755_v45  ;;  %v2077_v27 = vpop.permute.xlu2 %2076 }
0x1364   :  { %3045 = vmatpush.msrb.mxu2 %v7761_v47 }
0x1366   :  { %3046 = vmatpush.msrb.mxu2 %v7766_v37 }
0x1368   :  { %3047 = vmatpush.msrb.mxu2 %v7771_v39 }
0x136a   :  { %3048 = vmatpush.msrb.mxu2 %v7776_v61 }
0x1372   :  { %v2262_v59 = vpop.permute.xlu0 %2261 }
0x1378   :  { %v2266_v21 = vpop.permute.xlu1 %2265 }
0x1379   :  { %v2268_v58 = vsel %vm226_vm4, %v2262_v59, %v2266_v21 }
0x137a   :  { %v2270_v19 = vrot.slane %v2268_v58, 3  ;;  %v2081_v63 = vpop.permute.xlu0 %2080 }
0x137b   :  { %v2083_v62 = vsel %vm226_vm4, %v2077_v27, %v2081_v63 }
0x137c   :  { %5919 = vmatmul.msk.f32.vlgmr.msrb.gmra.mxu3 %vm491_vm14, %v2083_v62  ;;  %5924 = vmatmul.msk.f32.vlgmr.msrb.gmra.mxu1 %vm491_vm14, %v2270_v19 }
0x137d   :  { %2921 = vmatpush.msrb.mxu3 %v7666_v17  ;;  %2855 = vmatpush.msrb.mxu1 %v7850_v6  ;;  %v7865_v17 = vld [vmem:[#allocation3 + $0x58] sm:$0xff] }
0x137f   :  { %2922 = vmatpush.msrb.mxu3 %v7674_v12  ;;  %2856 = vmatpush.msrb.mxu1 %v7854_v33  ;;  %v7868_v12 = vld [vmem:[#allocation3 + $0x50] sm:$0xff] }
0x1381   :  { %2923 = vmatpush.msrb.mxu3 %v7682_v55  ;;  %2857 = vmatpush.msrb.mxu1 %v7858_v34  ;;  %v7874_v55 = vld [vmem:[#allocation3 + $0x40] sm:$0xff] }
0x1383   :  { %2924 = vmatpush.msrb.mxu3 %v7690_v14  ;;  %2858 = vmatpush.msrb.mxu1 %v7862_v60 }
0x1385   :  { %2859 = vmatpush.msrb.mxu1 %v7865_v17 }
0x1387   :  { %2860 = vmatpush.msrb.mxu1 %v7868_v12 }
0x1389   :  { %2861 = vmatpush.msrb.mxu1 %v7871_v35 }
0x138b   :  { %2862 = vmatpush.msrb.mxu1 %v7874_v55 }
0x13de   :  { %v2421_v14 = vpop.f32.mrf.mxu2 }
0x13df   :  { %v2425_v3 = vrot.slane %v2421_v14, 1  ;;  %v2428_v5 = vadd.f32 %v2421_v14, %v7139_v49 }
0x13e1   :  { %v2429_v8 = vadd.f32 %v2425_v3, %v7878_v52  ;;  %6277 = vtanh.f32 %v2428_v5  ;;  %v5929_v43 = vmul.f32 -1.442695, %v2428_v5 }
0x13e3   :  { %6279 = vtanh.f32 %v2429_v8  ;;  %v5930_v46 = vmul.f32 -1.442695, %v2429_v8 }
0x13e7   :  { %v6278_v23 = vpop.eup %6277 }
0x13e8   :  { %2482 = vrot.lane.b32.xlu1 %v6278_v23, %s6918_s18 }
0x13e9   :  { %v6280_v18 = vpop.eup %6279 }
0x13ea   :  { %2484 = vrot.lane.b32.xlu2 %v6280_v18, %s6918_s18 }
0x13f9   :  { %v2290_v31 = vpop.f32.mrf.mxu1 }
0x13fa   :  { %v2291_v50 = vadd.f32 %v7788_v57, %v2290_v31 }
0x13fc   :  { %6281 = vtanh.f32 %v2291_v50  ;;  %v5925_v21 = vmul.f32 -1.442695, %v2291_v50 }
0x13ff   :  { %v2104_v29 = vpop.f32.mrf.mxu3 }
0x1400   :  { %v2105_v20 = vadd.f32 %v7888_v41, %v2104_v29 }
0x1402   :  { %v6282_v28 = vpop.eup %6281  ;;  %6283 = vtanh.f32 %v2105_v20  ;;  %v5920_v27 = vmul.f32 -1.442695, %v2105_v20 }
0x1403   :  { %2315 = vrot.lane.b32.xlu0 %v6282_v28, %s6918_s18  ;;  %6285 = vpow2.f32 %v5930_v46 }
0x1408   :  { %v6284_v16 = vpop.eup %6283 }
0x1409   :  { %2129 = vrot.lane.b32.xlu1 %v6284_v16, %s6918_s18  ;;  %v6286_v51 = vpop.eup %6285 }
0x140a   :  { %v2437_v15 = vadd.f32 1.0, %v6286_v51 }
0x140c   :  { %6287 = vrcp.f32 %v2437_v15  ;;  %v2464_v7 = vand.u32 2147483648, %v2437_v15  ;;  %vm2458_vm2 = vweird.f32 %v2437_v15  ;;  %v2462_v13 = vand.u32 2147483647, %v2437_v15 }
0x140d   :  { %6289 = vpow2.f32 %v5929_v43 }
0x140e   :  { %v2465_v2 = vor.u32 1.1754944e-38, %v2464_v7  ;;  %vm2463_vm6 = vcmp.eq.f32.partialorder %v2462_v13, 8.507059e+37 }
0x1412   :  { %v6288_v22 = vpop.eup %6287 }
0x1413   :  { %v2454_v56 = vmul.f32 %v6288_v22, %v2437_v15  ;;  %v6290_v48 = vpop.eup %6289  ;;  %vm2459_vm11 = vweird.f32 %v6288_v22 }
0x1414   :  { %v2436_v40 = vadd.f32 1.0, %v6290_v48  ;;  %vm2460_vm0 = vmor %vm2458_vm2, %vm2459_vm11 }
0x1415   :  { %v2455_v30 = vsub.f32 1.0, %v2454_v56 }
0x1416   :  { %6291 = vrcp.f32 %v2436_v40  ;;  %v2449_v14 = vand.u32 2147483648, %v2436_v40  ;;  %vm2443_vm7 = vweird.f32 %v2436_v40  ;;  %v2447_v5 = vand.u32 2147483647, %v2436_v40 }
0x1417   :  { %v2456_v1 = vmul.f32 %v6288_v22, %v2455_v30  ;;  %6293 = vpow2.f32 %v5925_v21 }
0x1418   :  { %6295 = vpow2.f32 %v5920_v27  ;;  %v2450_v18 = vor.u32 1.1754944e-38, %v2449_v14  ;;  %vm2448_vm10 = vcmp.eq.f32.partialorder %v2447_v5, 8.507059e+37 }
0x1419   :  { %v2457_v4 = vadd.f32 %v6288_v22, %v2456_v1 }
0x141b   :  { %v2461_v25 = vsel %vm2460_vm0, %v6288_v22, %v2457_v4 }
0x141c   :  { %v6292_v11 = vpop.eup %6291  ;;  %v7893_v10 = vsel %vm2463_vm6, %v2465_v2, %v2461_v25 }
0x141d   :  { %v2439_v59 = vmul.f32 %v6292_v11, %v2436_v40  ;;  %v6294_v63 = vpop.eup %6293  ;;  %vm2444_vm12 = vweird.f32 %v6292_v11 }
0x141e   :  { %v2296_v3 = vadd.f32 1.0, %v6294_v63  ;;  %vm2445_vm8 = vmor %vm2443_vm7, %vm2444_vm12  ;;  %v6296_v23 = vpop.eup %6295 }
0x141f   :  { %v2440_v58 = vsub.f32 1.0, %v2439_v59  ;;  %v2110_v29 = vadd.f32 1.0, %v6296_v23 }
0x1420   :  { %6297 = vrcp.f32 %v2296_v3  ;;  %v2308_v30 = vand.u32 2147483648, %v2296_v3  ;;  %vm2302_vm11 = vweird.f32 %v2296_v3  ;;  %v2306_v48 = vand.u32 2147483647, %v2296_v3 }
0x1421   :  { %v2441_v19 = vmul.f32 %v6292_v11, %v2440_v58  ;;  %6299 = vrcp.f32 %v2110_v29  ;;  %v2122_v2 = vand.u32 2147483648, %v2110_v29  ;;  %vm2116_vm12 = vweird.f32 %v2110_v29 }
0x1422   :  { %v2309_v4 = vor.u32 1.1754944e-38, %v2308_v30  ;;  %vm2307_vm0 = vcmp.eq.f32.partialorder %v2306_v48, 8.507059e+37 }
0x1423   :  { %v2442_v62 = vadd.f32 %v6292_v11, %v2441_v19  ;;  %v2123_v59 = vor.u32 1.1754944e-38, %v2122_v2  ;;  %v5931_v19 = vrot.slane %v7807_v9, 11 }
0x1425   :  { %v2446_v8 = vsel %vm2445_vm8, %v6292_v11, %v2442_v62  ;;  %v5932_v62 = vrot.slane %v7823_v0, 11 }
0x1426   :  { %v7897_v50 = vsel %vm2448_vm10, %v2450_v18, %v2446_v8  ;;  %v6298_v28 = vpop.eup %6297 }
0x1427   :  { %v2298_v16 = vmul.f32 %v6298_v28, %v2296_v3  ;;  %v6300_v46 = vpop.eup %6299  ;;  %vm2303_vm9 = vweird.f32 %v6298_v28  ;;  %v2478_v63 = vmul.f32 %v5931_v19, %v7897_v50  ;;  %v2479_v5 = vmul.f32 %v5932_v62, %v7893_v10 }
0x1428   :  { %v2112_v15 = vmul.f32 %v6300_v46, %v2110_v29  ;;  %vm2304_vm2 = vmor %vm2302_vm11, %vm2303_vm9  ;;  %vm2117_vm6 = vweird.f32 %v6300_v46 }
0x1429   :  { %v2299_v51 = vsub.f32 1.0, %v2298_v16  ;;  %vm2118_vm7 = vmor %vm2116_vm12, %vm2117_vm6 }
0x142a   :  { %v2113_v22 = vsub.f32 1.0, %v2112_v15 }
0x142b   :  { %v2300_v43 = vmul.f32 %v6298_v28, %v2299_v51 }
0x142c   :  { %v2114_v40 = vmul.f32 %v6300_v46, %v2113_v22 }
0x142d   :  { %v2301_v56 = vadd.f32 %v6298_v28, %v2300_v43 }
0x142e   :  { %v2115_v7 = vadd.f32 %v6300_v46, %v2114_v40 }
0x142f   :  { %v2305_v1 = vsel %vm2304_vm2, %v6298_v28, %v2301_v56 }
0x1430   :  { %v2310_v13 = vsel %vm2307_vm0, %v2309_v4, %v2305_v1 }
0x1431   :  { %v2313_v28 = vmul.f32 %v2310_v13, %v7813_v38 }
0x1444   :  { %v2485_v36 = vpop.permute.xlu2 %2484 }
0x1445   :  { %v2489_v24 = vmul.f32 %v2485_v36, %v7893_v10  ;;  %v2120_v36 = vand.u32 2147483647, %v2110_v29 }
0x1447   :  { %2494 = vrot.lane.b32.xlu0 %v2489_v24, %s6919_s2  ;;  %v2119_v24 = vsel %vm2118_vm7, %v6300_v46, %v2115_v7  ;;  %vm2121_vm8 = vcmp.eq.f32.partialorder %v2120_v36, 8.507059e+37 }
0x1448   :  { %v2124_v58 = vsel %vm2121_vm8, %v2123_v59, %v2119_v24 }
0x1449   :  { %v2127_v0 = vmul.f32 %v2124_v58, %v7815_v42 }
0x145a   :  { %v2483_v31 = vpop.permute.xlu1 %2482 }
0x145b   :  { %v2488_v20 = vmul.f32 %v2483_v31, %v7897_v50 }
0x145d   :  { %2492 = vrot.lane.b32.xlu2 %v2488_v20, %s6919_s2 }
0x1475   :  { %v2316_v25 = vpop.permute.xlu0 %2315 }
0x1476   :  { %v2318_v11 = vmul.f32 %v2316_v25, %v2310_v13 }
0x1478   :  { %2320 = vrot.lane.b32.xlu1 %v2318_v11, %s6919_s2 }
0x147b   :  { %v2130_v21 = vpop.permute.xlu1 %2129 }
0x147c   :  { %v2132_v27 = vmul.f32 %v2130_v21, %v2124_v58 }
0x147e   :  { %2134 = vrot.lane.b32.xlu2 %v2132_v27, %s6919_s2 }
0x14b7   :  { %v2493_v14 = vpop.permute.xlu2 %2492 }
0x14b8   :  { %v7906_v3 = vadd.f32 %v2493_v14, %v2478_v63 }
0x14b9   :  { %v2495_v8 = vpop.permute.xlu0 %2494 }
0x14ba   :  { %6301 = vtanh.f32 %v7906_v3  ;;  %v7910_v23 = vadd.f32 %v2495_v8, %v2479_v5 }
0x14bc   :  { %6303 = vtanh.f32 %v7910_v23 }
0x14c0   :  { %v6302_v18 = vpop.eup %6301 }
0x14c1   :  { %2504 = vrot.lane.b32.xlu0 %v6302_v18, %s6918_s18 }
0x14c2   :  { %v6304_v9 = vpop.eup %6303 }
0x14c3   :  { %2506 = vrot.lane.b32.xlu1 %v6304_v9, %s6918_s18 }
0x14d8   :  { %v2135_v31 = vpop.permute.xlu2 %2134 }
0x14d9   :  { %v7916_v29 = vadd.f32 %v2135_v31, %v2127_v0 }
0x14db   :  { %6305 = vtanh.f32 %v7916_v29 }
0x14e1   :  { %v6306_v20 = vpop.eup %6305 }
0x14e2   :  { %2140 = vrot.lane.b32.xlu0 %v6306_v20, %s6918_s18 }
0x14ea   :  { %v2321_v16 = vpop.permute.xlu1 %2320 }
0x14eb   :  { %v7921_v46 = vadd.f32 %v2321_v16, %v2313_v28 }
0x14ed   :  { %6307 = vtanh.f32 %v7921_v46 }
0x14f3   :  { %v6308_v51 = vpop.eup %6307 }
0x14f4   :  { %2326 = vrot.lane.b32.xlu2 %v6308_v51, %s6918_s18 }
0x1533   :  { %v2505_v15 = vpop.permute.xlu0 %2504 }
0x1534   :  { %v2510_v42 = vmul.f32 %v2505_v15, %v7897_v50 }
0x1535   :  { %v2507_v43 = vpop.permute.xlu1 %2506 }
0x1536   :  { %v2511_v22 = vmul.f32 %v2507_v43, %v7893_v10  ;;  %v2514_v56 = vperm.slane %v2510_v42, 0 }
0x1538   :  { %v2515_v30 = vperm.slane %v2511_v22, 0 }
0x153a   :  { %v2516_v48 = vsel %vm482_vm13, %v2515_v30, %v2514_v56 }
0x153b   :  { %2517 = vrot.lane.b32.xlu1 %v2516_v48, %s6919_s2 }
0x154e   :  { %v2327_v38 = vpop.permute.xlu2 %2326 }
0x154f   :  { %v2329_v40 = vmul.f32 %v2327_v38, %v2310_v13 }
0x1551   :  { %2331 = vrot.lane.b32.xlu0 %v2329_v40, %s6919_s2  ;;  %2520 = vrot.lane.b32.xlu2 %v2329_v40, %s6918_s18 }
0x1554   :  { %v2141_v1 = vpop.permute.xlu0 %2140 }
0x1555   :  { %v2143_v4 = vmul.f32 %v2141_v1, %v2124_v58 }
0x1557   :  { %2335 = vrot.lane.b32.xlu1 %v2143_v4, %s6918_s18 }
0x15ab   :  { %v2521_v50 = vpop.permute.xlu2 %2520 }
0x15ad   :  { %v2518_v7 = vpop.permute.xlu1 %2517 }
0x15ae   :  { %v2523_v10 = vsel %vm226_vm4, %v2518_v7, %v2521_v50  ;;  %5937 = vmatmul.msk.f32.vlgmr.msra.gmra.mxu1 %vm226_vm4, %v2518_v7 }
0x15af   :  { %5933 = vmatmul.msk.f32.vlgmr.msra.gmra.mxu3 %vm491_vm14, %v2523_v10  ;;  %3296 = vmatpush.msra.mxu1 %v7743_v44 }
0x15b0   :  { %3110 = vmatpush.msra.mxu3 %v7850_v6 }
0x15b1   :  { %3297 = vmatpush.msra.mxu1 %v7747_v26 }
0x15b2   :  { %3111 = vmatpush.msra.mxu3 %v7854_v33 }
0x15b3   :  { %3298 = vmatpush.msra.mxu1 %v7751_v32 }
0x15b4   :  { %3112 = vmatpush.msra.mxu3 %v7858_v34 }
0x15b5   :  { %3299 = vmatpush.msra.mxu1 %v7755_v45  ;;  %v6754_v45 = vld [vmem:[%s9043_s6 + $0x18] sm:$0xff] }
0x15b6   :  { %3113 = vmatpush.msra.mxu3 %v7862_v60 }
0x15b7   :  { %3300 = vmatpush.msra.mxu1 %v7761_v47  ;;  %v6755_v47 = vld [vmem:[%s9043_s6 + $0x10] sm:$0xff] }
0x15b8   :  { %3114 = vmatpush.msra.mxu3 %v7865_v17 }
0x15b9   :  { %3301 = vmatpush.msra.mxu1 %v7766_v37  ;;  %v6756_v37 = vld [vmem:[%s9043_s6 + $0x8] sm:$0xff] }
0x15ba   :  { %3115 = vmatpush.msra.mxu3 %v7868_v12 }
0x15bb   :  { %3302 = vmatpush.msra.mxu1 %v7771_v39  ;;  %v6757_v39 = vld [vmem:[%s9043_s6] sm:$0xff] }
0x15bc   :  { %3116 = vmatpush.msra.mxu3 %v7871_v35 }
0x15bd   :  { %3303 = vmatpush.msra.mxu1 %v7776_v61 }
0x15be   :  { %3117 = vmatpush.msra.mxu3 %v7874_v55 }
0x15c3   :  { %v2332_v44 = vpop.permute.xlu0 %2331 }
0x15c9   :  { %v2336_v26 = vpop.permute.xlu1 %2335 }
0x15ca   :  { %v2338_v32 = vsel %vm226_vm4, %v2332_v44, %v2336_v26 }
0x15cb   :  { %5926 = vmatmul.msk.f32.vlgmr.msrb.gmra.mxu0 %vm491_vm14, %v2338_v32 }
0x15cc   :  { %3176 = vmatpush.msrb.mxu0 %v6754_v45 }
0x15ce   :  { %3177 = vmatpush.msrb.mxu0 %v6755_v47 }
0x15d0   :  { %3178 = vmatpush.msrb.mxu0 %v6756_v37 }
0x15d2   :  { %3179 = vmatpush.msrb.mxu0 %v6757_v39 }
0x162b   :  { %v2672_v61 = vpop.f32.mrf.mxu1 }
0x162c   :  { %v2676_v13 = vrot.slane %v2672_v61, 7  ;;  %v2680_v25 = vadd.f32 %v2672_v61, %v7878_v52 }
0x162e   :  { %v2679_v2 = vadd.f32 %v2676_v13, %v7139_v49  ;;  %6309 = vtanh.f32 %v2680_v25  ;;  %v5939_v14 = vmul.f32 -1.442695, %v2680_v25 }
0x1630   :  { %6311 = vtanh.f32 %v2679_v2  ;;  %v5938_v63 = vmul.f32 -1.442695, %v2679_v2 }
0x1632   :  { %v2544_v11 = vpop.f32.mrf.mxu3 }
0x1633   :  { %v2545_v36 = vadd.f32 %v7788_v57, %v2544_v11 }
0x1634   :  { %v6310_v24 = vpop.eup %6309 }
0x1635   :  { %6313 = vtanh.f32 %v2545_v36  ;;  %2733 = vrot.lane.b32.xlu0 %v6310_v24, %s6918_s18  ;;  %v5934_v9 = vmul.f32 -1.442695, %v2545_v36 }
0x1636   :  { %v6312_v59 = vpop.eup %6311 }
0x1637   :  { %2731 = vrot.lane.b32.xlu2 %v6312_v59, %s6918_s18 }
0x163b   :  { %v6314_v21 = vpop.eup %6313 }
0x163c   :  { %2569 = vrot.lane.b32.xlu1 %v6314_v21, %s6918_s18 }
0x1648   :  { %v2359_v58 = vpop.f32.mrf.mxu0 }
0x1649   :  { %v2360_v27 = vadd.f32 %v7888_v41, %v2359_v58 }
0x164b   :  { %6315 = vtanh.f32 %v2360_v27  ;;  %v5927_v8 = vmul.f32 -1.442695, %v2360_v27 }
0x164c   :  { %6317 = vpow2.f32 %v5938_v63 }
0x1651   :  { %v6316_v19 = vpop.eup %6315 }
0x1652   :  { %2384 = vrot.lane.b32.xlu2 %v6316_v19, %s6918_s18  ;;  %v6318_v57 = vpop.eup %6317 }
0x1653   :  { %v2687_v62 = vadd.f32 1.0, %v6318_v57 }
0x1655   :  { %6319 = vrcp.f32 %v2687_v62  ;;  %v2700_v43 = vand.u32 2147483648, %v2687_v62  ;;  %vm2694_vm9 = vweird.f32 %v2687_v62  ;;  %v2698_v22 = vand.u32 2147483647, %v2687_v62 }
0x1656   :  { %6321 = vpow2.f32 %v5939_v14 }
0x1657   :  { %6323 = vpow2.f32 %v5927_v8  ;;  %v2701_v48 = vor.u32 1.1754944e-38, %v2700_v43  ;;  %vm2699_vm2 = vcmp.eq.f32.partialorder %v2698_v22, 8.507059e+37 }
0x1658   :  { %6325 = vpow2.f32 %v5934_v9 }
0x165b   :  { %v6320_v5 = vpop.eup %6319 }
0x165c   :  { %v2690_v18 = vmul.f32 %v6320_v5, %v2687_v62  ;;  %v6322_v31 = vpop.eup %6321  ;;  %vm2695_vm10 = vweird.f32 %v6320_v5 }
0x165d   :  { %v2688_v20 = vadd.f32 1.0, %v6322_v31  ;;  %v6324_v16 = vpop.eup %6323  ;;  %vm2696_vm11 = vmor %vm2694_vm9, %vm2695_vm10 }
0x165e   :  { %v2691_v0 = vsub.f32 1.0, %v2690_v18  ;;  %v6326_v51 = vpop.eup %6325  ;;  %v2365_v15 = vadd.f32 1.0, %v6324_v16 }
0x165f   :  { %6327 = vrcp.f32 %v2688_v20  ;;  %v2550_v56 = vadd.f32 1.0, %v6326_v51  ;;  %v2715_v13 = vand.u32 2147483648, %v2688_v20  ;;  %vm2709_vm6 = vweird.f32 %v2688_v20 }
0x1660   :  { %v2692_v28 = vmul.f32 %v6320_v5, %v2691_v0  ;;  %6329 = vrcp.f32 %v2365_v15  ;;  %v2713_v25 = vand.u32 2147483647, %v2688_v20  ;;  %v2377_v59 = vand.u32 2147483648, %v2365_v15 }
0x1661   :  { %6331 = vrcp.f32 %v2550_v56  ;;  %v2716_v24 = vor.u32 1.1754944e-38, %v2715_v13  ;;  %vm2371_vm10 = vweird.f32 %v2365_v15  ;;  %v2375_v21 = vand.u32 2147483647, %v2365_v15 }
0x1662   :  { %v2693_v42 = vadd.f32 %v6320_v5, %v2692_v28  ;;  %vm2714_vm8 = vcmp.eq.f32.partialorder %v2713_v25, 8.507059e+37  ;;  %v2562_v62 = vand.u32 2147483648, %v2550_v56  ;;  %v2378_v14 = vor.u32 1.1754944e-38, %v2377_v59 }
0x1663   :  { %v2723_v51 = vrot.slane %v7906_v3, 7  ;;  %v2724_v3 = vrot.slane %v7910_v23, 7 }
0x1664   :  { %v2697_v30 = vsel %vm2696_vm11, %v6320_v5, %v2693_v42  ;;  %v2560_v5 = vand.u32 2147483647, %v2550_v56  ;;  %v2563_v31 = vor.u32 1.1754944e-38, %v2562_v62 }
0x1665   :  { %v6328_v38 = vpop.eup %6327  ;;  %v7973_v1 = vsel %vm2699_vm2, %v2701_v48, %v2697_v30  ;;  %vm2556_vm2 = vweird.f32 %v2550_v56 }
0x1666   :  { %v2705_v50 = vmul.f32 %v6328_v38, %v2688_v20  ;;  %v6330_v7 = vpop.eup %6329  ;;  %vm2710_vm0 = vweird.f32 %v6328_v38 }
0x1667   :  { %v6332_v10 = vpop.eup %6331  ;;  %v2367_v26 = vmul.f32 %v6330_v7, %v2365_v15  ;;  %vm2711_vm12 = vmor %vm2709_vm6, %vm2710_vm0  ;;  %vm2372_vm7 = vweird.f32 %v6330_v7  ;;  %vm2376_vm0 = vcmp.eq.f32.partialorder %v2375_v21, 8.507059e+37  ;;  %v2727_v15 = vmul.f32 %v2723_v51, %v7973_v1 }
0x1668   :  { %v2706_v44 = vsub.f32 1.0, %v2705_v50  ;;  %v2552_v32 = vmul.f32 %v6332_v10, %v2550_v56  ;;  %vm2373_vm9 = vmor %vm2371_vm10, %vm2372_vm7  ;;  %vm2557_vm11 = vweird.f32 %v6332_v10 }
0x1669   :  { %v2368_v47 = vsub.f32 1.0, %v2367_v26  ;;  %vm2558_vm6 = vmor %vm2556_vm2, %vm2557_vm11 }
0x166a   :  { %v2707_v45 = vmul.f32 %v6328_v38, %v2706_v44  ;;  %v2553_v37 = vsub.f32 1.0, %v2552_v32 }
0x166b   :  { %v2369_v61 = vmul.f32 %v6330_v7, %v2368_v47 }
0x166c   :  { %v2708_v39 = vadd.f32 %v6328_v38, %v2707_v45  ;;  %v2554_v2 = vmul.f32 %v6332_v10, %v2553_v37 }
0x166d   :  { %v2370_v36 = vadd.f32 %v6330_v7, %v2369_v61 }
0x166e   :  { %v2712_v11 = vsel %vm2711_vm12, %v6328_v38, %v2708_v39  ;;  %v2555_v19 = vadd.f32 %v6332_v10, %v2554_v2  ;;  %vm2561_vm12 = vcmp.eq.f32.partialorder %v2560_v5, 8.507059e+37 }
0x166f   :  { %v2717_v58 = vsel %vm2714_vm8, %v2716_v24, %v2712_v11  ;;  %v2374_v57 = vsel %vm2373_vm9, %v6330_v7, %v2370_v36 }
0x1670   :  { %v2379_v18 = vsel %vm2376_vm0, %v2378_v14, %v2374_v57  ;;  %v2559_v9 = vsel %vm2558_vm6, %v6332_v10, %v2555_v19 }
0x1671   :  { %v2564_v20 = vsel %vm2561_vm12, %v2563_v31, %v2559_v9 }
0x1672   :  { %v2567_v22 = vmul.f32 %v2564_v20, %v7921_v46  ;;  %v2382_v46 = vmul.f32 %v2379_v18, %v7916_v29 }
0x1691   :  { %v2732_v40 = vpop.permute.xlu2 %2731 }
0x1692   :  { %v2737_v4 = vmul.f32 %v2732_v40, %v7973_v1  ;;  %v2728_v40 = vmul.f32 %v2724_v3, %v2717_v58 }
0x1694   :  { %2741 = vrot.lane.b32.xlu0 %v2737_v4, %s6919_s2 }
0x16a7   :  { %v2734_v27 = vpop.permute.xlu0 %2733 }
0x16a8   :  { %v2738_v63 = vmul.f32 %v2734_v27, %v2717_v58 }
0x16aa   :  { %2743 = vrot.lane.b32.xlu1 %v2738_v63, %s6919_s2 }
0x16ac   :  { %v2385_v8 = vpop.permute.xlu2 %2384 }
0x16ad   :  { %v2387_v0 = vmul.f32 %v2385_v8, %v2379_v18 }
0x16ae   :  { %v2570_v28 = vpop.permute.xlu1 %2569 }
0x16af   :  { %2389 = vrot.lane.b32.xlu0 %v2387_v0, %s6919_s2  ;;  %v2572_v16 = vmul.f32 %v2570_v28, %v2564_v20 }
0x16b1   :  { %2574 = vrot.lane.b32.xlu2 %v2572_v16, %s6919_s2 }
0x1706   :  { %v2742_v42 = vpop.permute.xlu0 %2741 }
0x1707   :  { %v7982_v43 = vadd.f32 %v2742_v42, %v2727_v15 }
0x1709   :  { %6333 = vtanh.f32 %v7982_v43 }
0x170b   :  { %v2575_v56 = vpop.permute.xlu2 %2574 }
0x170c   :  { %v7986_v30 = vadd.f32 %v2575_v56, %v2567_v22 }
0x170e   :  { %6335 = vtanh.f32 %v7986_v30 }
0x170f   :  { %v6334_v48 = vpop.eup %6333 }
0x1710   :  { %2753 = vrot.lane.b32.xlu1 %v6334_v48, %s6918_s18 }
0x1714   :  { %v6336_v38 = vpop.eup %6335 }
0x1715   :  { %2580 = vrot.lane.b32.xlu0 %v6336_v38, %s6918_s18 }
0x171c   :  { %v2744_v4 = vpop.permute.xlu1 %2743 }
0x171d   :  { %v7992_v50 = vadd.f32 %v2744_v4, %v2728_v40 }
0x171f   :  { %6337 = vtanh.f32 %v7992_v50 }
0x1721   :  { %v2390_v7 = vpop.permute.xlu0 %2389 }
0x1722   :  { %v7996_v10 = vadd.f32 %v2390_v7, %v2382_v46 }
0x1724   :  { %6339 = vtanh.f32 %v7996_v10 }
0x1725   :  { %v6338_v44 = vpop.eup %6337 }
0x1726   :  { %2755 = vrot.lane.b32.xlu2 %v6338_v44, %s6918_s18 }
0x172a   :  { %v6340_v26 = vpop.eup %6339 }
0x172b   :  { %2395 = vrot.lane.b32.xlu1 %v6340_v26, %s6918_s18 }
0x1780   :  { %v2756_v23 = vpop.permute.xlu2 %2755 }
0x1781   :  { %v2760_v32 = vmul.f32 %v2756_v23, %v2717_v58 }
0x1782   :  { %v2754_v45 = vpop.permute.xlu1 %2753 }
0x1783   :  { %v2759_v47 = vmul.f32 %v2754_v45, %v7973_v1  ;;  %v2764_v37 = vperm.slane %v2760_v32, 1 }
0x1785   :  { %v2763_v39 = vperm.slane %v2759_v47, 1 }
0x1787   :  { %v2581_v61 = vpop.permute.xlu0 %2580  ;;  %v2904_v13 = vsel %vm482_vm13, %v2764_v37, %v2763_v39  ;;  %v2765_v25 = vsel %vm732_vm5, %v2764_v37, %v2763_v39 }
0x1788   :  { %v2583_v29 = vmul.f32 %v2581_v61, %v2564_v20  ;;  %2905 = vrot.lane.b32.xlu2 %v2904_v13, %s6919_s2  ;;  %2766 = vrot.lane.b32.xlu0 %v2765_v25, %s6919_s2 }
0x178a   :  { %v2769_v2 = vrot.slane %v2583_v29, 7 }
0x178c   :  { %2770 = vrot.lane.b32.xlu1 %v2769_v2, %s6918_s18 }
0x1790   :  { %2585 = vrot.lane.b32.xlu2 %v2583_v29, %s6919_s2 }
0x179d   :  { %v2396_v11 = vpop.permute.xlu1 %2395 }
0x179e   :  { %v2398_v36 = vmul.f32 %v2396_v11, %v2379_v18 }
0x17a0   :  { %2589 = vrot.lane.b32.xlu0 %v2398_v36, %s6918_s18 }
0x17e2   :  { %v2906_v1 = vpop.permute.xlu2 %2905 }
0x17e3   :  { %5944 = vmatmul.msk.f32.vlgmr.msrb.gmra.mxu3 %vm226_vm4, %v2906_v1 }
0x17ea   :  { %v2586_v27 = vpop.permute.xlu2 %2585 }
0x17fa   :  { %v2767_v24 = vpop.permute.xlu0 %2766 }
0x17fe   :  { %v2771_v59 = vpop.permute.xlu1 %2770 }
0x17ff   :  { %v2773_v21 = vsel %vm226_vm4, %v2767_v24, %v2771_v59 }
0x1800   :  { %v2775_v58 = vrot.slane %v2773_v21, 1 }
0x1802   :  { %5940 = vmatmul.msk.f32.vlgmr.msra.gmra.mxu0 %vm491_vm14, %v2775_v58 }
0x1803   :  { %3365 = vmatpush.msra.mxu0 %v7850_v6 }
0x1805   :  { %3366 = vmatpush.msra.mxu0 %v7854_v33 }
0x1807   :  { %3367 = vmatpush.msra.mxu0 %v7858_v34 }
0x1809   :  { %3368 = vmatpush.msra.mxu0 %v7862_v60 }
0x180b   :  { %3369 = vmatpush.msra.mxu0 %v7865_v17 }
0x180d   :  { %3370 = vmatpush.msra.mxu0 %v7868_v12 }
0x180f   :  { %3371 = vmatpush.msra.mxu0 %v7871_v35 }
0x1811   :  { %3372 = vmatpush.msra.mxu0 %v7874_v55  ;;  %v8029_v55 = vld [vmem:[%s9011_s8] ss:$0 sm:$0xff] }
0x1812   :  { %v2590_v19 = vpop.permute.xlu0 %2589 }
0x1813   :  { %v2592_v63 = vsel %vm226_vm4, %v2586_v27, %v2590_v19 }
0x1814   :  { %5935 = vmatmul.msk.f32.vlgmr.msra.gmra.mxu2 %vm491_vm14, %v2592_v63 }
0x1866   :  { %v2926_v6 = vpop.f32.mrf.mxu3 }
0x1867   :  { %v2930_v33 = vrot.slane %v2926_v6, 6  ;;  %v2931_v57 = vrot.slane %v2926_v6, 7 }
0x1869   :  { %v2934_v34 = vadd.f32 %v2930_v33, %v7139_v49  ;;  %v2935_v60 = vadd.f32 %v2931_v57, %v7878_v52 }
0x186b   :  { %6341 = vtanh.f32 %v2934_v34  ;;  %v5946_v9 = vmul.f32 -1.442695, %v2935_v60  ;;  %v5945_v28 = vmul.f32 -1.442695, %v2934_v34 }
0x186c   :  { %6343 = vtanh.f32 %v2935_v60 }
0x1871   :  { %v6342_v17 = vpop.eup %6341 }
0x1872   :  { %v6344_v12 = vpop.eup %6343  ;;  %2986 = vrot.lane.b32.xlu1 %v6342_v17, %s6918_s18 }
0x1873   :  { %2988 = vrot.lane.b32.xlu2 %v6344_v12, %s6918_s18 }
0x187f   :  { %v2795_v35 = vpop.f32.mrf.mxu0 }
0x1880   :  { %v2796_v62 = vadd.f32 %v8029_v55, %v2795_v35 }
0x1882   :  { %6345 = vtanh.f32 %v2796_v62  ;;  %v5941_v4 = vmul.f32 -1.442695, %v2796_v62 }
0x1888   :  { %v6346_v14 = vpop.eup %6345 }
0x1889   :  { %2820 = vrot.lane.b32.xlu0 %v6346_v14, %s6918_s18 }
0x1897   :  { %v2613_v5 = vpop.f32.mrf.mxu2 }
0x1898   :  { %v2614_v8 = vadd.f32 %v7888_v41, %v2613_v5 }
0x189a   :  { %6347 = vtanh.f32 %v2614_v8  ;;  %v5936_v11 = vmul.f32 -1.442695, %v2614_v8 }
0x189b   :  { %6349 = vpow2.f32 %v5946_v9 }
0x18a0   :  { %v6348_v18 = vpop.eup %6347 }
0x18a1   :  { %2638 = vrot.lane.b32.xlu1 %v6348_v18, %s6918_s18  ;;  %v6350_v0 = vpop.eup %6349 }
0x18a2   :  { %v2943_v31 = vadd.f32 1.0, %v6350_v0 }
0x18a4   :  { %6351 = vrcp.f32 %v2943_v31  ;;  %v2970_v48 = vand.u32 2147483648, %v2943_v31  ;;  %vm2964_vm8 = vweird.f32 %v2943_v31  ;;  %v2968_v38 = vand.u32 2147483647, %v2943_v31 }
0x18a5   :  { %6353 = vpow2.f32 %v5945_v28 }
0x18a6   :  { %v2971_v40 = vor.u32 1.1754944e-38, %v2970_v48  ;;  %vm2969_vm9 = vcmp.eq.f32.partialorder %v2968_v38, 8.507059e+37 }
0x18aa   :  { %v6352_v20 = vpop.eup %6351 }
0x18ab   :  { %v2960_v16 = vmul.f32 %v6352_v20, %v2943_v31  ;;  %v6354_v15 = vpop.eup %6353  ;;  %vm2965_vm7 = vweird.f32 %v6352_v20 }
0x18ac   :  { %v2942_v22 = vadd.f32 1.0, %v6354_v15  ;;  %vm2966_vm10 = vmor %vm2964_vm8, %vm2965_vm7  ;;  %v2979_v15 = vrot.slane %v7992_v50, 7 }
0x18ad   :  { %v2961_v51 = vsub.f32 1.0, %v2960_v16 }
0x18ae   :  { %6355 = vrcp.f32 %v2942_v22  ;;  %v2955_v61 = vand.u32 2147483648, %v2942_v22  ;;  %vm2949_vm2 = vweird.f32 %v2942_v22  ;;  %v2953_v29 = vand.u32 2147483647, %v2942_v22 }
0x18af   :  { %v2962_v42 = vmul.f32 %v6352_v20, %v2961_v51  ;;  %6357 = vpow2.f32 %v5941_v4  ;;  %v2978_v51 = vrot.slane %v7982_v43, 7 }
0x18b0   :  { %v2956_v25 = vor.u32 1.1754944e-38, %v2955_v61  ;;  %vm2954_vm6 = vcmp.eq.f32.partialorder %v2953_v29, 8.507059e+37 }
0x18b1   :  { %v2963_v56 = vadd.f32 %v6352_v20, %v2962_v42 }
0x18b3   :  { %v2967_v3 = vsel %vm2966_vm10, %v6352_v20, %v2963_v56 }
0x18b4   :  { %v8035_v46 = vsel %vm2969_vm9, %v2971_v40, %v2967_v3  ;;  %v6356_v44 = vpop.eup %6355 }
0x18b5   :  { %v2945_v23 = vmul.f32 %v6356_v44, %v2942_v22  ;;  %v6358_v45 = vpop.eup %6357  ;;  %vm2950_vm11 = vweird.f32 %v6356_v44  ;;  %v2983_v56 = vmul.f32 %v2979_v15, %v8035_v46 }
0x18b6   :  { %v2801_v37 = vadd.f32 1.0, %v6358_v45  ;;  %vm2951_vm0 = vmor %vm2949_vm2, %vm2950_vm11 }
0x18b7   :  { %v2946_v32 = vsub.f32 1.0, %v2945_v23 }
0x18b8   :  { %6359 = vrcp.f32 %v2801_v37  ;;  %v2813_v6 = vand.u32 2147483648, %v2801_v37  ;;  %vm2807_vm7 = vweird.f32 %v2801_v37  ;;  %v2811_v33 = vand.u32 2147483647, %v2801_v37 }
0x18b9   :  { %v2947_v47 = vmul.f32 %v6356_v44, %v2946_v32  ;;  %6361 = vpow2.f32 %v5936_v11 }
0x18ba   :  { %v2814_v34 = vor.u32 1.1754944e-38, %v2813_v6  ;;  %vm2812_vm10 = vcmp.eq.f32.partialorder %v2811_v33, 8.507059e+37 }
0x18bb   :  { %v2948_v39 = vadd.f32 %v6356_v44, %v2947_v47 }
0x18bd   :  { %v2952_v13 = vsel %vm2951_vm0, %v6356_v44, %v2948_v39 }
0x18be   :  { %v6360_v2 = vpop.eup %6359  ;;  %v8039_v36 = vsel %vm2954_vm6, %v2956_v25, %v2952_v13 }
0x18bf   :  { %v2803_v59 = vmul.f32 %v6360_v2, %v2801_v37  ;;  %v6362_v58 = vpop.eup %6361  ;;  %vm2808_vm12 = vweird.f32 %v6360_v2  ;;  %v2982_v42 = vmul.f32 %v2978_v51, %v8039_v36 }
0x18c0   :  { %v2619_v19 = vadd.f32 1.0, %v6362_v58  ;;  %vm2809_vm8 = vmor %vm2807_vm7, %vm2808_vm12 }
0x18c1   :  { %v2804_v21 = vsub.f32 1.0, %v2803_v59 }
0x18c2   :  { %6363 = vrcp.f32 %v2619_v19  ;;  %v2631_v18 = vand.u32 2147483648, %v2619_v19  ;;  %vm2625_vm11 = vweird.f32 %v2619_v19  ;;  %v2629_v9 = vand.u32 2147483647, %v2619_v19 }
0x18c3   :  { %v2805_v27 = vmul.f32 %v6360_v2, %v2804_v21 }
0x18c4   :  { %v2632_v31 = vor.u32 1.1754944e-38, %v2631_v18  ;;  %vm2630_vm0 = vcmp.eq.f32.partialorder %v2629_v9, 8.507059e+37 }
0x18c5   :  { %v2806_v63 = vadd.f32 %v6360_v2, %v2805_v27 }
0x18c7   :  { %v2810_v57 = vsel %vm2809_vm8, %v6360_v2, %v2806_v63 }
0x18c8   :  { %v2815_v60 = vsel %vm2812_vm10, %v2814_v34, %v2810_v57  ;;  %v6364_v12 = vpop.eup %6363 }
0x18c9   :  { %v2621_v62 = vmul.f32 %v6364_v12, %v2619_v19  ;;  %vm2626_vm9 = vweird.f32 %v6364_v12 }
0x18ca   :  { %vm2627_vm2 = vmor %vm2625_vm11, %vm2626_vm9 }
0x18cb   :  { %v2622_v14 = vsub.f32 1.0, %v2621_v62 }
0x18cd   :  { %v2989_v7 = vpop.permute.xlu2 %2988  ;;  %v2623_v5 = vmul.f32 %v6364_v12, %v2622_v14 }
0x18ce   :  { %v2993_v26 = vmul.f32 %v2989_v7, %v8035_v46  ;;  %v2818_v7 = vmul.f32 %v2815_v60, %v7986_v30 }
0x18cf   :  { %v2624_v8 = vadd.f32 %v6364_v12, %v2623_v5 }
0x18d0   :  { %2998 = vrot.lane.b32.xlu0 %v2993_v26, %s6919_s2 }
0x18d1   :  { %v2628_v0 = vsel %vm2627_vm2, %v6364_v12, %v2624_v8 }
0x18d2   :  { %v2633_v28 = vsel %vm2630_vm0, %v2632_v31, %v2628_v0 }
0x18d3   :  { %v2636_v43 = vmul.f32 %v2633_v28, %v7996_v10 }
0x18e4   :  { %v2987_v1 = vpop.permute.xlu1 %2986 }
0x18e5   :  { %v2992_v24 = vmul.f32 %v2987_v1, %v8039_v36 }
0x18e7   :  { %2996 = vrot.lane.b32.xlu2 %v2992_v24, %s6919_s2 }
0x18fb   :  { %v2821_v17 = vpop.permute.xlu0 %2820 }
0x18fc   :  { %v2823_v35 = vmul.f32 %v2821_v17, %v2815_v60 }
0x18fe   :  { %2825 = vrot.lane.b32.xlu1 %v2823_v35, %s6919_s2 }
0x1913   :  { %v2639_v20 = vpop.permute.xlu1 %2638 }
0x1914   :  { %v2641_v16 = vmul.f32 %v2639_v20, %v2633_v28 }
0x1916   :  { %2643 = vrot.lane.b32.xlu2 %v2641_v16, %s6919_s2 }
0x1941   :  { %v2997_v22 = vpop.permute.xlu2 %2996 }
0x1942   :  { %v8049_v48 = vadd.f32 %v2997_v22, %v2982_v42  ;;  %v2999_v38 = vpop.permute.xlu0 %2998 }
0x1943   :  { %v8051_v3 = vadd.f32 %v2999_v38, %v2983_v56 }
0x1944   :  { %6365 = vtanh.f32 %v8049_v48 }
0x1945   :  { %6367 = vtanh.f32 %v8051_v3 }
0x194a   :  { %v6366_v40 = vpop.eup %6365 }
0x194b   :  { %v6368_v4 = vpop.eup %6367  ;;  %3008 = vrot.lane.b32.xlu0 %v6366_v40, %s6918_s18 }
0x194c   :  { %3010 = vrot.lane.b32.xlu1 %v6368_v4, %s6918_s18 }
0x1970   :  { %v2644_v50 = vpop.permute.xlu2 %2643  ;;  %v2826_v26 = vpop.permute.xlu1 %2825 }
0x1971   :  { %v8059_v44 = vadd.f32 %v2644_v50, %v2636_v43  ;;  %v8061_v23 = vadd.f32 %v2826_v26, %v2818_v7 }
0x1973   :  { %6369 = vtanh.f32 %v8059_v44 }
0x1974   :  { %6371 = vtanh.f32 %v8061_v23 }
0x1979   :  { %v6370_v32 = vpop.eup %6369 }
0x197a   :  { %v6372_v45 = vpop.eup %6371  ;;  %2649 = vrot.lane.b32.xlu0 %v6370_v32, %s6918_s18 }
0x197b   :  { %2831 = vrot.lane.b32.xlu2 %v6372_v45, %s6918_s18 }
0x19bd   :  { %v3009_v47 = vpop.permute.xlu0 %3008 }
0x19be   :  { %v3011_v10 = vpop.permute.xlu1 %3010  ;;  %v3014_v37 = vmul.f32 %v3009_v47, %v8039_v36 }
0x19bf   :  { %v3015_v30 = vmul.f32 %v3011_v10, %v8035_v46 }
0x19c0   :  { %v3018_v39 = vperm.slane %v3014_v37, 2 }
0x19c1   :  { %v3019_v61 = vperm.slane %v3015_v30, 2 }
0x19c3   :  { %v3020_v29 = vsel %vm988_vm15, %v3019_v61, %v3018_v39  ;;  %v3159_v11 = vsel %vm482_vm13, %v3019_v61, %v3018_v39 }
0x19c4   :  { %3021 = vrot.lane.b32.xlu1 %v3020_v29, %s6919_s2 }
0x19d5   :  { %v2832_v13 = vpop.permute.xlu2 %2831 }
0x19d6   :  { %v2834_v25 = vmul.f32 %v2832_v13, %v2815_v60 }
0x19d8   :  { %v3024_v2 = vrot.slane %v2834_v25, 6  ;;  %2836 = vrot.lane.b32.xlu0 %v2834_v25, %s6919_s2 }
0x19da   :  { %3025 = vrot.lane.b32.xlu2 %v3024_v2, %s6918_s18 }
0x19e2   :  { %3160 = vrot.lane.b32.xlu2 %v3159_v11, %s6919_s2 }
0x19ec   :  { %v2650_v36 = vpop.permute.xlu0 %2649 }
0x19ed   :  { %v2652_v1 = vmul.f32 %v2650_v36, %v2633_v28 }
0x19ef   :  { %2840 = vrot.lane.b32.xlu1 %v2652_v1, %s6918_s18 }
0x1a34   :  { %v3026_v46 = vpop.permute.xlu2 %3025 }
0x1a36   :  { %v3022_v24 = vpop.permute.xlu1 %3021 }
0x1a37   :  { %v3028_v59 = vsel %vm226_vm4, %v3022_v24, %v3026_v46 }
0x1a38   :  { %v3030_v21 = vrot.slane %v3028_v59, 2 }
0x1a3a   :  { %5947 = vmatmul.msk.f32.vlgmr.msrb.gmra.mxu2 %vm491_vm14, %v3030_v21 }
0x1a3c   :  { %v3161_v58 = vpop.permute.xlu2 %3160 }
0x1a3d   :  { %5951 = vmatmul.msk.f32.vlgmr.msrb.gmra.mxu0 %vm226_vm4, %v3161_v58 }
0x1a4a   :  { %v2837_v27 = vpop.permute.xlu0 %2836 }
0x1a61   :  { %v2841_v19 = vpop.permute.xlu1 %2840 }
0x1a62   :  { %v2843_v63 = vsel %vm226_vm4, %v2837_v27, %v2841_v19 }
0x1a63   :  { %5942 = vmatmul.msk.f32.vlgmr.msrb.gmra.mxu1 %vm491_vm14, %v2843_v63 }
0x1aba   :  { %v3181_v6 = vpop.f32.mrf.mxu0 }
0x1abb   :  { %v3185_v33 = vrot.slane %v3181_v6, 5  ;;  %v3186_v14 = vrot.slane %v3181_v6, 6 }
0x1abd   :  { %v3189_v57 = vadd.f32 %v3185_v33, %v7139_v49  ;;  %v3050_v34 = vpop.f32.mrf.mxu2  ;;  %v3190_v5 = vadd.f32 %v3186_v14, %v7878_v52 }
0x1abe   :  { %v3051_v60 = vadd.f32 %v8029_v55, %v3050_v34 }
0x1abf   :  { %6373 = vtanh.f32 %v3189_v57  ;;  %v5952_v18 = vmul.f32 -1.442695, %v3189_v57  ;;  %v5953_v37 = vmul.f32 -1.442695, %v3190_v5 }
0x1ac0   :  { %6375 = vtanh.f32 %v3051_v60  ;;  %v5948_v28 = vmul.f32 -1.442695, %v3051_v60 }
0x1ac5   :  { %v6374_v17 = vpop.eup %6373 }
0x1ac6   :  { %3241 = vrot.lane.b32.xlu2 %v6374_v17, %s6918_s18  ;;  %v6376_v12 = vpop.eup %6375 }
0x1ac7   :  { %3075 = vrot.lane.b32.xlu1 %v6376_v12, %s6918_s18 }
0x1ae0   :  { %v2864_v35 = vpop.f32.mrf.mxu1 }
0x1ae1   :  { %v2865_v62 = vadd.f32 %v7888_v41, %v2864_v35 }
0x1ae3   :  { %6377 = vtanh.f32 %v2865_v62  ;;  %v5943_v32 = vmul.f32 -1.442695, %v2865_v62 }
0x1ae4   :  { %6379 = vtanh.f32 %v3190_v5 }
0x1ae5   :  { %6381 = vpow2.f32 %v5952_v18 }
0x1ae9   :  { %v6378_v8 = vpop.eup %6377 }
0x1aea   :  { %2889 = vrot.lane.b32.xlu0 %v6378_v8, %s6918_s18  ;;  %v6380_v49 = vpop.eup %6379 }
0x1aeb   :  { %v6382_v9 = vpop.eup %6381 }
0x1aec   :  { %v3197_v0 = vadd.f32 1.0, %v6382_v9 }
0x1aee   :  { %6383 = vrcp.f32 %v3197_v0  ;;  %v3210_v15 = vand.u32 2147483648, %v3197_v0  ;;  %vm3204_vm12 = vweird.f32 %v3197_v0  ;;  %v3208_v42 = vand.u32 2147483647, %v3197_v0 }
0x1aef   :  { %6385 = vpow2.f32 %v5948_v28 }
0x1af0   :  { %v3211_v38 = vor.u32 1.1754944e-38, %v3210_v15  ;;  %vm3209_vm8 = vcmp.eq.f32.partialorder %v3208_v42, 8.507059e+37 }
0x1af2   :  { %3243 = vrot.lane.b32.xlu0 %v6380_v49, %s6918_s18 }
0x1af4   :  { %v6384_v31 = vpop.eup %6383 }
0x1af5   :  { %v3200_v20 = vmul.f32 %v6384_v31, %v3197_v0  ;;  %v6386_v51 = vpop.eup %6385  ;;  %vm3205_vm6 = vweird.f32 %v6384_v31 }
0x1af6   :  { %v3056_v22 = vadd.f32 1.0, %v6386_v51  ;;  %vm3206_vm7 = vmor %vm3204_vm12, %vm3205_vm6 }
0x1af7   :  { %v3201_v41 = vsub.f32 1.0, %v3200_v20 }
0x1af8   :  { %6387 = vrcp.f32 %v3056_v22  ;;  %v3068_v10 = vand.u32 2147483648, %v3056_v22  ;;  %vm3062_vm9 = vweird.f32 %v3056_v22  ;;  %v3066_v30 = vand.u32 2147483647, %v3056_v22 }
0x1af9   :  { %v3202_v16 = vmul.f32 %v6384_v31, %v3201_v41  ;;  %6389 = vpow2.f32 %v5943_v32 }
0x1afa   :  { %v3069_v29 = vor.u32 1.1754944e-38, %v3068_v10  ;;  %6391 = vpow2.f32 %v5953_v37  ;;  %vm3067_vm2 = vcmp.eq.f32.partialorder %v3066_v30, 8.507059e+37 }
0x1afb   :  { %v3203_v52 = vadd.f32 %v6384_v31, %v3202_v16 }
0x1afd   :  { %v3207_v56 = vsel %vm3206_vm7, %v6384_v31, %v3203_v52  ;;  %v3233_v31 = vrot.slane %v8049_v48, 7 }
0x1afe   :  { %v8089_v4 = vsel %vm3209_vm8, %v3211_v38, %v3207_v56  ;;  %v6388_v50 = vpop.eup %6387 }
0x1aff   :  { %v3058_v7 = vmul.f32 %v6388_v50, %v3056_v22  ;;  %vm3063_vm10 = vweird.f32 %v6388_v50  ;;  %v6390_v39 = vpop.eup %6389  ;;  %v3237_v20 = vmul.f32 %v3233_v31, %v8089_v4 }
0x1b00   :  { %vm3064_vm11 = vmor %vm3062_vm9, %vm3063_vm10  ;;  %v2870_v13 = vadd.f32 1.0, %v6390_v39  ;;  %v6392_v36 = vpop.eup %6391 }
0x1b01   :  { %v3059_v26 = vsub.f32 1.0, %v3058_v7  ;;  %v3198_v1 = vadd.f32 1.0, %v6392_v36 }
0x1b02   :  { %6393 = vrcp.f32 %v2870_v13  ;;  %v2882_v6 = vand.u32 2147483648, %v2870_v13  ;;  %vm2876_vm6 = vweird.f32 %v2870_v13  ;;  %v2880_v33 = vand.u32 2147483647, %v2870_v13 }
0x1b03   :  { %v3060_v45 = vmul.f32 %v6388_v50, %v3059_v26  ;;  %6395 = vrcp.f32 %v3198_v1  ;;  %v3225_v14 = vand.u32 2147483648, %v3198_v1  ;;  %vm3219_vm10 = vweird.f32 %v3198_v1 }
0x1b04   :  { %v2883_v60 = vor.u32 1.1754944e-38, %v2882_v6  ;;  %vm2881_vm7 = vcmp.eq.f32.partialorder %v2880_v33, 8.507059e+37  ;;  %v3223_v5 = vand.u32 2147483647, %v3198_v1  ;;  %v8137_v6 = vld [vmem:[%s9011_s8 + $0x1] ss:$0 sm:$0xff] }
0x1b05   :  { %v3061_v47 = vadd.f32 %v6388_v50, %v3060_v45  ;;  %v3226_v49 = vor.u32 1.1754944e-38, %v3225_v14 }
0x1b07   :  { %v3065_v61 = vsel %vm3064_vm11, %v6388_v50, %v3061_v47  ;;  %vm3224_vm11 = vcmp.eq.f32.partialorder %v3223_v5, 8.507059e+37 }
0x1b08   :  { %v8093_v25 = vsel %vm3067_vm2, %v3069_v29, %v3065_v61  ;;  %v6394_v46 = vpop.eup %6393  ;;  %vm3425_vm2 = vcmask 1047559  }
0x1b09   :  { %v2872_v24 = vmul.f32 %v6394_v46, %v2870_v13  ;;  %v6396_v21 = vpop.eup %6395  ;;  %vm2877_vm0 = vweird.f32 %v6394_v46  ;;  %v3073_v16 = vmul.f32 %v8093_v25, %v8061_v23  ;;  %v3234_v23 = vrot.slane %v8051_v3, 7 }
0x1b0a   :  { %v3215_v27 = vmul.f32 %v6396_v21, %v3198_v1  ;;  %vm2878_vm12 = vmor %vm2876_vm6, %vm2877_vm0  ;;  %vm3220_vm8 = vweird.f32 %v6396_v21 }
0x1b0b   :  { %v2873_v59 = vsub.f32 1.0, %v2872_v24  ;;  %vm3221_vm9 = vmor %vm3219_vm10, %vm3220_vm8 }
0x1b0c   :  { %v3216_v63 = vsub.f32 1.0, %v3215_v27 }
0x1b0d   :  { %v2874_v58 = vmul.f32 %v6394_v46, %v2873_v59 }
0x1b0e   :  { %v3217_v34 = vmul.f32 %v6396_v21, %v3216_v63 }
0x1b0f   :  { %v2875_v19 = vadd.f32 %v6394_v46, %v2874_v58 }
0x1b10   :  { %v3218_v62 = vadd.f32 %v6396_v21, %v3217_v34 }
0x1b11   :  { %v2879_v57 = vsel %vm2878_vm12, %v6394_v46, %v2875_v19 }
0x1b12   :  { %v2884_v12 = vsel %vm2881_vm7, %v2883_v60, %v2879_v57  ;;  %v3222_v8 = vsel %vm3221_vm9, %v6396_v21, %v3218_v62 }
0x1b13   :  { %v3227_v18 = vsel %vm3224_vm11, %v3226_v49, %v3222_v8  ;;  %v2887_v48 = vmul.f32 %v2884_v12, %v8059_v44 }
0x1b14   :  { %v3238_v38 = vmul.f32 %v3234_v23, %v3227_v18 }
0x1b20   :  { %v3242_v40 = vpop.permute.xlu2 %3241 }
0x1b21   :  { %v3247_v43 = vmul.f32 %v3242_v40, %v8089_v4 }
0x1b23   :  { %3251 = vrot.lane.b32.xlu0 %v3247_v43, %s6919_s2 }
0x1b39   :  { %v3076_v2 = vpop.permute.xlu1 %3075 }
0x1b3a   :  { %v3078_v11 = vmul.f32 %v3076_v2, %v8093_v25 }
0x1b3c   :  { %3080 = vrot.lane.b32.xlu2 %v3078_v11, %s6919_s2 }
0x1b5c   :  { %v2890_v17 = vpop.permute.xlu0 %2889 }
0x1b5d   :  { %v2892_v35 = vmul.f32 %v2890_v17, %v2884_v12 }
0x1b5f   :  { %2894 = vrot.lane.b32.xlu1 %v2892_v35, %s6919_s2 }
0x1b64   :  { %v3244_v9 = vpop.permute.xlu0 %3243 }
0x1b65   :  { %v3248_v0 = vmul.f32 %v3244_v9, %v3227_v18 }
0x1b67   :  { %3253 = vrot.lane.b32.xlu1 %v3248_v0, %s6919_s2 }
0x1b95   :  { %v3252_v28 = vpop.permute.xlu0 %3251 }
0x1b96   :  { %v3257_v41 = vadd.f32 %v3252_v28, %v3237_v20  ;;  %v3081_v51 = vpop.permute.xlu2 %3080 }
0x1b97   :  { %v8103_v52 = vadd.f32 %v3081_v51, %v3073_v16 }
0x1b98   :  { %6397 = vtanh.f32 %v3257_v41  ;;  %v3423_v7 = vperm.slane %v3257_v41, 3 }
0x1b99   :  { %6399 = vtanh.f32 %v8103_v52 }
0x1b9e   :  { %v6398_v15 = vpop.eup %6397 }
0x1b9f   :  { %3263 = vrot.lane.b32.xlu1 %v6398_v15, %s6918_s18  ;;  %v6400_v42 = vpop.eup %6399 }
0x1ba0   :  { %3086 = vrot.lane.b32.xlu0 %v6400_v42, %s6918_s18 }
0x1bd1   :  { %v2895_v22 = vpop.permute.xlu1 %2894 }
0x1bd2   :  { %v8109_v56 = vadd.f32 %v2895_v22, %v2887_v48 }
0x1bd4   :  { %6401 = vtanh.f32 %v8109_v56 }
0x1bd9   :  { %v3254_v40 = vpop.permute.xlu1 %3253 }
0x1bda   :  { %v6402_v43 = vpop.eup %6401  ;;  %v3258_v50 = vadd.f32 %v3254_v40, %v3238_v38 }
0x1bdb   :  { %2900 = vrot.lane.b32.xlu2 %v6402_v43, %s6918_s18 }
0x1bdc   :  { %6403 = vtanh.f32 %v3258_v50  ;;  %v3424_v26 = vperm.slane %v3258_v50, 3 }
0x1bde   :  { %v8115_v32 = vsel %vm3425_vm2, %v3424_v26, %v3423_v7 }
0x1be2   :  { %v6404_v44 = vpop.eup %6403 }
0x1be3   :  { %3265 = vrot.lane.b32.xlu2 %v6404_v44, %s6918_s18 }
0x1c11   :  { %v3264_v30 = vpop.permute.xlu1 %3263 }
0x1c12   :  { %v3087_v45 = vpop.permute.xlu0 %3086  ;;  %v3269_v39 = vmul.f32 %v3264_v30, %v8089_v4 }
0x1c13   :  { %v3089_v47 = vmul.f32 %v3087_v45, %v8093_v25 }
0x1c14   :  { %v3273_v13 = vperm.slane %v3269_v39, 3 }
0x1c15   :  { %3091 = vrot.lane.b32.xlu0 %v3089_v47, %s6919_s2  ;;  %v3279_v3 = vrot.slane %v3089_v47, 5 }
0x1c1d   :  { %3280 = vrot.lane.b32.xlu0 %v3279_v3, %s6918_s18 }
0x1c35   :  { %v2901_v10 = vpop.permute.xlu2 %2900 }
0x1c36   :  { %v2903_v37 = vmul.f32 %v2901_v10, %v2884_v12 }
0x1c38   :  { %3095 = vrot.lane.b32.xlu1 %v2903_v37, %s6918_s18 }
0x1c3d   :  { %v3266_v61 = vpop.permute.xlu2 %3265 }
0x1c3e   :  { %v3270_v29 = vmul.f32 %v3266_v61, %v3227_v18 }
0x1c40   :  { %v3274_v2 = vperm.slane %v3270_v29, 3 }
0x1c42   :  { %v8124_v11 = vsel %vm482_vm13, %v3274_v2, %v3273_v13  ;;  %v3275_v25 = vsel %vm1244_vm3, %v3274_v2, %v3273_v13 }
0x1c43   :  { %3276 = vrot.lane.b32.xlu2 %v3275_v25, %s6919_s2 }
0x1c87   :  { %v3092_v36 = vpop.permute.xlu0 %3091 }
0x1c8f   :  { %v3281_v1 = vpop.permute.xlu0 %3280 }
0x1c9d   :  { %v3277_v46 = vpop.permute.xlu2 %3276 }
0x1c9e   :  { %v3283_v24 = vsel %vm226_vm4, %v3277_v46, %v3281_v1 }
0x1c9f   :  { %v3285_v59 = vrot.slane %v3283_v24, 3 }
0x1ca1   :  { %5954 = vmatmul.msk.f32.vlgmr.msra.gmra.mxu1 %vm491_vm14, %v3285_v59 }
0x1caa   :  { %v3096_v4 = vpop.permute.xlu1 %3095 }
0x1cab   :  { %v3098_v21 = vsel %vm226_vm4, %v3092_v36, %v3096_v4 }
0x1cac   :  { %5949 = vmatmul.msk.f32.vlgmr.msra.gmra.mxu3 %vm491_vm14, %v3098_v21 }
0x1d1e   :  { %v3305_v58 = vpop.f32.mrf.mxu1 }
0x1d1f   :  { %v3306_v27 = vadd.f32 %v8029_v55, %v3305_v58 }
0x1d21   :  { %6405 = vtanh.f32 %v3306_v27  ;;  %v5955_v34 = vmul.f32 -1.442695, %v3306_v27 }
0x1d27   :  { %v6406_v19 = vpop.eup %6405 }
0x1d28   :  { %3330 = vrot.lane.b32.xlu2 %v6406_v19, %s6918_s18 }
0x1d2f   :  { %v3119_v63 = vpop.f32.mrf.mxu3 }
0x1d30   :  { %v3120_v33 = vadd.f32 %v8137_v6, %v3119_v63 }
0x1d32   :  { %6407 = vtanh.f32 %v3120_v33  ;;  %v5950_v49 = vmul.f32 -1.442695, %v3120_v33 }
0x1d33   :  { %6409 = vpow2.f32 %v5955_v34 }
0x1d38   :  { %v6408_v57 = vpop.eup %6407 }
0x1d39   :  { %3144 = vrot.lane.b32.xlu1 %v6408_v57, %s6918_s18  ;;  %v6410_v60 = vpop.eup %6409 }
0x1d3a   :  { %v3311_v55 = vadd.f32 1.0, %v6410_v60 }
0x1d3c   :  { %6411 = vrcp.f32 %v3311_v55  ;;  %v3323_v5 = vand.u32 2147483648, %v3311_v55  ;;  %vm3317_vm6 = vweird.f32 %v3311_v55  ;;  %v3321_v8 = vand.u32 2147483647, %v3311_v55 }
0x1d3d   :  { %6413 = vpow2.f32 %v5950_v49  ;;  %v3444_v49 = vld [vmem:[%s9012_s9] sm:$0xff] }
0x1d3e   :  { %v3324_v9 = vor.u32 1.1754944e-38, %v3323_v5  ;;  %vm3322_vm7 = vcmp.eq.f32.partialorder %v3321_v8, 8.507059e+37  ;;  %v3446_v5 = vld [vmem:[%s9012_s9 + $0x10] sm:$0xff]  ;;  %v3445_v8 = vld [vmem:[%s9012_s9 + $0x8] sm:$0xff] }
0x1d42   :  { %v6412_v17 = vpop.eup %6411 }
0x1d43   :  { %v3313_v12 = vmul.f32 %v6412_v17, %v3311_v55  ;;  %vm3318_vm0 = vweird.f32 %v6412_v17  ;;  %v6414_v28 = vpop.eup %6413 }
0x1d44   :  { %vm3319_vm12 = vmor %vm3317_vm6, %vm3318_vm0  ;;  %v3125_v41 = vadd.f32 1.0, %v6414_v28  ;;  %vm3439_vm0 = vcmask 1041408  }
0x1d45   :  { %v3314_v35 = vsub.f32 1.0, %v3313_v12 }
0x1d46   :  { %6415 = vrcp.f32 %v3125_v41  ;;  %v3137_v22 = vand.u32 2147483648, %v3125_v41  ;;  %vm3131_vm10 = vweird.f32 %v3125_v41  ;;  %v3135_v23 = vand.u32 2147483647, %v3125_v41 }
0x1d47   :  { %v3315_v62 = vmul.f32 %v6412_v17, %v3314_v35 }
0x1d48   :  { %v3138_v40 = vor.u32 1.1754944e-38, %v3137_v22  ;;  %vm3136_vm11 = vcmp.eq.f32.partialorder %v3135_v23, 8.507059e+37 }
0x1d49   :  { %v3316_v14 = vadd.f32 %v6412_v17, %v3315_v62 }
0x1d4b   :  { %v3320_v18 = vsel %vm3319_vm12, %v6412_v17, %v3316_v14  ;;  %v3447_v14 = vld [vmem:[%s9012_s9 + $0x18] sm:$0xff] }
0x1d4c   :  { %v3325_v31 = vsel %vm3322_vm7, %v3324_v9, %v3320_v18  ;;  %v6416_v16 = vpop.eup %6415  ;;  %3474 = vmatpush.msra.mxu2 %v3447_v14 }
0x1d4d   :  { %v3127_v51 = vmul.f32 %v6416_v16, %v3125_v41  ;;  %vm3132_vm8 = vweird.f32 %v6416_v16  ;;  %v3328_v26 = vmul.f32 %v3325_v31, %v8103_v52  ;;  %v8180_v41 = vld [vmem:[#allocation7 + $0x18] sm:$0xff] }
0x1d4e   :  { %vm3133_vm9 = vmor %vm3131_vm10, %vm3132_vm8  ;;  %3475 = vmatpush.msra.mxu2 %v3446_v5  ;;  %vm9047_vm10 = vcmask 1045504   ;;  %3524 = vmatpush.msrb.mxu3 %v8180_v41 }
0x1d4f   :  { %v3128_v15 = vsub.f32 1.0, %v3127_v51  ;;  %v8185_v51 = vld [vmem:[#allocation7 + $0x8] sm:$0xff] }
0x1d50   :  { %3476 = vmatpush.msra.mxu2 %v3445_v8 }
0x1d51   :  { %v3129_v42 = vmul.f32 %v6416_v16, %v3128_v15 }
0x1d52   :  { %3477 = vmatpush.msra.mxu2 %v3444_v49 }
0x1d53   :  { %v3130_v48 = vadd.f32 %v6416_v16, %v3129_v42  ;;  %v8190_v42 = vld [vmem:[#allocation7] sm:$0xff] }
0x1d55   :  { %v3134_v38 = vsel %vm3133_vm9, %v6416_v16, %v3130_v48  ;;  %v8182_v16 = vld [vmem:[#allocation7 + $0x10] sm:$0xff]  ;;  %v8200_v48 = vld [vmem:[%s9013_s10] ss:$0 sm:$0xff] }
0x1d56   :  { %v3139_v50 = vsel %vm3136_vm11, %v3138_v40, %v3134_v38  ;;  %3525 = vmatpush.msrb.mxu3 %v8182_v16  ;;  %v6037_v38 = vld [vmem:[%s9017_s14] ss:$0 sm:$0xff] }
0x1d57   :  { %v3142_v3 = vmul.f32 %v3139_v50, %v8109_v56  ;;  %v8211_v40 = vadd.f32 %v6037_v38, %v7206_v53 }
0x1d58   :  { %3526 = vmatpush.msrb.mxu3 %v8185_v51 }
0x1d5a   :  { %3527 = vmatpush.msrb.mxu3 %v8190_v42 }
0x1d5c   :  { %3793 = vmatpush.msra.mxu3 %v8180_v41 }
0x1d5e   :  { %3794 = vmatpush.msra.mxu3 %v8182_v16 }
0x1d60   :  { %3795 = vmatpush.msra.mxu3 %v8185_v51 }
0x1d62   :  { %3796 = vmatpush.msra.mxu3 %v8190_v42 }
0x1d82   :  { %v3331_v0 = vpop.permute.xlu2 %3330 }
0x1d83   :  { %v3333_v20 = vmul.f32 %v3331_v0, %v3325_v31 }
0x1d85   :  { %3335 = vrot.lane.b32.xlu1 %v3333_v20, %s6919_s2 }
0x1dab   :  { %v3145_v43 = vpop.permute.xlu1 %3144 }
0x1dac   :  { %v3147_v7 = vmul.f32 %v3145_v43, %v3139_v50 }
0x1dae   :  { %3149 = vrot.lane.b32.xlu0 %v3147_v7, %s6919_s2 }
0x1df7   :  { %v3336_v44 = vpop.permute.xlu1 %3335 }
0x1df8   :  { %v8144_v45 = vadd.f32 %v3336_v44, %v3328_v26 }
0x1dfa   :  { %6417 = vtanh.f32 %v8144_v45 }
0x1e00   :  { %v6418_v47 = vpop.eup %6417 }
0x1e01   :  { %3341 = vrot.lane.b32.xlu0 %v6418_v47, %s6918_s18 }
0x1e20   :  { %v3150_v10 = vpop.permute.xlu0 %3149 }
0x1e21   :  { %v3152_v37 = vadd.f32 %v3150_v10, %v3142_v3 }
0x1e23   :  { %6419 = vtanh.f32 %v3152_v37 }
0x1e29   :  { %v6420_v30 = vpop.eup %6419 }
0x1e2a   :  { %3155 = vrot.lane.b32.xlu2 %v6420_v30, %s6918_s18 }
0x1e73   :  { %v3342_v39 = vpop.permute.xlu0 %3341 }
0x1e74   :  { %v3344_v61 = vmul.f32 %v3342_v39, %v3325_v31 }
0x1e76   :  { %v3416_v52 = vrot.slane %v3344_v61, 6  ;;  %3346 = vrot.lane.b32.xlu1 %v3344_v61, %s6919_s2 }
0x1e78   :  { %v3440_v29 = vsel %vm3439_vm0, %v8124_v11, %v3416_v52 }
0x1e84   :  { %v3156_v13 = vpop.permute.xlu2 %3155 }
0x1e85   :  { %v3158_v2 = vmul.f32 %v3156_v13, %v3139_v50  ;;  %v8214_v50 = vadd.f32 %v6037_v38, %v7208_v54 }
0x1e87   :  { %3350 = vrot.lane.b32.xlu2 %v3158_v2, %s6918_s18 }
0x1ee1   :  { %v3351_v56 = vpop.permute.xlu2 %3350 }
0x1ee8   :  { %v3347_v25 = vpop.permute.xlu1 %3346 }
0x1ee9   :  { %v3353_v36 = vsel %vm226_vm4, %v3347_v25, %v3351_v56 }
0x1eea   :  { %5956 = vmatmul.msk.f32.vlgmr.msra.gmra.mxu0 %vm491_vm14, %v3353_v36 }
0x1f67   :  { %v3374_v1 = vpop.f32.mrf.mxu0 }
0x1f68   :  { %v3375_v46 = vadd.f32 %v8137_v6, %v3374_v1 }
0x1f6a   :  { %6421 = vtanh.f32 %v3375_v46  ;;  %v5957_v11 = vmul.f32 -1.442695, %v3375_v46 }
0x1f6c   :  { %6423 = vpow2.f32 %v5957_v11 }
0x1f70   :  { %v6422_v24 = vpop.eup %6421 }
0x1f71   :  { %3399 = vrot.lane.b32.xlu0 %v6422_v24, %s6918_s18 }
0x1f72   :  { %v6424_v59 = vpop.eup %6423 }
0x1f73   :  { %v3380_v4 = vadd.f32 1.0, %v6424_v59 }
0x1f75   :  { %6425 = vrcp.f32 %v3380_v4  ;;  %v3392_v33 = vand.u32 2147483648, %v3380_v4  ;;  %vm3386_vm12 = vweird.f32 %v3380_v4  ;;  %v3390_v6 = vand.u32 2147483647, %v3380_v4 }
0x1f77   :  { %v3393_v34 = vor.u32 1.1754944e-38, %v3392_v33  ;;  %vm3391_vm8 = vcmp.eq.f32.partialorder %v3390_v6, 8.507059e+37 }
0x1f79   :  { %3427 = vrot.lane.b32.xlu0 %v8115_v32, %s6918_s18 }
0x1f7b   :  { %v6426_v21 = vpop.eup %6425 }
0x1f7c   :  { %v3382_v58 = vmul.f32 %v6426_v21, %v3380_v4  ;;  %vm3387_vm6 = vweird.f32 %v6426_v21 }
0x1f7d   :  { %vm3388_vm7 = vmor %vm3386_vm12, %vm3387_vm6 }
0x1f7e   :  { %v3383_v27 = vsub.f32 1.0, %v3382_v58 }
0x1f80   :  { %v3384_v19 = vmul.f32 %v6426_v21, %v3383_v27 }
0x1f82   :  { %v3385_v63 = vadd.f32 %v6426_v21, %v3384_v19 }
0x1f84   :  { %v3389_v57 = vsel %vm3388_vm7, %v6426_v21, %v3385_v63 }
0x1f85   :  { %v3394_v32 = vsel %vm3391_vm8, %v3393_v34, %v3389_v57 }
0x1f86   :  { %v3397_v17 = vmul.f32 %v3394_v32, %v3152_v37 }
0x1fe3   :  { %v3400_v60 = vpop.permute.xlu0 %3399 }
0x1fe4   :  { %v3402_v55 = vmul.f32 %v3400_v60, %v3394_v32 }
0x1fe6   :  { %3404 = vrot.lane.b32.xlu1 %v3402_v55, %s6919_s2 }
0x1feb   :  { %v3428_v31 = vpop.permute.xlu0 %3427 }
0x2058   :  { %v3405_v12 = vpop.permute.xlu1 %3404 }
0x2059   :  { %v8161_v35 = vadd.f32 %v3405_v12, %v3397_v17 }
0x205b   :  { %6427 = vtanh.f32 %v8161_v35 }
0x2061   :  { %v6428_v62 = vpop.eup %6427 }
0x2062   :  { %3410 = vrot.lane.b32.xlu2 %v6428_v62, %s6918_s18 }
0x20bc   :  { %v3411_v18 = vpop.permute.xlu2 %3410 }
0x20bd   :  { %v3413_v9 = vmul.f32 %v3411_v18, %v3394_v32  ;;  %v3435_v18 = vrot.slane %v8161_v35, 6  ;;  %v8242_v35 = vld [vmem:[#allocation8 + $0x38] sm:$0xff] }
0x20be   :  { %3642 = vmatpush.msrb.mxu2 %v8242_v35  ;;  %3911 = vmatpush.msrb.mxu0 %v8242_v35 }
0x20bf   :  { %v3419_v0 = vrot.slane %v3413_v9, 4 }
0x20c1   :  { %v3441_v20 = vsel %vm285_vm1, %v3440_v29, %v3419_v0 }
0x20c2   :  { %v3442_v28 = vsel %vm9047_vm10, %v3441_v20, %v3428_v31 }
0x20c3   :  { %3454 = vrot.lane.b32.xlu1 %v3442_v28, %s6919_s2 }
0x2135   :  { %v3455_v15 = vpop.permute.xlu1 %3454 }
0x2136   :  { %5958 = vmatmul.msk.f32.vlgmr.msra.gmra.mxu2 %vm226_vm4, %v3455_v15 }
0x21b9   :  { %v3479_v22 = vpop.f32.mrf.mxu2 }
0x21ba   :  { %v8203_v23 = vadd.f32 %v8200_v48, %v3479_v22 }
0x21bc   :  { %5961 = vmatmul.msk.f32.vlgmr.msrb.gmra.mxu3 %vm226_vm4, %v8203_v23  ;;  %v3578_v32 = vrot.slane %v8203_v23, 6  ;;  %v3579_v12 = vrot.slane %v8203_v23, 7  ;;  %v3623_v9 = vrot.slane %v8203_v23, 2 }
0x223f   :  { %v3529_v43 = vpop.f32.mrf.mxu3 }
0x2240   :  { %v3533_v7 = vrot.slane %v3529_v43, 1  ;;  %v3536_v26 = vadd.f32 %v3529_v43, %v8211_v40 }
0x2242   :  { %v3537_v44 = vadd.f32 %v3533_v7, %v8214_v50  ;;  %6429 = vtanh.f32 %v3536_v26  ;;  %v5962_v54 = vmul.f32 -1.442695, %v3536_v26  ;;  %v8244_v26 = vld [vmem:[#allocation8 + $0x30] sm:$0xff] }
0x2243   :  { %3643 = vmatpush.msrb.mxu2 %v8244_v26  ;;  %3912 = vmatpush.msrb.mxu0 %v8244_v26 }
0x2244   :  { %6431 = vtanh.f32 %v3537_v44  ;;  %v5963_v10 = vmul.f32 -1.442695, %v3537_v44  ;;  %v8248_v44 = vld [vmem:[#allocation8 + $0x28] sm:$0xff] }
0x2245   :  { %3644 = vmatpush.msrb.mxu2 %v8248_v44  ;;  %3913 = vmatpush.msrb.mxu0 %v8248_v44 }
0x2246   :  { %6433 = vpow2.f32 %v5963_v10  ;;  %v8260_v10 = vld [vmem:[#allocation8 + $0x10] sm:$0xff] }
0x2248   :  { %v6430_v47 = vpop.eup %6429 }
0x2249   :  { %3586 = vrot.lane.b32.xlu0 %v6430_v47, %s6918_s18  ;;  %v8252_v47 = vld [vmem:[#allocation8 + $0x20] sm:$0xff] }
0x224a   :  { %v6432_v3 = vpop.eup %6431  ;;  %3645 = vmatpush.msrb.mxu2 %v8252_v47  ;;  %3914 = vmatpush.msrb.mxu0 %v8252_v47 }
0x224b   :  { %3588 = vrot.lane.b32.xlu2 %v6432_v3, %s6918_s18  ;;  %v8256_v3 = vld [vmem:[#allocation8 + $0x18] sm:$0xff] }
0x224c   :  { %v6434_v53 = vpop.eup %6433  ;;  %3646 = vmatpush.msrb.mxu2 %v8256_v3  ;;  %3915 = vmatpush.msrb.mxu0 %v8256_v3 }
0x224d   :  { %v3545_v37 = vadd.f32 1.0, %v6434_v53  ;;  %v8264_v53 = vld [vmem:[#allocation8 + $0x8] sm:$0xff] }
0x224e   :  { %3647 = vmatpush.msrb.mxu2 %v8260_v10  ;;  %3916 = vmatpush.msrb.mxu0 %v8260_v10 }
0x224f   :  { %6435 = vrcp.f32 %v3545_v37  ;;  %v3572_v56 = vand.u32 2147483648, %v3545_v37  ;;  %vm3566_vm9 = vweird.f32 %v3545_v37  ;;  %v3570_v25 = vand.u32 2147483647, %v3545_v37 }
0x2250   :  { %6437 = vpow2.f32 %v5962_v54  ;;  %3648 = vmatpush.msrb.mxu2 %v8264_v53  ;;  %3917 = vmatpush.msrb.mxu0 %v8264_v53 }
0x2251   :  { %v3573_v1 = vor.u32 1.1754944e-38, %v3572_v56  ;;  %vm3571_vm6 = vcmp.eq.f32.partialorder %v3570_v25, 8.507059e+37 }
0x2255   :  { %v6436_v30 = vpop.eup %6435 }
0x2256   :  { %v3562_v39 = vmul.f32 %v6436_v30, %v3545_v37  ;;  %v6438_v52 = vpop.eup %6437  ;;  %vm3567_vm1 = vweird.f32 %v6436_v30  ;;  %v8270_v37 = vld [vmem:[#allocation8] sm:$0xff] }
0x2257   :  { %v3544_v29 = vadd.f32 1.0, %v6438_v52  ;;  %vm3568_vm11 = vmor %vm3566_vm9, %vm3567_vm1  ;;  %3649 = vmatpush.msrb.mxu2 %v8270_v37  ;;  %3918 = vmatpush.msrb.mxu0 %v8270_v37 }
0x2258   :  { %v3563_v61 = vsub.f32 1.0, %v3562_v39 }
0x2259   :  { %6439 = vrcp.f32 %v3544_v29  ;;  %v3557_v19 = vand.u32 2147483648, %v3544_v29  ;;  %vm3551_vm7 = vweird.f32 %v3544_v29  ;;  %v3555_v63 = vand.u32 2147483647, %v3544_v29  ;;  %4058 = vmatpush.msra.mxu2 %v8180_v41 }
0x225a   :  { %v3564_v13 = vmul.f32 %v6436_v30, %v3563_v61 }
0x225b   :  { %v3558_v6 = vor.u32 1.1754944e-38, %v3557_v19  ;;  %vm3556_vm10 = vcmp.eq.f32.partialorder %v3555_v63, 8.507059e+37  ;;  %4059 = vmatpush.msra.mxu2 %v8182_v16 }
0x225c   :  { %v3565_v2 = vadd.f32 %v6436_v30, %v3564_v13 }
0x225d   :  { %4060 = vmatpush.msra.mxu2 %v8185_v51 }
0x225e   :  { %v3569_v36 = vsel %vm3568_vm11, %v6436_v30, %v3565_v2 }
0x225f   :  { %v6440_v46 = vpop.eup %6439  ;;  %v3574_v11 = vsel %vm3571_vm6, %v3573_v1, %v3569_v36  ;;  %4061 = vmatpush.msra.mxu2 %v8190_v42 }
0x2260   :  { %v3547_v4 = vmul.f32 %v6440_v46, %v3544_v29  ;;  %vm3552_vm12 = vweird.f32 %v6440_v46  ;;  %v3583_v14 = vmul.f32 %v3579_v12, %v3574_v11  ;;  %v8291_v29 = vld [vmem:[%s9020_s17] ss:$0 sm:$0xff] }
0x2261   :  { %vm3553_vm8 = vmor %vm3551_vm7, %vm3552_vm12 }
0x2262   :  { %v3548_v21 = vsub.f32 1.0, %v3547_v4 }
0x2264   :  { %v3549_v58 = vmul.f32 %v6440_v46, %v3548_v21 }
0x2266   :  { %v3550_v27 = vadd.f32 %v6440_v46, %v3549_v58 }
0x2268   :  { %v3554_v33 = vsel %vm3553_vm8, %v6440_v46, %v3550_v27 }
0x2269   :  { %v3559_v34 = vsel %vm3556_vm10, %v3558_v6, %v3554_v33 }
0x226a   :  { %v3582_v55 = vmul.f32 %v3578_v32, %v3559_v34 }
0x22a5   :  { %v3589_v24 = vpop.permute.xlu2 %3588 }
0x22a6   :  { %v3593_v59 = vmul.f32 %v3589_v24, %v3574_v11 }
0x22a8   :  { %3598 = vrot.lane.b32.xlu1 %v3593_v59, %s6919_s2 }
0x22bb   :  { %v3587_v57 = vpop.permute.xlu0 %3586 }
0x22bc   :  { %v3592_v60 = vmul.f32 %v3587_v57, %v3559_v34 }
0x22be   :  { %3596 = vrot.lane.b32.xlu2 %v3592_v60, %s6919_s2 }
0x22c6   :  { %3431 = vrot.lane.b32.xlu2 %v8144_v45, %s6918_s18 }
0x2318   :  { %v3597_v17 = vpop.permute.xlu2 %3596 }
0x2319   :  { %v8226_v62 = vadd.f32 %v3597_v17, %v3582_v55 }
0x231a   :  { %v3599_v5 = vpop.permute.xlu1 %3598 }
0x231b   :  { %6441 = vtanh.f32 %v8226_v62  ;;  %v8229_v8 = vadd.f32 %v3599_v5, %v3583_v14 }
0x231d   :  { %6443 = vtanh.f32 %v8229_v8 }
0x2320   :  { %v3432_v38 = vpop.permute.xlu2 %3431 }
0x2321   :  { %v6442_v49 = vpop.eup %6441 }
0x2322   :  { %3608 = vrot.lane.b32.xlu1 %v6442_v49, %s6918_s18 }
0x2323   :  { %v6444_v45 = vpop.eup %6443 }
0x2324   :  { %3610 = vrot.lane.b32.xlu0 %v6444_v45, %s6918_s18 }
0x232c   :  { %3436 = vrot.lane.b32.xlu0 %v3435_v18, %s6918_s18 }
0x2334   :  { %3624 = vrot.lane.b32.xlu0 %v3623_v9, %s6919_s2 }
0x2394   :  { %v3609_v0 = vpop.permute.xlu1 %3608 }
0x2395   :  { %v3614_v28 = vmul.f32 %v3609_v0, %v3559_v34 }
0x2396   :  { %v3611_v31 = vpop.permute.xlu0 %3610 }
0x2397   :  { %v3615_v20 = vmul.f32 %v3611_v31, %v3574_v11 }
0x2399   :  { %v3618_v15 = vrot.slane %v3615_v20, 7 }
0x239b   :  { %v3619_v22 = vsel %vm482_vm13, %v3618_v15, %v3614_v28 }
0x239c   :  { %3620 = vrot.lane.b32.xlu1 %v3619_v22, %s6919_s2 }
0x239e   :  { %v3437_v43 = vpop.permute.xlu0 %3436 }
0x239f   :  { %v3443_v7 = vsel %vm3439_vm0, %v3432_v38, %v3437_v43 }
0x23a0   :  { %3456 = vrot.lane.b32.xlu2 %v3443_v7, %s6919_s2 }
0x23a6   :  { %v3625_v30 = vpop.permute.xlu0 %3624 }
0x23fa   :  { %v3457_v54 = vpop.permute.xlu2 %3456 }
0x23fb   :  { %5959 = vmatmul.msk.f32.gmra.mxu2 %vm226_vm4, %v3457_v54 }
0x240e   :  { %v3621_v39 = vpop.permute.xlu1 %3620 }
0x240f   :  { %v3627_v61 = vsel %vm226_vm4, %v3621_v39, %v3625_v30  ;;  %5968 = vmatmul.msk.f32.vlgmr.msra.gmra.mxu3 %vm226_vm4, %v3621_v39 }
0x2410   :  { %5964 = vmatmul.msk.f32.vlgmr.msrb.gmra.mxu2 %vm491_vm14, %v3627_v61 }
0x2411   :  { %4325 = vmatpush.msrb.mxu2 %v8180_v41 }
0x2413   :  { %4326 = vmatpush.msrb.mxu2 %v8182_v16 }
0x2415   :  { %4327 = vmatpush.msrb.mxu2 %v8185_v51 }
0x2417   :  { %4328 = vmatpush.msrb.mxu2 %v8190_v42 }
0x247e   :  { %v8286_v52 = vpop.f32.mrf.mxu2 }
0x2492   :  { %v3798_v13 = vpop.f32.mrf.mxu3 }
0x2493   :  { %v3802_v2 = vrot.slane %v3798_v13, 7  ;;  %v3806_v56 = vadd.f32 %v3798_v13, %v8214_v50  ;;  %v3651_v25 = vpop.f32.mrf.mxu2 }
0x2494   :  { %v3652_v36 = vadd.f32 %v8291_v29, %v3651_v25 }
0x2495   :  { %v3805_v1 = vadd.f32 %v3802_v2, %v8211_v40  ;;  %6445 = vtanh.f32 %v3806_v56  ;;  %v5970_v59 = vmul.f32 -1.442695, %v3806_v56 }
0x2496   :  { %6447 = vtanh.f32 %v3652_v36  ;;  %v5965_v27 = vmul.f32 -1.442695, %v3652_v36 }
0x2497   :  { %6449 = vtanh.f32 %v3805_v1  ;;  %v5969_v63 = vmul.f32 -1.442695, %v3805_v1 }
0x2498   :  { %6451 = vpow2.f32 %v5970_v59 }
0x249b   :  { %v6446_v46 = vpop.eup %6445 }
0x249c   :  { %v6448_v24 = vpop.eup %6447  ;;  %3859 = vrot.lane.b32.xlu2 %v6446_v46, %s6918_s18 }
0x249d   :  { %3676 = vrot.lane.b32.xlu0 %v6448_v24, %s6918_s18  ;;  %v6450_v11 = vpop.eup %6449 }
0x249e   :  { %3857 = vrot.lane.b32.xlu1 %v6450_v11, %s6918_s18  ;;  %v6452_v4 = vpop.eup %6451 }
0x249f   :  { %v3814_v21 = vadd.f32 1.0, %v6452_v4  ;;  %v3850_v4 = vrot.slane %v8229_v8, 7 }
0x24a1   :  { %6453 = vrcp.f32 %v3814_v21  ;;  %v3841_v55 = vand.u32 2147483648, %v3814_v21  ;;  %vm3835_vm1 = vweird.f32 %v3814_v21  ;;  %v3839_v12 = vand.u32 2147483647, %v3814_v21 }
0x24a2   :  { %6455 = vpow2.f32 %v5965_v27 }
0x24a3   :  { %6457 = vpow2.f32 %v5969_v63  ;;  %v3842_v5 = vor.u32 1.1754944e-38, %v3841_v55  ;;  %vm3840_vm11 = vcmp.eq.f32.partialorder %v3839_v12, 8.507059e+37  ;;  %v8309_v63 = vadd.f32 %v8200_v48, %v8286_v52 }
0x24a7   :  { %v6454_v58 = vpop.eup %6453 }
0x24a8   :  { %v3831_v19 = vmul.f32 %v6454_v58, %v3814_v21  ;;  %v6456_v57 = vpop.eup %6455  ;;  %vm3836_vm0 = vweird.f32 %v6454_v58 }
0x24a9   :  { %v6458_v34 = vpop.eup %6457  ;;  %v3657_v60 = vadd.f32 1.0, %v6456_v57  ;;  %vm3837_vm9 = vmor %vm3835_vm1, %vm3836_vm0 }
0x24aa   :  { %v3832_v33 = vsub.f32 1.0, %v3831_v19  ;;  %v3813_v17 = vadd.f32 1.0, %v6458_v34 }
0x24ab   :  { %6459 = vrcp.f32 %v3657_v60  ;;  %v3669_v7 = vand.u32 2147483648, %v3657_v60  ;;  %vm3663_vm12 = vweird.f32 %v3657_v60  ;;  %v3667_v54 = vand.u32 2147483647, %v3657_v60 }
0x24ac   :  { %v3833_v6 = vmul.f32 %v6454_v58, %v3832_v33  ;;  %6461 = vrcp.f32 %v3813_v17  ;;  %v3826_v39 = vand.u32 2147483648, %v3813_v17  ;;  %vm3820_vm10 = vweird.f32 %v3813_v17 }
0x24ad   :  { %v3824_v13 = vand.u32 2147483647, %v3813_v17  ;;  %v3670_v2 = vor.u32 1.1754944e-38, %v3669_v7  ;;  %vm3668_vm1 = vcmp.eq.f32.partialorder %v3667_v54, 8.507059e+37  ;;  %v3849_v33 = vrot.slane %v8226_v62, 7  ;;  %v8363_v7 = vld [vmem:[#allocation8 + $0x40] sm:$0xff] }
0x24ae   :  { %v3834_v32 = vadd.f32 %v6454_v58, %v3833_v6  ;;  %v3827_v1 = vor.u32 1.1754944e-38, %v3826_v39 }
0x24b0   :  { %v3838_v14 = vsel %vm3837_vm9, %v6454_v58, %v3834_v32  ;;  %vm3825_vm9 = vcmp.eq.f32.partialorder %v3824_v13, 8.507059e+37 }
0x24b1   :  { %v3843_v49 = vsel %vm3840_vm11, %v3842_v5, %v3838_v14  ;;  %v6460_v9 = vpop.eup %6459 }
0x24b2   :  { %v6462_v0 = vpop.eup %6461  ;;  %v3659_v31 = vmul.f32 %v6460_v9, %v3657_v60  ;;  %vm3664_vm6 = vweird.f32 %v6460_v9  ;;  %v3854_v21 = vmul.f32 %v3850_v4, %v3843_v49 }
0x24b3   :  { %v3816_v20 = vmul.f32 %v6462_v0, %v3813_v17  ;;  %vm3821_vm7 = vweird.f32 %v6462_v0  ;;  %vm3665_vm8 = vmor %vm3663_vm12, %vm3664_vm6 }
0x24b4   :  { %v3660_v28 = vsub.f32 1.0, %v3659_v31  ;;  %vm3822_vm0 = vmor %vm3820_vm10, %vm3821_vm7 }
0x24b5   :  { %v3817_v15 = vsub.f32 1.0, %v3816_v20  ;;  %v3695_v20 = vrot.slane %v8203_v23, 4  ;;  %v8339_v23 = vld [vmem:[#allocation8 + $0x68] sm:$0xff] }
0x24b6   :  { %v3661_v22 = vmul.f32 %v6460_v9, %v3660_v28  ;;  %v8331_v28 = vld [vmem:[#allocation8 + $0x70] sm:$0xff] }
0x24b7   :  { %v3818_v38 = vmul.f32 %v6462_v0, %v3817_v15  ;;  %v8342_v15 = vld [vmem:[#allocation8 + $0x60] sm:$0xff] }
0x24b8   :  { %v3662_v43 = vadd.f32 %v6460_v9, %v3661_v22  ;;  %v8345_v22 = vld [vmem:[#allocation8 + $0x58] sm:$0xff] }
0x24b9   :  { %v3819_v30 = vadd.f32 %v6462_v0, %v3818_v38  ;;  %v8350_v38 = vld [vmem:[#allocation8 + $0x50] sm:$0xff] }
0x24ba   :  { %v3666_v61 = vsel %vm3665_vm8, %v6460_v9, %v3662_v43  ;;  %v8355_v43 = vld [vmem:[#allocation8 + $0x48] sm:$0xff] }
0x24bb   :  { %v3823_v56 = vsel %vm3822_vm0, %v6462_v0, %v3819_v30  ;;  %v3671_v36 = vsel %vm3668_vm1, %v3670_v2, %v3666_v61 }
0x24bc   :  { %v3828_v11 = vsel %vm3825_vm9, %v3827_v1, %v3823_v56  ;;  %v3674_v6 = vmul.f32 %v3671_v36, %v8309_v63 }
0x24bd   :  { %v3853_v8 = vmul.f32 %v3849_v33, %v3828_v11 }
0x24f6   :  { %v3860_v45 = vpop.permute.xlu2 %3859 }
0x24f7   :  { %v3864_v18 = vmul.f32 %v3860_v45, %v3843_v49 }
0x24f9   :  { %3869 = vrot.lane.b32.xlu2 %v3864_v18, %s6919_s2 }
0x250f   :  { %v3677_v25 = vpop.permute.xlu0 %3676 }
0x2510   :  { %v3679_v46 = vmul.f32 %v3677_v25, %v3671_v36  ;;  %v3858_v24 = vpop.permute.xlu1 %3857 }
0x2511   :  { %v3863_v59 = vmul.f32 %v3858_v24, %v3828_v11 }
0x2512   :  { %3681 = vrot.lane.b32.xlu0 %v3679_v46, %s6919_s2 }
0x2513   :  { %3867 = vrot.lane.b32.xlu1 %v3863_v59, %s6919_s2 }
0x2553   :  { %v3870_v58 = vpop.permute.xlu2 %3869 }
0x2554   :  { %v8303_v27 = vadd.f32 %v3870_v58, %v3854_v21 }
0x2556   :  { %6463 = vtanh.f32 %v8303_v27 }
0x255c   :  { %v6464_v19 = vpop.eup %6463 }
0x255d   :  { %3881 = vrot.lane.b32.xlu2 %v6464_v19, %s6918_s18 }
0x2584   :  { %v3682_v57 = vpop.permute.xlu0 %3681 }
0x2585   :  { %v8313_v34 = vadd.f32 %v3682_v57, %v3674_v6  ;;  %v3868_v60 = vpop.permute.xlu1 %3867 }
0x2586   :  { %v8316_v32 = vadd.f32 %v3868_v60, %v3853_v8 }
0x2587   :  { %6465 = vtanh.f32 %v8313_v34 }
0x2588   :  { %6467 = vtanh.f32 %v8316_v32 }
0x258d   :  { %v6466_v55 = vpop.eup %6465 }
0x258e   :  { %3687 = vrot.lane.b32.xlu0 %v6466_v55, %s6918_s18  ;;  %v6468_v48 = vpop.eup %6467 }
0x258f   :  { %3879 = vrot.lane.b32.xlu1 %v6468_v48, %s6918_s18 }
0x25b7   :  { %v3882_v62 = vpop.permute.xlu2 %3881 }
0x25b8   :  { %v3886_v52 = vmul.f32 %v3882_v62, %v3843_v49  ;;  %v8329_v49 = vld [vmem:[#allocation8 + $0x78] sm:$0xff] }
0x25b9   :  { %3714 = vmatpush.msrb.mxu1 %v8329_v49  ;;  %3979 = vmatpush.msrb.mxu3 %v8329_v49 }
0x25ba   :  { %v3889_v5 = vrot.slane %v3886_v52, 7  ;;  %4245 = vmatpush.msra.mxu0 %v8329_v49 }
0x25bb   :  { %3715 = vmatpush.msrb.mxu1 %v8331_v28  ;;  %3980 = vmatpush.msrb.mxu3 %v8331_v28 }
0x25bc   :  { %4246 = vmatpush.msra.mxu0 %v8331_v28 }
0x25bd   :  { %3716 = vmatpush.msrb.mxu1 %v8339_v23  ;;  %3981 = vmatpush.msrb.mxu3 %v8339_v23 }
0x25be   :  { %4247 = vmatpush.msra.mxu0 %v8339_v23 }
0x25bf   :  { %3717 = vmatpush.msrb.mxu1 %v8342_v15  ;;  %3982 = vmatpush.msrb.mxu3 %v8342_v15 }
0x25c0   :  { %4248 = vmatpush.msra.mxu0 %v8342_v15 }
0x25c1   :  { %3718 = vmatpush.msrb.mxu1 %v8345_v22  ;;  %3983 = vmatpush.msrb.mxu3 %v8345_v22 }
0x25c2   :  { %4249 = vmatpush.msra.mxu0 %v8345_v22 }
0x25c3   :  { %3719 = vmatpush.msrb.mxu1 %v8350_v38  ;;  %3984 = vmatpush.msrb.mxu3 %v8350_v38 }
0x25c4   :  { %4250 = vmatpush.msra.mxu0 %v8350_v38 }
0x25c5   :  { %3720 = vmatpush.msrb.mxu1 %v8355_v43  ;;  %3985 = vmatpush.msrb.mxu3 %v8355_v43 }
0x25c6   :  { %4251 = vmatpush.msra.mxu0 %v8355_v43 }
0x25c7   :  { %3721 = vmatpush.msrb.mxu1 %v8363_v7  ;;  %3986 = vmatpush.msrb.mxu3 %v8363_v7 }
0x25c8   :  { %4252 = vmatpush.msra.mxu0 %v8363_v7 }
0x25c9   :  { %4177 = vmatpush.msra.mxu1 %v8242_v35  ;;  %4444 = vmatpush.msra.mxu3 %v8242_v35 }
0x25cb   :  { %4178 = vmatpush.msra.mxu1 %v8244_v26  ;;  %4445 = vmatpush.msra.mxu3 %v8244_v26 }
0x25cd   :  { %4179 = vmatpush.msra.mxu1 %v8248_v44  ;;  %4446 = vmatpush.msra.mxu3 %v8248_v44 }
0x25cf   :  { %4180 = vmatpush.msra.mxu1 %v8252_v47  ;;  %4447 = vmatpush.msra.mxu3 %v8252_v47 }
0x25d1   :  { %4181 = vmatpush.msra.mxu1 %v8256_v3  ;;  %4448 = vmatpush.msra.mxu3 %v8256_v3 }
0x25d3   :  { %4182 = vmatpush.msra.mxu1 %v8260_v10  ;;  %4449 = vmatpush.msra.mxu3 %v8260_v10 }
0x25d5   :  { %4183 = vmatpush.msra.mxu1 %v8264_v53  ;;  %4450 = vmatpush.msra.mxu3 %v8264_v53 }
0x25d7   :  { %4184 = vmatpush.msra.mxu1 %v8270_v37  ;;  %4451 = vmatpush.msra.mxu3 %v8270_v37 }
0x2600   :  { %v3688_v17 = vpop.permute.xlu0 %3687 }
0x2601   :  { %v3690_v12 = vmul.f32 %v3688_v17, %v3671_v36  ;;  %v3880_v14 = vpop.permute.xlu1 %3879 }
0x2602   :  { %v3885_v18 = vmul.f32 %v3880_v14, %v3828_v11 }
0x2603   :  { %v3894_v45 = vrot.slane %v3690_v12, 7 }
0x2604   :  { %v4040_v9 = vrot.slane %v3885_v18, 1  ;;  %v3890_v0 = vsel %vm732_vm5, %v3889_v5, %v3885_v18 }
0x2605   :  { %3895 = vrot.lane.b32.xlu0 %v3894_v45, %s6918_s18  ;;  %3891 = vrot.lane.b32.xlu2 %v3890_v0, %s6919_s2 }
0x2606   :  { %v4041_v31 = vsel %vm482_vm13, %v3886_v52, %v4040_v9 }
0x2607   :  { %4042 = vrot.lane.b32.xlu1 %v4041_v31, %s6919_s2 }
0x260d   :  { %3696 = vrot.lane.b32.xlu2 %v3695_v20, %s6919_s2 }
0x260f   :  { %3692 = vrot.lane.b32.xlu1 %v3690_v12, %s6919_s2 }
0x265f   :  { %v3892_v54 = vpop.permute.xlu2 %3891 }
0x2667   :  { %v3697_v2 = vpop.permute.xlu2 %3696 }
0x2677   :  { %v3896_v30 = vpop.permute.xlu0 %3895 }
0x2678   :  { %v3898_v39 = vsel %vm226_vm4, %v3892_v54, %v3896_v30 }
0x2679   :  { %v3900_v61 = vrot.slane %v3898_v39, 1  ;;  %v4043_v13 = vpop.permute.xlu1 %4042 }
0x267a   :  { %5975 = vmatmul.msk.f32.vlgmr.msra.gmra.mxu2 %vm226_vm4, %v4043_v13 }
0x267b   :  { %5971 = vmatmul.msk.f32.vlgmr.msrb.gmra.mxu0 %vm491_vm14, %v3900_v61  ;;  %4512 = vmatpush.msra.mxu2 %v8329_v49 }
0x267c   :  { %4712 = vmatpush.msrb.mxu0 %v8242_v35 }
0x267d   :  { %4513 = vmatpush.msra.mxu2 %v8331_v28 }
0x267e   :  { %4713 = vmatpush.msrb.mxu0 %v8244_v26 }
0x267f   :  { %4514 = vmatpush.msra.mxu2 %v8339_v23 }
0x2680   :  { %4714 = vmatpush.msrb.mxu0 %v8248_v44 }
0x2681   :  { %v3693_v56 = vpop.permute.xlu1 %3692  ;;  %4515 = vmatpush.msra.mxu2 %v8342_v15 }
0x2682   :  { %4715 = vmatpush.msrb.mxu0 %v8252_v47  ;;  %v3699_v25 = vsel %vm226_vm4, %v3693_v56, %v3697_v2 }
0x2683   :  { %5966 = vmatmul.msk.f32.vlgmr.msrb.gmra.mxu1 %vm491_vm14, %v3699_v25  ;;  %4516 = vmatpush.msra.mxu2 %v8345_v22 }
0x2684   :  { %4716 = vmatpush.msrb.mxu0 %v8256_v3  ;;  %4592 = vmatpush.msrb.mxu1 %v8180_v41 }
0x2685   :  { %4517 = vmatpush.msra.mxu2 %v8350_v38 }
0x2686   :  { %4717 = vmatpush.msrb.mxu0 %v8260_v10  ;;  %4593 = vmatpush.msrb.mxu1 %v8182_v16 }
0x2687   :  { %4518 = vmatpush.msra.mxu2 %v8355_v43 }
0x2688   :  { %4718 = vmatpush.msrb.mxu0 %v8264_v53  ;;  %4594 = vmatpush.msrb.mxu1 %v8185_v51 }
0x2689   :  { %4519 = vmatpush.msra.mxu2 %v8363_v7 }
0x268a   :  { %4719 = vmatpush.msrb.mxu0 %v8270_v37  ;;  %4595 = vmatpush.msrb.mxu1 %v8190_v42  ;;  %v8417_v42 = vld [vmem:[%s9020_s17 + $0x1] ss:$0 sm:$0xff] }
0x26f8   :  { %v3920_v41 = vpop.f32.mrf.mxu0 }
0x26f9   :  { %v3921_v36 = vadd.f32 %v8291_v29, %v3920_v41 }
0x26fb   :  { %6469 = vtanh.f32 %v3921_v36  ;;  %v5972_v33 = vmul.f32 -1.442695, %v3921_v36 }
0x26fd   :  { %v4063_v1 = vpop.f32.mrf.mxu2 }
0x26fe   :  { %v4067_v16 = vrot.slane %v4063_v1, 6  ;;  %v4068_v46 = vrot.slane %v4063_v1, 7 }
0x2700   :  { %v4071_v11 = vadd.f32 %v4067_v16, %v8211_v40  ;;  %v4072_v51 = vadd.f32 %v4068_v46, %v8214_v50  ;;  %v3723_v59 = vpop.f32.mrf.mxu1 }
0x2701   :  { %v6470_v24 = vpop.eup %6469  ;;  %v3724_v4 = vadd.f32 %v8417_v42, %v3723_v59 }
0x2702   :  { %3945 = vrot.lane.b32.xlu2 %v6470_v24, %s6918_s18  ;;  %6471 = vtanh.f32 %v4071_v11  ;;  %v5976_v48 = vmul.f32 -1.442695, %v4071_v11  ;;  %v5977_v62 = vmul.f32 -1.442695, %v4072_v51 }
0x2703   :  { %6473 = vtanh.f32 %v4072_v51  ;;  %v5967_v14 = vmul.f32 -1.442695, %v3724_v4 }
0x2704   :  { %6475 = vtanh.f32 %v3724_v4 }
0x2705   :  { %6477 = vpow2.f32 %v5972_v33 }
0x2708   :  { %v6472_v21 = vpop.eup %6471 }
0x2709   :  { %v6474_v58 = vpop.eup %6473  ;;  %4123 = vrot.lane.b32.xlu0 %v6472_v21, %s6918_s18 }
0x270a   :  { %4125 = vrot.lane.b32.xlu1 %v6474_v58, %s6918_s18  ;;  %v6476_v19 = vpop.eup %6475 }
0x270b   :  { %v6478_v6 = vpop.eup %6477 }
0x270c   :  { %v3926_v57 = vadd.f32 1.0, %v6478_v6 }
0x270e   :  { %6479 = vrcp.f32 %v3926_v57  ;;  %v3938_v12 = vand.u32 2147483648, %v3926_v57  ;;  %vm3932_vm11 = vweird.f32 %v3926_v57  ;;  %v3936_v5 = vand.u32 2147483647, %v3926_v57 }
0x270f   :  { %6481 = vpow2.f32 %v5976_v48 }
0x2710   :  { %6483 = vpow2.f32 %v5977_v62  ;;  %v3939_v0 = vor.u32 1.1754944e-38, %v3938_v12  ;;  %vm3937_vm12 = vcmp.eq.f32.partialorder %v3936_v5, 8.507059e+37 }
0x2711   :  { %3751 = vrot.lane.b32.xlu0 %v6476_v19, %s6918_s18  ;;  %6485 = vpow2.f32 %v5967_v14 }
0x2714   :  { %v6480_v8 = vpop.eup %6479 }
0x2715   :  { %v3928_v60 = vmul.f32 %v6480_v8, %v3926_v57  ;;  %vm3933_vm5 = vweird.f32 %v6480_v8  ;;  %v6482_v45 = vpop.eup %6481 }
0x2716   :  { %vm3934_vm6 = vmor %vm3932_vm11, %vm3933_vm5  ;;  %v6484_v9 = vpop.eup %6483  ;;  %v4079_v31 = vadd.f32 1.0, %v6482_v45 }
0x2717   :  { %v3929_v55 = vsub.f32 1.0, %v3928_v60  ;;  %v4080_v30 = vadd.f32 1.0, %v6484_v9  ;;  %v6486_v61 = vpop.eup %6485 }
0x2718   :  { %6487 = vrcp.f32 %v4079_v31  ;;  %v3729_v13 = vadd.f32 1.0, %v6486_v61  ;;  %v4092_v21 = vand.u32 2147483648, %v4079_v31  ;;  %vm4086_vm10 = vweird.f32 %v4079_v31 }
0x2719   :  { %v3930_v52 = vmul.f32 %v6480_v8, %v3929_v55  ;;  %6489 = vrcp.f32 %v4080_v30  ;;  %v4107_v58 = vand.u32 2147483648, %v4080_v30  ;;  %v4090_v19 = vand.u32 2147483647, %v4079_v31 }
0x271a   :  { %6491 = vrcp.f32 %v3729_v13  ;;  %vm4101_vm0 = vweird.f32 %v4080_v30  ;;  %v4105_v33 = vand.u32 2147483647, %v4080_v30  ;;  %v4093_v60 = vor.u32 1.1754944e-38, %v4092_v21 }
0x271b   :  { %v3931_v17 = vadd.f32 %v6480_v8, %v3930_v52  ;;  %v4108_v55 = vor.u32 1.1754944e-38, %v4107_v58  ;;  %vm4091_vm5 = vcmp.eq.f32.partialorder %v4090_v19, 8.507059e+37  ;;  %v3741_v45 = vand.u32 2147483648, %v3729_v13 }
0x271c   :  { %vm4106_vm11 = vcmp.eq.f32.partialorder %v4105_v33, 8.507059e+37 }
0x271d   :  { %v3935_v18 = vsel %vm3934_vm6, %v6480_v8, %v3931_v17 }
0x271e   :  { %v8423_v54 = vsel %vm3937_vm12, %v3939_v0, %v3935_v18  ;;  %v6488_v2 = vpop.eup %6487  ;;  %vm3735_vm12 = vweird.f32 %v3729_v13  ;;  %v3739_v18 = vand.u32 2147483647, %v3729_v13  ;;  %v3742_v0 = vor.u32 1.1754944e-38, %v3741_v45 }
0x271f   :  { %v6490_v56 = vpop.eup %6489  ;;  %v4082_v25 = vmul.f32 %v6488_v2, %v4079_v31  ;;  %vm4087_vm7 = vweird.f32 %v6488_v2 }
0x2720   :  { %v4097_v41 = vmul.f32 %v6490_v56, %v4080_v30  ;;  %v6492_v1 = vpop.eup %6491  ;;  %vm4102_vm8 = vweird.f32 %v6490_v56  ;;  %vm4088_vm1 = vmor %vm4086_vm10, %vm4087_vm7 }
0x2721   :  { %v4083_v36 = vsub.f32 1.0, %v4082_v25  ;;  %v3731_v24 = vmul.f32 %v6492_v1, %v3729_v13  ;;  %vm4103_vm9 = vmor %vm4101_vm0, %vm4102_vm8  ;;  %vm3736_vm6 = vweird.f32 %v6492_v1  ;;  %vm3740_vm8 = vcmp.eq.f32.partialorder %v3739_v18, 8.507059e+37 }
0x2722   :  { %v4098_v16 = vsub.f32 1.0, %v4097_v41  ;;  %vm3737_vm7 = vmor %vm3735_vm12, %vm3736_vm6  ;;  %v4116_v13 = vrot.slane %v8303_v27, 7  ;;  %v3747_v27 = vrot.slane %v8309_v63, 2 }
0x2723   :  { %v4084_v46 = vmul.f32 %v6488_v2, %v4083_v36  ;;  %v3732_v59 = vsub.f32 1.0, %v3731_v24 }
0x2724   :  { %v4099_v11 = vmul.f32 %v6490_v56, %v4098_v16 }
0x2725   :  { %v4085_v51 = vadd.f32 %v6488_v2, %v4084_v46  ;;  %v3733_v57 = vmul.f32 %v6492_v1, %v3732_v59 }
0x2726   :  { %v4100_v4 = vadd.f32 %v6490_v56, %v4099_v11 }
0x2727   :  { %v4089_v6 = vsel %vm4088_vm1, %v6488_v2, %v4085_v51  ;;  %v3734_v14 = vadd.f32 %v6492_v1, %v3733_v57 }
0x2728   :  { %v4104_v8 = vsel %vm4103_vm9, %v6490_v56, %v4100_v4  ;;  %v4094_v48 = vsel %vm4091_vm5, %v4093_v60, %v4089_v6 }
0x2729   :  { %v4109_v52 = vsel %vm4106_vm11, %v4108_v55, %v4104_v8  ;;  %v3738_v9 = vsel %vm3737_vm7, %v6492_v1, %v3734_v14 }
0x272a   :  { %v3743_v31 = vsel %vm3740_vm8, %v3742_v0, %v3738_v9  ;;  %v4120_v56 = vmul.f32 %v4116_v13, %v4109_v52 }
0x272b   :  { %v3749_v11 = vmul.f32 %v3747_v27, %v3743_v31 }
0x275c   :  { %v3946_v20 = vpop.permute.xlu2 %3945 }
0x275d   :  { %v3948_v39 = vmul.f32 %v3946_v20, %v8423_v54 }
0x275f   :  { %3950 = vrot.lane.b32.xlu0 %v3948_v39, %s6919_s2  ;;  %v3943_v39 = vmul.f32 %v8423_v54, %v8313_v34  ;;  %v4115_v34 = vrot.slane %v8316_v32, 7 }
0x2761   :  { %v4119_v16 = vmul.f32 %v4115_v34, %v4094_v48 }
0x277b   :  { %v4124_v62 = vpop.permute.xlu0 %4123 }
0x277c   :  { %v4126_v17 = vpop.permute.xlu1 %4125  ;;  %v4129_v12 = vmul.f32 %v4124_v62, %v4094_v48 }
0x277d   :  { %v4130_v5 = vmul.f32 %v4126_v17, %v4109_v52 }
0x277e   :  { %4133 = vrot.lane.b32.xlu1 %v4129_v12, %s6919_s2 }
0x277f   :  { %4135 = vrot.lane.b32.xlu2 %v4130_v5, %s6919_s2 }
0x2783   :  { %v3752_v20 = vpop.permute.xlu0 %3751 }
0x2784   :  { %v3754_v30 = vmul.f32 %v3752_v20, %v3743_v31 }
0x2786   :  { %3756 = vrot.lane.b32.xlu1 %v3754_v30, %s6919_s2 }
0x27d1   :  { %v3951_v61 = vpop.permute.xlu0 %3950 }
0x27d2   :  { %v8432_v2 = vadd.f32 %v3951_v61, %v3943_v39 }
0x27d4   :  { %6493 = vtanh.f32 %v8432_v2 }
0x27d9   :  { %v4136_v41 = vpop.permute.xlu2 %4135 }
0x27da   :  { %v6494_v25 = vpop.eup %6493  ;;  %v8436_v36 = vadd.f32 %v4136_v41, %v4120_v56 }
0x27db   :  { %3956 = vrot.lane.b32.xlu1 %v6494_v25, %s6918_s18 }
0x27dc   :  { %6495 = vtanh.f32 %v8436_v36 }
0x27e2   :  { %v6496_v1 = vpop.eup %6495 }
0x27e3   :  { %4147 = vrot.lane.b32.xlu0 %v6496_v1, %s6918_s18 }
0x27f0   :  { %v4134_v46 = vpop.permute.xlu1 %4133 }
0x27f1   :  { %v8442_v24 = vadd.f32 %v4134_v46, %v4119_v16 }
0x27f3   :  { %6497 = vtanh.f32 %v8442_v24 }
0x27f8   :  { %v3757_v51 = vpop.permute.xlu1 %3756 }
0x27f9   :  { %v6498_v59 = vpop.eup %6497  ;;  %v8446_v4 = vadd.f32 %v3757_v51, %v3749_v11 }
0x27fa   :  { %4145 = vrot.lane.b32.xlu2 %v6498_v59, %s6918_s18 }
0x27fb   :  { %6499 = vtanh.f32 %v8446_v4 }
0x2801   :  { %v6500_v21 = vpop.eup %6499 }
0x2802   :  { %3762 = vrot.lane.b32.xlu2 %v6500_v21, %s6918_s18 }
0x284d   :  { %v3957_v32 = vpop.permute.xlu1 %3956 }
0x284e   :  { %v3959_v58 = vmul.f32 %v3957_v32, %v8423_v54 }
0x2850   :  { %v4160_v19 = vrot.slane %v3959_v58, 6 }
0x2852   :  { %4161 = vrot.lane.b32.xlu2 %v4160_v19, %s6918_s18 }
0x2854   :  { %v4146_v33 = vpop.permute.xlu2 %4145 }
0x2855   :  { %v4151_v63 = vmul.f32 %v4146_v33, %v4094_v48  ;;  %v4148_v6 = vpop.permute.xlu0 %4147 }
0x2856   :  { %v4152_v57 = vmul.f32 %v4148_v6, %v4109_v52 }
0x2857   :  { %v4306_v8 = vrot.slane %v4151_v63, 2 }
0x2858   :  { %v4155_v60 = vrot.slane %v4152_v57, 7  ;;  %v4307_v55 = vrot.slane %v4152_v57, 1 }
0x285a   :  { %v4308_v62 = vsel %vm482_vm13, %v4307_v55, %v4306_v8  ;;  %v4156_v17 = vsel %vm988_vm15, %v4155_v60, %v4151_v63 }
0x285b   :  { %4309 = vrot.lane.b32.xlu0 %v4308_v62, %s6919_s2  ;;  %4157 = vrot.lane.b32.xlu1 %v4156_v17, %s6919_s2 }
0x285c   :  { %v3763_v12 = vpop.permute.xlu2 %3762 }
0x285d   :  { %v8457_v54 = vmul.f32 %v3763_v12, %v3743_v31 }
0x2863   :  { %3961 = vrot.lane.b32.xlu0 %v3959_v58, %s6919_s2  ;;  %3964 = vrot.lane.b32.xlu1 %v8457_v54, %s6918_s18 }
0x28ac   :  { %v4162_v48 = vpop.permute.xlu2 %4161 }
0x28cd   :  { %v4310_v52 = vpop.permute.xlu0 %4309  ;;  %v4158_v14 = vpop.permute.xlu1 %4157 }
0x28ce   :  { %v4164_v5 = vsel %vm226_vm4, %v4158_v14, %v4162_v48  ;;  %5982 = vmatmul.msk.f32.vlgmr.msrb.gmra.mxu2 %vm226_vm4, %v4310_v52 }
0x28cf   :  { %v4166_v45 = vrot.slane %v4164_v5, 2  ;;  %4980 = vmatpush.msrb.mxu2 %v8242_v35  ;;  %v8475_v35 = vld [vmem:[#allocation7 + $0x18] sm:$0xff] }
0x28d1   :  { %5978 = vmatmul.msk.f32.vlgmr.msra.gmra.mxu1 %vm491_vm14, %v4166_v45  ;;  %4981 = vmatpush.msrb.mxu2 %v8244_v26  ;;  %v8480_v26 = vld [vmem:[#allocation7 + $0x10] sm:$0xff] }
0x28d2   :  { %4780 = vmatpush.msra.mxu1 %v8329_v49 }
0x28d3   :  { %4982 = vmatpush.msrb.mxu2 %v8248_v44  ;;  %v8485_v44 = vld [vmem:[#allocation7 + $0x8] sm:$0xff] }
0x28d4   :  { %4781 = vmatpush.msra.mxu1 %v8331_v28 }
0x28d5   :  { %v3962_v18 = vpop.permute.xlu0 %3961  ;;  %v3965_v9 = vpop.permute.xlu1 %3964  ;;  %4983 = vmatpush.msrb.mxu2 %v8252_v47  ;;  %v8490_v47 = vld [vmem:[#allocation7] sm:$0xff] }
0x28d6   :  { %v3967_v0 = vsel %vm226_vm4, %v3962_v18, %v3965_v9  ;;  %4782 = vmatpush.msra.mxu1 %v8339_v23 }
0x28d7   :  { %5973 = vmatmul.msk.f32.vlgmr.msrb.gmra.mxu3 %vm491_vm14, %v3967_v0  ;;  %4984 = vmatpush.msrb.mxu2 %v8256_v3 }
0x28d8   :  { %4860 = vmatpush.msrb.mxu3 %v8475_v35  ;;  %4783 = vmatpush.msra.mxu1 %v8342_v15 }
0x28d9   :  { %4985 = vmatpush.msrb.mxu2 %v8260_v10 }
0x28da   :  { %4861 = vmatpush.msrb.mxu3 %v8480_v26  ;;  %4784 = vmatpush.msra.mxu1 %v8345_v22 }
0x28db   :  { %4986 = vmatpush.msrb.mxu2 %v8264_v53 }
0x28dc   :  { %4862 = vmatpush.msrb.mxu3 %v8485_v44  ;;  %4785 = vmatpush.msra.mxu1 %v8350_v38 }
0x28dd   :  { %4987 = vmatpush.msrb.mxu2 %v8270_v37 }
0x28de   :  { %4863 = vmatpush.msrb.mxu3 %v8490_v47  ;;  %4786 = vmatpush.msra.mxu1 %v8355_v43 }
0x28e0   :  { %4787 = vmatpush.msra.mxu1 %v8363_v7 }
0x294e   :  { %v4186_v3 = vpop.f32.mrf.mxu1 }
0x294f   :  { %v4187_v10 = vadd.f32 %v8291_v29, %v4186_v3 }
0x2951   :  { %6501 = vtanh.f32 %v4187_v10  ;;  %v4330_v53 = vpop.f32.mrf.mxu2  ;;  %v5979_v27 = vmul.f32 -1.442695, %v4187_v10 }
0x2952   :  { %v4334_v31 = vrot.slane %v4330_v53, 5  ;;  %v4335_v20 = vrot.slane %v4330_v53, 6 }
0x2954   :  { %v4338_v30 = vadd.f32 %v4334_v31, %v8211_v40  ;;  %v4339_v39 = vadd.f32 %v4335_v20, %v8214_v50 }
0x2956   :  { %6503 = vtanh.f32 %v4338_v30  ;;  %v5983_v41 = vmul.f32 -1.442695, %v4338_v30  ;;  %v5984_v59 = vmul.f32 -1.442695, %v4339_v39 }
0x2957   :  { %v6502_v37 = vpop.eup %6501  ;;  %6505 = vtanh.f32 %v4339_v39 }
0x2958   :  { %4211 = vrot.lane.b32.xlu1 %v6502_v37, %s6918_s18 }
0x295a   :  { %v3988_v61 = vpop.f32.mrf.mxu3 }
0x295b   :  { %v3989_v13 = vadd.f32 %v8417_v42, %v3988_v61 }
0x295c   :  { %v6504_v56 = vpop.eup %6503 }
0x295d   :  { %v6506_v25 = vpop.eup %6505  ;;  %6507 = vtanh.f32 %v3989_v13  ;;  %4390 = vrot.lane.b32.xlu2 %v6504_v56, %s6918_s18  ;;  %v5974_v1 = vmul.f32 -1.442695, %v3989_v13 }
0x295e   :  { %4392 = vrot.lane.b32.xlu0 %v6506_v25, %s6918_s18  ;;  %6509 = vpow2.f32 %v5983_v41 }
0x295f   :  { %6511 = vpow2.f32 %v5974_v1 }
0x2963   :  { %v6508_v29 = vpop.eup %6507 }
0x2964   :  { %v6510_v34 = vpop.eup %6509 }
0x2965   :  { %4013 = vrot.lane.b32.xlu2 %v6508_v29, %s6918_s18  ;;  %v4346_v16 = vadd.f32 1.0, %v6510_v34  ;;  %v6512_v46 = vpop.eup %6511 }
0x2966   :  { %v3994_v11 = vadd.f32 1.0, %v6512_v46 }
0x2967   :  { %6513 = vrcp.f32 %v4346_v16  ;;  %v4359_v62 = vand.u32 2147483648, %v4346_v16  ;;  %vm4353_vm10 = vweird.f32 %v4346_v16  ;;  %v4357_v17 = vand.u32 2147483647, %v4346_v16 }
0x2968   :  { %6515 = vpow2.f32 %v5979_v27  ;;  %v4006_v3 = vand.u32 2147483648, %v3994_v11  ;;  %vm4000_vm5 = vweird.f32 %v3994_v11  ;;  %v4004_v53 = vand.u32 2147483647, %v3994_v11 }
0x2969   :  { %6517 = vrcp.f32 %v3994_v11  ;;  %v4360_v14 = vor.u32 1.1754944e-38, %v4359_v62  ;;  %vm4358_vm1 = vcmp.eq.f32.partialorder %v4357_v17, 8.507059e+37  ;;  %v4382_v62 = vrot.slane %v8442_v24, 7 }
0x296a   :  { %6519 = vpow2.f32 %v5984_v59  ;;  %v4007_v30 = vor.u32 1.1754944e-38, %v4006_v3  ;;  %vm4005_vm6 = vcmp.eq.f32.partialorder %v4004_v53, 8.507059e+37 }
0x296d   :  { %v6514_v51 = vpop.eup %6513 }
0x296e   :  { %v4349_v21 = vmul.f32 %v6514_v51, %v4346_v16  ;;  %v6516_v32 = vpop.eup %6515  ;;  %vm4354_vm15 = vweird.f32 %v6514_v51 }
0x296f   :  { %v6518_v19 = vpop.eup %6517  ;;  %v4192_v33 = vadd.f32 1.0, %v6516_v32  ;;  %vm4355_vm0 = vmor %vm4353_vm10, %vm4354_vm15 }
0x2970   :  { %v4350_v58 = vsub.f32 1.0, %v4349_v21  ;;  %v3996_v6 = vmul.f32 %v6518_v19, %v3994_v11  ;;  %v6520_v57 = vpop.eup %6519  ;;  %vm4001_vm9 = vweird.f32 %v6518_v19 }
0x2971   :  { %6521 = vrcp.f32 %v4192_v33  ;;  %v4347_v8 = vadd.f32 1.0, %v6520_v57  ;;  %vm4002_vm11 = vmor %vm4000_vm5, %vm4001_vm9  ;;  %v4204_v41 = vand.u32 2147483648, %v4192_v33  ;;  %vm4198_vm7 = vweird.f32 %v4192_v33 }
0x2972   :  { %v4351_v63 = vmul.f32 %v6514_v51, %v4350_v58  ;;  %v3997_v55 = vsub.f32 1.0, %v3996_v6  ;;  %v4202_v1 = vand.u32 2147483647, %v4192_v33 }
0x2973   :  { %6523 = vrcp.f32 %v4347_v8  ;;  %v4205_v46 = vor.u32 1.1754944e-38, %v4204_v41  ;;  %v4374_v59 = vand.u32 2147483648, %v4347_v8  ;;  %v4372_v32 = vand.u32 2147483647, %v4347_v8 }
0x2974   :  { %v4352_v60 = vadd.f32 %v6514_v51, %v4351_v63  ;;  %v3998_v52 = vmul.f32 %v6518_v19, %v3997_v55  ;;  %vm4203_vm15 = vcmp.eq.f32.partialorder %v4202_v1, 8.507059e+37 }
0x2975   :  { %vm4373_vm9 = vcmp.eq.f32.partialorder %v4372_v32, 8.507059e+37 }
0x2976   :  { %v4356_v48 = vsel %vm4355_vm0, %v6514_v51, %v4352_v60  ;;  %v3999_v0 = vadd.f32 %v6518_v19, %v3998_v52  ;;  %vm4368_vm0 = vweird.f32 %v4347_v8 }
0x2977   :  { %v6522_v12 = vpop.eup %6521  ;;  %v8503_v45 = vsel %vm4358_vm1, %v4360_v14, %v4356_v48 }
0x2978   :  { %v4194_v18 = vmul.f32 %v6522_v12, %v4192_v33  ;;  %v4003_v20 = vsel %vm4002_vm11, %v6518_v19, %v3999_v0  ;;  %vm4199_vm12 = vweird.f32 %v6522_v12  ;;  %v4375_v19 = vor.u32 1.1754944e-38, %v4374_v59  ;;  %v8557_v59 = vld [vmem:[#allocation8 + $0x30] sm:$0xff] }
0x2979   :  { %v6524_v10 = vpop.eup %6523  ;;  %v8507_v61 = vsel %vm4005_vm6, %v4007_v30, %v4003_v20  ;;  %vm4200_vm8 = vmor %vm4198_vm7, %vm4199_vm12 }
0x297a   :  { %v4195_v31 = vsub.f32 1.0, %v4194_v18  ;;  %v4364_v39 = vmul.f32 %v6524_v10, %v4347_v8  ;;  %vm4369_vm10 = vweird.f32 %v6524_v10  ;;  %v4386_v8 = vmul.f32 %v4382_v62, %v8503_v45 }
0x297b   :  { %vm4370_vm1 = vmor %vm4368_vm0, %vm4369_vm10  ;;  %v4383_v18 = vrot.slane %v8436_v36, 7 }
0x297c   :  { %v4196_v13 = vmul.f32 %v6522_v12, %v4195_v31  ;;  %v4365_v25 = vsub.f32 1.0, %v4364_v39 }
0x297e   :  { %v4197_v29 = vadd.f32 %v6522_v12, %v4196_v13  ;;  %v4366_v34 = vmul.f32 %v6524_v10, %v4365_v25 }
0x2980   :  { %v4201_v16 = vsel %vm4200_vm8, %v6522_v12, %v4197_v29  ;;  %v4367_v27 = vadd.f32 %v6524_v10, %v4366_v34 }
0x2981   :  { %v4206_v11 = vsel %vm4203_vm15, %v4205_v46, %v4201_v16 }
0x2982   :  { %v4371_v58 = vsel %vm4370_vm1, %v6524_v10, %v4367_v27  ;;  %v4209_v57 = vmul.f32 %v4206_v11, %v8432_v2  ;;  %v4011_v2 = vmul.f32 %v8507_v61, %v8446_v4 }
0x2983   :  { %v4376_v33 = vsel %vm4373_vm9, %v4375_v19, %v4371_v58 }
0x29b7   :  { %v4391_v5 = vpop.permute.xlu2 %4390 }
0x29b8   :  { %v4396_v9 = vmul.f32 %v4391_v5, %v8503_v45 }
0x29ba   :  { %4400 = vrot.lane.b32.xlu0 %v4396_v9, %s6919_s2  ;;  %v4387_v9 = vmul.f32 %v4383_v18, %v4376_v33 }
0x29bf   :  { %v4014_v37 = vpop.permute.xlu2 %4013 }
0x29c0   :  { %v4016_v56 = vmul.f32 %v4014_v37, %v8507_v61 }
0x29c2   :  { %4018 = vrot.lane.b32.xlu0 %v4016_v56, %s6919_s2 }
0x29ca   :  { %v4212_v51 = vpop.permute.xlu1 %4211 }
0x29cb   :  { %v4214_v21 = vmul.f32 %v4212_v51, %v4206_v11 }
0x29cd   :  { %4216 = vrot.lane.b32.xlu2 %v4214_v21, %s6919_s2  ;;  %v8585_v21 = vld [vmem:[#allocation8] sm:$0xff] }
0x29d0   :  { %v4393_v63 = vpop.permute.xlu0 %4392 }
0x29d1   :  { %v4397_v6 = vmul.f32 %v4393_v63, %v4376_v33  ;;  %v8593_v63 = vld [vmem:[%s9020_s17] ss:$0 sm:$0xff] }
0x29d3   :  { %4402 = vrot.lane.b32.xlu1 %v4397_v6, %s6919_s2 }
0x2a27   :  { %v4217_v60 = vpop.permute.xlu2 %4216 }
0x2a28   :  { %v8514_v55 = vadd.f32 %v4217_v60, %v4209_v57 }
0x2a2a   :  { %6525 = vtanh.f32 %v8514_v55 }
0x2a2c   :  { %v4401_v17 = vpop.permute.xlu0 %4400 }
0x2a2d   :  { %v8519_v12 = vadd.f32 %v4401_v17, %v4386_v8 }
0x2a2f   :  { %6527 = vtanh.f32 %v8519_v12 }
0x2a30   :  { %v6526_v48 = vpop.eup %6525 }
0x2a31   :  { %4222 = vrot.lane.b32.xlu0 %v6526_v48, %s6918_s18 }
0x2a34   :  { %v4019_v52 = vpop.permute.xlu0 %4018 }
0x2a35   :  { %v6528_v14 = vpop.eup %6527  ;;  %v8525_v5 = vadd.f32 %v4019_v52, %v4011_v2 }
0x2a36   :  { %4412 = vrot.lane.b32.xlu1 %v6528_v14, %s6918_s18 }
0x2a37   :  { %6529 = vtanh.f32 %v8525_v5 }
0x2a3d   :  { %v6530_v24 = vpop.eup %6529 }
0x2a3e   :  { %4024 = vrot.lane.b32.xlu1 %v6530_v24, %s6918_s18 }
0x2a45   :  { %v4403_v0 = vpop.permute.xlu1 %4402 }
0x2a46   :  { %v8531_v3 = vadd.f32 %v4403_v0, %v4387_v9 }
0x2a48   :  { %6531 = vtanh.f32 %v8531_v3 }
0x2a4e   :  { %v6532_v4 = vpop.eup %6531 }
0x2a4f   :  { %4414 = vrot.lane.b32.xlu2 %v6532_v4, %s6918_s18 }
0x2aa3   :  { %v4223_v10 = vpop.permute.xlu0 %4222 }
0x2aa4   :  { %v4225_v53 = vmul.f32 %v4223_v10, %v4206_v11 }
0x2aa6   :  { %v4427_v31 = vrot.slane %v4225_v53, 5 }
0x2aa8   :  { %4428 = vrot.lane.b32.xlu0 %v4427_v31, %s6918_s18  ;;  %v4413_v20 = vpop.permute.xlu1 %4412 }
0x2aa9   :  { %v4415_v30 = vpop.permute.xlu2 %4414  ;;  %v4418_v39 = vmul.f32 %v4413_v20, %v8503_v45 }
0x2aaa   :  { %v4419_v37 = vmul.f32 %v4415_v30, %v4376_v33 }
0x2aab   :  { %v4573_v36 = vrot.slane %v4418_v39, 3 }
0x2aac   :  { %v4422_v13 = vrot.slane %v4419_v37, 7  ;;  %v4574_v56 = vrot.slane %v4419_v37, 2 }
0x2aae   :  { %v4575_v25 = vsel %vm482_vm13, %v4574_v56, %v4573_v36  ;;  %v4423_v29 = vsel %vm1244_vm3, %v4422_v13, %v4418_v39 }
0x2aaf   :  { %4576 = vrot.lane.b32.xlu1 %v4575_v25, %s6919_s2  ;;  %4424 = vrot.lane.b32.xlu2 %v4423_v29, %s6919_s2 }
0x2ab0   :  { %v4025_v41 = vpop.permute.xlu1 %4024 }
0x2ab1   :  { %v8542_v1 = vmul.f32 %v4025_v41, %v8507_v61  ;;  %v8553_v61 = vld [vmem:[#allocation8 + $0x38] sm:$0xff] }
0x2ab3   :  { %4230 = vrot.lane.b32.xlu0 %v8542_v1, %s6918_s18 }
0x2ab7   :  { %4227 = vrot.lane.b32.xlu2 %v4225_v53, %s6919_s2 }
0x2b09   :  { %v4425_v45 = vpop.permute.xlu2 %4424 }
0x2b11   :  { %v4228_v11 = vpop.permute.xlu2 %4227 }
0x2b1a   :  { %v4429_v34 = vpop.permute.xlu0 %4428 }
0x2b1b   :  { %v4431_v16 = vsel %vm226_vm4, %v4425_v45, %v4429_v34 }
0x2b1c   :  { %v4433_v46 = vrot.slane %v4431_v16, 3 }
0x2b1e   :  { %5985 = vmatmul.msk.f32.vlgmr.msra.gmra.mxu3 %vm491_vm14, %v4433_v46 }
0x2b1f   :  { %5048 = vmatpush.msra.mxu3 %v8329_v49 }
0x2b21   :  { %v4577_v27 = vpop.permute.xlu1 %4576  ;;  %5049 = vmatpush.msra.mxu3 %v8331_v28  ;;  %v8564_v28 = vld [vmem:[#allocation8 + $0x28] sm:$0xff] }
0x2b22   :  { %5989 = vmatmul.msk.f32.vlgmr.msrb.gmra.mxu1 %vm226_vm4, %v4577_v27 }
0x2b23   :  { %5050 = vmatpush.msra.mxu3 %v8339_v23  ;;  %5247 = vmatpush.msrb.mxu1 %v8553_v61  ;;  %v8569_v23 = vld [vmem:[#allocation8 + $0x20] sm:$0xff] }
0x2b25   :  { %v4231_v51 = vpop.permute.xlu0 %4230  ;;  %5051 = vmatpush.msra.mxu3 %v8342_v15  ;;  %5248 = vmatpush.msrb.mxu1 %v8557_v59  ;;  %v8574_v15 = vld [vmem:[#allocation8 + $0x18] sm:$0xff] }
0x2b26   :  { %v4233_v49 = vsel %vm226_vm4, %v4228_v11, %v4231_v51 }
0x2b27   :  { %5980 = vmatmul.msk.f32.vlgmr.msra.gmra.mxu0 %vm491_vm14, %v4233_v49  ;;  %5052 = vmatpush.msra.mxu3 %v8345_v22  ;;  %v8579_v22 = vld [vmem:[#allocation8 + $0x10] sm:$0xff] }
0x2b28   :  { %5128 = vmatpush.msra.mxu0 %v8475_v35  ;;  %5249 = vmatpush.msrb.mxu1 %v8564_v28 }
0x2b29   :  { %5053 = vmatpush.msra.mxu3 %v8350_v38  ;;  %v8582_v38 = vld [vmem:[#allocation8 + $0x8] sm:$0xff] }
0x2b2a   :  { %5129 = vmatpush.msra.mxu0 %v8480_v26  ;;  %5250 = vmatpush.msrb.mxu1 %v8569_v23 }
0x2b2b   :  { %5054 = vmatpush.msra.mxu3 %v8355_v43 }
0x2b2c   :  { %5130 = vmatpush.msra.mxu0 %v8485_v44  ;;  %5251 = vmatpush.msrb.mxu1 %v8574_v15 }
0x2b2d   :  { %5055 = vmatpush.msra.mxu3 %v8363_v7 }
0x2b2e   :  { %5131 = vmatpush.msra.mxu0 %v8490_v47  ;;  %5252 = vmatpush.msrb.mxu1 %v8579_v22 }
0x2b30   :  { %5253 = vmatpush.msrb.mxu1 %v8582_v38 }
0x2b32   :  { %5254 = vmatpush.msrb.mxu1 %v8585_v21 }
0x2b9f   :  { %v4597_v43 = vpop.f32.mrf.mxu1 }
0x2ba0   :  { %v4601_v32 = vrot.slane %v4597_v43, 4  ;;  %v4602_v58 = vrot.slane %v4597_v43, 5 }
0x2ba1   :  { %v4453_v33 = vpop.f32.mrf.mxu3 }
0x2ba2   :  { %v4605_v19 = vadd.f32 %v4601_v32, %v8211_v40  ;;  %v4606_v7 = vadd.f32 %v4602_v58, %v8214_v50  ;;  %v4454_v6 = vadd.f32 %v8593_v63, %v4453_v33 }
0x2ba4   :  { %6533 = vtanh.f32 %v4605_v19  ;;  %v4254_v57 = vpop.f32.mrf.mxu0  ;;  %v5991_v2 = vmul.f32 -1.442695, %v4606_v7  ;;  %v5990_v24 = vmul.f32 -1.442695, %v4605_v19  ;;  %v5986_v9 = vmul.f32 -1.442695, %v4454_v6 }
0x2ba5   :  { %6535 = vtanh.f32 %v4606_v7  ;;  %v4255_v60 = vadd.f32 %v8417_v42, %v4254_v57 }
0x2ba6   :  { %6537 = vtanh.f32 %v4454_v6 }
0x2ba7   :  { %6539 = vtanh.f32 %v4255_v60  ;;  %v5981_v4 = vmul.f32 -1.442695, %v4255_v60 }
0x2ba8   :  { %6541 = vpow2.f32 %v5991_v2 }
0x2baa   :  { %v6534_v62 = vpop.eup %6533 }
0x2bab   :  { %v6536_v8 = vpop.eup %6535  ;;  %4657 = vrot.lane.b32.xlu1 %v6534_v62, %s6918_s18 }
0x2bac   :  { %4659 = vrot.lane.b32.xlu2 %v6536_v8, %s6918_s18  ;;  %v6538_v17 = vpop.eup %6537 }
0x2bad   :  { %4478 = vrot.lane.b32.xlu0 %v6538_v17, %s6918_s18  ;;  %v6540_v48 = vpop.eup %6539 }
0x2bae   :  { %v6542_v52 = vpop.eup %6541 }
0x2baf   :  { %v4614_v14 = vadd.f32 1.0, %v6542_v52 }
0x2bb1   :  { %6543 = vrcp.f32 %v4614_v14  ;;  %v4641_v39 = vand.u32 2147483648, %v4614_v14  ;;  %vm4635_vm5 = vweird.f32 %v4614_v14  ;;  %v4639_v37 = vand.u32 2147483647, %v4614_v14 }
0x2bb2   :  { %6545 = vpow2.f32 %v5990_v24 }
0x2bb3   :  { %4279 = vrot.lane.b32.xlu1 %v6540_v48, %s6918_s18  ;;  %6547 = vpow2.f32 %v5986_v9  ;;  %v4642_v25 = vor.u32 1.1754944e-38, %v4641_v39  ;;  %vm4640_vm6 = vcmp.eq.f32.partialorder %v4639_v37, 8.507059e+37 }
0x2bb4   :  { %6549 = vpow2.f32 %v5981_v4 }
0x2bb7   :  { %v6544_v42 = vpop.eup %6543 }
0x2bb8   :  { %v4631_v18 = vmul.f32 %v6544_v42, %v4614_v14  ;;  %v6546_v10 = vpop.eup %6545  ;;  %vm4636_vm3 = vweird.f32 %v6544_v42 }
0x2bb9   :  { %v4613_v31 = vadd.f32 1.0, %v6546_v10  ;;  %v6548_v20 = vpop.eup %6547  ;;  %vm4637_vm11 = vmor %vm4635_vm5, %vm4636_vm3 }
0x2bba   :  { %v4632_v0 = vsub.f32 1.0, %v4631_v18  ;;  %v6550_v36 = vpop.eup %6549  ;;  %v4459_v13 = vadd.f32 1.0, %v6548_v20 }
0x2bbb   :  { %6551 = vrcp.f32 %v4613_v31  ;;  %v4260_v29 = vadd.f32 1.0, %v6550_v36  ;;  %v4626_v33 = vand.u32 2147483648, %v4613_v31  ;;  %vm4620_vm7 = vweird.f32 %v4613_v31 }
0x2bbc   :  { %v4633_v53 = vmul.f32 %v6544_v42, %v4632_v0  ;;  %6553 = vrcp.f32 %v4459_v13  ;;  %v4624_v57 = vand.u32 2147483647, %v4613_v31  ;;  %v4471_v48 = vand.u32 2147483648, %v4459_v13 }
0x2bbd   :  { %6555 = vrcp.f32 %v4260_v29  ;;  %v4627_v8 = vor.u32 1.1754944e-38, %v4626_v33  ;;  %vm4465_vm0 = vweird.f32 %v4459_v13  ;;  %v4469_v14 = vand.u32 2147483647, %v4459_v13 }
0x2bbe   :  { %v4634_v30 = vadd.f32 %v6544_v42, %v4633_v53  ;;  %vm4625_vm10 = vcmp.eq.f32.partialorder %v4624_v57, 8.507059e+37  ;;  %v4272_v9 = vand.u32 2147483648, %v4260_v29  ;;  %v4472_v0 = vor.u32 1.1754944e-38, %v4471_v48 }
0x2bbf   :  { %vm4266_vm3 = vweird.f32 %v4260_v29  ;;  %v4270_v4 = vand.u32 2147483647, %v4260_v29  ;;  %vm4470_vm5 = vcmp.eq.f32.partialorder %v4469_v14, 8.507059e+37 }
0x2bc0   :  { %v4638_v56 = vsel %vm4637_vm11, %v6544_v42, %v4634_v30  ;;  %v4273_v30 = vor.u32 1.1754944e-38, %v4272_v9 }
0x2bc1   :  { %v8601_v45 = vsel %vm4640_vm6, %v4642_v25, %v4638_v56  ;;  %v6552_v34 = vpop.eup %6551  ;;  %vm4271_vm6 = vcmp.eq.f32.partialorder %v4270_v4, 8.507059e+37  ;;  %v4650_v56 = vrot.slane %v8531_v3, 7 }
0x2bc2   :  { %v4616_v46 = vmul.f32 %v6552_v34, %v4613_v31  ;;  %v6554_v27 = vpop.eup %6553  ;;  %vm4621_vm12 = vweird.f32 %v6552_v34 }
0x2bc3   :  { %v6556_v51 = vpop.eup %6555  ;;  %v4461_v49 = vmul.f32 %v6554_v27, %v4459_v13  ;;  %vm4622_vm8 = vmor %vm4620_vm7, %vm4621_vm12  ;;  %vm4466_vm15 = vweird.f32 %v6554_v27  ;;  %v4649_v13 = vrot.slane %v8519_v12, 7  ;;  %vm4690_vm12 = vcmask 1045509  }
0x2bc4   :  { %v4617_v11 = vsub.f32 1.0, %v4616_v46  ;;  %v4262_v32 = vmul.f32 %v6556_v51, %v4260_v29  ;;  %vm4467_vm1 = vmor %vm4465_vm0, %vm4466_vm15  ;;  %vm4267_vm9 = vweird.f32 %v6556_v51  ;;  %v4654_v29 = vmul.f32 %v4650_v56, %v8601_v45 }
0x2bc5   :  { %v4462_v58 = vsub.f32 1.0, %v4461_v49  ;;  %vm4268_vm11 = vmor %vm4266_vm3, %vm4267_vm9 }
0x2bc6   :  { %v4618_v43 = vmul.f32 %v6552_v34, %v4617_v11  ;;  %v4263_v7 = vsub.f32 1.0, %v4262_v32 }
0x2bc7   :  { %v4463_v6 = vmul.f32 %v6554_v27, %v4462_v58 }
0x2bc8   :  { %v4619_v19 = vadd.f32 %v6552_v34, %v4618_v43  ;;  %v4264_v62 = vmul.f32 %v6556_v51, %v4263_v7 }
0x2bc9   :  { %v4464_v17 = vadd.f32 %v6554_v27, %v4463_v6 }
0x2bca   :  { %v4623_v60 = vsel %vm4622_vm8, %v6552_v34, %v4619_v19  ;;  %v4265_v24 = vadd.f32 %v6556_v51, %v4264_v62 }
0x2bcb   :  { %v4628_v52 = vsel %vm4625_vm10, %v4627_v8, %v4623_v60  ;;  %v4468_v18 = vsel %vm4467_vm1, %v6554_v27, %v4464_v17 }
0x2bcc   :  { %v4473_v10 = vsel %vm4470_vm5, %v4472_v0, %v4468_v18  ;;  %v4269_v31 = vsel %vm4268_vm11, %v6556_v51, %v4265_v24  ;;  %v4653_v25 = vmul.f32 %v4649_v13, %v4628_v52 }
0x2bcd   :  { %v4274_v39 = vsel %vm4271_vm6, %v4273_v30, %v4269_v31  ;;  %v4476_v43 = vmul.f32 %v4473_v10, %v8514_v55 }
0x2bce   :  { %v4277_v27 = vmul.f32 %v4274_v39, %v8525_v5 }
0x2c06   :  { %v4660_v41 = vpop.permute.xlu2 %4659 }
0x2c07   :  { %v4664_v16 = vmul.f32 %v4660_v41, %v8601_v45 }
0x2c09   :  { %4669 = vrot.lane.b32.xlu0 %v4664_v16, %s6919_s2 }
0x2c1d   :  { %v4658_v2 = vpop.permute.xlu1 %4657 }
0x2c1e   :  { %v4663_v42 = vmul.f32 %v4658_v2, %v4628_v52 }
0x2c1f   :  { %v4479_v53 = vpop.permute.xlu0 %4478 }
0x2c20   :  { %4667 = vrot.lane.b32.xlu2 %v4663_v42, %s6919_s2  ;;  %v4481_v20 = vmul.f32 %v4479_v53, %v4473_v10  ;;  %v8651_v53 = vld [vmem:[#allocation8 + $0x70] sm:$0xff] }
0x2c22   :  { %4483 = vrot.lane.b32.xlu1 %v4481_v20, %s6919_s2 }
0x2c25   :  { %v4280_v37 = vpop.permute.xlu1 %4279 }
0x2c26   :  { %v4282_v36 = vmul.f32 %v4280_v37, %v4274_v39  ;;  %v8687_v37 = vld [vmem:[%s9020_s17 + $0x1] ss:$0 sm:$0xff] }
0x2c28   :  { %4284 = vrot.lane.b32.xlu2 %v4282_v36, %s6919_s2 }
0x2c7a   :  { %v4668_v41 = vpop.permute.xlu2 %4667 }
0x2c7b   :  { %v4670_v34 = vpop.permute.xlu0 %4669  ;;  %v8611_v16 = vadd.f32 %v4668_v41, %v4653_v25 }
0x2c7c   :  { %v8613_v46 = vadd.f32 %v4670_v34, %v4654_v29 }
0x2c7d   :  { %6557 = vtanh.f32 %v8611_v16 }
0x2c7e   :  { %6559 = vtanh.f32 %v8613_v46 }
0x2c82   :  { %v4285_v11 = vpop.permute.xlu2 %4284 }
0x2c83   :  { %v6558_v51 = vpop.eup %6557  ;;  %v8618_v12 = vadd.f32 %v4285_v11, %v4277_v27 }
0x2c84   :  { %v6560_v3 = vpop.eup %6559  ;;  %4679 = vrot.lane.b32.xlu0 %v6558_v51, %s6918_s18 }
0x2c85   :  { %6561 = vtanh.f32 %v8618_v12  ;;  %4681 = vrot.lane.b32.xlu1 %v6560_v3, %s6918_s18 }
0x2c8b   :  { %v6562_v49 = vpop.eup %6561 }
0x2c8c   :  { %4290 = vrot.lane.b32.xlu0 %v6562_v49, %s6918_s18 }
0x2c94   :  { %v4484_v32 = vpop.permute.xlu1 %4483 }
0x2c95   :  { %v8625_v58 = vadd.f32 %v4484_v32, %v4476_v43 }
0x2c97   :  { %6563 = vtanh.f32 %v8625_v58 }
0x2c9d   :  { %v6564_v5 = vpop.eup %6563 }
0x2c9e   :  { %4489 = vrot.lane.b32.xlu2 %v6564_v5, %s6918_s18 }
0x2cf6   :  { %v4680_v19 = vpop.permute.xlu0 %4679 }
0x2cf7   :  { %v4682_v7 = vpop.permute.xlu1 %4681  ;;  %v4685_v33 = vmul.f32 %v4680_v19, %v4628_v52 }
0x2cf8   :  { %v4686_v6 = vmul.f32 %v4682_v7, %v8601_v45  ;;  %v4490_v8 = vpop.permute.xlu2 %4489 }
0x2cf9   :  { %v4841_v57 = vrot.slane %v4685_v33, 4  ;;  %v4492_v17 = vmul.f32 %v4490_v8, %v4473_v10  ;;  %v8645_v10 = vld [vmem:[#allocation8 + $0x78] sm:$0xff] }
0x2cfa   :  { %v4689_v60 = vrot.slane %v4686_v6, 7  ;;  %v4842_v62 = vrot.slane %v4686_v6, 3 }
0x2cfb   :  { %v4695_v2 = vrot.slane %v4492_v17, 4 }
0x2cfc   :  { %v4843_v55 = vsel %vm482_vm13, %v4842_v62, %v4841_v57  ;;  %v4691_v48 = vsel %vm4690_vm12, %v4689_v60, %v4685_v33 }
0x2cfd   :  { %4844 = vrot.lane.b32.xlu1 %v4843_v55, %s6919_s2  ;;  %4692 = vrot.lane.b32.xlu2 %v4691_v48, %s6919_s2 }
0x2cfe   :  { %4696 = vrot.lane.b32.xlu0 %v4695_v2, %s6918_s18  ;;  %v4291_v14 = vpop.permute.xlu0 %4290 }
0x2cff   :  { %v8634_v52 = vmul.f32 %v4291_v14, %v4274_v39 }
0x2d05   :  { %4494 = vrot.lane.b32.xlu1 %v4492_v17, %s6919_s2  ;;  %4497 = vrot.lane.b32.xlu2 %v8634_v52, %s6918_s18 }
0x2d57   :  { %v4693_v45 = vpop.permute.xlu2 %4692 }
0x2d5f   :  { %v4498_v0 = vpop.permute.xlu2 %4497 }
0x2d6f   :  { %v4845_v42 = vpop.permute.xlu1 %4844 }
0x2d70   :  { %5996 = vmatmul.msk.f32.vlgmr.msrb.gmra.mxu3 %vm226_vm4, %v4845_v42  ;;  %v4697_v24 = vpop.permute.xlu0 %4696 }
0x2d71   :  { %5521 = vmatpush.msrb.mxu3 %v8553_v61  ;;  %v4699_v18 = vsel %vm226_vm4, %v4693_v45, %v4697_v24 }
0x2d72   :  { %v4701_v9 = vrot.slane %v4699_v18, 4 }
0x2d73   :  { %5522 = vmatpush.msrb.mxu3 %v8557_v59  ;;  %v8656_v59 = vld [vmem:[#allocation8 + $0x68] sm:$0xff] }
0x2d74   :  { %5992 = vmatmul.msk.f32.vlgmr.msrb.gmra.mxu0 %vm491_vm14, %v4701_v9 }
0x2d75   :  { %5523 = vmatpush.msrb.mxu3 %v8564_v28  ;;  %5315 = vmatpush.msrb.mxu0 %v8645_v10  ;;  %v8661_v28 = vld [vmem:[#allocation8 + $0x60] sm:$0xff] }
0x2d77   :  { %v4495_v4 = vpop.permute.xlu1 %4494  ;;  %5524 = vmatpush.msrb.mxu3 %v8569_v23  ;;  %5316 = vmatpush.msrb.mxu0 %v8651_v53  ;;  %v8666_v23 = vld [vmem:[#allocation8 + $0x58] sm:$0xff] }
0x2d78   :  { %v4500_v61 = vsel %vm226_vm4, %v4495_v4, %v4498_v0 }
0x2d79   :  { %5987 = vmatmul.msk.f32.vlgmr.msra.gmra.mxu2 %vm491_vm14, %v4500_v61  ;;  %5525 = vmatpush.msrb.mxu3 %v8574_v15  ;;  %v8677_v15 = vld [vmem:[#allocation8 + $0x40] sm:$0xff] }
0x2d7a   :  { %5395 = vmatpush.msra.mxu2 %v8475_v35  ;;  %5317 = vmatpush.msrb.mxu0 %v8656_v59  ;;  %v8671_v35 = vld [vmem:[#allocation8 + $0x50] sm:$0xff] }
0x2d7b   :  { %5526 = vmatpush.msrb.mxu3 %v8579_v22 }
0x2d7c   :  { %5396 = vmatpush.msra.mxu2 %v8480_v26  ;;  %5318 = vmatpush.msrb.mxu0 %v8661_v28  ;;  %v8674_v26 = vld [vmem:[#allocation8 + $0x48] sm:$0xff] }
0x2d7d   :  { %5527 = vmatpush.msrb.mxu3 %v8582_v38 }
0x2d7e   :  { %5397 = vmatpush.msra.mxu2 %v8485_v44  ;;  %5319 = vmatpush.msrb.mxu0 %v8666_v23 }
0x2d7f   :  { %5528 = vmatpush.msrb.mxu3 %v8585_v21 }
0x2d80   :  { %5398 = vmatpush.msra.mxu2 %v8490_v47  ;;  %5320 = vmatpush.msrb.mxu0 %v8671_v35 }
0x2d82   :  { %5321 = vmatpush.msrb.mxu0 %v8674_v26 }
0x2d84   :  { %5322 = vmatpush.msrb.mxu0 %v8677_v15 }
0x2df1   :  { %v4721_v44 = vpop.f32.mrf.mxu0 }
0x2df2   :  { %v4722_v38 = vadd.f32 %v8593_v63, %v4721_v44 }
0x2df3   :  { %v4865_v22 = vpop.f32.mrf.mxu3 }
0x2df4   :  { %v4869_v31 = vrot.slane %v4865_v22, 3  ;;  %v4870_v47 = vrot.slane %v4865_v22, 4  ;;  %6565 = vtanh.f32 %v4722_v38  ;;  %v5993_v27 = vmul.f32 -1.442695, %v4722_v38 }
0x2df6   :  { %v4873_v21 = vadd.f32 %v4869_v31, %v8211_v40  ;;  %v4874_v20 = vadd.f32 %v4870_v47, %v8214_v50 }
0x2df8   :  { %6567 = vtanh.f32 %v4873_v21  ;;  %v5997_v29 = vmul.f32 -1.442695, %v4873_v21  ;;  %v5998_v3 = vmul.f32 -1.442695, %v4874_v20 }
0x2df9   :  { %6569 = vtanh.f32 %v4874_v20 }
0x2dfa   :  { %v6566_v30 = vpop.eup %6565 }
0x2dfb   :  { %4746 = vrot.lane.b32.xlu1 %v6566_v30, %s6918_s18 }
0x2dfc   :  { %v4521_v39 = vpop.f32.mrf.mxu2 }
0x2dfd   :  { %v4522_v36 = vadd.f32 %v8687_v37, %v4521_v39 }
0x2dfe   :  { %v6568_v13 = vpop.eup %6567 }
0x2dff   :  { %4925 = vrot.lane.b32.xlu2 %v6568_v13, %s6918_s18  ;;  %v6570_v56 = vpop.eup %6569  ;;  %6571 = vtanh.f32 %v4522_v36  ;;  %v5988_v19 = vmul.f32 -1.442695, %v4522_v36 }
0x2e00   :  { %4927 = vrot.lane.b32.xlu0 %v6570_v56, %s6918_s18  ;;  %6573 = vpow2.f32 %v5997_v29 }
0x2e05   :  { %v6572_v25 = vpop.eup %6571 }
0x2e06   :  { %v6574_v41 = vpop.eup %6573 }
0x2e07   :  { %v4881_v34 = vadd.f32 1.0, %v6574_v41 }
0x2e08   :  { %4546 = vrot.lane.b32.xlu0 %v6572_v25, %s6918_s18 }
0x2e09   :  { %6575 = vrcp.f32 %v4881_v34  ;;  %v4894_v6 = vand.u32 2147483648, %v4881_v34  ;;  %vm4888_vm8 = vweird.f32 %v4881_v34  ;;  %v4892_v60 = vand.u32 2147483647, %v4881_v34 }
0x2e0a   :  { %6577 = vpow2.f32 %v5993_v27 }
0x2e0b   :  { %6579 = vpow2.f32 %v5998_v3  ;;  %v4895_v8 = vor.u32 1.1754944e-38, %v4894_v6  ;;  %vm4893_vm10 = vcmp.eq.f32.partialorder %v4892_v60, 8.507059e+37  ;;  %v4917_v60 = vrot.slane %v8611_v16, 7 }
0x2e0c   :  { %v4918_v16 = vrot.slane %v8613_v46, 7 }
0x2e0f   :  { %v6576_v11 = vpop.eup %6575 }
0x2e10   :  { %v4884_v51 = vmul.f32 %v6576_v11, %v4881_v34  ;;  %v6578_v43 = vpop.eup %6577  ;;  %vm4889_vm7 = vweird.f32 %v6576_v11 }
0x2e11   :  { %v4727_v32 = vadd.f32 1.0, %v6578_v43  ;;  %v6580_v7 = vpop.eup %6579  ;;  %vm4890_vm15 = vmor %vm4888_vm8, %vm4889_vm7 }
0x2e12   :  { %v4885_v49 = vsub.f32 1.0, %v4884_v51  ;;  %v4882_v57 = vadd.f32 1.0, %v6580_v7 }
0x2e13   :  { %6581 = vrcp.f32 %v4727_v32  ;;  %v4739_v22 = vand.u32 2147483648, %v4727_v32  ;;  %vm4733_vm1 = vweird.f32 %v4727_v32  ;;  %v4737_v38 = vand.u32 2147483647, %v4727_v32 }
0x2e14   :  { %v4886_v5 = vmul.f32 %v6576_v11, %v4885_v49  ;;  %6583 = vpow2.f32 %v5988_v19  ;;  %v4909_v56 = vand.u32 2147483648, %v4882_v57  ;;  %vm4903_vm11 = vweird.f32 %v4882_v57 }
0x2e15   :  { %6585 = vrcp.f32 %v4882_v57  ;;  %v4740_v20 = vor.u32 1.1754944e-38, %v4739_v22  ;;  %vm4738_vm3 = vcmp.eq.f32.partialorder %v4737_v38, 8.507059e+37  ;;  %v4907_v29 = vand.u32 2147483647, %v4882_v57 }
0x2e16   :  { %v4887_v33 = vadd.f32 %v6576_v11, %v4886_v5  ;;  %v4910_v27 = vor.u32 1.1754944e-38, %v4909_v56 }
0x2e17   :  { %vm4908_vm12 = vcmp.eq.f32.partialorder %v4907_v29, 8.507059e+37 }
0x2e18   :  { %v4891_v62 = vsel %vm4890_vm15, %v6576_v11, %v4887_v33 }
0x2e19   :  { %v6582_v17 = vpop.eup %6581  ;;  %v8693_v48 = vsel %vm4893_vm10, %v4895_v8, %v4891_v62 }
0x2e1a   :  { %v6584_v55 = vpop.eup %6583  ;;  %v4729_v45 = vmul.f32 %v6582_v17, %v4727_v32  ;;  %vm4734_vm0 = vweird.f32 %v6582_v17 }
0x2e1b   :  { %v4527_v42 = vadd.f32 1.0, %v6584_v55  ;;  %v6586_v24 = vpop.eup %6585  ;;  %vm4735_vm9 = vmor %vm4733_vm1, %vm4734_vm0  ;;  %vm4958_vm0 = vcmask 1046534  }
0x2e1c   :  { %v4730_v18 = vsub.f32 1.0, %v4729_v45  ;;  %v4899_v9 = vmul.f32 %v6586_v24, %v4882_v57  ;;  %vm4904_vm5 = vweird.f32 %v6586_v24 }
0x2e1d   :  { %6587 = vrcp.f32 %v4527_v42  ;;  %vm4905_vm6 = vmor %vm4903_vm11, %vm4904_vm5  ;;  %v4539_v43 = vand.u32 2147483648, %v4527_v42  ;;  %vm4533_vm8 = vweird.f32 %v4527_v42  ;;  %v4537_v32 = vand.u32 2147483647, %v4527_v42 }
0x2e1e   :  { %v4731_v0 = vmul.f32 %v6582_v17, %v4730_v18  ;;  %v4900_v4 = vsub.f32 1.0, %v4899_v9 }
0x2e1f   :  { %v4540_v19 = vor.u32 1.1754944e-38, %v4539_v43  ;;  %vm4538_vm10 = vcmp.eq.f32.partialorder %v4537_v32, 8.507059e+37 }
0x2e20   :  { %v4732_v44 = vadd.f32 %v6582_v17, %v4731_v0  ;;  %v4901_v31 = vmul.f32 %v6586_v24, %v4900_v4 }
0x2e22   :  { %v4736_v21 = vsel %vm4735_vm9, %v6582_v17, %v4732_v44  ;;  %v4902_v30 = vadd.f32 %v6586_v24, %v4901_v31  ;;  %v4921_v17 = vmul.f32 %v4917_v60, %v8693_v48 }
0x2e23   :  { %v6588_v61 = vpop.eup %6587  ;;  %v4741_v13 = vsel %vm4738_vm3, %v4740_v20, %v4736_v21 }
0x2e24   :  { %v4529_v47 = vmul.f32 %v6588_v61, %v4527_v42  ;;  %v4906_v41 = vsel %vm4905_vm6, %v6586_v24, %v4902_v30  ;;  %vm4534_vm7 = vweird.f32 %v6588_v61  ;;  %v4744_v57 = vmul.f32 %v4741_v13, %v8625_v58 }
0x2e25   :  { %v4911_v11 = vsel %vm4908_vm12, %v4910_v27, %v4906_v41  ;;  %vm4535_vm15 = vmor %vm4533_vm8, %vm4534_vm7 }
0x2e26   :  { %v4530_v39 = vsub.f32 1.0, %v4529_v47  ;;  %v4922_v58 = vmul.f32 %v4918_v16, %v4911_v11 }
0x2e28   :  { %v4531_v34 = vmul.f32 %v6588_v61, %v4530_v39 }
0x2e2a   :  { %v4532_v49 = vadd.f32 %v6588_v61, %v4531_v34 }
0x2e2c   :  { %v4536_v5 = vsel %vm4535_vm15, %v6588_v61, %v4532_v49 }
0x2e2d   :  { %v4541_v7 = vsel %vm4538_vm10, %v4540_v19, %v4536_v5 }
0x2e2e   :  { %v4544_v18 = vmul.f32 %v4541_v7, %v8618_v12 }
0x2e59   :  { %v4926_v2 = vpop.permute.xlu2 %4925 }
0x2e5a   :  { %v4931_v14 = vmul.f32 %v4926_v2, %v8693_v48 }
0x2e5c   :  { %4935 = vrot.lane.b32.xlu0 %v4931_v14, %s6919_s2 }
0x2e6d   :  { %v4747_v36 = vpop.permute.xlu1 %4746 }
0x2e6e   :  { %v4749_v25 = vmul.f32 %v4747_v36, %v4741_v13 }
0x2e70   :  { %4751 = vrot.lane.b32.xlu2 %v4749_v25, %s6919_s2 }
0x2e72   :  { %v4928_v51 = vpop.permute.xlu0 %4927 }
0x2e73   :  { %v4932_v3 = vmul.f32 %v4928_v51, %v4911_v11 }
0x2e75   :  { %4937 = vrot.lane.b32.xlu1 %v4932_v3, %s6919_s2 }
0x2e7a   :  { %v4547_v33 = vpop.permute.xlu0 %4546 }
0x2e7b   :  { %v4549_v6 = vmul.f32 %v4547_v33, %v4541_v7 }
0x2e7d   :  { %4551 = vrot.lane.b32.xlu1 %v4549_v6, %s6919_s2 }
0x2eca   :  { %v4752_v62 = vpop.permute.xlu2 %4751 }
0x2ecb   :  { %v8702_v8 = vadd.f32 %v4752_v62, %v4744_v57 }
0x2ecd   :  { %6589 = vtanh.f32 %v8702_v8 }
0x2ece   :  { %v4936_v55 = vpop.permute.xlu0 %4935 }
0x2ecf   :  { %v8706_v2 = vadd.f32 %v4936_v55, %v4921_v17 }
0x2ed1   :  { %6591 = vtanh.f32 %v8706_v2 }
0x2ed3   :  { %v6590_v14 = vpop.eup %6589 }
0x2ed4   :  { %4757 = vrot.lane.b32.xlu0 %v6590_v14, %s6918_s18 }
0x2ed7   :  { %v6592_v45 = vpop.eup %6591 }
0x2ed8   :  { %4947 = vrot.lane.b32.xlu1 %v6592_v45, %s6918_s18 }
0x2ee7   :  { %v4938_v42 = vpop.permute.xlu1 %4937 }
0x2ee8   :  { %v8712_v24 = vadd.f32 %v4938_v42, %v4922_v58 }
0x2eea   :  { %6593 = vtanh.f32 %v8712_v24 }
0x2eef   :  { %v4552_v9 = vpop.permute.xlu1 %4551 }
0x2ef0   :  { %v6594_v0 = vpop.eup %6593  ;;  %v8716_v4 = vadd.f32 %v4552_v9, %v4544_v18 }
0x2ef1   :  { %4949 = vrot.lane.b32.xlu2 %v6594_v0, %s6918_s18 }
0x2ef2   :  { %6595 = vtanh.f32 %v8716_v4 }
0x2ef8   :  { %v6596_v61 = vpop.eup %6595 }
0x2ef9   :  { %4557 = vrot.lane.b32.xlu2 %v6596_v61, %s6918_s18 }
0x2f46   :  { %v4758_v46 = vpop.permute.xlu0 %4757 }
0x2f47   :  { %v4760_v44 = vmul.f32 %v4758_v46, %v4741_v13 }
0x2f49   :  { %v4963_v22 = vrot.slane %v4760_v44, 3 }
0x2f4a   :  { %v4948_v38 = vpop.permute.xlu1 %4947 }
0x2f4b   :  { %v4953_v31 = vmul.f32 %v4948_v38, %v8693_v48  ;;  %4964 = vrot.lane.b32.xlu1 %v4963_v22, %s6918_s18  ;;  %v4950_v12 = vpop.permute.xlu2 %4949 }
0x2f4c   :  { %v4954_v47 = vmul.f32 %v4950_v12, %v4911_v11 }
0x2f4d   :  { %v5109_v21 = vrot.slane %v4953_v31, 5 }
0x2f4e   :  { %v4957_v20 = vrot.slane %v4954_v47, 7  ;;  %v5110_v30 = vrot.slane %v4954_v47, 4 }
0x2f50   :  { %v5111_v39 = vsel %vm482_vm13, %v5110_v30, %v5109_v21  ;;  %v4959_v36 = vsel %vm4958_vm0, %v4957_v20, %v4953_v31 }
0x2f51   :  { %5112 = vrot.lane.b32.xlu2 %v5111_v39, %s6919_s2  ;;  %4960 = vrot.lane.b32.xlu0 %v4959_v36, %s6919_s2 }
0x2f53   :  { %v4558_v13 = vpop.permute.xlu2 %4557 }
0x2f54   :  { %v8726_v56 = vmul.f32 %v4558_v13, %v4541_v7 }
0x2f56   :  { %4765 = vrot.lane.b32.xlu1 %v8726_v56, %s6918_s18 }
0x2f59   :  { %4762 = vrot.lane.b32.xlu0 %v4760_v44, %s6919_s2 }
0x2fab   :  { %v5113_v48 = vpop.permute.xlu2 %5112 }
0x2fac   :  { %6003 = vmatmul.msk.f32.vlgmr.msra.gmra.mxu0 %vm226_vm4, %v5113_v48 }
0x2fbd   :  { %v4965_v25 = vpop.permute.xlu1 %4964 }
0x2fc3   :  { %v4961_v29 = vpop.permute.xlu0 %4960 }
0x2fc4   :  { %v4967_v41 = vsel %vm226_vm4, %v4961_v29, %v4965_v25 }
0x2fc5   :  { %v4969_v34 = vrot.slane %v4967_v41, 5 }
0x2fc7   :  { %5999 = vmatmul.msk.f32.vlgmr.msrb.gmra.mxu2 %vm491_vm14, %v4969_v34 }
0x2fc8   :  { %5589 = vmatpush.msrb.mxu2 %v8645_v10  ;;  %v4766_v27 = vpop.permute.xlu1 %4765 }
0x2fca   :  { %5590 = vmatpush.msrb.mxu2 %v8651_v53 }
0x2fcb   :  { %v4763_v11 = vpop.permute.xlu0 %4762 }
0x2fcc   :  { %v4768_v51 = vsel %vm226_vm4, %v4763_v11, %v4766_v27  ;;  %5591 = vmatpush.msrb.mxu2 %v8656_v59 }
0x2fcd   :  { %5994 = vmatmul.msk.f32.vlgmr.msra.gmra.mxu1 %vm491_vm14, %v4768_v51 }
0x2fce   :  { %5592 = vmatpush.msrb.mxu2 %v8661_v28 }
0x2fd0   :  { %5593 = vmatpush.msrb.mxu2 %v8666_v23 }
0x2fd2   :  { %5594 = vmatpush.msrb.mxu2 %v8671_v35 }
0x2fd4   :  { %5595 = vmatpush.msrb.mxu2 %v8674_v26 }
0x2fd6   :  { %5596 = vmatpush.msrb.mxu2 %v8677_v15 }
0x3029   :  { %v5133_v10 = vpop.f32.mrf.mxu0 }
0x302a   :  { %v5137_v53 = vrot.slane %v5133_v10, 2  ;;  %v5138_v3 = vrot.slane %v5133_v10, 3 }
0x302c   :  { %v5141_v49 = vadd.f32 %v5137_v53, %v8211_v40  ;;  %v5142_v43 = vadd.f32 %v5138_v3, %v8214_v50 }
0x302e   :  { %6597 = vtanh.f32 %v5141_v49  ;;  %v6004_v19 = vmul.f32 -1.442695, %v5141_v49  ;;  %v6005_v57 = vmul.f32 -1.442695, %v5142_v43 }
0x302f   :  { %6599 = vtanh.f32 %v5142_v43 }
0x3034   :  { %v6598_v59 = vpop.eup %6597 }
0x3035   :  { %v6600_v32 = vpop.eup %6599  ;;  %5193 = vrot.lane.b32.xlu2 %v6598_v59, %s6918_s18 }
0x3036   :  { %5195 = vrot.lane.b32.xlu0 %v6600_v32, %s6918_s18 }
0x304a   :  { %v4789_v28 = vpop.f32.mrf.mxu1  ;;  %v4989_v23 = vpop.f32.mrf.mxu2 }
0x304b   :  { %v4790_v35 = vadd.f32 %v8687_v37, %v4789_v28  ;;  %v4990_v26 = vadd.f32 %v8593_v63, %v4989_v23 }
0x304d   :  { %6601 = vtanh.f32 %v4790_v35  ;;  %v5995_v17 = vmul.f32 -1.442695, %v4790_v35  ;;  %v6000_v47 = vmul.f32 -1.442695, %v4990_v26 }
0x304e   :  { %6603 = vtanh.f32 %v4990_v26 }
0x304f   :  { %6605 = vpow2.f32 %v6004_v19 }
0x3053   :  { %v6602_v15 = vpop.eup %6601 }
0x3054   :  { %v6604_v5 = vpop.eup %6603  ;;  %4814 = vrot.lane.b32.xlu2 %v6602_v15, %s6918_s18 }
0x3055   :  { %5014 = vrot.lane.b32.xlu1 %v6604_v5, %s6918_s18  ;;  %v6606_v7 = vpop.eup %6605 }
0x3056   :  { %v5149_v33 = vadd.f32 1.0, %v6606_v7 }
0x3058   :  { %6607 = vrcp.f32 %v5149_v33  ;;  %v5162_v16 = vand.u32 2147483648, %v5149_v33  ;;  %vm5156_vm9 = vweird.f32 %v5149_v33  ;;  %v5160_v58 = vand.u32 2147483647, %v5149_v33 }
0x3059   :  { %6609 = vpow2.f32 %v6005_v57 }
0x305a   :  { %6611 = vpow2.f32 %v5995_v17  ;;  %v5163_v9 = vor.u32 1.1754944e-38, %v5162_v16  ;;  %vm5161_vm5 = vcmp.eq.f32.partialorder %v5160_v58, 8.507059e+37  ;;  %v5185_v17 = vrot.slane %v8706_v2, 7 }
0x305b   :  { %v5186_v16 = vrot.slane %v8712_v24, 7 }
0x305e   :  { %v6608_v6 = vpop.eup %6607 }
0x305f   :  { %v5152_v60 = vmul.f32 %v6608_v6, %v5149_v33  ;;  %v6610_v55 = vpop.eup %6609  ;;  %vm5157_vm1 = vweird.f32 %v6608_v6 }
0x3060   :  { %v5150_v14 = vadd.f32 1.0, %v6610_v55  ;;  %v6612_v42 = vpop.eup %6611  ;;  %vm5158_vm3 = vmor %vm5156_vm9, %vm5157_vm1 }
0x3061   :  { %v5153_v62 = vsub.f32 1.0, %v5152_v60  ;;  %v4795_v0 = vadd.f32 1.0, %v6612_v42 }
0x3062   :  { %6613 = vrcp.f32 %v5150_v14  ;;  %v5177_v36 = vand.u32 2147483648, %v5150_v14  ;;  %vm5171_vm6 = vweird.f32 %v5150_v14  ;;  %v5175_v13 = vand.u32 2147483647, %v5150_v14 }
0x3063   :  { %v5154_v63 = vmul.f32 %v6608_v6, %v5153_v62  ;;  %6615 = vrcp.f32 %v4795_v0  ;;  %v4807_v10 = vand.u32 2147483648, %v4795_v0  ;;  %vm4801_vm15 = vweird.f32 %v4795_v0 }
0x3064   :  { %6617 = vpow2.f32 %v6000_v47  ;;  %v5178_v41 = vor.u32 1.1754944e-38, %v5177_v36  ;;  %vm5176_vm7 = vcmp.eq.f32.partialorder %v5175_v13, 8.507059e+37  ;;  %v4805_v3 = vand.u32 2147483647, %v4795_v0 }
0x3065   :  { %v5155_v45 = vadd.f32 %v6608_v6, %v5154_v63  ;;  %v4808_v43 = vor.u32 1.1754944e-38, %v4807_v10 }
0x3066   :  { %vm4806_vm0 = vcmp.eq.f32.partialorder %v4805_v3, 8.507059e+37 }
0x3067   :  { %v5159_v18 = vsel %vm5158_vm3, %v6608_v6, %v5155_v45 }
0x3068   :  { %v8752_v46 = vsel %vm5161_vm5, %v5163_v9, %v5159_v18  ;;  %v6614_v22 = vpop.eup %6613 }
0x3069   :  { %v5167_v38 = vmul.f32 %v6614_v22, %v5150_v14  ;;  %v6616_v31 = vpop.eup %6615  ;;  %vm5172_vm11 = vweird.f32 %v6614_v22  ;;  %v5189_v63 = vmul.f32 %v5185_v17, %v8752_v46 }
0x306a   :  { %v4797_v21 = vmul.f32 %v6616_v31, %v4795_v0  ;;  %v6618_v25 = vpop.eup %6617  ;;  %vm5173_vm12 = vmor %vm5171_vm6, %vm5172_vm11  ;;  %vm4802_vm8 = vweird.f32 %v6616_v31 }
0x306b   :  { %v5168_v12 = vsub.f32 1.0, %v5167_v38  ;;  %v4995_v34 = vadd.f32 1.0, %v6618_v25  ;;  %vm4803_vm10 = vmor %vm4801_vm15, %vm4802_vm8 }
0x306c   :  { %v4798_v30 = vsub.f32 1.0, %v4797_v21 }
0x306d   :  { %v5169_v20 = vmul.f32 %v6614_v22, %v5168_v12  ;;  %6619 = vrcp.f32 %v4995_v34  ;;  %v5007_v19 = vand.u32 2147483648, %v4995_v34  ;;  %vm5001_vm9 = vweird.f32 %v4995_v34 }
0x306e   :  { %v4799_v48 = vmul.f32 %v6616_v31, %v4798_v30  ;;  %v5005_v7 = vand.u32 2147483647, %v4995_v34 }
0x306f   :  { %v5170_v39 = vadd.f32 %v6614_v22, %v5169_v20  ;;  %v5008_v6 = vor.u32 1.1754944e-38, %v5007_v19 }
0x3070   :  { %v4800_v27 = vadd.f32 %v6616_v31, %v4799_v48  ;;  %vm5006_vm5 = vcmp.eq.f32.partialorder %v5005_v7, 8.507059e+37 }
0x3071   :  { %v5174_v29 = vsel %vm5173_vm12, %v6614_v22, %v5170_v39 }
0x3072   :  { %v5179_v11 = vsel %vm5176_vm7, %v5178_v41, %v5174_v29  ;;  %v4804_v49 = vsel %vm4803_vm10, %v6616_v31, %v4800_v27 }
0x3073   :  { %v4809_v32 = vsel %vm4806_vm0, %v4808_v43, %v4804_v49  ;;  %v6620_v23 = vpop.eup %6619  ;;  %v5190_v58 = vmul.f32 %v5186_v16, %v5179_v11 }
0x3074   :  { %v4997_v35 = vmul.f32 %v6620_v23, %v4995_v34  ;;  %vm5002_vm1 = vweird.f32 %v6620_v23  ;;  %v4812_v2 = vmul.f32 %v4809_v32, %v8716_v4 }
0x3075   :  { %vm5003_vm3 = vmor %vm5001_vm9, %vm5002_vm1 }
0x3076   :  { %v4998_v26 = vsub.f32 1.0, %v4997_v35 }
0x3078   :  { %v4999_v15 = vmul.f32 %v6620_v23, %v4998_v26 }
0x307a   :  { %v5000_v5 = vadd.f32 %v6620_v23, %v4999_v15  ;;  %v8803_v15 = vld [vmem:[%s9020_s17] ss:$0 sm:$0xff] }
0x307c   :  { %v5004_v33 = vsel %vm5003_vm3, %v6620_v23, %v5000_v5 }
0x307d   :  { %v5009_v60 = vsel %vm5006_vm5, %v5008_v6, %v5004_v33 }
0x307e   :  { %v5012_v9 = vmul.f32 %v5009_v60, %v8702_v8 }
0x308f   :  { %v5194_v61 = vpop.permute.xlu2 %5193 }
0x3090   :  { %v5199_v44 = vmul.f32 %v5194_v61, %v8752_v46 }
0x3092   :  { %5203 = vrot.lane.b32.xlu0 %v5199_v44, %s6919_s2 }
0x30a8   :  { %v5196_v51 = vpop.permute.xlu0 %5195 }
0x30a9   :  { %v5200_v53 = vmul.f32 %v5196_v51, %v5179_v11 }
0x30ab   :  { %5205 = vrot.lane.b32.xlu1 %v5200_v53, %s6919_s2 }
0x30ae   :  { %v4815_v59 = vpop.permute.xlu2 %4814 }
0x30af   :  { %v4817_v28 = vmul.f32 %v4815_v59, %v4809_v32 }
0x30b1   :  { %4819 = vrot.lane.b32.xlu0 %v4817_v28, %s6919_s2 }
0x30c7   :  { %v5015_v57 = vpop.permute.xlu1 %5014 }
0x30c8   :  { %v5017_v62 = vmul.f32 %v5015_v57, %v5009_v60 }
0x30ca   :  { %5019 = vrot.lane.b32.xlu2 %v5017_v62, %s6919_s2 }
0x3104   :  { %v5204_v55 = vpop.permute.xlu0 %5203 }
0x3105   :  { %v8761_v14 = vadd.f32 %v5204_v55, %v5189_v63 }
0x3107   :  { %6621 = vtanh.f32 %v8761_v14 }
0x310d   :  { %v6622_v45 = vpop.eup %6621 }
0x310e   :  { %5215 = vrot.lane.b32.xlu1 %v6622_v45, %s6918_s18 }
0x311d   :  { %v5206_v42 = vpop.permute.xlu1 %5205 }
0x311e   :  { %v8766_v18 = vadd.f32 %v5206_v42, %v5190_v58 }
0x3120   :  { %6623 = vtanh.f32 %v8766_v18 }
0x3123   :  { %v4820_v0 = vpop.permute.xlu0 %4819 }
0x3124   :  { %v5020_v61 = vpop.permute.xlu2 %5019  ;;  %v8771_v44 = vadd.f32 %v4820_v0, %v4812_v2 }
0x3125   :  { %v8773_v22 = vadd.f32 %v5020_v61, %v5012_v9 }
0x3126   :  { %v6624_v38 = vpop.eup %6623  ;;  %6625 = vtanh.f32 %v8771_v44 }
0x3127   :  { %6627 = vtanh.f32 %v8773_v22  ;;  %5217 = vrot.lane.b32.xlu2 %v6624_v38, %s6918_s18 }
0x312c   :  { %v6626_v24 = vpop.eup %6625 }
0x312d   :  { %v6628_v31 = vpop.eup %6627  ;;  %4825 = vrot.lane.b32.xlu1 %v6626_v24, %s6918_s18 }
0x312e   :  { %5025 = vrot.lane.b32.xlu0 %v6628_v31, %s6918_s18 }
0x3180   :  { %v5216_v8 = vpop.permute.xlu1 %5215 }
0x3181   :  { %v5218_v4 = vpop.permute.xlu2 %5217  ;;  %v5221_v12 = vmul.f32 %v5216_v8, %v8752_v46 }
0x3182   :  { %v5222_v47 = vmul.f32 %v5218_v4, %v5179_v11 }
0x3183   :  { %v5376_v21 = vrot.slane %v5221_v12, 6 }
0x3184   :  { %v5225_v20 = vrot.slane %v5222_v47, 7  ;;  %v5377_v30 = vrot.slane %v5222_v47, 5 }
0x3186   :  { %v5378_v39 = vsel %vm482_vm13, %v5377_v30, %v5376_v21  ;;  %v5226_v36 = vsel %vm3425_vm2, %v5225_v20, %v5221_v12 }
0x3187   :  { %5379 = vrot.lane.b32.xlu2 %v5378_v39, %s6919_s2  ;;  %5227 = vrot.lane.b32.xlu0 %v5226_v36, %s6919_s2 }
0x319f   :  { %v4826_v13 = vpop.permute.xlu1 %4825 }
0x31a0   :  { %v8785_v48 = vmul.f32 %v4826_v13, %v4809_v32  ;;  %v5026_v25 = vpop.permute.xlu0 %5025 }
0x31a1   :  { %v5028_v29 = vmul.f32 %v5026_v25, %v5009_v60 }
0x31a2   :  { %5033 = vrot.lane.b32.xlu0 %v8785_v48, %s6918_s18 }
0x31a3   :  { %v5230_v46 = vrot.slane %v5028_v29, 2  ;;  %5030 = vrot.lane.b32.xlu2 %v5028_v29, %s6919_s2 }
0x31a5   :  { %5231 = vrot.lane.b32.xlu1 %v5230_v46, %s6918_s18 }
0x31e1   :  { %v5380_v41 = vpop.permute.xlu2 %5379 }
0x31e2   :  { %6010 = vmatmul.msk.f32.vlgmr.msra.gmra.mxu2 %vm226_vm4, %v5380_v41 }
0x31f9   :  { %v5228_v34 = vpop.permute.xlu0 %5227 }
0x31fd   :  { %v5031_v27 = vpop.permute.xlu2 %5030 }
0x3214   :  { %v5034_v11 = vpop.permute.xlu0 %5033 }
0x3215   :  { %v5036_v51 = vsel %vm226_vm4, %v5031_v27, %v5034_v11 }
0x3216   :  { %6001 = vmatmul.msk.f32.vlgmr.msra.gmra.mxu3 %vm491_vm14, %v5036_v51 }
0x3217   :  { %v5232_v10 = vpop.permute.xlu1 %5231 }
0x3218   :  { %v5234_v53 = vsel %vm226_vm4, %v5228_v34, %v5232_v10 }
0x3219   :  { %v5236_v3 = vrot.slane %v5234_v53, 6 }
0x321b   :  { %6006 = vmatmul.msk.f32.vlgmr.msrb.gmra.mxu1 %vm491_vm14, %v5236_v3 }
0x3265   :  { %v5400_v49 = vpop.f32.mrf.mxu2 }
0x3266   :  { %v5404_v43 = vrot.slane %v5400_v49, 1  ;;  %v5405_v59 = vrot.slane %v5400_v49, 2 }
0x3268   :  { %v5408_v32 = vadd.f32 %v5404_v43, %v8211_v40  ;;  %v5409_v28 = vadd.f32 %v5405_v59, %v8214_v50 }
0x326a   :  { %6629 = vtanh.f32 %v5408_v32  ;;  %v6012_v19 = vmul.f32 -1.442695, %v5409_v28  ;;  %v6011_v62 = vmul.f32 -1.442695, %v5408_v32 }
0x326b   :  { %6631 = vtanh.f32 %v5409_v28 }
0x3270   :  { %v6630_v23 = vpop.eup %6629 }
0x3271   :  { %v6632_v35 = vpop.eup %6631  ;;  %5460 = vrot.lane.b32.xlu0 %v6630_v23, %s6918_s18 }
0x3272   :  { %5462 = vrot.lane.b32.xlu2 %v6632_v35, %s6918_s18 }
0x3298   :  { %v5256_v26 = vpop.f32.mrf.mxu1 }
0x3299   :  { %v5257_v5 = vadd.f32 %v8803_v15, %v5256_v26  ;;  %v5057_v40 = vpop.f32.mrf.mxu3 }
0x329a   :  { %v5058_v50 = vadd.f32 %v8687_v37, %v5057_v40 }
0x329b   :  { %6633 = vtanh.f32 %v5257_v5  ;;  %v6007_v29 = vmul.f32 -1.442695, %v5257_v5 }
0x329c   :  { %6635 = vpow2.f32 %v6012_v19  ;;  %v6002_v46 = vmul.f32 -1.442695, %v5058_v50 }
0x329d   :  { %6637 = vtanh.f32 %v5058_v50 }
0x32a1   :  { %v6634_v7 = vpop.eup %6633 }
0x32a2   :  { %5281 = vrot.lane.b32.xlu1 %v6634_v7, %s6918_s18  ;;  %v6636_v33 = vpop.eup %6635 }
0x32a3   :  { %v6638_v6 = vpop.eup %6637  ;;  %v5417_v57 = vadd.f32 1.0, %v6636_v33 }
0x32a5   :  { %6639 = vrcp.f32 %v5417_v57  ;;  %v5444_v42 = vand.u32 2147483648, %v5417_v57  ;;  %vm5438_vm2 = vweird.f32 %v5417_v57  ;;  %v5442_v2 = vand.u32 2147483647, %v5417_v57 }
0x32a6   :  { %6641 = vpow2.f32 %v6011_v62 }
0x32a7   :  { %v5445_v0 = vor.u32 1.1754944e-38, %v5444_v42  ;;  %vm5443_vm6 = vcmp.eq.f32.partialorder %v5442_v2, 8.507059e+37  ;;  %v5452_v2 = vrot.slane %v8761_v14, 7 }
0x32aa   :  { %5082 = vrot.lane.b32.xlu1 %v6638_v6, %s6918_s18 }
0x32ab   :  { %v6640_v60 = vpop.eup %6639 }
0x32ac   :  { %v5434_v17 = vmul.f32 %v6640_v60, %v5417_v57  ;;  %v6642_v55 = vpop.eup %6641  ;;  %vm5439_vm13 = vweird.f32 %v6640_v60 }
0x32ad   :  { %v5416_v16 = vadd.f32 1.0, %v6642_v55  ;;  %vm5440_vm11 = vmor %vm5438_vm2, %vm5439_vm13  ;;  %v5453_v55 = vrot.slane %v8766_v18, 7 }
0x32ae   :  { %v5435_v63 = vsub.f32 1.0, %v5434_v17 }
0x32af   :  { %6643 = vrcp.f32 %v5416_v16  ;;  %v5429_v21 = vand.u32 2147483648, %v5416_v16  ;;  %vm5423_vm7 = vweird.f32 %v5416_v16  ;;  %v5427_v20 = vand.u32 2147483647, %v5416_v16 }
0x32b0   :  { %v5436_v45 = vmul.f32 %v6640_v60, %v5435_v63  ;;  %6645 = vpow2.f32 %v6007_v29 }
0x32b1   :  { %v5430_v39 = vor.u32 1.1754944e-38, %v5429_v21  ;;  %vm5428_vm15 = vcmp.eq.f32.partialorder %v5427_v20, 8.507059e+37  ;;  %6647 = vpow2.f32 %v6002_v46 }
0x32b2   :  { %v5437_v58 = vadd.f32 %v6640_v60, %v5436_v45 }
0x32b4   :  { %v5441_v9 = vsel %vm5440_vm11, %v6640_v60, %v5437_v58  ;;  %vm5507_vm11 = vcmask 1040384  }
0x32b5   :  { %v8809_v61 = vsel %vm5443_vm6, %v5445_v0, %v5441_v9  ;;  %v6644_v24 = vpop.eup %6643 }
0x32b6   :  { %v5419_v8 = vmul.f32 %v6644_v24, %v5416_v16  ;;  %vm5424_vm12 = vweird.f32 %v6644_v24  ;;  %v6646_v41 = vpop.eup %6645  ;;  %v5457_v45 = vmul.f32 %v5453_v55, %v8809_v61 }
0x32b7   :  { %vm5425_vm8 = vmor %vm5423_vm7, %vm5424_vm12  ;;  %v5262_v34 = vadd.f32 1.0, %v6646_v41  ;;  %v6648_v27 = vpop.eup %6647 }
0x32b8   :  { %v5420_v4 = vsub.f32 1.0, %v5419_v8  ;;  %v5063_v11 = vadd.f32 1.0, %v6648_v27 }
0x32b9   :  { %6649 = vrcp.f32 %v5262_v34  ;;  %v5274_v28 = vand.u32 2147483648, %v5262_v34  ;;  %vm5268_vm0 = vweird.f32 %v5262_v34  ;;  %v5272_v23 = vand.u32 2147483647, %v5262_v34 }
0x32ba   :  { %v5421_v12 = vmul.f32 %v6644_v24, %v5420_v4  ;;  %6651 = vrcp.f32 %v5063_v11  ;;  %v5075_v33 = vand.u32 2147483648, %v5063_v11  ;;  %vm5069_vm5 = vweird.f32 %v5063_v11 }
0x32bb   :  { %v5275_v5 = vor.u32 1.1754944e-38, %v5274_v28  ;;  %vm5273_vm9 = vcmp.eq.f32.partialorder %v5272_v23, 8.507059e+37  ;;  %v5073_v6 = vand.u32 2147483647, %v5063_v11 }
0x32bc   :  { %v5422_v47 = vadd.f32 %v6644_v24, %v5421_v12  ;;  %v5076_v60 = vor.u32 1.1754944e-38, %v5075_v33 }
0x32bd   :  { %vm5074_vm2 = vcmp.eq.f32.partialorder %v5073_v6, 8.507059e+37 }
0x32be   :  { %v5426_v30 = vsel %vm5425_vm8, %v6644_v24, %v5422_v47 }
0x32bf   :  { %v8813_v36 = vsel %vm5428_vm15, %v5430_v39, %v5426_v30  ;;  %v6650_v51 = vpop.eup %6649 }
0x32c0   :  { %v5264_v10 = vmul.f32 %v6650_v51, %v5262_v34  ;;  %v6652_v3 = vpop.eup %6651  ;;  %vm5269_vm10 = vweird.f32 %v6650_v51  ;;  %v5456_v9 = vmul.f32 %v5452_v2, %v8813_v36 }
0x32c1   :  { %v5065_v43 = vmul.f32 %v6652_v3, %v5063_v11  ;;  %vm5270_vm1 = vmor %vm5268_vm0, %vm5269_vm10  ;;  %vm5070_vm3 = vweird.f32 %v6652_v3 }
0x32c2   :  { %v5265_v53 = vsub.f32 1.0, %v5264_v10  ;;  %vm5071_vm13 = vmor %vm5069_vm5, %vm5070_vm3 }
0x32c3   :  { %v5066_v32 = vsub.f32 1.0, %v5065_v43 }
0x32c4   :  { %v5266_v49 = vmul.f32 %v6650_v51, %v5265_v53 }
0x32c5   :  { %v5067_v26 = vmul.f32 %v6652_v3, %v5066_v32 }
0x32c6   :  { %v5267_v59 = vadd.f32 %v6650_v51, %v5266_v49 }
0x32c7   :  { %v5068_v7 = vadd.f32 %v6652_v3, %v5067_v26 }
0x32c8   :  { %v5271_v35 = vsel %vm5270_vm1, %v6650_v51, %v5267_v59 }
0x32c9   :  { %v5276_v19 = vsel %vm5273_vm9, %v5275_v5, %v5271_v35  ;;  %v5072_v57 = vsel %vm5071_vm13, %v6652_v3, %v5068_v7 }
0x32ca   :  { %v5077_v17 = vsel %vm5074_vm2, %v5076_v60, %v5072_v57  ;;  %v5279_v18 = vmul.f32 %v5276_v19, %v8773_v22  ;;  %vm3776_vm2 = vcmask 253952  }
0x32cb   :  { %v5080_v4 = vmul.f32 %v5077_v17, %v8771_v44 }
0x32cc   :  { %v5463_v38 = vpop.permute.xlu2 %5462 }
0x32cd   :  { %v5467_v31 = vmul.f32 %v5463_v38, %v8809_v61 }
0x32cf   :  { %5472 = vrot.lane.b32.xlu0 %v5467_v31, %s6919_s2 }
0x32e3   :  { %v5461_v13 = vpop.permute.xlu0 %5460 }
0x32e4   :  { %v5466_v25 = vmul.f32 %v5461_v13, %v8813_v36 }
0x32e6   :  { %5470 = vrot.lane.b32.xlu1 %v5466_v25, %s6919_s2 }
0x3314   :  { %v5282_v40 = vpop.permute.xlu1 %5281 }
0x3315   :  { %v5284_v50 = vmul.f32 %v5282_v40, %v5276_v19 }
0x3317   :  { %5286 = vrot.lane.b32.xlu2 %v5284_v50, %s6919_s2 }
0x331c   :  { %v5083_v62 = vpop.permute.xlu1 %5082 }
0x331d   :  { %v5085_v63 = vmul.f32 %v5083_v62, %v5077_v17 }
0x331f   :  { %5087 = vrot.lane.b32.xlu2 %v5085_v63, %s6919_s2 }
0x3341   :  { %v5473_v16 = vpop.permute.xlu0 %5472 }
0x3342   :  { %v5477_v58 = vadd.f32 %v5473_v16, %v5457_v45 }
0x3344   :  { %6653 = vtanh.f32 %v5477_v58 }
0x334a   :  { %v6654_v42 = vpop.eup %6653 }
0x334b   :  { %5484 = vrot.lane.b32.xlu1 %v6654_v42, %s6918_s18 }
0x3358   :  { %v5471_v0 = vpop.permute.xlu1 %5470 }
0x3359   :  { %v5476_v38 = vadd.f32 %v5471_v0, %v5456_v9 }
0x335b   :  { %6655 = vtanh.f32 %v5476_v38 }
0x3361   :  { %v6656_v24 = vpop.eup %6655 }
0x3362   :  { %5482 = vrot.lane.b32.xlu2 %v6656_v24, %s6918_s18 }
0x3371   :  { %v5287_v31 = vpop.permute.xlu2 %5286 }
0x3372   :  { %v8826_v8 = vadd.f32 %v5287_v31, %v5279_v18 }
0x3374   :  { %6657 = vtanh.f32 %v8826_v8 }
0x3379   :  { %v5088_v12 = vpop.permute.xlu2 %5087 }
0x337a   :  { %v6658_v47 = vpop.eup %6657  ;;  %v8830_v14 = vadd.f32 %v5088_v12, %v5080_v4 }
0x337b   :  { %5292 = vrot.lane.b32.xlu0 %v6658_v47, %s6918_s18 }
0x337c   :  { %6659 = vtanh.f32 %v8830_v14 }
0x3382   :  { %v6660_v21 = vpop.eup %6659 }
0x3383   :  { %5093 = vrot.lane.b32.xlu0 %v6660_v21, %s6918_s18 }
0x33bc   :  { %v5483_v20 = vpop.permute.xlu2 %5482 }
0x33bd   :  { %v5488_v22 = vmul.f32 %v5483_v20, %v8813_v36  ;;  %v5485_v30 = vpop.permute.xlu1 %5484 }
0x33be   :  { %v5489_v39 = vmul.f32 %v5485_v30, %v8809_v61 }
0x33bf   :  { %5493 = vrot.lane.b32.xlu1 %v5488_v22, %s6919_s2 }
0x33c0   :  { %v5492_v44 = vrot.slane %v5489_v39, 7 }
0x33c2   :  { %5495 = vrot.lane.b32.xlu2 %v5492_v44, %s6919_s2 }
0x33ed   :  { %v5293_v13 = vpop.permute.xlu0 %5292 }
0x33ee   :  { %v5295_v25 = vmul.f32 %v5293_v13, %v5276_v19 }
0x33f0   :  { %v5499_v29 = vrot.slane %v5295_v25, 1  ;;  %5297 = vrot.lane.b32.xlu1 %v5295_v25, %s6919_s2 }
0x33f2   :  { %5500 = vrot.lane.b32.xlu0 %v5499_v29, %s6918_s18 }
0x33f5   :  { %v5094_v46 = vpop.permute.xlu0 %5093 }
0x33f6   :  { %v8841_v41 = vmul.f32 %v5094_v46, %v5077_v17 }
0x33f8   :  { %5300 = vrot.lane.b32.xlu2 %v8841_v41, %s6918_s18 }
0x341c   :  { %v5496_v36 = vpop.permute.xlu2 %5495 }
0x3431   :  { %v5494_v61 = vpop.permute.xlu1 %5493 }
0x3452   :  { %v5301_v34 = vpop.permute.xlu2 %5300 }
0x3462   :  { %v5298_v27 = vpop.permute.xlu1 %5297 }
0x3463   :  { %v5303_v11 = vsel %vm226_vm4, %v5298_v27, %v5301_v34 }
0x3464   :  { %6008 = vmatmul.msk.f32.vlgmr.msrb.gmra.mxu0 %vm491_vm14, %v5303_v11  ;;  %v5501_v51 = vpop.permute.xlu0 %5500 }
0x3465   :  { %v5503_v10 = vsel %vm226_vm4, %v5494_v61, %v5501_v51  ;;  %v5504_v53 = vsel %vm226_vm4, %v5496_v36, %v5501_v51  ;;  %v6783_v51 = vld [vmem:[%s9020_s17 + $0x1] ss:$0 sm:$0xff] }
0x3466   :  { %v5508_v3 = vrot.slane %v5503_v10, 7  ;;  %v5509_v49 = vrot.slane %v5504_v53, 7 }
0x3468   :  { %v5510_v43 = vsel %vm5507_vm11, %v5508_v3, %v5509_v49  ;;  %v3768_v3 = vperm.slane %v8457_v54, 0  ;;  %v4563_v49 = vperm.slane %v8726_v56, 0 }
0x3469   :  { %6013 = vmatmul.msk.f32.vlgmr.msrb.gmra.mxu3 %vm491_vm14, %v5510_v43 }
0x34e1   :  { %v5324_v59 = vpop.f32.mrf.mxu0 }
0x34e2   :  { %v5325_v32 = vadd.f32 %v8687_v37, %v5324_v59  ;;  %v4029_v59 = vrot.slane %v8542_v1, 1 }
0x34e4   :  { %6661 = vtanh.f32 %v5325_v32  ;;  %v6009_v5 = vmul.f32 -1.442695, %v5325_v32  ;;  %v4031_v32 = vperm.slane %v4029_v59, 0  ;;  %v5694_v59 = vld [vmem:[%s9023_s20 + $0x18] sm:$0xff] }
0x34ea   :  { %v6662_v28 = vpop.eup %6661 }
0x34eb   :  { %5349 = vrot.lane.b32.xlu0 %v6662_v28, %s6918_s18  ;;  %v4830_v28 = vrot.slane %v8785_v48, 1 }
0x34ec   :  { %v5530_v23 = vpop.f32.mrf.mxu3 }
0x34ed   :  { %v5531_v35 = vadd.f32 %v8803_v15, %v5530_v23  ;;  %v4832_v23 = vperm.slane %v4830_v28, 0 }
0x34ef   :  { %6663 = vtanh.f32 %v5531_v35  ;;  %v6014_v19 = vmul.f32 -1.442695, %v5531_v35 }
0x34f0   :  { %6665 = vpow2.f32 %v6009_v5 }
0x34f1   :  { %6667 = vpow2.f32 %v6014_v19 }
0x34f5   :  { %v6664_v26 = vpop.eup %6663 }
0x34f6   :  { %5555 = vrot.lane.b32.xlu1 %v6664_v26, %s6918_s18  ;;  %v6666_v40 = vpop.eup %6665 }
0x34f7   :  { %v5330_v50 = vadd.f32 1.0, %v6666_v40  ;;  %v6668_v7 = vpop.eup %6667 }
0x34f8   :  { %v5536_v33 = vadd.f32 1.0, %v6668_v7 }
0x34f9   :  { %6669 = vrcp.f32 %v5330_v50  ;;  %v5342_v63 = vand.u32 2147483648, %v5330_v50  ;;  %vm5336_vm12 = vweird.f32 %v5330_v50  ;;  %v5340_v55 = vand.u32 2147483647, %v5330_v50 }
0x34fa   :  { %6671 = vrcp.f32 %v5536_v33  ;;  %v5548_v24 = vand.u32 2147483648, %v5536_v33  ;;  %vm5542_vm10 = vweird.f32 %v5536_v33  ;;  %v5546_v18 = vand.u32 2147483647, %v5536_v33 }
0x34fb   :  { %v5343_v58 = vor.u32 1.1754944e-38, %v5342_v63  ;;  %vm5341_vm8 = vcmp.eq.f32.partialorder %v5340_v55, 8.507059e+37  ;;  %v4030_v55 = vperm.slane %v8542_v1, 0 }
0x34fc   :  { %v5549_v4 = vor.u32 1.1754944e-38, %v5548_v24  ;;  %vm5547_vm1 = vcmp.eq.f32.partialorder %v5546_v18, 8.507059e+37 }
0x34ff   :  { %v6670_v37 = vpop.eup %6669 }
0x3500   :  { %v5332_v6 = vmul.f32 %v6670_v37, %v5330_v50  ;;  %v6672_v62 = vpop.eup %6671  ;;  %vm5337_vm6 = vweird.f32 %v6670_v37 }
0x3501   :  { %v5538_v17 = vmul.f32 %v6672_v62, %v5536_v33  ;;  %vm5338_vm7 = vmor %vm5336_vm12, %vm5337_vm6  ;;  %vm5543_vm15 = vweird.f32 %v6672_v62  ;;  %vm5843_vm12 = vcmask 15360  }
0x3502   :  { %v5333_v57 = vsub.f32 1.0, %v5332_v6  ;;  %vm5544_vm0 = vmor %vm5542_vm10, %vm5543_vm15 }
0x3503   :  { %v5539_v16 = vsub.f32 1.0, %v5538_v17 }
0x3504   :  { %v5334_v60 = vmul.f32 %v6670_v37, %v5333_v57 }
0x3505   :  { %v5540_v0 = vmul.f32 %v6672_v62, %v5539_v16  ;;  %v4831_v16 = vperm.slane %v8785_v48, 0 }
0x3506   :  { %v5335_v15 = vadd.f32 %v6670_v37, %v5334_v60 }
0x3507   :  { %v5541_v38 = vadd.f32 %v6672_v62, %v5540_v0 }
0x3508   :  { %v5339_v45 = vsel %vm5338_vm7, %v6670_v37, %v5335_v15 }
0x3509   :  { %v5344_v42 = vsel %vm5341_vm8, %v5343_v58, %v5339_v45  ;;  %v5545_v31 = vsel %vm5544_vm0, %v6672_v62, %v5541_v38  ;;  %v4295_v58 = vrot.slane %v8634_v52, 1 }
0x350a   :  { %v5550_v47 = vsel %vm5547_vm1, %v5549_v4, %v5545_v31  ;;  %v5347_v20 = vmul.f32 %v5344_v42, %v8830_v14  ;;  %v4296_v31 = vperm.slane %v8634_v52, 0  ;;  %vm5846_vm1 = vcmask 23552  }
0x350b   :  { %v5553_v44 = vmul.f32 %v5550_v47, %v8826_v8 }
0x355d   :  { %v5350_v2 = vpop.permute.xlu0 %5349 }
0x355e   :  { %v5352_v9 = vmul.f32 %v5350_v2, %v5344_v42  ;;  %v4297_v2 = vperm.slane %v4295_v58, 0 }
0x3560   :  { %5354 = vrot.lane.b32.xlu2 %v5352_v9, %s6919_s2 }
0x3568   :  { %v5556_v12 = vpop.permute.xlu1 %5555 }
0x3569   :  { %v5558_v21 = vmul.f32 %v5556_v12, %v5550_v47  ;;  %v5099_v12 = vperm.slane %v8841_v41, 0 }
0x356b   :  { %5560 = vrot.lane.b32.xlu0 %v5558_v21, %s6919_s2  ;;  %v3767_v21 = vrot.slane %v8457_v54, 1  ;;  %v5098_v54 = vrot.slane %v8841_v41, 1  ;;  %v5655_v41 = vld [vmem:[#allocation10 + $0x18] sm:$0xff] }
0x356c   :  { %5678 = vmatpush.msra.mxu1 %v5655_v41 }
0x35ba   :  { %v5355_v22 = vpop.permute.xlu2 %5354 }
0x35bb   :  { %v8857_v30 = vadd.f32 %v5355_v22, %v5347_v20  ;;  %v3769_v20 = vperm.slane %v3767_v21, 0  ;;  %v4562_v22 = vrot.slane %v8726_v56, 1 }
0x35bd   :  { %6673 = vtanh.f32 %v8857_v30  ;;  %v4564_v52 = vperm.slane %v4562_v22, 0 }
0x35c3   :  { %v6674_v39 = vpop.eup %6673 }
0x35c4   :  { %5360 = vrot.lane.b32.xlu1 %v6674_v39, %s6918_s18 }
0x35dd   :  { %v5561_v13 = vpop.permute.xlu0 %5560 }
0x35de   :  { %v5563_v25 = vadd.f32 %v5561_v13, %v5553_v44 }
0x35e0   :  { %6675 = vtanh.f32 %v5563_v25 }
0x35e6   :  { %v6676_v29 = vpop.eup %6675 }
0x35e7   :  { %5566 = vrot.lane.b32.xlu2 %v6676_v29, %s6918_s18 }
0x3636   :  { %v5361_v46 = vpop.permute.xlu1 %5360 }
0x3637   :  { %v8863_v36 = vmul.f32 %v5361_v46, %v5344_v42 }
0x3639   :  { %5574 = vrot.lane.b32.xlu1 %v8863_v36, %s6918_s18  ;;  %v5366_v43 = vperm.slane %v8863_v36, 0 }
0x3641   :  { %v5567_v14 = vpop.permute.xlu2 %5566 }
0x3642   :  { %v5569_v61 = vmul.f32 %v5567_v14, %v5550_v47  ;;  %v5100_v14 = vperm.slane %v5098_v54, 0 }
0x3644   :  { %5571 = vrot.lane.b32.xlu0 %v5569_v61, %s6919_s2 }
0x36ab   :  { %v5575_v34 = vpop.permute.xlu1 %5574 }
0x36b6   :  { %v5572_v27 = vpop.permute.xlu0 %5571 }
0x36b7   :  { %v5577_v8 = vsel %vm226_vm4, %v5572_v27, %v5575_v34 }
0x36b8   :  { %6015 = vmatmul.msk.f32.vlgmr.msrb.gmra.mxu2 %vm491_vm14, %v5577_v8  ;;  %v5654_v8 = vld [vmem:[#allocation10 + $0x10] sm:$0xff] }
0x36b9   :  { %5679 = vmatpush.msra.mxu1 %v5654_v8 }
0x373b   :  { %v5598_v11 = vpop.f32.mrf.mxu2 }
0x373c   :  { %v5599_v10 = vadd.f32 %v6783_v51, %v5598_v11  ;;  %v5653_v11 = vld [vmem:[#allocation10 + $0x8] sm:$0xff]  ;;  %v5652_v51 = vld [vmem:[#allocation10] sm:$0xff] }
0x373d   :  { %5680 = vmatpush.msra.mxu1 %v5653_v11 }
0x373e   :  { %6677 = vtanh.f32 %v5599_v10  ;;  %v6016_v35 = vmul.f32 -1.442695, %v5599_v10 }
0x373f   :  { %5681 = vmatpush.msra.mxu1 %v5652_v51 }
0x3740   :  { %6679 = vpow2.f32 %v6016_v35 }
0x3744   :  { %v6678_v53 = vpop.eup %6677 }
0x3745   :  { %5623 = vrot.lane.b32.xlu2 %v6678_v53, %s6918_s18  ;;  %v5698_v53 = vld [vmem:[%s9023_s20 + $0x38] sm:$0xff] }
0x3746   :  { %v6680_v26 = vpop.eup %6679  ;;  %5717 = vmatpush.msra.mxu0 %v5698_v53 }
0x3747   :  { %v5604_v5 = vadd.f32 1.0, %v6680_v26  ;;  %v5693_v26 = vld [vmem:[%s9023_s20 + $0x10] sm:$0xff] }
0x3749   :  { %6681 = vrcp.f32 %v5604_v5  ;;  %v5616_v33 = vand.u32 2147483648, %v5604_v5  ;;  %vm5610_vm3 = vweird.f32 %v5604_v5  ;;  %v5614_v6 = vand.u32 2147483647, %v5604_v5 }
0x374b   :  { %v5617_v60 = vor.u32 1.1754944e-38, %v5616_v33  ;;  %vm5615_vm13 = vcmp.eq.f32.partialorder %v5614_v6, 8.507059e+37 }
0x374d   :  { %3770 = vrot.lane.b32.xlu2 %v3768_v3, %s6919_s2  ;;  %v5697_v3 = vld [vmem:[%s9023_s20 + $0x30] sm:$0xff] }
0x374e   :  { %5718 = vmatpush.msra.mxu0 %v5697_v3 }
0x374f   :  { %v6682_v40 = vpop.eup %6681 }
0x3750   :  { %v5606_v19 = vmul.f32 %v6682_v40, %v5604_v5  ;;  %vm5611_vm9 = vweird.f32 %v6682_v40  ;;  %v5692_v5 = vld [vmem:[%s9023_s20 + $0x8] sm:$0xff] }
0x3751   :  { %vm5612_vm5 = vmor %vm5610_vm3, %vm5611_vm9 }
0x3752   :  { %v5607_v50 = vsub.f32 1.0, %v5606_v19  ;;  %v6043_v19 = vld [vmem:[%s9022_s19] ss:$0 sm:$0xff] }
0x3754   :  { %v5608_v7 = vmul.f32 %v6682_v40, %v5607_v50 }
0x3755   :  { %4565 = vrot.lane.b32.xlu2 %v4563_v49, %s6919_s2  ;;  %v5696_v49 = vld [vmem:[%s9023_s20 + $0x28] sm:$0xff] }
0x3756   :  { %v5609_v37 = vadd.f32 %v6682_v40, %v5608_v7  ;;  %5719 = vmatpush.msra.mxu0 %v5696_v49 }
0x3758   :  { %v5613_v57 = vsel %vm5612_vm5, %v6682_v40, %v5609_v37  ;;  %v5691_v40 = vld [vmem:[%s9023_s20] sm:$0xff] }
0x3759   :  { %v5618_v15 = vsel %vm5615_vm13, %v5617_v60, %v5613_v57  ;;  %v6044_v60 = vld [vmem:[%s9024_s21] ss:$0 sm:$0xff] }
0x375a   :  { %v5621_v48 = vmul.f32 %v5618_v15, %v8857_v30  ;;  %v5365_v30 = vrot.slane %v8863_v36, 1 }
0x375c   :  { %v5367_v39 = vperm.slane %v5365_v30, 0 }
0x375d   :  { %5368 = vrot.lane.b32.xlu2 %v5366_v43, %s6919_s2  ;;  %v5695_v43 = vld [vmem:[%s9023_s20 + $0x20] sm:$0xff] }
0x375e   :  { %5720 = vmatpush.msra.mxu0 %v5695_v43 }
0x3760   :  { %5721 = vmatpush.msra.mxu0 %v5694_v59 }
0x3762   :  { %5722 = vmatpush.msra.mxu0 %v5693_v26 }
0x3764   :  { %5723 = vmatpush.msra.mxu0 %v5692_v5 }
0x3765   :  { %4034 = vrot.lane.b32.xlu2 %v4031_v32, %s6919_s2 }
0x3766   :  { %5724 = vmatpush.msra.mxu0 %v5691_v40 }
0x376d   :  { %4835 = vrot.lane.b32.xlu2 %v4832_v23, %s6919_s2 }
0x379f   :  { %v5624_v62 = vpop.permute.xlu2 %5623 }
0x37a0   :  { %v5626_v17 = vmul.f32 %v5624_v62, %v5618_v15 }
0x37a2   :  { %5628 = vrot.lane.b32.xlu0 %v5626_v17, %s6919_s2 }
0x37a7   :  { %v3771_v63 = vpop.permute.xlu2 %3770 }
0x37a8   :  { %3777 = vst.msk [vmem:[#allocation2] sm:$0x1] %vm3776_vm2, %v3771_v63 }
0x37aa   :  { %4032 = vrot.lane.b32.xlu0 %v4030_v55, %s6919_s2 }
0x37af   :  { %v4566_v45 = vpop.permute.xlu2 %4565 }
0x37b0   :  { %4571 = vst.msk [vmem:[#allocation2 + $0x3] sm:$0x1] %vm3776_vm2, %v4566_v45 }
0x37b2   :  { %4833 = vrot.lane.b32.xlu0 %v4831_v16, %s6919_s2 }
0x37b7   :  { %v5369_v42 = vpop.permute.xlu2 %5368 }
0x37b8   :  { %5374 = vst.msk [vmem:[#allocation2 + $0x6] sm:$0x1] %vm3776_vm2, %v5369_v42 }
0x37ba   :  { %4300 = vrot.lane.b32.xlu0 %v4297_v2, %s6919_s2 }
0x37bf   :  { %v4035_v1 = vpop.permute.xlu2 %4034 }
0x37c0   :  { %4039 = vst.msk [vmem:[#allocation2 + $0x9] sm:$0x1] %vm3776_vm2, %v4035_v1 }
0x37c7   :  { %v4836_v9 = vpop.permute.xlu2 %4835 }
0x37c8   :  { %4840 = vst.msk [vmem:[#allocation2 + $0xc] sm:$0x1] %vm3776_vm2, %v4836_v9 }
0x3814   :  { %v5629_v0 = vpop.permute.xlu0 %5628 }
0x3815   :  { %v5631_v38 = vadd.f32 %v5629_v0, %v5621_v48 }
0x3817   :  { %6683 = vtanh.f32 %v5631_v38 }
0x381c   :  { %v4033_v24 = vpop.permute.xlu0 %4032 }
0x381d   :  { %v6684_v18 = vpop.eup %6683  ;;  %4038 = vst.msk [vmem:[#allocation2 + $0x1] sm:$0x1] %vm3776_vm2, %v4033_v24 }
0x381e   :  { %5634 = vrot.lane.b32.xlu1 %v6684_v18, %s6918_s18 }
0x3824   :  { %v4834_v4 = vpop.permute.xlu0 %4833 }
0x3825   :  { %4839 = vst.msk [vmem:[#allocation2 + $0x4] sm:$0x1] %vm3776_vm2, %v4834_v4 }
0x3826   :  { %4298 = vrot.lane.b32.xlu1 %v4296_v31, %s6919_s2 }
0x382c   :  { %v4301_v47 = vpop.permute.xlu0 %4300 }
0x382d   :  { %4305 = vst.msk [vmem:[#allocation2 + $0xa] sm:$0x1] %vm3776_vm2, %v4301_v47 }
0x382e   :  { %5101 = vrot.lane.b32.xlu1 %v5099_v12, %s6919_s2 }
0x3836   :  { %3772 = vrot.lane.b32.xlu1 %v3769_v20, %s6919_s2 }
0x383e   :  { %4567 = vrot.lane.b32.xlu1 %v4564_v52, %s6919_s2 }
0x3846   :  { %5370 = vrot.lane.b32.xlu1 %v5367_v39, %s6919_s2 }
0x3890   :  { %v5635_v44 = vpop.permute.xlu1 %5634 }
0x3891   :  { %v5637_v13 = vmul.f32 %v5635_v44, %v5618_v15 }
0x3893   :  { %v5639_v25 = vrot.slane %v5637_v13, 1  ;;  %v5640_v29 = vperm.slane %v5637_v13, 0 }
0x3895   :  { %v5641_v46 = vperm.slane %v5639_v25, 0  ;;  %5642 = vrot.lane.b32.xlu0 %v5640_v29, %s6919_s2 }
0x3897   :  { %5644 = vrot.lane.b32.xlu2 %v5641_v46, %s6919_s2 }
0x3898   :  { %v4299_v56 = vpop.permute.xlu1 %4298 }
0x3899   :  { %4304 = vst.msk [vmem:[#allocation2 + $0x2] sm:$0x1] %vm3776_vm2, %v4299_v56 }
0x389d   :  { %5103 = vrot.lane.b32.xlu0 %v5100_v14, %s6919_s2 }
0x38a0   :  { %v5102_v36 = vpop.permute.xlu1 %5101 }
0x38a1   :  { %5107 = vst.msk [vmem:[#allocation2 + $0x5] sm:$0x1] %vm3776_vm2, %v5102_v36 }
0x38a8   :  { %v3773_v61 = vpop.permute.xlu1 %3772 }
0x38a9   :  { %3778 = vst.msk [vmem:[#allocation2 + $0x8] sm:$0x1] %vm3776_vm2, %v3773_v61 }
0x38b0   :  { %v4568_v34 = vpop.permute.xlu1 %4567 }
0x38b1   :  { %4572 = vst.msk [vmem:[#allocation2 + $0xb] sm:$0x1] %vm3776_vm2, %v4568_v34 }
0x38b8   :  { %v5371_v27 = vpop.permute.xlu1 %5370 }
0x38b9   :  { %5375 = vst.msk [vmem:[#allocation2 + $0xe] sm:$0x1] %vm3776_vm2, %v5371_v27 }
0x38f1   :  { %v5645_v10 = vpop.permute.xlu2 %5644 }
0x38f2   :  { %5649 = vst.msk [vmem:[#allocation2 + $0xf] sm:$0x1] %vm3776_vm2, %v5645_v10 }
0x3907   :  { %v5643_v32 = vpop.permute.xlu0 %5642 }
0x3908   :  { %5648 = vst.msk [vmem:[#allocation2 + $0x7] sm:$0x1] %vm3776_vm2, %v5643_v32 }
0x390f   :  { %v5104_v28 = vpop.permute.xlu0 %5103  ;;  %v5650_v23 = vld [vmem:[#allocation2] sm:$0xff] }
0x3910   :  { %5108 = vst.msk [vmem:[#allocation2 + $0xd] sm:$0x1] %vm3776_vm2, %v5104_v28  ;;  %6017 = vmatmul.msk.f32.vlgmr.msra.gmra.mxu1 %vm226_vm4, %v5650_v23 }
0x3917   :  { %v5651_v35 = vld [vmem:[#allocation2 + $0x8] sm:$0xff] }
0x3918   :  { %6018 = vmatmul.msk.f32.gmra.mxu1 %vm226_vm4, %v5651_v35  ;;  %vm5840_vm4 = vcmask 7168  }
0x398d   :  { %v5683_v50 = vpop.f32.mrf.mxu1 }
0x398e   :  { %v5684_v7 = vadd.f32 %v6043_v19, %v5683_v50 }
0x3990   :  { %v5689_v37 = vmax.f32 %v5684_v7, 0.0 }
0x3992   :  { %6019 = vmatmul.msk.f32.vlgmr.msra.gmra.mxu0 %vm491_vm14, %v5689_v37 }
0x3995   :  { %v5686_v33 = vpop.f32.mrf.mxu1 }
0x3996   :  { %v5687_v6 = vadd.f32 %v6043_v19, %v5686_v33 }
0x3998   :  { %v5690_v57 = vmax.f32 %v5687_v6, 0.0 }
0x399a   :  { %6020 = vmatmul.msk.f32.gmra.mxu0 %vm491_vm14, %v5690_v57 }
0x3a0f   :  { %v5726_v62 = vpop.f32.mrf.mxu0 }
0x3a10   :  { %v8957_v15 = vadd.f32 %v6044_v60, %v5726_v62 }
0x3a12   :  { %v5734_v17 = vmul.f32 2.0, %v8957_v15  ;;  %v6021_v63 = vmul.f32 -1.442695, %v8957_v15  ;;  %v5798_v55 = vsub.f32 %v8957_v15, %v8957_v15  ;;  %v5732_v25 = vmax.f32 %v8957_v15, 0.0 }
0x3a14   :  { %v5736_v45 = vand.u32 2147483647, %v5734_v17  ;;  %6685 = vpow2.f32 %v6021_v63  ;;  %v5800_v16 = vmul.f32 1.442695, %v5798_v55 }
0x3a16   :  { %v5738_v58 = vsub.f32 0.0, %v5736_v45  ;;  %6687 = vpow2.f32 %v5800_v16 }
0x3a17   :  { %v5729_v42 = vpop.f32.mrf.mxu0 }
0x3a18   :  { %v5740_v2 = vmul.f32 1.442695, %v5738_v58  ;;  %v8963_v1 = vadd.f32 %v6044_v60, %v5729_v42 }
0x3a1a   :  { %v6686_v9 = vpop.eup %6685  ;;  %6689 = vpow2.f32 %v5740_v2  ;;  %v5735_v48 = vmul.f32 2.0, %v8963_v1  ;;  %v6022_v0 = vmul.f32 -1.442695, %v8963_v1  ;;  %v5799_v24 = vsub.f32 %v8963_v1, %v8963_v1 }
0x3a1b   :  { %v5762_v38 = vadd.f32 1.0, %v6686_v9 }
0x3a1c   :  { %v6688_v18 = vpop.eup %6687  ;;  %v5737_v31 = vand.u32 2147483647, %v5735_v48  ;;  %6691 = vpow2.f32 %v6022_v0  ;;  %v5802_v12 = vmul.f32 1.442695, %v5799_v24 }
0x3a1d   :  { %6693 = vrcp.f32 %v5762_v38  ;;  %v5773_v46 = vand.u32 2147483647, %v5762_v38  ;;  %v5775_v56 = vand.u32 2147483648, %v5762_v38  ;;  %v5815_v36 = vand.u32 2147483647, %v6688_v18 }
0x3a1e   :  { %6695 = vrcp.f32 %v6688_v18  ;;  %v5739_v4 = vsub.f32 0.0, %v5737_v31  ;;  %v5817_v34 = vand.u32 2147483648, %v6688_v18  ;;  %vm5769_vm11 = vweird.f32 %v5762_v38 }
0x3a1f   :  { %6697 = vpow2.f32 %v5802_v12  ;;  %vm5774_vm7 = vcmp.eq.f32.partialorder %v5773_v46, 8.507059e+37  ;;  %vm5811_vm8 = vweird.f32 %v6688_v18  ;;  %v5776_v53 = vor.u32 1.1754944e-38, %v5775_v56 }
0x3a20   :  { %v6690_v47 = vpop.eup %6689  ;;  %v5742_v20 = vmul.f32 1.442695, %v5739_v4  ;;  %vm5816_vm10 = vcmp.eq.f32.partialorder %v5815_v36, 8.507059e+37  ;;  %v5818_v32 = vor.u32 1.1754944e-38, %v5817_v34 }
0x3a21   :  { %v5744_v21 = vadd.f32 1.0, %v6690_v47 }
0x3a22   :  { %v6692_v22 = vpop.eup %6691 }
0x3a23   :  { %v6694_v52 = vpop.eup %6693  ;;  %6699 = vlog2.f32 %v5744_v21  ;;  %v8969_v30 = vadd.f32 1.0, %v6692_v22 }
0x3a24   :  { %v6696_v39 = vpop.eup %6695  ;;  %v5765_v44 = vmul.f32 %v6694_v52, %v5762_v38  ;;  %6701 = vpow2.f32 %v5742_v20  ;;  %vm5770_vm14 = vweird.f32 %v6694_v52 }
0x3a25   :  { %v5807_v13 = vmul.f32 %v6696_v39, %v6688_v18  ;;  %6703 = vrcp.f32 %v8969_v30  ;;  %v8973_v54 = vpop.eup %6697  ;;  %vm5812_vm6 = vweird.f32 %v6696_v39  ;;  %vm5771_vm15 = vmor %vm5769_vm11, %vm5770_vm14  ;;  %v5790_v26 = vand.u32 2147483648, %v8969_v30 }
0x3a26   :  { %v5766_v29 = vsub.f32 1.0, %v5765_v44  ;;  %6705 = vrcp.f32 %v8973_v54  ;;  %vm5813_vm0 = vmor %vm5811_vm8, %vm5812_vm6  ;;  %v5788_v33 = vand.u32 2147483647, %v8969_v30  ;;  %vm5784_vm3 = vweird.f32 %v8969_v30 }
0x3a27   :  { %v5808_v14 = vsub.f32 1.0, %v5807_v13  ;;  %v5791_v63 = vor.u32 1.1754944e-38, %v5790_v26  ;;  %v5830_v58 = vand.u32 2147483647, %v8973_v54  ;;  %v5832_v42 = vand.u32 2147483648, %v8973_v54 }
0x3a28   :  { %v5767_v61 = vmul.f32 %v6694_v52, %v5766_v29  ;;  %vm5789_vm2 = vcmp.eq.f32.partialorder %v5788_v33, 8.507059e+37  ;;  %vm5826_vm14 = vweird.f32 %v8973_v54  ;;  %vm9048_vm11 = vcmask 31744  }
0x3a29   :  { %v6700_v27 = vpop.eup %6699  ;;  %v5809_v41 = vmul.f32 %v6696_v39, %v5808_v14  ;;  %v5833_v21 = vor.u32 1.1754944e-38, %v5832_v42  ;;  %vm9049_vm8 = vmmov %vm9048_vm11 }
0x3a2a   :  { %v6702_v8 = vpop.eup %6701  ;;  %v5747_v11 = vmul.f32 0.6931472, %v6700_v27  ;;  %v5768_v51 = vadd.f32 %v6694_v52, %v5767_v61 }
0x3a2b   :  { %v6704_v10 = vpop.eup %6703  ;;  %v5810_v3 = vadd.f32 %v6696_v39, %v5809_v41  ;;  %v5745_v49 = vadd.f32 1.0, %v6702_v8 }
0x3a2c   :  { %v5750_v43 = vmul.f32 0.5, %v5747_v11  ;;  %v5772_v59 = vsel %vm5771_vm15, %v6694_v52, %v5768_v51  ;;  %v5780_v28 = vmul.f32 %v6704_v10, %v8969_v30  ;;  %v6706_v5 = vpop.eup %6705  ;;  %vm5785_vm9 = vweird.f32 %v6704_v10 }
0x3a2d   :  { %v5777_v23 = vsel %vm5774_vm7, %v5776_v53, %v5772_v59  ;;  %v5814_v35 = vsel %vm5813_vm0, %v6696_v39, %v5810_v3  ;;  %6707 = vlog2.f32 %v5745_v49  ;;  %v5822_v6 = vmul.f32 %v6706_v5, %v8973_v54  ;;  %vm5786_vm5 = vmor %vm5784_vm3, %vm5785_vm9 }
0x3a2e   :  { %v5752_v40 = vadd.f32 %v5750_v43, %v5732_v25  ;;  %v5794_v19 = vmul.f32 0.99999, %v5777_v23  ;;  %v5819_v50 = vsel %vm5816_vm10, %v5818_v32, %v5814_v35  ;;  %v5781_v7 = vsub.f32 1.0, %v5780_v28 }
0x3a2f   :  { %v5820_v37 = vmul.f32 %v6688_v18, %v5819_v50  ;;  %v5823_v55 = vsub.f32 1.0, %v5822_v6  ;;  %vm5827_vm13 = vweird.f32 %v6706_v5  ;;  %vm5831_vm7 = vcmp.eq.f32.partialorder %v5830_v58, 8.507059e+37 }
0x3a30   :  { %v5754_v57 = vadd.f32 1e-05, %v5752_v40  ;;  %v5796_v60 = vadd.f32 1e-05, %v5794_v19  ;;  %v5782_v62 = vmul.f32 %v6704_v10, %v5781_v7  ;;  %vm5828_vm6 = vmor %vm5826_vm14, %vm5827_vm13 }
0x3a31   :  { %v5836_v17 = vmul.f32 0.99999, %v5820_v37  ;;  %v5824_v0 = vmul.f32 %v6706_v5, %v5823_v55 }
0x3a32   :  { %v5841_v45 = vsel %vm5840_vm4, %v8957_v15, %v5754_v57  ;;  %v5783_v16 = vadd.f32 %v6704_v10, %v5782_v62  ;;  %v5733_v15 = vmax.f32 %v8963_v1, 0.0 }
0x3a33   :  { %v6708_v2 = vpop.eup %6707  ;;  %v5838_v9 = vadd.f32 1e-05, %v5836_v17  ;;  %v5844_v48 = vsel %vm5843_vm12, %v5841_v45, %v5796_v60  ;;  %v5825_v4 = vadd.f32 %v6706_v5, %v5824_v0 }
0x3a34   :  { %v5749_v38 = vmul.f32 0.6931472, %v6708_v2  ;;  %v5787_v24 = vsel %vm5786_vm5, %v6704_v10, %v5783_v16 }
0x3a35   :  { %v5847_v18 = vsel %vm5846_vm1, %v5844_v48, %v5838_v9  ;;  %v5792_v31 = vsel %vm5789_vm2, %v5791_v63, %v5787_v24  ;;  %v5829_v20 = vsel %vm5828_vm6, %v6706_v5, %v5825_v4 }
0x3a36   :  { %5849 = vst.msk [vmem:[%s9025_s22] sm:$0xff] %vm9048_vm11, %v5847_v18  ;;  %v5751_v12 = vmul.f32 0.5, %v5749_v38  ;;  %v5795_v47 = vmul.f32 0.99999, %v5792_v31  ;;  %v5834_v52 = vsel %vm5831_vm7, %v5833_v21, %v5829_v20 }
0x3a37   :  { %v5835_v39 = vmul.f32 %v8973_v54, %v5834_v52 }
0x3a38   :  { %v5753_v22 = vadd.f32 %v5751_v12, %v5733_v15  ;;  %v5797_v30 = vadd.f32 1e-05, %v5795_v47 }
0x3a39   :  { %v5837_v13 = vmul.f32 0.99999, %v5835_v39 }
0x3a3a   :  { %v5755_v44 = vadd.f32 1e-05, %v5753_v22 }
0x3a3b   :  { %v5839_v29 = vadd.f32 1e-05, %v5837_v13 }
0x3a3c   :  { %v5842_v25 = vsel %vm5840_vm4, %v8963_v1, %v5755_v44 }
0x3a3d   :  { %v5845_v46 = vsel %vm5843_vm12, %v5842_v25, %v5797_v30 }
0x3a3e   :  { %v5848_v56 = vsel %vm5846_vm1, %v5845_v46, %v5839_v29 }
0x3a3f   :  { %5850 = vst.msk [vmem:[%s9025_s22 + $0x8] sm:$0xff] %vm9049_vm8, %v5848_v56 }
0x3a40   :  { %5855 = vsyncpa [#allocation4], 1 }
0x3a41   :  { %5856 = vsyncpa [#allocation6], 1 }
0x3a42   :  { %5857 = vsyncpa [#allocation9], 1 }

</bundles_post_ra>
